<compile_context>
chip_gen: v7x
topology: tpu7x:2x2x1
jax: 0.10.0
libtpu: 0.0.40
codegen_flags: <defaults>
</compile_context>

<pallas_src>
import functools

import numpy as np
import jax
import jax.numpy as jnp
from jax.experimental import pallas as pl
from jax.experimental.pallas import tpu as pltpu

NEG_SLOPE = 0.01   # nn.LeakyReLU() default negative_slope
_WPAD = 8          # sublane-tile-aligned zero halo on each side of W
_CPAD = 64         # input channels padded to 64 so every conv uses 64-wide taps


def _leaky(v):
    return jnp.where(v >= 0, v, NEG_SLOPE * v)


def _to_canvas(v, H, W):
    """(H*W, C) conv output -> (1, H+2, W+2*_WPAD, C) zero-bordered canvas.

    Uses only tile-aligned (8-wide) sublane concatenation and outer-dim
    concatenation; the zero border doubles as the conv zero padding.
    """
    C = v.shape[-1]
    v = v.reshape(1, H, W, C)
    zw = jnp.zeros((1, H, _WPAD, C), v.dtype)
    v = jnp.concatenate([zw, v, zw], axis=2)
    zh = jnp.zeros((1, 1, W + 2 * _WPAD, C), v.dtype)
    return jnp.concatenate([zh, v, zh], axis=1)


def _im2col(canvas, H, W):
    """canvas: (1, H+2, W+2*_WPAD, C), valid data at [1:H+1, _WPAD:_WPAD+W].

    Returns the (H*W, 9*C) im2col patch matrix (column order: dy, dx, cin),
    matching an HWIO weight reshaped to (9*C, Cout).
    """
    C = canvas.shape[-1]
    taps = []
    for dy in range(3):
        for dx in range(3):
            t = canvas[:, dy:dy + H, _WPAD - 1 + dx:_WPAD - 1 + dx + W, :]
            taps.append(t.reshape(H * W, C))
    return jnp.concatenate(taps, axis=-1)


def _conv3x3(canvas, w, b, H, W, *, leaky):
    """3x3 conv (zero pad 1) as one (H*W, 9*Cin) x (9*Cin, Cout) MXU matmul."""
    patches = _im2col(canvas, H, W)
    out = jnp.dot(patches, w, preferred_element_type=jnp.float32) + b
    if leaky:
        out = _leaky(out)
    return out  # (H*W, Cout)


# ----------------------------------------------------------------------------
# Fused Trans_upper kernel: one grid step == one batch element.
# ----------------------------------------------------------------------------
def _trans_upper_kernel(xc_ref, w_head_ref, b_head_ref,
                        w_ra_ref, b_ra_ref, w_rb_ref, b_rb_ref,
                        w_tail_ref, b_tail_ref,
                        tm_w1_ref, tm_b1_ref, tm_w2_ref, tm_b2_ref,
                        *rest, num_res, num_high, resize_flags):
    n_rt = sum(1 for f in resize_flags if f)
    rt_refs = rest[:n_rt]
    pyr_refs = rest[n_rt:n_rt + num_high]
    out_refs = rest[n_rt + num_high:]

    Hc, Wc = xc_ref.shape[1], xc_ref.shape[2]
    H, W = Hc - 2, Wc - 2 * _WPAD

    # ---- backbone: head conv + residual blocks + tail conv, all in VMEM ----
    xc = xc_ref[...].astype(jnp.float32)
    h = _conv3x3(xc, w_head_ref[...], b_head_ref[...], H, W, leaky=True)
    hc = _to_canvas(h, H, W)
    for r in range(num_res):                      # static unrolled loop
        a = _conv3x3(hc, w_ra_ref[r], b_ra_ref[r], H, W, leaky=True)
        bq = _conv3x3(_to_canvas(a, H, W), w_rb_ref[r], b_rb_ref[r],
                      H, W, leaky=False)
        hc = hc + _to_canvas(bq, H, W)            # residual add; border stays 0

    # tail conv (64 -> 1), produced directly as a lane-dense (1, H*W) row.
    patches = _im2col(hc, H, W)
    m = jnp.einsum('ok,pk->op', w_tail_ref[...], patches,
                   preferred_element_type=jnp.float32) + b_tail_ref[0, 0]

    # ---- per level: nearest resize (0/1 matmul) + 1x1 MLP + highfreq mul ----
    hidden = tm_w1_ref.shape[1]
    k = 0
    for i in range(num_high):
        if resize_flags[i]:
            m = jnp.dot(m, rt_refs[k][...], preferred_element_type=jnp.float32)
            k += 1
        # trans_mask_block_i: Conv1x1(1->16) + LeakyReLU + Conv1x1(16->1),
        # evaluated pointwise with SMEM scalar weights (stays lane-dense).
        acc = jnp.zeros_like(m)
        for c in range(hidden):
            z = m * tm_w1_ref[i, c] + tm_b1_ref[i, c]
            z = _leaky(z)
            acc = acc + z * tm_w2_ref[i, c]
        m = acc + tm_b2_ref[i, 0]
        hw = pyr_refs[i].shape[-1]
        out_refs[i][...] = (pyr_refs[i][...].astype(jnp.float32)
                            * m.reshape(1, 1, hw)).astype(out_refs[i].dtype)


# ----------------------------------------------------------------------------
# Glue: nearest-resize replication matrix (matches F.interpolate 'nearest')
# ----------------------------------------------------------------------------
def _nearest_rt(hin, win, hout, wout):
    """(Hin*Win, Hout*Wout) 0/1 matrix; row_in @ RT == nearest-resized row."""
    o = np.arange(hout * wout)
    sy = (o // wout) * hin // hout
    sx = (o % wout) * win // wout
    src = sy * win + sx
    rt = np.zeros((hin * win, hout * wout), np.float32)
    rt[src, o] = 1.0
    return jnp.asarray(rt)


# ----------------------------------------------------------------------------
# Parameter init (deterministic, synthetic — HWIO weight layout)
# ----------------------------------------------------------------------------
def init_params(key, num_residual_blocks, num_high=3):
    def conv_p(k, kh, kw, cin, cout):
        kw_, kb_ = jax.random.split(k)
        scale = 1.0 / (kh * kw * cin) ** 0.5
        w = scale * jax.random.normal(kw_, (kh, kw, cin, cout), jnp.float32)
        b = 0.01 * jax.random.normal(kb_, (cout,), jnp.float32)
        return w, b

    n_keys = 2 + 2 * num_residual_blocks + 2 * num_high
    keys = iter(jax.random.split(key, n_keys))

    params = {}
    params['head'] = conv_p(next(keys), 3, 3, 9, 64)          # Conv2d(9, 64, 3)
    res_blocks = []
    for _ in range(num_residual_blocks):                       # ResidualBlock(64)
        wa, ba = conv_p(next(keys), 3, 3, 64, 64)
        wb, bb = conv_p(next(keys), 3, 3, 64, 64)
        res_blocks.append((wa, ba, wb, bb))
    params['res_blocks'] = res_blocks
    params['tail'] = conv_p(next(keys), 3, 3, 64, 1)           # Conv2d(64, 1, 3)
    trans_mask = []
    for _ in range(num_high):                                  # trans_mask_block_i
        w1, b1 = conv_p(next(keys), 1, 1, 1, 16)
        w2, b2 = conv_p(next(keys), 1, 1, 16, 1)
        trans_mask.append((w1, b1, w2, b2))
    params['trans_mask'] = trans_mask
    return params


# ----------------------------------------------------------------------------
# Trans_upper forward (single pallas_call)
# ----------------------------------------------------------------------------
def trans_upper_forward(params, x_nchw, pyr_original_nchw, fake_low_nchw,
                        num_high=3):
    N, Cin, H, W = x_nchw.shape
    assert Cin <= _CPAD

    # NCHW -> NHWC, zero halo (H by 1, W by 8 for aligned in-kernel concat),
    # channels zero-padded to 64 so the head conv uses the same path as others.
    x = jnp.transpose(x_nchw, (0, 2, 3, 1))
    xc = jnp.pad(x, ((0, 0), (1, 1), (_WPAD, _WPAD), (0, _CPAD - Cin)))

    # Weights: HWIO -> (9*Cin, Cout) matching the im2col column order.
    w_head, b_head = params['head']
    w_head = jnp.pad(w_head, ((0, 0), (0, 0), (0, _CPAD - Cin), (0, 0)))
    w_head = w_head.reshape(9 * _CPAD, 64)
    b_head = b_head.reshape(1, 64)

    res = params['res_blocks']
    num_res = len(res)
    w_ra = jnp.stack([wa.reshape(9 * 64, 64) for wa, _, _, _ in res])
    b_ra = jnp.stack([ba.reshape(1, 64) for _, ba, _, _ in res])
    w_rb = jnp.stack([wb.reshape(9 * 64, 64) for _, _, wb, _ in res])
    b_rb = jnp.stack([bb.reshape(1, 64) for _, _, _, bb in res])

    w_tail, b_tail = params['tail']
    w_tail = w_tail.reshape(1, 9 * 64)        # row form -> lane-dense mask
    b_tail = b_tail.reshape(1, 1)

    tm = params['trans_mask']
    tm_w1 = jnp.stack([w1.reshape(-1) for w1, _, _, _ in tm])   # (nh, 16)
    tm_b1 = jnp.stack([b1.reshape(-1) for _, b1, _, _ in tm])   # (nh, 16)
    tm_w2 = jnp.stack([w2.reshape(-1) for _, _, w2, _ in tm])   # (nh, 16)
    tm_b2 = jnp.stack([b2.reshape(-1) for _, _, _, b2 in tm])   # (nh, 1)

    # Per-level targets as lane-dense (N, C, H*W) views + resize matrices.
    targets = [pyr_original_nchw[-2 - i] for i in range(num_high)]
    pyr_flat, rts, resize_flags = [], [], []
    cur = (H, W)
    for t in targets:
        tn, tc, th, tw = t.shape
        pyr_flat.append(t.reshape(tn, tc, th * tw))
        if (th, tw) == cur:
            resize_flags.append(False)          # nearest resize to same size
        else:
            rts.append(_nearest_rt(cur[0], cur[1], th, tw))
            resize_flags.append(True)
        cur = (th, tw)

    vmem = pl.BlockSpec(memory_space=pltpu.MemorySpace.VMEM)
    smem = pl.BlockSpec(memory_space=pltpu.MemorySpace.SMEM)
    in_specs = (
        [pl.BlockSpec((1, H + 2, W + 2 * _WPAD, _CPAD),
                      lambda n: (n, 0, 0, 0))]
        + [vmem] * 7                       # w_head b_head w_ra b_ra w_rb b_rb w_tail
        + [smem] * 5                       # b_tail tm_w1 tm_b1 tm_w2 tm_b2
        + [vmem] * len(rts)                # nearest-resize replication matrices
        + [pl.BlockSpec((1, p.shape[1], p.shape[2]), lambda n: (n, 0, 0))
           for p in pyr_flat]
    )
    out_specs = tuple(
        pl.BlockSpec((1, p.shape[1], p.shape[2]), lambda n: (n, 0, 0))
        for p in pyr_flat)
    out_shape = tuple(
        jax.ShapeDtypeStruct(p.shape, x_nchw.dtype) for p in pyr_flat)

    kernel = functools.partial(_trans_upper_kernel, num_res=num_res,
                               num_high=num_high,
                               resize_flags=tuple(resize_flags))
    outs = pl.pallas_call(
        kernel,
        grid=(N,),
        in_specs=in_specs,
        out_specs=out_specs,
        out_shape=out_shape,
        compiler_params=pltpu.CompilerParams(
            dimension_semantics=("parallel",)),   # 2nd TensorCore on v7x
    )(xc, w_head, b_head, w_ra, b_ra, w_rb, b_rb, w_tail, b_tail,
      tm_w1, tm_b1, tm_w2, tm_b2, *rts, *pyr_flat)

    results = [o.reshape(t.shape) for o, t in zip(outs, targets)]
    pyr_result = [results[i] for i in reversed(range(num_high))]
    pyr_result.append(fake_low_nchw)
    return pyr_result


if __name__ == "__main__":
    num_residual_blocks = 2
    num_high = 3

    key = jax.random.PRNGKey(0)
    k_param, kx, kp0, kp1, kp2, kp3, kfl = jax.random.split(key, 7)
    params = init_params(k_param, num_residual_blocks, num_high)

    # x is a 9-channel concatenation at the coarsest high-freq level (8x8);
    # pyr_original is a 4-level Laplacian pyramid (3 high-freq + 1 low).
    x = jax.random.normal(kx, (2, 9, 8, 8), jnp.float32)
    pyr_original = [
        jax.random.normal(kp0, (2, 3, 32, 32), jnp.float32),
        jax.random.normal(kp1, (2, 3, 16, 16), jnp.float32),
        jax.random.normal(kp2, (2, 3, 8, 8), jnp.float32),
        jax.random.normal(kp3, (2, 3, 4, 4), jnp.float32),
    ]
    fake_low = jax.random.normal(kfl, (2, 3, 4, 4), jnp.float32)

    fwd = jax.jit(lambda p, xx, pyr, fl:
                  trans_upper_forward(p, xx, pyr, fl, num_high=num_high))
    out = fwd(params, x, pyr_original, fake_low)
    out = jax.block_until_ready(out)

    assert out[0].shape == (2, 3, 32, 32)
    assert out[1].shape == (2, 3, 16, 16)
    assert out[2].shape == (2, 3, 8, 8)
    assert out[3].shape == (2, 3, 4, 4)
    assert all(jnp.all(jnp.isfinite(o)) for o in out)
    print("KERNEL_OK")
</pallas_src>

<mosaic_0001>
module attributes {stable_mosaic.version = 11 : i64} {
  func.func @_trans_upper_kernel(%arg0: i32, %arg1: memref<1x10x24x64xf32, #tpu.memory_space<vmem>>, %arg2: memref<576x64xf32, #tpu.memory_space<vmem>>, %arg3: memref<1x64xf32, #tpu.memory_space<vmem>>, %arg4: memref<2x576x64xf32, #tpu.memory_space<vmem>>, %arg5: memref<2x1x64xf32, #tpu.memory_space<vmem>>, %arg6: memref<2x576x64xf32, #tpu.memory_space<vmem>>, %arg7: memref<2x1x64xf32, #tpu.memory_space<vmem>>, %arg8: memref<1x576xf32, #tpu.memory_space<vmem>>, %arg9: memref<1x1xf32, #tpu.memory_space<smem>>, %arg10: memref<3x16xf32, #tpu.memory_space<smem>>, %arg11: memref<3x16xf32, #tpu.memory_space<smem>>, %arg12: memref<3x16xf32, #tpu.memory_space<smem>>, %arg13: memref<3x1xf32, #tpu.memory_space<smem>>, %arg14: memref<64x256xf32, #tpu.memory_space<vmem>>, %arg15: memref<256x1024xf32, #tpu.memory_space<vmem>>, %arg16: memref<1x3x64xf32, #tpu.memory_space<vmem>>, %arg17: memref<1x3x256xf32, #tpu.memory_space<vmem>>, %arg18: memref<1x3x1024xf32, #tpu.memory_space<vmem>>, %arg19: memref<1x3x64xf32, #tpu.memory_space<vmem>>, %arg20: memref<1x3x256xf32, #tpu.memory_space<vmem>>, %arg21: memref<1x3x1024xf32, #tpu.memory_space<vmem>>) attributes {dimension_semantics = [#tpu.dimension_semantics<parallel>], iteration_bounds = array<i64: 2>, scalar_prefetch = 0 : i64, scratch_operands = 0 : i64, tpu.core_type = #tpu.core_type<tc>, window_params = [{transform_indices = @transform_0, window_bounds = array<i64: 1, 10, 24, 64>}, {pipeline_mode = #tpu.pipeline_mode<synchronous>, transform_indices = @transform_1, window_bounds = array<i64: 576, 64>}, {pipeline_mode = #tpu.pipeline_mode<synchronous>, transform_indices = @transform_2, window_bounds = array<i64: 1, 64>}, {pipeline_mode = #tpu.pipeline_mode<synchronous>, transform_indices = @transform_3, window_bounds = array<i64: 2, 576, 64>}, {pipeline_mode = #tpu.pipeline_mode<synchronous>, transform_indices = @transform_4, window_bounds = array<i64: 2, 1, 64>}, {pipeline_mode = #tpu.pipeline_mode<synchronous>, transform_indices = @transform_5, window_bounds = array<i64: 2, 576, 64>}, {pipeline_mode = #tpu.pipeline_mode<synchronous>, transform_indices = @transform_6, window_bounds = array<i64: 2, 1, 64>}, {pipeline_mode = #tpu.pipeline_mode<synchronous>, transform_indices = @transform_7, window_bounds = array<i64: 1, 576>}, {transform_indices = @transform_8, window_bounds = array<i64: 1, 1>}, {transform_indices = @transform_9, window_bounds = array<i64: 3, 16>}, {transform_indices = @transform_10, window_bounds = array<i64: 3, 16>}, {transform_indices = @transform_11, window_bounds = array<i64: 3, 16>}, {transform_indices = @transform_12, window_bounds = array<i64: 3, 1>}, {pipeline_mode = #tpu.pipeline_mode<synchronous>, transform_indices = @transform_13, window_bounds = array<i64: 64, 256>}, {pipeline_mode = #tpu.pipeline_mode<synchronous>, transform_indices = @transform_14, window_bounds = array<i64: 256, 1024>}, {transform_indices = @transform_15, window_bounds = array<i64: 1, 3, 64>}, {transform_indices = @transform_16, window_bounds = array<i64: 1, 3, 256>}, {transform_indices = @transform_17, window_bounds = array<i64: 1, 3, 1024>}, {transform_indices = @transform_18, window_bounds = array<i64: 1, 3, 64>}, {transform_indices = @transform_19, window_bounds = array<i64: 1, 3, 256>}, {transform_indices = @transform_20, window_bounds = array<i64: 1, 3, 1024>}]} {
    %c0 = arith.constant 0 : index
    %c0_0 = arith.constant 0 : index
    %c0_1 = arith.constant 0 : index
    %c0_2 = arith.constant 0 : index
    %0 = vector.load %arg1[%c0, %c0_0, %c0_1, %c0_2] : memref<1x10x24x64xf32, #tpu.memory_space<vmem>>, vector<1x10x24x64xf32>
    %c0_3 = arith.constant 0 : index
    %c0_4 = arith.constant 0 : index
    %1 = vector.load %arg2[%c0_3, %c0_4] : memref<576x64xf32, #tpu.memory_space<vmem>>, vector<576x64xf32>
    %c0_5 = arith.constant 0 : index
    %c0_6 = arith.constant 0 : index
    %2 = vector.load %arg3[%c0_5, %c0_6] : memref<1x64xf32, #tpu.memory_space<vmem>>, vector<1x64xf32>
    %3 = vector.extract_strided_slice %0 {offsets = [0, 0, 7, 0], sizes = [1, 8, 8, 64], strides = [1, 1, 1, 1]} : vector<1x10x24x64xf32> to vector<1x8x8x64xf32>
    %4 = vector.shape_cast %3 : vector<1x8x8x64xf32> to vector<64x64xf32>
    %5 = vector.extract_strided_slice %0 {offsets = [0, 0, 8, 0], sizes = [1, 8, 8, 64], strides = [1, 1, 1, 1]} : vector<1x10x24x64xf32> to vector<1x8x8x64xf32>
    %6 = vector.shape_cast %5 : vector<1x8x8x64xf32> to vector<64x64xf32>
    %7 = vector.extract_strided_slice %0 {offsets = [0, 0, 9, 0], sizes = [1, 8, 8, 64], strides = [1, 1, 1, 1]} : vector<1x10x24x64xf32> to vector<1x8x8x64xf32>
    %8 = vector.shape_cast %7 : vector<1x8x8x64xf32> to vector<64x64xf32>
    %9 = vector.extract_strided_slice %0 {offsets = [0, 1, 7, 0], sizes = [1, 8, 8, 64], strides = [1, 1, 1, 1]} : vector<1x10x24x64xf32> to vector<1x8x8x64xf32>
    %10 = vector.shape_cast %9 : vector<1x8x8x64xf32> to vector<64x64xf32>
    %11 = vector.extract_strided_slice %0 {offsets = [0, 1, 8, 0], sizes = [1, 8, 8, 64], strides = [1, 1, 1, 1]} : vector<1x10x24x64xf32> to vector<1x8x8x64xf32>
    %12 = vector.shape_cast %11 : vector<1x8x8x64xf32> to vector<64x64xf32>
    %13 = vector.extract_strided_slice %0 {offsets = [0, 1, 9, 0], sizes = [1, 8, 8, 64], strides = [1, 1, 1, 1]} : vector<1x10x24x64xf32> to vector<1x8x8x64xf32>
    %14 = vector.shape_cast %13 : vector<1x8x8x64xf32> to vector<64x64xf32>
    %15 = vector.extract_strided_slice %0 {offsets = [0, 2, 7, 0], sizes = [1, 8, 8, 64], strides = [1, 1, 1, 1]} : vector<1x10x24x64xf32> to vector<1x8x8x64xf32>
    %16 = vector.shape_cast %15 : vector<1x8x8x64xf32> to vector<64x64xf32>
    %17 = vector.extract_strided_slice %0 {offsets = [0, 2, 8, 0], sizes = [1, 8, 8, 64], strides = [1, 1, 1, 1]} : vector<1x10x24x64xf32> to vector<1x8x8x64xf32>
    %18 = vector.shape_cast %17 : vector<1x8x8x64xf32> to vector<64x64xf32>
    %19 = vector.extract_strided_slice %0 {offsets = [0, 2, 9, 0], sizes = [1, 8, 8, 64], strides = [1, 1, 1, 1]} : vector<1x10x24x64xf32> to vector<1x8x8x64xf32>
    %20 = vector.shape_cast %19 : vector<1x8x8x64xf32> to vector<64x64xf32>
    %21 = tpu.concatenate %4, %6, %8, %10, %12, %14, %16, %18, %20 in 1 : vector<64x64xf32>, vector<64x64xf32>, vector<64x64xf32>, vector<64x64xf32>, vector<64x64xf32>, vector<64x64xf32>, vector<64x64xf32>, vector<64x64xf32>, vector<64x64xf32> -> vector<64x576xf32>
    %cst = arith.constant dense<0.000000e+00> : vector<64x64xf32>
    %22 = tpu.matmul %21, %1, %cst {dimension_numbers = #tpu.dot_dimension_numbers<[1], [0], [0], [1], [0, 0, 1, 1], [], []>} : vector<64x576xf32>, vector<576x64xf32>, vector<64x64xf32> -> vector<64x64xf32>
    %23 = vector.broadcast %2 : vector<1x64xf32> to vector<64x64xf32>
    %24 = arith.addf %22, %23 : vector<64x64xf32>
    %cst_7 = arith.constant 0.000000e+00 : f32
    %25 = vector.broadcast %cst_7 : f32 to vector<64x64xf32>
    %26 = arith.cmpf oge, %24, %25 : vector<64x64xf32>
    %cst_8 = arith.constant 0.00999999977 : f32
    %27 = vector.broadcast %cst_8 : f32 to vector<64x64xf32>
    %28 = arith.mulf %27, %24 : vector<64x64xf32>
    %29 = arith.select %26, %24, %28 : vector<64x64xi1>, vector<64x64xf32>
    %30 = vector.shape_cast %29 : vector<64x64xf32> to vector<1x8x8x64xf32>
    %cst_9 = arith.constant 0.000000e+00 : f32
    %31 = vector.broadcast %cst_9 : f32 to vector<1x8x8x64xf32>
    %32 = tpu.concatenate %31, %30, %31 in 2 : vector<1x8x8x64xf32>, vector<1x8x8x64xf32>, vector<1x8x8x64xf32> -> vector<1x8x24x64xf32>
    %cst_10 = arith.constant 0.000000e+00 : f32
    %33 = vector.broadcast %cst_10 : f32 to vector<1x1x24x64xf32>
    %34 = tpu.concatenate %33, %32, %33 in 1 : vector<1x1x24x64xf32>, vector<1x8x24x64xf32>, vector<1x1x24x64xf32> -> vector<1x10x24x64xf32>
    %c0_11 = arith.constant 0 : index
    %c0_12 = arith.constant 0 : index
    %c0_13 = arith.constant 0 : index
    %35 = vector.load %arg4[%c0_11, %c0_12, %c0_13] : memref<2x576x64xf32, #tpu.memory_space<vmem>>, vector<1x576x64xf32>
    %36 = vector.shape_cast %35 : vector<1x576x64xf32> to vector<576x64xf32>
    %c0_14 = arith.constant 0 : index
    %c0_15 = arith.constant 0 : index
    %c0_16 = arith.constant 0 : index
    %37 = vector.load %arg5[%c0_14, %c0_15, %c0_16] : memref<2x1x64xf32, #tpu.memory_space<vmem>>, vector<1x1x64xf32>
    %38 = vector.shape_cast %37 : vector<1x1x64xf32> to vector<1x64xf32>
    %39 = vector.extract_strided_slice %34 {offsets = [0, 0, 7, 0], sizes = [1, 8, 8, 64], strides = [1, 1, 1, 1]} : vector<1x10x24x64xf32> to vector<1x8x8x64xf32>
    %40 = vector.shape_cast %39 : vector<1x8x8x64xf32> to vector<64x64xf32>
    %41 = vector.extract_strided_slice %34 {offsets = [0, 0, 8, 0], sizes = [1, 8, 8, 64], strides = [1, 1, 1, 1]} : vector<1x10x24x64xf32> to vector<1x8x8x64xf32>
    %42 = vector.shape_cast %41 : vector<1x8x8x64xf32> to vector<64x64xf32>
    %43 = vector.extract_strided_slice %34 {offsets = [0, 0, 9, 0], sizes = [1, 8, 8, 64], strides = [1, 1, 1, 1]} : vector<1x10x24x64xf32> to vector<1x8x8x64xf32>
    %44 = vector.shape_cast %43 : vector<1x8x8x64xf32> to vector<64x64xf32>
    %45 = vector.extract_strided_slice %34 {offsets = [0, 1, 7, 0], sizes = [1, 8, 8, 64], strides = [1, 1, 1, 1]} : vector<1x10x24x64xf32> to vector<1x8x8x64xf32>
    %46 = vector.shape_cast %45 : vector<1x8x8x64xf32> to vector<64x64xf32>
    %47 = vector.extract_strided_slice %34 {offsets = [0, 1, 8, 0], sizes = [1, 8, 8, 64], strides = [1, 1, 1, 1]} : vector<1x10x24x64xf32> to vector<1x8x8x64xf32>
    %48 = vector.shape_cast %47 : vector<1x8x8x64xf32> to vector<64x64xf32>
    %49 = vector.extract_strided_slice %34 {offsets = [0, 1, 9, 0], sizes = [1, 8, 8, 64], strides = [1, 1, 1, 1]} : vector<1x10x24x64xf32> to vector<1x8x8x64xf32>
    %50 = vector.shape_cast %49 : vector<1x8x8x64xf32> to vector<64x64xf32>
    %51 = vector.extract_strided_slice %34 {offsets = [0, 2, 7, 0], sizes = [1, 8, 8, 64], strides = [1, 1, 1, 1]} : vector<1x10x24x64xf32> to vector<1x8x8x64xf32>
    %52 = vector.shape_cast %51 : vector<1x8x8x64xf32> to vector<64x64xf32>
    %53 = vector.extract_strided_slice %34 {offsets = [0, 2, 8, 0], sizes = [1, 8, 8, 64], strides = [1, 1, 1, 1]} : vector<1x10x24x64xf32> to vector<1x8x8x64xf32>
    %54 = vector.shape_cast %53 : vector<1x8x8x64xf32> to vector<64x64xf32>
    %55 = vector.extract_strided_slice %34 {offsets = [0, 2, 9, 0], sizes = [1, 8, 8, 64], strides = [1, 1, 1, 1]} : vector<1x10x24x64xf32> to vector<1x8x8x64xf32>
    %56 = vector.shape_cast %55 : vector<1x8x8x64xf32> to vector<64x64xf32>
    %57 = tpu.concatenate %40, %42, %44, %46, %48, %50, %52, %54, %56 in 1 : vector<64x64xf32>, vector<64x64xf32>, vector<64x64xf32>, vector<64x64xf32>, vector<64x64xf32>, vector<64x64xf32>, vector<64x64xf32>, vector<64x64xf32>, vector<64x64xf32> -> vector<64x576xf32>
    %cst_17 = arith.constant dense<0.000000e+00> : vector<64x64xf32>
    %58 = tpu.matmul %57, %36, %cst_17 {dimension_numbers = #tpu.dot_dimension_numbers<[1], [0], [0], [1], [0, 0, 1, 1], [], []>} : vector<64x576xf32>, vector<576x64xf32>, vector<64x64xf32> -> vector<64x64xf32>
    %59 = vector.broadcast %38 : vector<1x64xf32> to vector<64x64xf32>
    %60 = arith.addf %58, %59 : vector<64x64xf32>
    %cst_18 = arith.constant 0.000000e+00 : f32
    %61 = vector.broadcast %cst_18 : f32 to vector<64x64xf32>
    %62 = arith.cmpf oge, %60, %61 : vector<64x64xf32>
    %cst_19 = arith.constant 0.00999999977 : f32
    %63 = vector.broadcast %cst_19 : f32 to vector<64x64xf32>
    %64 = arith.mulf %63, %60 : vector<64x64xf32>
    %65 = arith.select %62, %60, %64 : vector<64x64xi1>, vector<64x64xf32>
    %66 = vector.shape_cast %65 : vector<64x64xf32> to vector<1x8x8x64xf32>
    %cst_20 = arith.constant 0.000000e+00 : f32
    %67 = vector.broadcast %cst_20 : f32 to vector<1x8x8x64xf32>
    %68 = tpu.concatenate %67, %66, %67 in 2 : vector<1x8x8x64xf32>, vector<1x8x8x64xf32>, vector<1x8x8x64xf32> -> vector<1x8x24x64xf32>
    %cst_21 = arith.constant 0.000000e+00 : f32
    %69 = vector.broadcast %cst_21 : f32 to vector<1x1x24x64xf32>
    %70 = tpu.concatenate %69, %68, %69 in 1 : vector<1x1x24x64xf32>, vector<1x8x24x64xf32>, vector<1x1x24x64xf32> -> vector<1x10x24x64xf32>
    %c0_22 = arith.constant 0 : index
    %c0_23 = arith.constant 0 : index
    %c0_24 = arith.constant 0 : index
    %71 = vector.load %arg6[%c0_22, %c0_23, %c0_24] : memref<2x576x64xf32, #tpu.memory_space<vmem>>, vector<1x576x64xf32>
    %72 = vector.shape_cast %71 : vector<1x576x64xf32> to vector<576x64xf32>
    %c0_25 = arith.constant 0 : index
    %c0_26 = arith.constant 0 : index
    %c0_27 = arith.constant 0 : index
    %73 = vector.load %arg7[%c0_25, %c0_26, %c0_27] : memref<2x1x64xf32, #tpu.memory_space<vmem>>, vector<1x1x64xf32>
    %74 = vector.shape_cast %73 : vector<1x1x64xf32> to vector<1x64xf32>
    %75 = vector.extract_strided_slice %70 {offsets = [0, 0, 7, 0], sizes = [1, 8, 8, 64], strides = [1, 1, 1, 1]} : vector<1x10x24x64xf32> to vector<1x8x8x64xf32>
    %76 = vector.shape_cast %75 : vector<1x8x8x64xf32> to vector<64x64xf32>
    %77 = vector.extract_strided_slice %70 {offsets = [0, 0, 8, 0], sizes = [1, 8, 8, 64], strides = [1, 1, 1, 1]} : vector<1x10x24x64xf32> to vector<1x8x8x64xf32>
    %78 = vector.shape_cast %77 : vector<1x8x8x64xf32> to vector<64x64xf32>
    %79 = vector.extract_strided_slice %70 {offsets = [0, 0, 9, 0], sizes = [1, 8, 8, 64], strides = [1, 1, 1, 1]} : vector<1x10x24x64xf32> to vector<1x8x8x64xf32>
    %80 = vector.shape_cast %79 : vector<1x8x8x64xf32> to vector<64x64xf32>
    %81 = vector.extract_strided_slice %70 {offsets = [0, 1, 7, 0], sizes = [1, 8, 8, 64], strides = [1, 1, 1, 1]} : vector<1x10x24x64xf32> to vector<1x8x8x64xf32>
    %82 = vector.shape_cast %81 : vector<1x8x8x64xf32> to vector<64x64xf32>
    %83 = vector.extract_strided_slice %70 {offsets = [0, 1, 8, 0], sizes = [1, 8, 8, 64], strides = [1, 1, 1, 1]} : vector<1x10x24x64xf32> to vector<1x8x8x64xf32>
    %84 = vector.shape_cast %83 : vector<1x8x8x64xf32> to vector<64x64xf32>
    %85 = vector.extract_strided_slice %70 {offsets = [0, 1, 9, 0], sizes = [1, 8, 8, 64], strides = [1, 1, 1, 1]} : vector<1x10x24x64xf32> to vector<1x8x8x64xf32>
    %86 = vector.shape_cast %85 : vector<1x8x8x64xf32> to vector<64x64xf32>
    %87 = vector.extract_strided_slice %70 {offsets = [0, 2, 7, 0], sizes = [1, 8, 8, 64], strides = [1, 1, 1, 1]} : vector<1x10x24x64xf32> to vector<1x8x8x64xf32>
    %88 = vector.shape_cast %87 : vector<1x8x8x64xf32> to vector<64x64xf32>
    %89 = vector.extract_strided_slice %70 {offsets = [0, 2, 8, 0], sizes = [1, 8, 8, 64], strides = [1, 1, 1, 1]} : vector<1x10x24x64xf32> to vector<1x8x8x64xf32>
    %90 = vector.shape_cast %89 : vector<1x8x8x64xf32> to vector<64x64xf32>
    %91 = vector.extract_strided_slice %70 {offsets = [0, 2, 9, 0], sizes = [1, 8, 8, 64], strides = [1, 1, 1, 1]} : vector<1x10x24x64xf32> to vector<1x8x8x64xf32>
    %92 = vector.shape_cast %91 : vector<1x8x8x64xf32> to vector<64x64xf32>
    %93 = tpu.concatenate %76, %78, %80, %82, %84, %86, %88, %90, %92 in 1 : vector<64x64xf32>, vector<64x64xf32>, vector<64x64xf32>, vector<64x64xf32>, vector<64x64xf32>, vector<64x64xf32>, vector<64x64xf32>, vector<64x64xf32>, vector<64x64xf32> -> vector<64x576xf32>
    %cst_28 = arith.constant dense<0.000000e+00> : vector<64x64xf32>
    %94 = tpu.matmul %93, %72, %cst_28 {dimension_numbers = #tpu.dot_dimension_numbers<[1], [0], [0], [1], [0, 0, 1, 1], [], []>} : vector<64x576xf32>, vector<576x64xf32>, vector<64x64xf32> -> vector<64x64xf32>
    %95 = vector.broadcast %74 : vector<1x64xf32> to vector<64x64xf32>
    %96 = arith.addf %94, %95 : vector<64x64xf32>
    %97 = vector.shape_cast %96 : vector<64x64xf32> to vector<1x8x8x64xf32>
    %cst_29 = arith.constant 0.000000e+00 : f32
    %98 = vector.broadcast %cst_29 : f32 to vector<1x8x8x64xf32>
    %99 = tpu.concatenate %98, %97, %98 in 2 : vector<1x8x8x64xf32>, vector<1x8x8x64xf32>, vector<1x8x8x64xf32> -> vector<1x8x24x64xf32>
    %cst_30 = arith.constant 0.000000e+00 : f32
    %100 = vector.broadcast %cst_30 : f32 to vector<1x1x24x64xf32>
    %101 = tpu.concatenate %100, %99, %100 in 1 : vector<1x1x24x64xf32>, vector<1x8x24x64xf32>, vector<1x1x24x64xf32> -> vector<1x10x24x64xf32>
    %102 = arith.addf %34, %101 : vector<1x10x24x64xf32>
    %c1 = arith.constant 1 : index
    %c0_31 = arith.constant 0 : index
    %c0_32 = arith.constant 0 : index
    %103 = vector.load %arg4[%c1, %c0_31, %c0_32] : memref<2x576x64xf32, #tpu.memory_space<vmem>>, vector<1x576x64xf32>
    %104 = vector.shape_cast %103 : vector<1x576x64xf32> to vector<576x64xf32>
    %c1_33 = arith.constant 1 : index
    %c0_34 = arith.constant 0 : index
    %c0_35 = arith.constant 0 : index
    %105 = vector.load %arg5[%c1_33, %c0_34, %c0_35] : memref<2x1x64xf32, #tpu.memory_space<vmem>>, vector<1x1x64xf32>
    %106 = vector.shape_cast %105 : vector<1x1x64xf32> to vector<1x64xf32>
    %107 = vector.extract_strided_slice %102 {offsets = [0, 0, 7, 0], sizes = [1, 8, 8, 64], strides = [1, 1, 1, 1]} : vector<1x10x24x64xf32> to vector<1x8x8x64xf32>
    %108 = vector.shape_cast %107 : vector<1x8x8x64xf32> to vector<64x64xf32>
    %109 = vector.extract_strided_slice %102 {offsets = [0, 0, 8, 0], sizes = [1, 8, 8, 64], strides = [1, 1, 1, 1]} : vector<1x10x24x64xf32> to vector<1x8x8x64xf32>
    %110 = vector.shape_cast %109 : vector<1x8x8x64xf32> to vector<64x64xf32>
    %111 = vector.extract_strided_slice %102 {offsets = [0, 0, 9, 0], sizes = [1, 8, 8, 64], strides = [1, 1, 1, 1]} : vector<1x10x24x64xf32> to vector<1x8x8x64xf32>
    %112 = vector.shape_cast %111 : vector<1x8x8x64xf32> to vector<64x64xf32>
    %113 = vector.extract_strided_slice %102 {offsets = [0, 1, 7, 0], sizes = [1, 8, 8, 64], strides = [1, 1, 1, 1]} : vector<1x10x24x64xf32> to vector<1x8x8x64xf32>
    %114 = vector.shape_cast %113 : vector<1x8x8x64xf32> to vector<64x64xf32>
    %115 = vector.extract_strided_slice %102 {offsets = [0, 1, 8, 0], sizes = [1, 8, 8, 64], strides = [1, 1, 1, 1]} : vector<1x10x24x64xf32> to vector<1x8x8x64xf32>
    %116 = vector.shape_cast %115 : vector<1x8x8x64xf32> to vector<64x64xf32>
    %117 = vector.extract_strided_slice %102 {offsets = [0, 1, 9, 0], sizes = [1, 8, 8, 64], strides = [1, 1, 1, 1]} : vector<1x10x24x64xf32> to vector<1x8x8x64xf32>
    %118 = vector.shape_cast %117 : vector<1x8x8x64xf32> to vector<64x64xf32>
    %119 = vector.extract_strided_slice %102 {offsets = [0, 2, 7, 0], sizes = [1, 8, 8, 64], strides = [1, 1, 1, 1]} : vector<1x10x24x64xf32> to vector<1x8x8x64xf32>
    %120 = vector.shape_cast %119 : vector<1x8x8x64xf32> to vector<64x64xf32>
    %121 = vector.extract_strided_slice %102 {offsets = [0, 2, 8, 0], sizes = [1, 8, 8, 64], strides = [1, 1, 1, 1]} : vector<1x10x24x64xf32> to vector<1x8x8x64xf32>
    %122 = vector.shape_cast %121 : vector<1x8x8x64xf32> to vector<64x64xf32>
    %123 = vector.extract_strided_slice %102 {offsets = [0, 2, 9, 0], sizes = [1, 8, 8, 64], strides = [1, 1, 1, 1]} : vector<1x10x24x64xf32> to vector<1x8x8x64xf32>
    %124 = vector.shape_cast %123 : vector<1x8x8x64xf32> to vector<64x64xf32>
    %125 = tpu.concatenate %108, %110, %112, %114, %116, %118, %120, %122, %124 in 1 : vector<64x64xf32>, vector<64x64xf32>, vector<64x64xf32>, vector<64x64xf32>, vector<64x64xf32>, vector<64x64xf32>, vector<64x64xf32>, vector<64x64xf32>, vector<64x64xf32> -> vector<64x576xf32>
    %cst_36 = arith.constant dense<0.000000e+00> : vector<64x64xf32>
    %126 = tpu.matmul %125, %104, %cst_36 {dimension_numbers = #tpu.dot_dimension_numbers<[1], [0], [0], [1], [0, 0, 1, 1], [], []>} : vector<64x576xf32>, vector<576x64xf32>, vector<64x64xf32> -> vector<64x64xf32>
    %127 = vector.broadcast %106 : vector<1x64xf32> to vector<64x64xf32>
    %128 = arith.addf %126, %127 : vector<64x64xf32>
    %cst_37 = arith.constant 0.000000e+00 : f32
    %129 = vector.broadcast %cst_37 : f32 to vector<64x64xf32>
    %130 = arith.cmpf oge, %128, %129 : vector<64x64xf32>
    %cst_38 = arith.constant 0.00999999977 : f32
    %131 = vector.broadcast %cst_38 : f32 to vector<64x64xf32>
    %132 = arith.mulf %131, %128 : vector<64x64xf32>
    %133 = arith.select %130, %128, %132 : vector<64x64xi1>, vector<64x64xf32>
    %134 = vector.shape_cast %133 : vector<64x64xf32> to vector<1x8x8x64xf32>
    %cst_39 = arith.constant 0.000000e+00 : f32
    %135 = vector.broadcast %cst_39 : f32 to vector<1x8x8x64xf32>
    %136 = tpu.concatenate %135, %134, %135 in 2 : vector<1x8x8x64xf32>, vector<1x8x8x64xf32>, vector<1x8x8x64xf32> -> vector<1x8x24x64xf32>
    %cst_40 = arith.constant 0.000000e+00 : f32
    %137 = vector.broadcast %cst_40 : f32 to vector<1x1x24x64xf32>
    %138 = tpu.concatenate %137, %136, %137 in 1 : vector<1x1x24x64xf32>, vector<1x8x24x64xf32>, vector<1x1x24x64xf32> -> vector<1x10x24x64xf32>
    %c1_41 = arith.constant 1 : index
    %c0_42 = arith.constant 0 : index
    %c0_43 = arith.constant 0 : index
    %139 = vector.load %arg6[%c1_41, %c0_42, %c0_43] : memref<2x576x64xf32, #tpu.memory_space<vmem>>, vector<1x576x64xf32>
    %140 = vector.shape_cast %139 : vector<1x576x64xf32> to vector<576x64xf32>
    %c1_44 = arith.constant 1 : index
    %c0_45 = arith.constant 0 : index
    %c0_46 = arith.constant 0 : index
    %141 = vector.load %arg7[%c1_44, %c0_45, %c0_46] : memref<2x1x64xf32, #tpu.memory_space<vmem>>, vector<1x1x64xf32>
    %142 = vector.shape_cast %141 : vector<1x1x64xf32> to vector<1x64xf32>
    %143 = vector.extract_strided_slice %138 {offsets = [0, 0, 7, 0], sizes = [1, 8, 8, 64], strides = [1, 1, 1, 1]} : vector<1x10x24x64xf32> to vector<1x8x8x64xf32>
    %144 = vector.shape_cast %143 : vector<1x8x8x64xf32> to vector<64x64xf32>
    %145 = vector.extract_strided_slice %138 {offsets = [0, 0, 8, 0], sizes = [1, 8, 8, 64], strides = [1, 1, 1, 1]} : vector<1x10x24x64xf32> to vector<1x8x8x64xf32>
    %146 = vector.shape_cast %145 : vector<1x8x8x64xf32> to vector<64x64xf32>
    %147 = vector.extract_strided_slice %138 {offsets = [0, 0, 9, 0], sizes = [1, 8, 8, 64], strides = [1, 1, 1, 1]} : vector<1x10x24x64xf32> to vector<1x8x8x64xf32>
    %148 = vector.shape_cast %147 : vector<1x8x8x64xf32> to vector<64x64xf32>
    %149 = vector.extract_strided_slice %138 {offsets = [0, 1, 7, 0], sizes = [1, 8, 8, 64], strides = [1, 1, 1, 1]} : vector<1x10x24x64xf32> to vector<1x8x8x64xf32>
    %150 = vector.shape_cast %149 : vector<1x8x8x64xf32> to vector<64x64xf32>
    %151 = vector.extract_strided_slice %138 {offsets = [0, 1, 8, 0], sizes = [1, 8, 8, 64], strides = [1, 1, 1, 1]} : vector<1x10x24x64xf32> to vector<1x8x8x64xf32>
    %152 = vector.shape_cast %151 : vector<1x8x8x64xf32> to vector<64x64xf32>
    %153 = vector.extract_strided_slice %138 {offsets = [0, 1, 9, 0], sizes = [1, 8, 8, 64], strides = [1, 1, 1, 1]} : vector<1x10x24x64xf32> to vector<1x8x8x64xf32>
    %154 = vector.shape_cast %153 : vector<1x8x8x64xf32> to vector<64x64xf32>
    %155 = vector.extract_strided_slice %138 {offsets = [0, 2, 7, 0], sizes = [1, 8, 8, 64], strides = [1, 1, 1, 1]} : vector<1x10x24x64xf32> to vector<1x8x8x64xf32>
    %156 = vector.shape_cast %155 : vector<1x8x8x64xf32> to vector<64x64xf32>
    %157 = vector.extract_strided_slice %138 {offsets = [0, 2, 8, 0], sizes = [1, 8, 8, 64], strides = [1, 1, 1, 1]} : vector<1x10x24x64xf32> to vector<1x8x8x64xf32>
    %158 = vector.shape_cast %157 : vector<1x8x8x64xf32> to vector<64x64xf32>
    %159 = vector.extract_strided_slice %138 {offsets = [0, 2, 9, 0], sizes = [1, 8, 8, 64], strides = [1, 1, 1, 1]} : vector<1x10x24x64xf32> to vector<1x8x8x64xf32>
    %160 = vector.shape_cast %159 : vector<1x8x8x64xf32> to vector<64x64xf32>
    %161 = tpu.concatenate %144, %146, %148, %150, %152, %154, %156, %158, %160 in 1 : vector<64x64xf32>, vector<64x64xf32>, vector<64x64xf32>, vector<64x64xf32>, vector<64x64xf32>, vector<64x64xf32>, vector<64x64xf32>, vector<64x64xf32>, vector<64x64xf32> -> vector<64x576xf32>
    %cst_47 = arith.constant dense<0.000000e+00> : vector<64x64xf32>
    %162 = tpu.matmul %161, %140, %cst_47 {dimension_numbers = #tpu.dot_dimension_numbers<[1], [0], [0], [1], [0, 0, 1, 1], [], []>} : vector<64x576xf32>, vector<576x64xf32>, vector<64x64xf32> -> vector<64x64xf32>
    %163 = vector.broadcast %142 : vector<1x64xf32> to vector<64x64xf32>
    %164 = arith.addf %162, %163 : vector<64x64xf32>
    %165 = vector.shape_cast %164 : vector<64x64xf32> to vector<1x8x8x64xf32>
    %cst_48 = arith.constant 0.000000e+00 : f32
    %166 = vector.broadcast %cst_48 : f32 to vector<1x8x8x64xf32>
    %167 = tpu.concatenate %166, %165, %166 in 2 : vector<1x8x8x64xf32>, vector<1x8x8x64xf32>, vector<1x8x8x64xf32> -> vector<1x8x24x64xf32>
    %cst_49 = arith.constant 0.000000e+00 : f32
    %168 = vector.broadcast %cst_49 : f32 to vector<1x1x24x64xf32>
    %169 = tpu.concatenate %168, %167, %168 in 1 : vector<1x1x24x64xf32>, vector<1x8x24x64xf32>, vector<1x1x24x64xf32> -> vector<1x10x24x64xf32>
    %170 = arith.addf %102, %169 : vector<1x10x24x64xf32>
    %171 = vector.extract_strided_slice %170 {offsets = [0, 0, 7, 0], sizes = [1, 8, 8, 64], strides = [1, 1, 1, 1]} : vector<1x10x24x64xf32> to vector<1x8x8x64xf32>
    %172 = vector.shape_cast %171 : vector<1x8x8x64xf32> to vector<64x64xf32>
    %173 = vector.extract_strided_slice %170 {offsets = [0, 0, 8, 0], sizes = [1, 8, 8, 64], strides = [1, 1, 1, 1]} : vector<1x10x24x64xf32> to vector<1x8x8x64xf32>
    %174 = vector.shape_cast %173 : vector<1x8x8x64xf32> to vector<64x64xf32>
    %175 = vector.extract_strided_slice %170 {offsets = [0, 0, 9, 0], sizes = [1, 8, 8, 64], strides = [1, 1, 1, 1]} : vector<1x10x24x64xf32> to vector<1x8x8x64xf32>
    %176 = vector.shape_cast %175 : vector<1x8x8x64xf32> to vector<64x64xf32>
    %177 = vector.extract_strided_slice %170 {offsets = [0, 1, 7, 0], sizes = [1, 8, 8, 64], strides = [1, 1, 1, 1]} : vector<1x10x24x64xf32> to vector<1x8x8x64xf32>
    %178 = vector.shape_cast %177 : vector<1x8x8x64xf32> to vector<64x64xf32>
    %179 = vector.extract_strided_slice %170 {offsets = [0, 1, 8, 0], sizes = [1, 8, 8, 64], strides = [1, 1, 1, 1]} : vector<1x10x24x64xf32> to vector<1x8x8x64xf32>
    %180 = vector.shape_cast %179 : vector<1x8x8x64xf32> to vector<64x64xf32>
    %181 = vector.extract_strided_slice %170 {offsets = [0, 1, 9, 0], sizes = [1, 8, 8, 64], strides = [1, 1, 1, 1]} : vector<1x10x24x64xf32> to vector<1x8x8x64xf32>
    %182 = vector.shape_cast %181 : vector<1x8x8x64xf32> to vector<64x64xf32>
    %183 = vector.extract_strided_slice %170 {offsets = [0, 2, 7, 0], sizes = [1, 8, 8, 64], strides = [1, 1, 1, 1]} : vector<1x10x24x64xf32> to vector<1x8x8x64xf32>
    %184 = vector.shape_cast %183 : vector<1x8x8x64xf32> to vector<64x64xf32>
    %185 = vector.extract_strided_slice %170 {offsets = [0, 2, 8, 0], sizes = [1, 8, 8, 64], strides = [1, 1, 1, 1]} : vector<1x10x24x64xf32> to vector<1x8x8x64xf32>
    %186 = vector.shape_cast %185 : vector<1x8x8x64xf32> to vector<64x64xf32>
    %187 = vector.extract_strided_slice %170 {offsets = [0, 2, 9, 0], sizes = [1, 8, 8, 64], strides = [1, 1, 1, 1]} : vector<1x10x24x64xf32> to vector<1x8x8x64xf32>
    %188 = vector.shape_cast %187 : vector<1x8x8x64xf32> to vector<64x64xf32>
    %189 = tpu.concatenate %172, %174, %176, %178, %180, %182, %184, %186, %188 in 1 : vector<64x64xf32>, vector<64x64xf32>, vector<64x64xf32>, vector<64x64xf32>, vector<64x64xf32>, vector<64x64xf32>, vector<64x64xf32>, vector<64x64xf32>, vector<64x64xf32> -> vector<64x576xf32>
    %c0_50 = arith.constant 0 : index
    %c0_51 = arith.constant 0 : index
    %190 = vector.load %arg8[%c0_50, %c0_51] : memref<1x576xf32, #tpu.memory_space<vmem>>, vector<1x576xf32>
    "tpu.trace_start"() <{level = 10 : i32, message = "ok,pk->op"}> : () -> ()
    %cst_52 = arith.constant dense<0.000000e+00> : vector<1x64xf32>
    %191 = tpu.matmul %190, %189, %cst_52 {dimension_numbers = #tpu.dot_dimension_numbers<[1], [1], [0], [0], [0, 0, 1, 0], [], []>} : vector<1x576xf32>, vector<64x576xf32>, vector<1x64xf32> -> vector<1x64xf32>
    "tpu.trace_stop"() : () -> ()
    %c0_53 = arith.constant 0 : index
    %c0_54 = arith.constant 0 : index
    %192 = memref.load %arg9[%c0_53, %c0_54] : memref<1x1xf32, #tpu.memory_space<smem>>
    %193 = vector.broadcast %192 : f32 to vector<1x64xf32>
    %194 = arith.addf %191, %193 : vector<1x64xf32>
    %cst_55 = arith.constant 0.000000e+00 : f32
    %195 = vector.broadcast %cst_55 : f32 to vector<1x64xf32>
    %c0_56 = arith.constant 0 : index
    %c0_57 = arith.constant 0 : index
    %196 = memref.load %arg10[%c0_56, %c0_57] : memref<3x16xf32, #tpu.memory_space<smem>>
    %197 = vector.broadcast %196 : f32 to vector<1x64xf32>
    %198 = arith.mulf %194, %197 : vector<1x64xf32>
    %c0_58 = arith.constant 0 : index
    %c0_59 = arith.constant 0 : index
    %199 = memref.load %arg11[%c0_58, %c0_59] : memref<3x16xf32, #tpu.memory_space<smem>>
    %200 = vector.broadcast %199 : f32 to vector<1x64xf32>
    %201 = arith.addf %198, %200 : vector<1x64xf32>
    %cst_60 = arith.constant 0.000000e+00 : f32
    %202 = vector.broadcast %cst_60 : f32 to vector<1x64xf32>
    %203 = arith.cmpf oge, %201, %202 : vector<1x64xf32>
    %cst_61 = arith.constant 0.00999999977 : f32
    %204 = vector.broadcast %cst_61 : f32 to vector<1x64xf32>
    %205 = arith.mulf %204, %201 : vector<1x64xf32>
    %206 = arith.select %203, %201, %205 : vector<1x64xi1>, vector<1x64xf32>
    %c0_62 = arith.constant 0 : index
    %c0_63 = arith.constant 0 : index
    %207 = memref.load %arg12[%c0_62, %c0_63] : memref<3x16xf32, #tpu.memory_space<smem>>
    %208 = vector.broadcast %207 : f32 to vector<1x64xf32>
    %209 = arith.mulf %206, %208 : vector<1x64xf32>
    %210 = arith.addf %195, %209 : vector<1x64xf32>
    %c0_64 = arith.constant 0 : index
    %c1_65 = arith.constant 1 : index
    %211 = memref.load %arg10[%c0_64, %c1_65] : memref<3x16xf32, #tpu.memory_space<smem>>
    %212 = vector.broadcast %211 : f32 to vector<1x64xf32>
    %213 = arith.mulf %194, %212 : vector<1x64xf32>
    %c0_66 = arith.constant 0 : index
    %c1_67 = arith.constant 1 : index
    %214 = memref.load %arg11[%c0_66, %c1_67] : memref<3x16xf32, #tpu.memory_space<smem>>
    %215 = vector.broadcast %214 : f32 to vector<1x64xf32>
    %216 = arith.addf %213, %215 : vector<1x64xf32>
    %cst_68 = arith.constant 0.000000e+00 : f32
    %217 = vector.broadcast %cst_68 : f32 to vector<1x64xf32>
    %218 = arith.cmpf oge, %216, %217 : vector<1x64xf32>
    %cst_69 = arith.constant 0.00999999977 : f32
    %219 = vector.broadcast %cst_69 : f32 to vector<1x64xf32>
    %220 = arith.mulf %219, %216 : vector<1x64xf32>
    %221 = arith.select %218, %216, %220 : vector<1x64xi1>, vector<1x64xf32>
    %c0_70 = arith.constant 0 : index
    %c1_71 = arith.constant 1 : index
    %222 = memref.load %arg12[%c0_70, %c1_71] : memref<3x16xf32, #tpu.memory_space<smem>>
    %223 = vector.broadcast %222 : f32 to vector<1x64xf32>
    %224 = arith.mulf %221, %223 : vector<1x64xf32>
    %225 = arith.addf %210, %224 : vector<1x64xf32>
    %c0_72 = arith.constant 0 : index
    %c2 = arith.constant 2 : index
    %226 = memref.load %arg10[%c0_72, %c2] : memref<3x16xf32, #tpu.memory_space<smem>>
    %227 = vector.broadcast %226 : f32 to vector<1x64xf32>
    %228 = arith.mulf %194, %227 : vector<1x64xf32>
    %c0_73 = arith.constant 0 : index
    %c2_74 = arith.constant 2 : index
    %229 = memref.load %arg11[%c0_73, %c2_74] : memref<3x16xf32, #tpu.memory_space<smem>>
    %230 = vector.broadcast %229 : f32 to vector<1x64xf32>
    %231 = arith.addf %228, %230 : vector<1x64xf32>
    %cst_75 = arith.constant 0.000000e+00 : f32
    %232 = vector.broadcast %cst_75 : f32 to vector<1x64xf32>
    %233 = arith.cmpf oge, %231, %232 : vector<1x64xf32>
    %cst_76 = arith.constant 0.00999999977 : f32
    %234 = vector.broadcast %cst_76 : f32 to vector<1x64xf32>
    %235 = arith.mulf %234, %231 : vector<1x64xf32>
    %236 = arith.select %233, %231, %235 : vector<1x64xi1>, vector<1x64xf32>
    %c0_77 = arith.constant 0 : index
    %c2_78 = arith.constant 2 : index
    %237 = memref.load %arg12[%c0_77, %c2_78] : memref<3x16xf32, #tpu.memory_space<smem>>
    %238 = vector.broadcast %237 : f32 to vector<1x64xf32>
    %239 = arith.mulf %236, %238 : vector<1x64xf32>
    %240 = arith.addf %225, %239 : vector<1x64xf32>
    %c0_79 = arith.constant 0 : index
    %c3 = arith.constant 3 : index
    %241 = memref.load %arg10[%c0_79, %c3] : memref<3x16xf32, #tpu.memory_space<smem>>
    %242 = vector.broadcast %241 : f32 to vector<1x64xf32>
    %243 = arith.mulf %194, %242 : vector<1x64xf32>
    %c0_80 = arith.constant 0 : index
    %c3_81 = arith.constant 3 : index
    %244 = memref.load %arg11[%c0_80, %c3_81] : memref<3x16xf32, #tpu.memory_space<smem>>
    %245 = vector.broadcast %244 : f32 to vector<1x64xf32>
    %246 = arith.addf %243, %245 : vector<1x64xf32>
    %cst_82 = arith.constant 0.000000e+00 : f32
    %247 = vector.broadcast %cst_82 : f32 to vector<1x64xf32>
    %248 = arith.cmpf oge, %246, %247 : vector<1x64xf32>
    %cst_83 = arith.constant 0.00999999977 : f32
    %249 = vector.broadcast %cst_83 : f32 to vector<1x64xf32>
    %250 = arith.mulf %249, %246 : vector<1x64xf32>
    %251 = arith.select %248, %246, %250 : vector<1x64xi1>, vector<1x64xf32>
    %c0_84 = arith.constant 0 : index
    %c3_85 = arith.constant 3 : index
    %252 = memref.load %arg12[%c0_84, %c3_85] : memref<3x16xf32, #tpu.memory_space<smem>>
    %253 = vector.broadcast %252 : f32 to vector<1x64xf32>
    %254 = arith.mulf %251, %253 : vector<1x64xf32>
    %255 = arith.addf %240, %254 : vector<1x64xf32>
    %c0_86 = arith.constant 0 : index
    %c4 = arith.constant 4 : index
    %256 = memref.load %arg10[%c0_86, %c4] : memref<3x16xf32, #tpu.memory_space<smem>>
    %257 = vector.broadcast %256 : f32 to vector<1x64xf32>
    %258 = arith.mulf %194, %257 : vector<1x64xf32>
    %c0_87 = arith.constant 0 : index
    %c4_88 = arith.constant 4 : index
    %259 = memref.load %arg11[%c0_87, %c4_88] : memref<3x16xf32, #tpu.memory_space<smem>>
    %260 = vector.broadcast %259 : f32 to vector<1x64xf32>
    %261 = arith.addf %258, %260 : vector<1x64xf32>
    %cst_89 = arith.constant 0.000000e+00 : f32
    %262 = vector.broadcast %cst_89 : f32 to vector<1x64xf32>
    %263 = arith.cmpf oge, %261, %262 : vector<1x64xf32>
    %cst_90 = arith.constant 0.00999999977 : f32
    %264 = vector.broadcast %cst_90 : f32 to vector<1x64xf32>
    %265 = arith.mulf %264, %261 : vector<1x64xf32>
    %266 = arith.select %263, %261, %265 : vector<1x64xi1>, vector<1x64xf32>
    %c0_91 = arith.constant 0 : index
    %c4_92 = arith.constant 4 : index
    %267 = memref.load %arg12[%c0_91, %c4_92] : memref<3x16xf32, #tpu.memory_space<smem>>
    %268 = vector.broadcast %267 : f32 to vector<1x64xf32>
    %269 = arith.mulf %266, %268 : vector<1x64xf32>
    %270 = arith.addf %255, %269 : vector<1x64xf32>
    %c0_93 = arith.constant 0 : index
    %c5 = arith.constant 5 : index
    %271 = memref.load %arg10[%c0_93, %c5] : memref<3x16xf32, #tpu.memory_space<smem>>
    %272 = vector.broadcast %271 : f32 to vector<1x64xf32>
    %273 = arith.mulf %194, %272 : vector<1x64xf32>
    %c0_94 = arith.constant 0 : index
    %c5_95 = arith.constant 5 : index
    %274 = memref.load %arg11[%c0_94, %c5_95] : memref<3x16xf32, #tpu.memory_space<smem>>
    %275 = vector.broadcast %274 : f32 to vector<1x64xf32>
    %276 = arith.addf %273, %275 : vector<1x64xf32>
    %cst_96 = arith.constant 0.000000e+00 : f32
    %277 = vector.broadcast %cst_96 : f32 to vector<1x64xf32>
    %278 = arith.cmpf oge, %276, %277 : vector<1x64xf32>
    %cst_97 = arith.constant 0.00999999977 : f32
    %279 = vector.broadcast %cst_97 : f32 to vector<1x64xf32>
    %280 = arith.mulf %279, %276 : vector<1x64xf32>
    %281 = arith.select %278, %276, %280 : vector<1x64xi1>, vector<1x64xf32>
    %c0_98 = arith.constant 0 : index
    %c5_99 = arith.constant 5 : index
    %282 = memref.load %arg12[%c0_98, %c5_99] : memref<3x16xf32, #tpu.memory_space<smem>>
    %283 = vector.broadcast %282 : f32 to vector<1x64xf32>
    %284 = arith.mulf %281, %283 : vector<1x64xf32>
    %285 = arith.addf %270, %284 : vector<1x64xf32>
    %c0_100 = arith.constant 0 : index
    %c6 = arith.constant 6 : index
    %286 = memref.load %arg10[%c0_100, %c6] : memref<3x16xf32, #tpu.memory_space<smem>>
    %287 = vector.broadcast %286 : f32 to vector<1x64xf32>
    %288 = arith.mulf %194, %287 : vector<1x64xf32>
    %c0_101 = arith.constant 0 : index
    %c6_102 = arith.constant 6 : index
    %289 = memref.load %arg11[%c0_101, %c6_102] : memref<3x16xf32, #tpu.memory_space<smem>>
    %290 = vector.broadcast %289 : f32 to vector<1x64xf32>
    %291 = arith.addf %288, %290 : vector<1x64xf32>
    %cst_103 = arith.constant 0.000000e+00 : f32
    %292 = vector.broadcast %cst_103 : f32 to vector<1x64xf32>
    %293 = arith.cmpf oge, %291, %292 : vector<1x64xf32>
    %cst_104 = arith.constant 0.00999999977 : f32
    %294 = vector.broadcast %cst_104 : f32 to vector<1x64xf32>
    %295 = arith.mulf %294, %291 : vector<1x64xf32>
    %296 = arith.select %293, %291, %295 : vector<1x64xi1>, vector<1x64xf32>
    %c0_105 = arith.constant 0 : index
    %c6_106 = arith.constant 6 : index
    %297 = memref.load %arg12[%c0_105, %c6_106] : memref<3x16xf32, #tpu.memory_space<smem>>
    %298 = vector.broadcast %297 : f32 to vector<1x64xf32>
    %299 = arith.mulf %296, %298 : vector<1x64xf32>
    %300 = arith.addf %285, %299 : vector<1x64xf32>
    %c0_107 = arith.constant 0 : index
    %c7 = arith.constant 7 : index
    %301 = memref.load %arg10[%c0_107, %c7] : memref<3x16xf32, #tpu.memory_space<smem>>
    %302 = vector.broadcast %301 : f32 to vector<1x64xf32>
    %303 = arith.mulf %194, %302 : vector<1x64xf32>
    %c0_108 = arith.constant 0 : index
    %c7_109 = arith.constant 7 : index
    %304 = memref.load %arg11[%c0_108, %c7_109] : memref<3x16xf32, #tpu.memory_space<smem>>
    %305 = vector.broadcast %304 : f32 to vector<1x64xf32>
    %306 = arith.addf %303, %305 : vector<1x64xf32>
    %cst_110 = arith.constant 0.000000e+00 : f32
    %307 = vector.broadcast %cst_110 : f32 to vector<1x64xf32>
    %308 = arith.cmpf oge, %306, %307 : vector<1x64xf32>
    %cst_111 = arith.constant 0.00999999977 : f32
    %309 = vector.broadcast %cst_111 : f32 to vector<1x64xf32>
    %310 = arith.mulf %309, %306 : vector<1x64xf32>
    %311 = arith.select %308, %306, %310 : vector<1x64xi1>, vector<1x64xf32>
    %c0_112 = arith.constant 0 : index
    %c7_113 = arith.constant 7 : index
    %312 = memref.load %arg12[%c0_112, %c7_113] : memref<3x16xf32, #tpu.memory_space<smem>>
    %313 = vector.broadcast %312 : f32 to vector<1x64xf32>
    %314 = arith.mulf %311, %313 : vector<1x64xf32>
    %315 = arith.addf %300, %314 : vector<1x64xf32>
    %c0_114 = arith.constant 0 : index
    %c8 = arith.constant 8 : index
    %316 = memref.load %arg10[%c0_114, %c8] : memref<3x16xf32, #tpu.memory_space<smem>>
    %317 = vector.broadcast %316 : f32 to vector<1x64xf32>
    %318 = arith.mulf %194, %317 : vector<1x64xf32>
    %c0_115 = arith.constant 0 : index
    %c8_116 = arith.constant 8 : index
    %319 = memref.load %arg11[%c0_115, %c8_116] : memref<3x16xf32, #tpu.memory_space<smem>>
    %320 = vector.broadcast %319 : f32 to vector<1x64xf32>
    %321 = arith.addf %318, %320 : vector<1x64xf32>
    %cst_117 = arith.constant 0.000000e+00 : f32
    %322 = vector.broadcast %cst_117 : f32 to vector<1x64xf32>
    %323 = arith.cmpf oge, %321, %322 : vector<1x64xf32>
    %cst_118 = arith.constant 0.00999999977 : f32
    %324 = vector.broadcast %cst_118 : f32 to vector<1x64xf32>
    %325 = arith.mulf %324, %321 : vector<1x64xf32>
    %326 = arith.select %323, %321, %325 : vector<1x64xi1>, vector<1x64xf32>
    %c0_119 = arith.constant 0 : index
    %c8_120 = arith.constant 8 : index
    %327 = memref.load %arg12[%c0_119, %c8_120] : memref<3x16xf32, #tpu.memory_space<smem>>
    %328 = vector.broadcast %327 : f32 to vector<1x64xf32>
    %329 = arith.mulf %326, %328 : vector<1x64xf32>
    %330 = arith.addf %315, %329 : vector<1x64xf32>
    %c0_121 = arith.constant 0 : index
    %c9 = arith.constant 9 : index
    %331 = memref.load %arg10[%c0_121, %c9] : memref<3x16xf32, #tpu.memory_space<smem>>
    %332 = vector.broadcast %331 : f32 to vector<1x64xf32>
    %333 = arith.mulf %194, %332 : vector<1x64xf32>
    %c0_122 = arith.constant 0 : index
    %c9_123 = arith.constant 9 : index
    %334 = memref.load %arg11[%c0_122, %c9_123] : memref<3x16xf32, #tpu.memory_space<smem>>
    %335 = vector.broadcast %334 : f32 to vector<1x64xf32>
    %336 = arith.addf %333, %335 : vector<1x64xf32>
    %cst_124 = arith.constant 0.000000e+00 : f32
    %337 = vector.broadcast %cst_124 : f32 to vector<1x64xf32>
    %338 = arith.cmpf oge, %336, %337 : vector<1x64xf32>
    %cst_125 = arith.constant 0.00999999977 : f32
    %339 = vector.broadcast %cst_125 : f32 to vector<1x64xf32>
    %340 = arith.mulf %339, %336 : vector<1x64xf32>
    %341 = arith.select %338, %336, %340 : vector<1x64xi1>, vector<1x64xf32>
    %c0_126 = arith.constant 0 : index
    %c9_127 = arith.constant 9 : index
    %342 = memref.load %arg12[%c0_126, %c9_127] : memref<3x16xf32, #tpu.memory_space<smem>>
    %343 = vector.broadcast %342 : f32 to vector<1x64xf32>
    %344 = arith.mulf %341, %343 : vector<1x64xf32>
    %345 = arith.addf %330, %344 : vector<1x64xf32>
    %c0_128 = arith.constant 0 : index
    %c10 = arith.constant 10 : index
    %346 = memref.load %arg10[%c0_128, %c10] : memref<3x16xf32, #tpu.memory_space<smem>>
    %347 = vector.broadcast %346 : f32 to vector<1x64xf32>
    %348 = arith.mulf %194, %347 : vector<1x64xf32>
    %c0_129 = arith.constant 0 : index
    %c10_130 = arith.constant 10 : index
    %349 = memref.load %arg11[%c0_129, %c10_130] : memref<3x16xf32, #tpu.memory_space<smem>>
    %350 = vector.broadcast %349 : f32 to vector<1x64xf32>
    %351 = arith.addf %348, %350 : vector<1x64xf32>
    %cst_131 = arith.constant 0.000000e+00 : f32
    %352 = vector.broadcast %cst_131 : f32 to vector<1x64xf32>
    %353 = arith.cmpf oge, %351, %352 : vector<1x64xf32>
    %cst_132 = arith.constant 0.00999999977 : f32
    %354 = vector.broadcast %cst_132 : f32 to vector<1x64xf32>
    %355 = arith.mulf %354, %351 : vector<1x64xf32>
    %356 = arith.select %353, %351, %355 : vector<1x64xi1>, vector<1x64xf32>
    %c0_133 = arith.constant 0 : index
    %c10_134 = arith.constant 10 : index
    %357 = memref.load %arg12[%c0_133, %c10_134] : memref<3x16xf32, #tpu.memory_space<smem>>
    %358 = vector.broadcast %357 : f32 to vector<1x64xf32>
    %359 = arith.mulf %356, %358 : vector<1x64xf32>
    %360 = arith.addf %345, %359 : vector<1x64xf32>
    %c0_135 = arith.constant 0 : index
    %c11 = arith.constant 11 : index
    %361 = memref.load %arg10[%c0_135, %c11] : memref<3x16xf32, #tpu.memory_space<smem>>
    %362 = vector.broadcast %361 : f32 to vector<1x64xf32>
    %363 = arith.mulf %194, %362 : vector<1x64xf32>
    %c0_136 = arith.constant 0 : index
    %c11_137 = arith.constant 11 : index
    %364 = memref.load %arg11[%c0_136, %c11_137] : memref<3x16xf32, #tpu.memory_space<smem>>
    %365 = vector.broadcast %364 : f32 to vector<1x64xf32>
    %366 = arith.addf %363, %365 : vector<1x64xf32>
    %cst_138 = arith.constant 0.000000e+00 : f32
    %367 = vector.broadcast %cst_138 : f32 to vector<1x64xf32>
    %368 = arith.cmpf oge, %366, %367 : vector<1x64xf32>
    %cst_139 = arith.constant 0.00999999977 : f32
    %369 = vector.broadcast %cst_139 : f32 to vector<1x64xf32>
    %370 = arith.mulf %369, %366 : vector<1x64xf32>
    %371 = arith.select %368, %366, %370 : vector<1x64xi1>, vector<1x64xf32>
    %c0_140 = arith.constant 0 : index
    %c11_141 = arith.constant 11 : index
    %372 = memref.load %arg12[%c0_140, %c11_141] : memref<3x16xf32, #tpu.memory_space<smem>>
    %373 = vector.broadcast %372 : f32 to vector<1x64xf32>
    %374 = arith.mulf %371, %373 : vector<1x64xf32>
    %375 = arith.addf %360, %374 : vector<1x64xf32>
    %c0_142 = arith.constant 0 : index
    %c12 = arith.constant 12 : index
    %376 = memref.load %arg10[%c0_142, %c12] : memref<3x16xf32, #tpu.memory_space<smem>>
    %377 = vector.broadcast %376 : f32 to vector<1x64xf32>
    %378 = arith.mulf %194, %377 : vector<1x64xf32>
    %c0_143 = arith.constant 0 : index
    %c12_144 = arith.constant 12 : index
    %379 = memref.load %arg11[%c0_143, %c12_144] : memref<3x16xf32, #tpu.memory_space<smem>>
    %380 = vector.broadcast %379 : f32 to vector<1x64xf32>
    %381 = arith.addf %378, %380 : vector<1x64xf32>
    %cst_145 = arith.constant 0.000000e+00 : f32
    %382 = vector.broadcast %cst_145 : f32 to vector<1x64xf32>
    %383 = arith.cmpf oge, %381, %382 : vector<1x64xf32>
    %cst_146 = arith.constant 0.00999999977 : f32
    %384 = vector.broadcast %cst_146 : f32 to vector<1x64xf32>
    %385 = arith.mulf %384, %381 : vector<1x64xf32>
    %386 = arith.select %383, %381, %385 : vector<1x64xi1>, vector<1x64xf32>
    %c0_147 = arith.constant 0 : index
    %c12_148 = arith.constant 12 : index
    %387 = memref.load %arg12[%c0_147, %c12_148] : memref<3x16xf32, #tpu.memory_space<smem>>
    %388 = vector.broadcast %387 : f32 to vector<1x64xf32>
    %389 = arith.mulf %386, %388 : vector<1x64xf32>
    %390 = arith.addf %375, %389 : vector<1x64xf32>
    %c0_149 = arith.constant 0 : index
    %c13 = arith.constant 13 : index
    %391 = memref.load %arg10[%c0_149, %c13] : memref<3x16xf32, #tpu.memory_space<smem>>
    %392 = vector.broadcast %391 : f32 to vector<1x64xf32>
    %393 = arith.mulf %194, %392 : vector<1x64xf32>
    %c0_150 = arith.constant 0 : index
    %c13_151 = arith.constant 13 : index
    %394 = memref.load %arg11[%c0_150, %c13_151] : memref<3x16xf32, #tpu.memory_space<smem>>
    %395 = vector.broadcast %394 : f32 to vector<1x64xf32>
    %396 = arith.addf %393, %395 : vector<1x64xf32>
    %cst_152 = arith.constant 0.000000e+00 : f32
    %397 = vector.broadcast %cst_152 : f32 to vector<1x64xf32>
    %398 = arith.cmpf oge, %396, %397 : vector<1x64xf32>
    %cst_153 = arith.constant 0.00999999977 : f32
    %399 = vector.broadcast %cst_153 : f32 to vector<1x64xf32>
    %400 = arith.mulf %399, %396 : vector<1x64xf32>
    %401 = arith.select %398, %396, %400 : vector<1x64xi1>, vector<1x64xf32>
    %c0_154 = arith.constant 0 : index
    %c13_155 = arith.constant 13 : index
    %402 = memref.load %arg12[%c0_154, %c13_155] : memref<3x16xf32, #tpu.memory_space<smem>>
    %403 = vector.broadcast %402 : f32 to vector<1x64xf32>
    %404 = arith.mulf %401, %403 : vector<1x64xf32>
    %405 = arith.addf %390, %404 : vector<1x64xf32>
    %c0_156 = arith.constant 0 : index
    %c14 = arith.constant 14 : index
    %406 = memref.load %arg10[%c0_156, %c14] : memref<3x16xf32, #tpu.memory_space<smem>>
    %407 = vector.broadcast %406 : f32 to vector<1x64xf32>
    %408 = arith.mulf %194, %407 : vector<1x64xf32>
    %c0_157 = arith.constant 0 : index
    %c14_158 = arith.constant 14 : index
    %409 = memref.load %arg11[%c0_157, %c14_158] : memref<3x16xf32, #tpu.memory_space<smem>>
    %410 = vector.broadcast %409 : f32 to vector<1x64xf32>
    %411 = arith.addf %408, %410 : vector<1x64xf32>
    %cst_159 = arith.constant 0.000000e+00 : f32
    %412 = vector.broadcast %cst_159 : f32 to vector<1x64xf32>
    %413 = arith.cmpf oge, %411, %412 : vector<1x64xf32>
    %cst_160 = arith.constant 0.00999999977 : f32
    %414 = vector.broadcast %cst_160 : f32 to vector<1x64xf32>
    %415 = arith.mulf %414, %411 : vector<1x64xf32>
    %416 = arith.select %413, %411, %415 : vector<1x64xi1>, vector<1x64xf32>
    %c0_161 = arith.constant 0 : index
    %c14_162 = arith.constant 14 : index
    %417 = memref.load %arg12[%c0_161, %c14_162] : memref<3x16xf32, #tpu.memory_space<smem>>
    %418 = vector.broadcast %417 : f32 to vector<1x64xf32>
    %419 = arith.mulf %416, %418 : vector<1x64xf32>
    %420 = arith.addf %405, %419 : vector<1x64xf32>
    %c0_163 = arith.constant 0 : index
    %c15 = arith.constant 15 : index
    %421 = memref.load %arg10[%c0_163, %c15] : memref<3x16xf32, #tpu.memory_space<smem>>
    %422 = vector.broadcast %421 : f32 to vector<1x64xf32>
    %423 = arith.mulf %194, %422 : vector<1x64xf32>
    %c0_164 = arith.constant 0 : index
    %c15_165 = arith.constant 15 : index
    %424 = memref.load %arg11[%c0_164, %c15_165] : memref<3x16xf32, #tpu.memory_space<smem>>
    %425 = vector.broadcast %424 : f32 to vector<1x64xf32>
    %426 = arith.addf %423, %425 : vector<1x64xf32>
    %cst_166 = arith.constant 0.000000e+00 : f32
    %427 = vector.broadcast %cst_166 : f32 to vector<1x64xf32>
    %428 = arith.cmpf oge, %426, %427 : vector<1x64xf32>
    %cst_167 = arith.constant 0.00999999977 : f32
    %429 = vector.broadcast %cst_167 : f32 to vector<1x64xf32>
    %430 = arith.mulf %429, %426 : vector<1x64xf32>
    %431 = arith.select %428, %426, %430 : vector<1x64xi1>, vector<1x64xf32>
    %c0_168 = arith.constant 0 : index
    %c15_169 = arith.constant 15 : index
    %432 = memref.load %arg12[%c0_168, %c15_169] : memref<3x16xf32, #tpu.memory_space<smem>>
    %433 = vector.broadcast %432 : f32 to vector<1x64xf32>
    %434 = arith.mulf %431, %433 : vector<1x64xf32>
    %435 = arith.addf %420, %434 : vector<1x64xf32>
    %c0_170 = arith.constant 0 : index
    %c0_171 = arith.constant 0 : index
    %436 = memref.load %arg13[%c0_170, %c0_171] : memref<3x1xf32, #tpu.memory_space<smem>>
    %437 = vector.broadcast %436 : f32 to vector<1x64xf32>
    %438 = arith.addf %435, %437 : vector<1x64xf32>
    %c0_172 = arith.constant 0 : index
    %c0_173 = arith.constant 0 : index
    %c0_174 = arith.constant 0 : index
    %439 = vector.load %arg16[%c0_172, %c0_173, %c0_174] : memref<1x3x64xf32, #tpu.memory_space<vmem>>, vector<1x3x64xf32>
    %440 = vector.shape_cast %438 : vector<1x64xf32> to vector<1x1x64xf32>
    %441 = vector.broadcast %440 : vector<1x1x64xf32> to vector<1x3x64xf32>
    %442 = arith.mulf %439, %441 : vector<1x3x64xf32>
    %c0_175 = arith.constant 0 : index
    %c0_176 = arith.constant 0 : index
    %c0_177 = arith.constant 0 : index
    %443 = vector.load %arg19[%c0_175, %c0_176, %c0_177] : memref<1x3x64xf32, #tpu.memory_space<vmem>>, vector<1x3x64xf32>
    tpu.vector_store %arg19[%c0_175, %c0_176, %c0_177], %442 {strides = array<i32>} : memref<1x3x64xf32, #tpu.memory_space<vmem>>, vector<1x3x64xf32>,
    %c0_178 = arith.constant 0 : index
    %c0_179 = arith.constant 0 : index
    %444 = vector.load %arg14[%c0_178, %c0_179] : memref<64x256xf32, #tpu.memory_space<vmem>>, vector<64x256xf32>
    %cst_180 = arith.constant dense<0.000000e+00> : vector<1x256xf32>
    %445 = tpu.matmul %438, %444, %cst_180 {dimension_numbers = #tpu.dot_dimension_numbers<[1], [0], [0], [1], [0, 0, 1, 1], [], []>} : vector<1x64xf32>, vector<64x256xf32>, vector<1x256xf32> -> vector<1x256xf32>
    %cst_181 = arith.constant 0.000000e+00 : f32
    %446 = vector.broadcast %cst_181 : f32 to vector<1x256xf32>
    %c1_182 = arith.constant 1 : index
    %c0_183 = arith.constant 0 : index
    %447 = memref.load %arg10[%c1_182, %c0_183] : memref<3x16xf32, #tpu.memory_space<smem>>
    %448 = vector.broadcast %447 : f32 to vector<1x256xf32>
    %449 = arith.mulf %445, %448 : vector<1x256xf32>
    %c1_184 = arith.constant 1 : index
    %c0_185 = arith.constant 0 : index
    %450 = memref.load %arg11[%c1_184, %c0_185] : memref<3x16xf32, #tpu.memory_space<smem>>
    %451 = vector.broadcast %450 : f32 to vector<1x256xf32>
    %452 = arith.addf %449, %451 : vector<1x256xf32>
    %cst_186 = arith.constant 0.000000e+00 : f32
    %453 = vector.broadcast %cst_186 : f32 to vector<1x256xf32>
    %454 = arith.cmpf oge, %452, %453 : vector<1x256xf32>
    %cst_187 = arith.constant 0.00999999977 : f32
    %455 = vector.broadcast %cst_187 : f32 to vector<1x256xf32>
    %456 = arith.mulf %455, %452 : vector<1x256xf32>
    %457 = arith.select %454, %452, %456 : vector<1x256xi1>, vector<1x256xf32>
    %c1_188 = arith.constant 1 : index
    %c0_189 = arith.constant 0 : index
    %458 = memref.load %arg12[%c1_188, %c0_189] : memref<3x16xf32, #tpu.memory_space<smem>>
    %459 = vector.broadcast %458 : f32 to vector<1x256xf32>
    %460 = arith.mulf %457, %459 : vector<1x256xf32>
    %461 = arith.addf %446, %460 : vector<1x256xf32>
    %c1_190 = arith.constant 1 : index
    %c1_191 = arith.constant 1 : index
    %462 = memref.load %arg10[%c1_190, %c1_191] : memref<3x16xf32, #tpu.memory_space<smem>>
    %463 = vector.broadcast %462 : f32 to vector<1x256xf32>
    %464 = arith.mulf %445, %463 : vector<1x256xf32>
    %c1_192 = arith.constant 1 : index
    %c1_193 = arith.constant 1 : index
    %465 = memref.load %arg11[%c1_192, %c1_193] : memref<3x16xf32, #tpu.memory_space<smem>>
    %466 = vector.broadcast %465 : f32 to vector<1x256xf32>
    %467 = arith.addf %464, %466 : vector<1x256xf32>
    %cst_194 = arith.constant 0.000000e+00 : f32
    %468 = vector.broadcast %cst_194 : f32 to vector<1x256xf32>
    %469 = arith.cmpf oge, %467, %468 : vector<1x256xf32>
    %cst_195 = arith.constant 0.00999999977 : f32
    %470 = vector.broadcast %cst_195 : f32 to vector<1x256xf32>
    %471 = arith.mulf %470, %467 : vector<1x256xf32>
    %472 = arith.select %469, %467, %471 : vector<1x256xi1>, vector<1x256xf32>
    %c1_196 = arith.constant 1 : index
    %c1_197 = arith.constant 1 : index
    %473 = memref.load %arg12[%c1_196, %c1_197] : memref<3x16xf32, #tpu.memory_space<smem>>
    %474 = vector.broadcast %473 : f32 to vector<1x256xf32>
    %475 = arith.mulf %472, %474 : vector<1x256xf32>
    %476 = arith.addf %461, %475 : vector<1x256xf32>
    %c1_198 = arith.constant 1 : index
    %c2_199 = arith.constant 2 : index
    %477 = memref.load %arg10[%c1_198, %c2_199] : memref<3x16xf32, #tpu.memory_space<smem>>
    %478 = vector.broadcast %477 : f32 to vector<1x256xf32>
    %479 = arith.mulf %445, %478 : vector<1x256xf32>
    %c1_200 = arith.constant 1 : index
    %c2_201 = arith.constant 2 : index
    %480 = memref.load %arg11[%c1_200, %c2_201] : memref<3x16xf32, #tpu.memory_space<smem>>
    %481 = vector.broadcast %480 : f32 to vector<1x256xf32>
    %482 = arith.addf %479, %481 : vector<1x256xf32>
    %cst_202 = arith.constant 0.000000e+00 : f32
    %483 = vector.broadcast %cst_202 : f32 to vector<1x256xf32>
    %484 = arith.cmpf oge, %482, %483 : vector<1x256xf32>
    %cst_203 = arith.constant 0.00999999977 : f32
    %485 = vector.broadcast %cst_203 : f32 to vector<1x256xf32>
    %486 = arith.mulf %485, %482 : vector<1x256xf32>
    %487 = arith.select %484, %482, %486 : vector<1x256xi1>, vector<1x256xf32>
    %c1_204 = arith.constant 1 : index
    %c2_205 = arith.constant 2 : index
    %488 = memref.load %arg12[%c1_204, %c2_205] : memref<3x16xf32, #tpu.memory_space<smem>>
    %489 = vector.broadcast %488 : f32 to vector<1x256xf32>
    %490 = arith.mulf %487, %489 : vector<1x256xf32>
    %491 = arith.addf %476, %490 : vector<1x256xf32>
    %c1_206 = arith.constant 1 : index
    %c3_207 = arith.constant 3 : index
    %492 = memref.load %arg10[%c1_206, %c3_207] : memref<3x16xf32, #tpu.memory_space<smem>>
    %493 = vector.broadcast %492 : f32 to vector<1x256xf32>
    %494 = arith.mulf %445, %493 : vector<1x256xf32>
    %c1_208 = arith.constant 1 : index
    %c3_209 = arith.constant 3 : index
    %495 = memref.load %arg11[%c1_208, %c3_209] : memref<3x16xf32, #tpu.memory_space<smem>>
    %496 = vector.broadcast %495 : f32 to vector<1x256xf32>
    %497 = arith.addf %494, %496 : vector<1x256xf32>
    %cst_210 = arith.constant 0.000000e+00 : f32
    %498 = vector.broadcast %cst_210 : f32 to vector<1x256xf32>
    %499 = arith.cmpf oge, %497, %498 : vector<1x256xf32>
    %cst_211 = arith.constant 0.00999999977 : f32
    %500 = vector.broadcast %cst_211 : f32 to vector<1x256xf32>
    %501 = arith.mulf %500, %497 : vector<1x256xf32>
    %502 = arith.select %499, %497, %501 : vector<1x256xi1>, vector<1x256xf32>
    %c1_212 = arith.constant 1 : index
    %c3_213 = arith.constant 3 : index
    %503 = memref.load %arg12[%c1_212, %c3_213] : memref<3x16xf32, #tpu.memory_space<smem>>
    %504 = vector.broadcast %503 : f32 to vector<1x256xf32>
    %505 = arith.mulf %502, %504 : vector<1x256xf32>
    %506 = arith.addf %491, %505 : vector<1x256xf32>
    %c1_214 = arith.constant 1 : index
    %c4_215 = arith.constant 4 : index
    %507 = memref.load %arg10[%c1_214, %c4_215] : memref<3x16xf32, #tpu.memory_space<smem>>
    %508 = vector.broadcast %507 : f32 to vector<1x256xf32>
    %509 = arith.mulf %445, %508 : vector<1x256xf32>
    %c1_216 = arith.constant 1 : index
    %c4_217 = arith.constant 4 : index
    %510 = memref.load %arg11[%c1_216, %c4_217] : memref<3x16xf32, #tpu.memory_space<smem>>
    %511 = vector.broadcast %510 : f32 to vector<1x256xf32>
    %512 = arith.addf %509, %511 : vector<1x256xf32>
    %cst_218 = arith.constant 0.000000e+00 : f32
    %513 = vector.broadcast %cst_218 : f32 to vector<1x256xf32>
    %514 = arith.cmpf oge, %512, %513 : vector<1x256xf32>
    %cst_219 = arith.constant 0.00999999977 : f32
    %515 = vector.broadcast %cst_219 : f32 to vector<1x256xf32>
    %516 = arith.mulf %515, %512 : vector<1x256xf32>
    %517 = arith.select %514, %512, %516 : vector<1x256xi1>, vector<1x256xf32>
    %c1_220 = arith.constant 1 : index
    %c4_221 = arith.constant 4 : index
    %518 = memref.load %arg12[%c1_220, %c4_221] : memref<3x16xf32, #tpu.memory_space<smem>>
    %519 = vector.broadcast %518 : f32 to vector<1x256xf32>
    %520 = arith.mulf %517, %519 : vector<1x256xf32>
    %521 = arith.addf %506, %520 : vector<1x256xf32>
    %c1_222 = arith.constant 1 : index
    %c5_223 = arith.constant 5 : index
    %522 = memref.load %arg10[%c1_222, %c5_223] : memref<3x16xf32, #tpu.memory_space<smem>>
    %523 = vector.broadcast %522 : f32 to vector<1x256xf32>
    %524 = arith.mulf %445, %523 : vector<1x256xf32>
    %c1_224 = arith.constant 1 : index
    %c5_225 = arith.constant 5 : index
    %525 = memref.load %arg11[%c1_224, %c5_225] : memref<3x16xf32, #tpu.memory_space<smem>>
    %526 = vector.broadcast %525 : f32 to vector<1x256xf32>
    %527 = arith.addf %524, %526 : vector<1x256xf32>
    %cst_226 = arith.constant 0.000000e+00 : f32
    %528 = vector.broadcast %cst_226 : f32 to vector<1x256xf32>
    %529 = arith.cmpf oge, %527, %528 : vector<1x256xf32>
    %cst_227 = arith.constant 0.00999999977 : f32
    %530 = vector.broadcast %cst_227 : f32 to vector<1x256xf32>
    %531 = arith.mulf %530, %527 : vector<1x256xf32>
    %532 = arith.select %529, %527, %531 : vector<1x256xi1>, vector<1x256xf32>
    %c1_228 = arith.constant 1 : index
    %c5_229 = arith.constant 5 : index
    %533 = memref.load %arg12[%c1_228, %c5_229] : memref<3x16xf32, #tpu.memory_space<smem>>
    %534 = vector.broadcast %533 : f32 to vector<1x256xf32>
    %535 = arith.mulf %532, %534 : vector<1x256xf32>
    %536 = arith.addf %521, %535 : vector<1x256xf32>
    %c1_230 = arith.constant 1 : index
    %c6_231 = arith.constant 6 : index
    %537 = memref.load %arg10[%c1_230, %c6_231] : memref<3x16xf32, #tpu.memory_space<smem>>
    %538 = vector.broadcast %537 : f32 to vector<1x256xf32>
    %539 = arith.mulf %445, %538 : vector<1x256xf32>
    %c1_232 = arith.constant 1 : index
    %c6_233 = arith.constant 6 : index
    %540 = memref.load %arg11[%c1_232, %c6_233] : memref<3x16xf32, #tpu.memory_space<smem>>
    %541 = vector.broadcast %540 : f32 to vector<1x256xf32>
    %542 = arith.addf %539, %541 : vector<1x256xf32>
    %cst_234 = arith.constant 0.000000e+00 : f32
    %543 = vector.broadcast %cst_234 : f32 to vector<1x256xf32>
    %544 = arith.cmpf oge, %542, %543 : vector<1x256xf32>
    %cst_235 = arith.constant 0.00999999977 : f32
    %545 = vector.broadcast %cst_235 : f32 to vector<1x256xf32>
    %546 = arith.mulf %545, %542 : vector<1x256xf32>
    %547 = arith.select %544, %542, %546 : vector<1x256xi1>, vector<1x256xf32>
    %c1_236 = arith.constant 1 : index
    %c6_237 = arith.constant 6 : index
    %548 = memref.load %arg12[%c1_236, %c6_237] : memref<3x16xf32, #tpu.memory_space<smem>>
    %549 = vector.broadcast %548 : f32 to vector<1x256xf32>
    %550 = arith.mulf %547, %549 : vector<1x256xf32>
    %551 = arith.addf %536, %550 : vector<1x256xf32>
    %c1_238 = arith.constant 1 : index
    %c7_239 = arith.constant 7 : index
    %552 = memref.load %arg10[%c1_238, %c7_239] : memref<3x16xf32, #tpu.memory_space<smem>>
    %553 = vector.broadcast %552 : f32 to vector<1x256xf32>
    %554 = arith.mulf %445, %553 : vector<1x256xf32>
    %c1_240 = arith.constant 1 : index
    %c7_241 = arith.constant 7 : index
    %555 = memref.load %arg11[%c1_240, %c7_241] : memref<3x16xf32, #tpu.memory_space<smem>>
    %556 = vector.broadcast %555 : f32 to vector<1x256xf32>
    %557 = arith.addf %554, %556 : vector<1x256xf32>
    %cst_242 = arith.constant 0.000000e+00 : f32
    %558 = vector.broadcast %cst_242 : f32 to vector<1x256xf32>
    %559 = arith.cmpf oge, %557, %558 : vector<1x256xf32>
    %cst_243 = arith.constant 0.00999999977 : f32
    %560 = vector.broadcast %cst_243 : f32 to vector<1x256xf32>
    %561 = arith.mulf %560, %557 : vector<1x256xf32>
    %562 = arith.select %559, %557, %561 : vector<1x256xi1>, vector<1x256xf32>
    %c1_244 = arith.constant 1 : index
    %c7_245 = arith.constant 7 : index
    %563 = memref.load %arg12[%c1_244, %c7_245] : memref<3x16xf32, #tpu.memory_space<smem>>
    %564 = vector.broadcast %563 : f32 to vector<1x256xf32>
    %565 = arith.mulf %562, %564 : vector<1x256xf32>
    %566 = arith.addf %551, %565 : vector<1x256xf32>
    %c1_246 = arith.constant 1 : index
    %c8_247 = arith.constant 8 : index
    %567 = memref.load %arg10[%c1_246, %c8_247] : memref<3x16xf32, #tpu.memory_space<smem>>
    %568 = vector.broadcast %567 : f32 to vector<1x256xf32>
    %569 = arith.mulf %445, %568 : vector<1x256xf32>
    %c1_248 = arith.constant 1 : index
    %c8_249 = arith.constant 8 : index
    %570 = memref.load %arg11[%c1_248, %c8_249] : memref<3x16xf32, #tpu.memory_space<smem>>
    %571 = vector.broadcast %570 : f32 to vector<1x256xf32>
    %572 = arith.addf %569, %571 : vector<1x256xf32>
    %cst_250 = arith.constant 0.000000e+00 : f32
    %573 = vector.broadcast %cst_250 : f32 to vector<1x256xf32>
    %574 = arith.cmpf oge, %572, %573 : vector<1x256xf32>
    %cst_251 = arith.constant 0.00999999977 : f32
    %575 = vector.broadcast %cst_251 : f32 to vector<1x256xf32>
    %576 = arith.mulf %575, %572 : vector<1x256xf32>
    %577 = arith.select %574, %572, %576 : vector<1x256xi1>, vector<1x256xf32>
    %c1_252 = arith.constant 1 : index
    %c8_253 = arith.constant 8 : index
    %578 = memref.load %arg12[%c1_252, %c8_253] : memref<3x16xf32, #tpu.memory_space<smem>>
    %579 = vector.broadcast %578 : f32 to vector<1x256xf32>
    %580 = arith.mulf %577, %579 : vector<1x256xf32>
    %581 = arith.addf %566, %580 : vector<1x256xf32>
    %c1_254 = arith.constant 1 : index
    %c9_255 = arith.constant 9 : index
    %582 = memref.load %arg10[%c1_254, %c9_255] : memref<3x16xf32, #tpu.memory_space<smem>>
    %583 = vector.broadcast %582 : f32 to vector<1x256xf32>
    %584 = arith.mulf %445, %583 : vector<1x256xf32>
    %c1_256 = arith.constant 1 : index
    %c9_257 = arith.constant 9 : index
    %585 = memref.load %arg11[%c1_256, %c9_257] : memref<3x16xf32, #tpu.memory_space<smem>>
    %586 = vector.broadcast %585 : f32 to vector<1x256xf32>
    %587 = arith.addf %584, %586 : vector<1x256xf32>
    %cst_258 = arith.constant 0.000000e+00 : f32
    %588 = vector.broadcast %cst_258 : f32 to vector<1x256xf32>
    %589 = arith.cmpf oge, %587, %588 : vector<1x256xf32>
    %cst_259 = arith.constant 0.00999999977 : f32
    %590 = vector.broadcast %cst_259 : f32 to vector<1x256xf32>
    %591 = arith.mulf %590, %587 : vector<1x256xf32>
    %592 = arith.select %589, %587, %591 : vector<1x256xi1>, vector<1x256xf32>
    %c1_260 = arith.constant 1 : index
    %c9_261 = arith.constant 9 : index
    %593 = memref.load %arg12[%c1_260, %c9_261] : memref<3x16xf32, #tpu.memory_space<smem>>
    %594 = vector.broadcast %593 : f32 to vector<1x256xf32>
    %595 = arith.mulf %592, %594 : vector<1x256xf32>
    %596 = arith.addf %581, %595 : vector<1x256xf32>
    %c1_262 = arith.constant 1 : index
    %c10_263 = arith.constant 10 : index
    %597 = memref.load %arg10[%c1_262, %c10_263] : memref<3x16xf32, #tpu.memory_space<smem>>
    %598 = vector.broadcast %597 : f32 to vector<1x256xf32>
    %599 = arith.mulf %445, %598 : vector<1x256xf32>
    %c1_264 = arith.constant 1 : index
    %c10_265 = arith.constant 10 : index
    %600 = memref.load %arg11[%c1_264, %c10_265] : memref<3x16xf32, #tpu.memory_space<smem>>
    %601 = vector.broadcast %600 : f32 to vector<1x256xf32>
    %602 = arith.addf %599, %601 : vector<1x256xf32>
    %cst_266 = arith.constant 0.000000e+00 : f32
    %603 = vector.broadcast %cst_266 : f32 to vector<1x256xf32>
    %604 = arith.cmpf oge, %602, %603 : vector<1x256xf32>
    %cst_267 = arith.constant 0.00999999977 : f32
    %605 = vector.broadcast %cst_267 : f32 to vector<1x256xf32>
    %606 = arith.mulf %605, %602 : vector<1x256xf32>
    %607 = arith.select %604, %602, %606 : vector<1x256xi1>, vector<1x256xf32>
    %c1_268 = arith.constant 1 : index
    %c10_269 = arith.constant 10 : index
    %608 = memref.load %arg12[%c1_268, %c10_269] : memref<3x16xf32, #tpu.memory_space<smem>>
    %609 = vector.broadcast %608 : f32 to vector<1x256xf32>
    %610 = arith.mulf %607, %609 : vector<1x256xf32>
    %611 = arith.addf %596, %610 : vector<1x256xf32>
    %c1_270 = arith.constant 1 : index
    %c11_271 = arith.constant 11 : index
    %612 = memref.load %arg10[%c1_270, %c11_271] : memref<3x16xf32, #tpu.memory_space<smem>>
    %613 = vector.broadcast %612 : f32 to vector<1x256xf32>
    %614 = arith.mulf %445, %613 : vector<1x256xf32>
    %c1_272 = arith.constant 1 : index
    %c11_273 = arith.constant 11 : index
    %615 = memref.load %arg11[%c1_272, %c11_273] : memref<3x16xf32, #tpu.memory_space<smem>>
    %616 = vector.broadcast %615 : f32 to vector<1x256xf32>
    %617 = arith.addf %614, %616 : vector<1x256xf32>
    %cst_274 = arith.constant 0.000000e+00 : f32
    %618 = vector.broadcast %cst_274 : f32 to vector<1x256xf32>
    %619 = arith.cmpf oge, %617, %618 : vector<1x256xf32>
    %cst_275 = arith.constant 0.00999999977 : f32
    %620 = vector.broadcast %cst_275 : f32 to vector<1x256xf32>
    %621 = arith.mulf %620, %617 : vector<1x256xf32>
    %622 = arith.select %619, %617, %621 : vector<1x256xi1>, vector<1x256xf32>
    %c1_276 = arith.constant 1 : index
    %c11_277 = arith.constant 11 : index
    %623 = memref.load %arg12[%c1_276, %c11_277] : memref<3x16xf32, #tpu.memory_space<smem>>
    %624 = vector.broadcast %623 : f32 to vector<1x256xf32>
    %625 = arith.mulf %622, %624 : vector<1x256xf32>
    %626 = arith.addf %611, %625 : vector<1x256xf32>
    %c1_278 = arith.constant 1 : index
    %c12_279 = arith.constant 12 : index
    %627 = memref.load %arg10[%c1_278, %c12_279] : memref<3x16xf32, #tpu.memory_space<smem>>
    %628 = vector.broadcast %627 : f32 to vector<1x256xf32>
    %629 = arith.mulf %445, %628 : vector<1x256xf32>
    %c1_280 = arith.constant 1 : index
    %c12_281 = arith.constant 12 : index
    %630 = memref.load %arg11[%c1_280, %c12_281] : memref<3x16xf32, #tpu.memory_space<smem>>
    %631 = vector.broadcast %630 : f32 to vector<1x256xf32>
    %632 = arith.addf %629, %631 : vector<1x256xf32>
    %cst_282 = arith.constant 0.000000e+00 : f32
    %633 = vector.broadcast %cst_282 : f32 to vector<1x256xf32>
    %634 = arith.cmpf oge, %632, %633 : vector<1x256xf32>
    %cst_283 = arith.constant 0.00999999977 : f32
    %635 = vector.broadcast %cst_283 : f32 to vector<1x256xf32>
    %636 = arith.mulf %635, %632 : vector<1x256xf32>
    %637 = arith.select %634, %632, %636 : vector<1x256xi1>, vector<1x256xf32>
    %c1_284 = arith.constant 1 : index
    %c12_285 = arith.constant 12 : index
    %638 = memref.load %arg12[%c1_284, %c12_285] : memref<3x16xf32, #tpu.memory_space<smem>>
    %639 = vector.broadcast %638 : f32 to vector<1x256xf32>
    %640 = arith.mulf %637, %639 : vector<1x256xf32>
    %641 = arith.addf %626, %640 : vector<1x256xf32>
    %c1_286 = arith.constant 1 : index
    %c13_287 = arith.constant 13 : index
    %642 = memref.load %arg10[%c1_286, %c13_287] : memref<3x16xf32, #tpu.memory_space<smem>>
    %643 = vector.broadcast %642 : f32 to vector<1x256xf32>
    %644 = arith.mulf %445, %643 : vector<1x256xf32>
    %c1_288 = arith.constant 1 : index
    %c13_289 = arith.constant 13 : index
    %645 = memref.load %arg11[%c1_288, %c13_289] : memref<3x16xf32, #tpu.memory_space<smem>>
    %646 = vector.broadcast %645 : f32 to vector<1x256xf32>
    %647 = arith.addf %644, %646 : vector<1x256xf32>
    %cst_290 = arith.constant 0.000000e+00 : f32
    %648 = vector.broadcast %cst_290 : f32 to vector<1x256xf32>
    %649 = arith.cmpf oge, %647, %648 : vector<1x256xf32>
    %cst_291 = arith.constant 0.00999999977 : f32
    %650 = vector.broadcast %cst_291 : f32 to vector<1x256xf32>
    %651 = arith.mulf %650, %647 : vector<1x256xf32>
    %652 = arith.select %649, %647, %651 : vector<1x256xi1>, vector<1x256xf32>
    %c1_292 = arith.constant 1 : index
    %c13_293 = arith.constant 13 : index
    %653 = memref.load %arg12[%c1_292, %c13_293] : memref<3x16xf32, #tpu.memory_space<smem>>
    %654 = vector.broadcast %653 : f32 to vector<1x256xf32>
    %655 = arith.mulf %652, %654 : vector<1x256xf32>
    %656 = arith.addf %641, %655 : vector<1x256xf32>
    %c1_294 = arith.constant 1 : index
    %c14_295 = arith.constant 14 : index
    %657 = memref.load %arg10[%c1_294, %c14_295] : memref<3x16xf32, #tpu.memory_space<smem>>
    %658 = vector.broadcast %657 : f32 to vector<1x256xf32>
    %659 = arith.mulf %445, %658 : vector<1x256xf32>
    %c1_296 = arith.constant 1 : index
    %c14_297 = arith.constant 14 : index
    %660 = memref.load %arg11[%c1_296, %c14_297] : memref<3x16xf32, #tpu.memory_space<smem>>
    %661 = vector.broadcast %660 : f32 to vector<1x256xf32>
    %662 = arith.addf %659, %661 : vector<1x256xf32>
    %cst_298 = arith.constant 0.000000e+00 : f32
    %663 = vector.broadcast %cst_298 : f32 to vector<1x256xf32>
    %664 = arith.cmpf oge, %662, %663 : vector<1x256xf32>
    %cst_299 = arith.constant 0.00999999977 : f32
    %665 = vector.broadcast %cst_299 : f32 to vector<1x256xf32>
    %666 = arith.mulf %665, %662 : vector<1x256xf32>
    %667 = arith.select %664, %662, %666 : vector<1x256xi1>, vector<1x256xf32>
    %c1_300 = arith.constant 1 : index
    %c14_301 = arith.constant 14 : index
    %668 = memref.load %arg12[%c1_300, %c14_301] : memref<3x16xf32, #tpu.memory_space<smem>>
    %669 = vector.broadcast %668 : f32 to vector<1x256xf32>
    %670 = arith.mulf %667, %669 : vector<1x256xf32>
    %671 = arith.addf %656, %670 : vector<1x256xf32>
    %c1_302 = arith.constant 1 : index
    %c15_303 = arith.constant 15 : index
    %672 = memref.load %arg10[%c1_302, %c15_303] : memref<3x16xf32, #tpu.memory_space<smem>>
    %673 = vector.broadcast %672 : f32 to vector<1x256xf32>
    %674 = arith.mulf %445, %673 : vector<1x256xf32>
    %c1_304 = arith.constant 1 : index
    %c15_305 = arith.constant 15 : index
    %675 = memref.load %arg11[%c1_304, %c15_305] : memref<3x16xf32, #tpu.memory_space<smem>>
    %676 = vector.broadcast %675 : f32 to vector<1x256xf32>
    %677 = arith.addf %674, %676 : vector<1x256xf32>
    %cst_306 = arith.constant 0.000000e+00 : f32
    %678 = vector.broadcast %cst_306 : f32 to vector<1x256xf32>
    %679 = arith.cmpf oge, %677, %678 : vector<1x256xf32>
    %cst_307 = arith.constant 0.00999999977 : f32
    %680 = vector.broadcast %cst_307 : f32 to vector<1x256xf32>
    %681 = arith.mulf %680, %677 : vector<1x256xf32>
    %682 = arith.select %679, %677, %681 : vector<1x256xi1>, vector<1x256xf32>
    %c1_308 = arith.constant 1 : index
    %c15_309 = arith.constant 15 : index
    %683 = memref.load %arg12[%c1_308, %c15_309] : memref<3x16xf32, #tpu.memory_space<smem>>
    %684 = vector.broadcast %683 : f32 to vector<1x256xf32>
    %685 = arith.mulf %682, %684 : vector<1x256xf32>
    %686 = arith.addf %671, %685 : vector<1x256xf32>
    %c1_310 = arith.constant 1 : index
    %c0_311 = arith.constant 0 : index
    %687 = memref.load %arg13[%c1_310, %c0_311] : memref<3x1xf32, #tpu.memory_space<smem>>
    %688 = vector.broadcast %687 : f32 to vector<1x256xf32>
    %689 = arith.addf %686, %688 : vector<1x256xf32>
    %c0_312 = arith.constant 0 : index
    %c0_313 = arith.constant 0 : index
    %c0_314 = arith.constant 0 : index
    %690 = vector.load %arg17[%c0_312, %c0_313, %c0_314] : memref<1x3x256xf32, #tpu.memory_space<vmem>>, vector<1x3x256xf32>
    %691 = vector.shape_cast %689 : vector<1x256xf32> to vector<1x1x256xf32>
    %692 = vector.broadcast %691 : vector<1x1x256xf32> to vector<1x3x256xf32>
    %693 = arith.mulf %690, %692 : vector<1x3x256xf32>
    %c0_315 = arith.constant 0 : index
    %c0_316 = arith.constant 0 : index
    %c0_317 = arith.constant 0 : index
    %694 = vector.load %arg20[%c0_315, %c0_316, %c0_317] : memref<1x3x256xf32, #tpu.memory_space<vmem>>, vector<1x3x256xf32>
    tpu.vector_store %arg20[%c0_315, %c0_316, %c0_317], %693 {strides = array<i32>} : memref<1x3x256xf32, #tpu.memory_space<vmem>>, vector<1x3x256xf32>,
    %c0_318 = arith.constant 0 : index
    %c0_319 = arith.constant 0 : index
    %695 = vector.load %arg15[%c0_318, %c0_319] : memref<256x1024xf32, #tpu.memory_space<vmem>>, vector<256x1024xf32>
    %cst_320 = arith.constant dense<0.000000e+00> : vector<1x1024xf32>
    %696 = tpu.matmul %689, %695, %cst_320 {dimension_numbers = #tpu.dot_dimension_numbers<[1], [0], [0], [1], [0, 0, 1, 1], [], []>} : vector<1x256xf32>, vector<256x1024xf32>, vector<1x1024xf32> -> vector<1x1024xf32>
    %cst_321 = arith.constant 0.000000e+00 : f32
    %697 = vector.broadcast %cst_321 : f32 to vector<1x1024xf32>
    %c2_322 = arith.constant 2 : index
    %c0_323 = arith.constant 0 : index
    %698 = memref.load %arg10[%c2_322, %c0_323] : memref<3x16xf32, #tpu.memory_space<smem>>
    %699 = vector.broadcast %698 : f32 to vector<1x1024xf32>
    %700 = arith.mulf %696, %699 : vector<1x1024xf32>
    %c2_324 = arith.constant 2 : index
    %c0_325 = arith.constant 0 : index
    %701 = memref.load %arg11[%c2_324, %c0_325] : memref<3x16xf32, #tpu.memory_space<smem>>
    %702 = vector.broadcast %701 : f32 to vector<1x1024xf32>
    %703 = arith.addf %700, %702 : vector<1x1024xf32>
    %cst_326 = arith.constant 0.000000e+00 : f32
    %704 = vector.broadcast %cst_326 : f32 to vector<1x1024xf32>
    %705 = arith.cmpf oge, %703, %704 : vector<1x1024xf32>
    %cst_327 = arith.constant 0.00999999977 : f32
    %706 = vector.broadcast %cst_327 : f32 to vector<1x1024xf32>
    %707 = arith.mulf %706, %703 : vector<1x1024xf32>
    %708 = arith.select %705, %703, %707 : vector<1x1024xi1>, vector<1x1024xf32>
    %c2_328 = arith.constant 2 : index
    %c0_329 = arith.constant 0 : index
    %709 = memref.load %arg12[%c2_328, %c0_329] : memref<3x16xf32, #tpu.memory_space<smem>>
    %710 = vector.broadcast %709 : f32 to vector<1x1024xf32>
    %711 = arith.mulf %708, %710 : vector<1x1024xf32>
    %712 = arith.addf %697, %711 : vector<1x1024xf32>
    %c2_330 = arith.constant 2 : index
    %c1_331 = arith.constant 1 : index
    %713 = memref.load %arg10[%c2_330, %c1_331] : memref<3x16xf32, #tpu.memory_space<smem>>
    %714 = vector.broadcast %713 : f32 to vector<1x1024xf32>
    %715 = arith.mulf %696, %714 : vector<1x1024xf32>
    %c2_332 = arith.constant 2 : index
    %c1_333 = arith.constant 1 : index
    %716 = memref.load %arg11[%c2_332, %c1_333] : memref<3x16xf32, #tpu.memory_space<smem>>
    %717 = vector.broadcast %716 : f32 to vector<1x1024xf32>
    %718 = arith.addf %715, %717 : vector<1x1024xf32>
    %cst_334 = arith.constant 0.000000e+00 : f32
    %719 = vector.broadcast %cst_334 : f32 to vector<1x1024xf32>
    %720 = arith.cmpf oge, %718, %719 : vector<1x1024xf32>
    %cst_335 = arith.constant 0.00999999977 : f32
    %721 = vector.broadcast %cst_335 : f32 to vector<1x1024xf32>
    %722 = arith.mulf %721, %718 : vector<1x1024xf32>
    %723 = arith.select %720, %718, %722 : vector<1x1024xi1>, vector<1x1024xf32>
    %c2_336 = arith.constant 2 : index
    %c1_337 = arith.constant 1 : index
    %724 = memref.load %arg12[%c2_336, %c1_337] : memref<3x16xf32, #tpu.memory_space<smem>>
    %725 = vector.broadcast %724 : f32 to vector<1x1024xf32>
    %726 = arith.mulf %723, %725 : vector<1x1024xf32>
    %727 = arith.addf %712, %726 : vector<1x1024xf32>
    %c2_338 = arith.constant 2 : index
    %c2_339 = arith.constant 2 : index
    %728 = memref.load %arg10[%c2_338, %c2_339] : memref<3x16xf32, #tpu.memory_space<smem>>
    %729 = vector.broadcast %728 : f32 to vector<1x1024xf32>
    %730 = arith.mulf %696, %729 : vector<1x1024xf32>
    %c2_340 = arith.constant 2 : index
    %c2_341 = arith.constant 2 : index
    %731 = memref.load %arg11[%c2_340, %c2_341] : memref<3x16xf32, #tpu.memory_space<smem>>
    %732 = vector.broadcast %731 : f32 to vector<1x1024xf32>
    %733 = arith.addf %730, %732 : vector<1x1024xf32>
    %cst_342 = arith.constant 0.000000e+00 : f32
    %734 = vector.broadcast %cst_342 : f32 to vector<1x1024xf32>
    %735 = arith.cmpf oge, %733, %734 : vector<1x1024xf32>
    %cst_343 = arith.constant 0.00999999977 : f32
    %736 = vector.broadcast %cst_343 : f32 to vector<1x1024xf32>
    %737 = arith.mulf %736, %733 : vector<1x1024xf32>
    %738 = arith.select %735, %733, %737 : vector<1x1024xi1>, vector<1x1024xf32>
    %c2_344 = arith.constant 2 : index
    %c2_345 = arith.constant 2 : index
    %739 = memref.load %arg12[%c2_344, %c2_345] : memref<3x16xf32, #tpu.memory_space<smem>>
    %740 = vector.broadcast %739 : f32 to vector<1x1024xf32>
    %741 = arith.mulf %738, %740 : vector<1x1024xf32>
    %742 = arith.addf %727, %741 : vector<1x1024xf32>
    %c2_346 = arith.constant 2 : index
    %c3_347 = arith.constant 3 : index
    %743 = memref.load %arg10[%c2_346, %c3_347] : memref<3x16xf32, #tpu.memory_space<smem>>
    %744 = vector.broadcast %743 : f32 to vector<1x1024xf32>
    %745 = arith.mulf %696, %744 : vector<1x1024xf32>
    %c2_348 = arith.constant 2 : index
    %c3_349 = arith.constant 3 : index
    %746 = memref.load %arg11[%c2_348, %c3_349] : memref<3x16xf32, #tpu.memory_space<smem>>
    %747 = vector.broadcast %746 : f32 to vector<1x1024xf32>
    %748 = arith.addf %745, %747 : vector<1x1024xf32>
    %cst_350 = arith.constant 0.000000e+00 : f32
    %749 = vector.broadcast %cst_350 : f32 to vector<1x1024xf32>
    %750 = arith.cmpf oge, %748, %749 : vector<1x1024xf32>
    %cst_351 = arith.constant 0.00999999977 : f32
    %751 = vector.broadcast %cst_351 : f32 to vector<1x1024xf32>
    %752 = arith.mulf %751, %748 : vector<1x1024xf32>
    %753 = arith.select %750, %748, %752 : vector<1x1024xi1>, vector<1x1024xf32>
    %c2_352 = arith.constant 2 : index
    %c3_353 = arith.constant 3 : index
    %754 = memref.load %arg12[%c2_352, %c3_353] : memref<3x16xf32, #tpu.memory_space<smem>>
    %755 = vector.broadcast %754 : f32 to vector<1x1024xf32>
    %756 = arith.mulf %753, %755 : vector<1x1024xf32>
    %757 = arith.addf %742, %756 : vector<1x1024xf32>
    %c2_354 = arith.constant 2 : index
    %c4_355 = arith.constant 4 : index
    %758 = memref.load %arg10[%c2_354, %c4_355] : memref<3x16xf32, #tpu.memory_space<smem>>
    %759 = vector.broadcast %758 : f32 to vector<1x1024xf32>
    %760 = arith.mulf %696, %759 : vector<1x1024xf32>
    %c2_356 = arith.constant 2 : index
    %c4_357 = arith.constant 4 : index
    %761 = memref.load %arg11[%c2_356, %c4_357] : memref<3x16xf32, #tpu.memory_space<smem>>
    %762 = vector.broadcast %761 : f32 to vector<1x1024xf32>
    %763 = arith.addf %760, %762 : vector<1x1024xf32>
    %cst_358 = arith.constant 0.000000e+00 : f32
    %764 = vector.broadcast %cst_358 : f32 to vector<1x1024xf32>
    %765 = arith.cmpf oge, %763, %764 : vector<1x1024xf32>
    %cst_359 = arith.constant 0.00999999977 : f32
    %766 = vector.broadcast %cst_359 : f32 to vector<1x1024xf32>
    %767 = arith.mulf %766, %763 : vector<1x1024xf32>
    %768 = arith.select %765, %763, %767 : vector<1x1024xi1>, vector<1x1024xf32>
    %c2_360 = arith.constant 2 : index
    %c4_361 = arith.constant 4 : index
    %769 = memref.load %arg12[%c2_360, %c4_361] : memref<3x16xf32, #tpu.memory_space<smem>>
    %770 = vector.broadcast %769 : f32 to vector<1x1024xf32>
    %771 = arith.mulf %768, %770 : vector<1x1024xf32>
    %772 = arith.addf %757, %771 : vector<1x1024xf32>
    %c2_362 = arith.constant 2 : index
    %c5_363 = arith.constant 5 : index
    %773 = memref.load %arg10[%c2_362, %c5_363] : memref<3x16xf32, #tpu.memory_space<smem>>
    %774 = vector.broadcast %773 : f32 to vector<1x1024xf32>
    %775 = arith.mulf %696, %774 : vector<1x1024xf32>
    %c2_364 = arith.constant 2 : index
    %c5_365 = arith.constant 5 : index
    %776 = memref.load %arg11[%c2_364, %c5_365] : memref<3x16xf32, #tpu.memory_space<smem>>
    %777 = vector.broadcast %776 : f32 to vector<1x1024xf32>
    %778 = arith.addf %775, %777 : vector<1x1024xf32>
    %cst_366 = arith.constant 0.000000e+00 : f32
    %779 = vector.broadcast %cst_366 : f32 to vector<1x1024xf32>
    %780 = arith.cmpf oge, %778, %779 : vector<1x1024xf32>
    %cst_367 = arith.constant 0.00999999977 : f32
    %781 = vector.broadcast %cst_367 : f32 to vector<1x1024xf32>
    %782 = arith.mulf %781, %778 : vector<1x1024xf32>
    %783 = arith.select %780, %778, %782 : vector<1x1024xi1>, vector<1x1024xf32>
    %c2_368 = arith.constant 2 : index
    %c5_369 = arith.constant 5 : index
    %784 = memref.load %arg12[%c2_368, %c5_369] : memref<3x16xf32, #tpu.memory_space<smem>>
    %785 = vector.broadcast %784 : f32 to vector<1x1024xf32>
    %786 = arith.mulf %783, %785 : vector<1x1024xf32>
    %787 = arith.addf %772, %786 : vector<1x1024xf32>
    %c2_370 = arith.constant 2 : index
    %c6_371 = arith.constant 6 : index
    %788 = memref.load %arg10[%c2_370, %c6_371] : memref<3x16xf32, #tpu.memory_space<smem>>
    %789 = vector.broadcast %788 : f32 to vector<1x1024xf32>
    %790 = arith.mulf %696, %789 : vector<1x1024xf32>
    %c2_372 = arith.constant 2 : index
    %c6_373 = arith.constant 6 : index
    %791 = memref.load %arg11[%c2_372, %c6_373] : memref<3x16xf32, #tpu.memory_space<smem>>
    %792 = vector.broadcast %791 : f32 to vector<1x1024xf32>
    %793 = arith.addf %790, %792 : vector<1x1024xf32>
    %cst_374 = arith.constant 0.000000e+00 : f32
    %794 = vector.broadcast %cst_374 : f32 to vector<1x1024xf32>
    %795 = arith.cmpf oge, %793, %794 : vector<1x1024xf32>
    %cst_375 = arith.constant 0.00999999977 : f32
    %796 = vector.broadcast %cst_375 : f32 to vector<1x1024xf32>
    %797 = arith.mulf %796, %793 : vector<1x1024xf32>
    %798 = arith.select %795, %793, %797 : vector<1x1024xi1>, vector<1x1024xf32>
    %c2_376 = arith.constant 2 : index
    %c6_377 = arith.constant 6 : index
    %799 = memref.load %arg12[%c2_376, %c6_377] : memref<3x16xf32, #tpu.memory_space<smem>>
    %800 = vector.broadcast %799 : f32 to vector<1x1024xf32>
    %801 = arith.mulf %798, %800 : vector<1x1024xf32>
    %802 = arith.addf %787, %801 : vector<1x1024xf32>
    %c2_378 = arith.constant 2 : index
    %c7_379 = arith.constant 7 : index
    %803 = memref.load %arg10[%c2_378, %c7_379] : memref<3x16xf32, #tpu.memory_space<smem>>
    %804 = vector.broadcast %803 : f32 to vector<1x1024xf32>
    %805 = arith.mulf %696, %804 : vector<1x1024xf32>
    %c2_380 = arith.constant 2 : index
    %c7_381 = arith.constant 7 : index
    %806 = memref.load %arg11[%c2_380, %c7_381] : memref<3x16xf32, #tpu.memory_space<smem>>
    %807 = vector.broadcast %806 : f32 to vector<1x1024xf32>
    %808 = arith.addf %805, %807 : vector<1x1024xf32>
    %cst_382 = arith.constant 0.000000e+00 : f32
    %809 = vector.broadcast %cst_382 : f32 to vector<1x1024xf32>
    %810 = arith.cmpf oge, %808, %809 : vector<1x1024xf32>
    %cst_383 = arith.constant 0.00999999977 : f32
    %811 = vector.broadcast %cst_383 : f32 to vector<1x1024xf32>
    %812 = arith.mulf %811, %808 : vector<1x1024xf32>
    %813 = arith.select %810, %808, %812 : vector<1x1024xi1>, vector<1x1024xf32>
    %c2_384 = arith.constant 2 : index
    %c7_385 = arith.constant 7 : index
    %814 = memref.load %arg12[%c2_384, %c7_385] : memref<3x16xf32, #tpu.memory_space<smem>>
    %815 = vector.broadcast %814 : f32 to vector<1x1024xf32>
    %816 = arith.mulf %813, %815 : vector<1x1024xf32>
    %817 = arith.addf %802, %816 : vector<1x1024xf32>
    %c2_386 = arith.constant 2 : index
    %c8_387 = arith.constant 8 : index
    %818 = memref.load %arg10[%c2_386, %c8_387] : memref<3x16xf32, #tpu.memory_space<smem>>
    %819 = vector.broadcast %818 : f32 to vector<1x1024xf32>
    %820 = arith.mulf %696, %819 : vector<1x1024xf32>
    %c2_388 = arith.constant 2 : index
    %c8_389 = arith.constant 8 : index
    %821 = memref.load %arg11[%c2_388, %c8_389] : memref<3x16xf32, #tpu.memory_space<smem>>
    %822 = vector.broadcast %821 : f32 to vector<1x1024xf32>
    %823 = arith.addf %820, %822 : vector<1x1024xf32>
    %cst_390 = arith.constant 0.000000e+00 : f32
    %824 = vector.broadcast %cst_390 : f32 to vector<1x1024xf32>
    %825 = arith.cmpf oge, %823, %824 : vector<1x1024xf32>
    %cst_391 = arith.constant 0.00999999977 : f32
    %826 = vector.broadcast %cst_391 : f32 to vector<1x1024xf32>
    %827 = arith.mulf %826, %823 : vector<1x1024xf32>
    %828 = arith.select %825, %823, %827 : vector<1x1024xi1>, vector<1x1024xf32>
    %c2_392 = arith.constant 2 : index
    %c8_393 = arith.constant 8 : index
    %829 = memref.load %arg12[%c2_392, %c8_393] : memref<3x16xf32, #tpu.memory_space<smem>>
    %830 = vector.broadcast %829 : f32 to vector<1x1024xf32>
    %831 = arith.mulf %828, %830 : vector<1x1024xf32>
    %832 = arith.addf %817, %831 : vector<1x1024xf32>
    %c2_394 = arith.constant 2 : index
    %c9_395 = arith.constant 9 : index
    %833 = memref.load %arg10[%c2_394, %c9_395] : memref<3x16xf32, #tpu.memory_space<smem>>
    %834 = vector.broadcast %833 : f32 to vector<1x1024xf32>
    %835 = arith.mulf %696, %834 : vector<1x1024xf32>
    %c2_396 = arith.constant 2 : index
    %c9_397 = arith.constant 9 : index
    %836 = memref.load %arg11[%c2_396, %c9_397] : memref<3x16xf32, #tpu.memory_space<smem>>
    %837 = vector.broadcast %836 : f32 to vector<1x1024xf32>
    %838 = arith.addf %835, %837 : vector<1x1024xf32>
    %cst_398 = arith.constant 0.000000e+00 : f32
    %839 = vector.broadcast %cst_398 : f32 to vector<1x1024xf32>
    %840 = arith.cmpf oge, %838, %839 : vector<1x1024xf32>
    %cst_399 = arith.constant 0.00999999977 : f32
    %841 = vector.broadcast %cst_399 : f32 to vector<1x1024xf32>
    %842 = arith.mulf %841, %838 : vector<1x1024xf32>
    %843 = arith.select %840, %838, %842 : vector<1x1024xi1>, vector<1x1024xf32>
    %c2_400 = arith.constant 2 : index
    %c9_401 = arith.constant 9 : index
    %844 = memref.load %arg12[%c2_400, %c9_401] : memref<3x16xf32, #tpu.memory_space<smem>>
    %845 = vector.broadcast %844 : f32 to vector<1x1024xf32>
    %846 = arith.mulf %843, %845 : vector<1x1024xf32>
    %847 = arith.addf %832, %846 : vector<1x1024xf32>
    %c2_402 = arith.constant 2 : index
    %c10_403 = arith.constant 10 : index
    %848 = memref.load %arg10[%c2_402, %c10_403] : memref<3x16xf32, #tpu.memory_space<smem>>
    %849 = vector.broadcast %848 : f32 to vector<1x1024xf32>
    %850 = arith.mulf %696, %849 : vector<1x1024xf32>
    %c2_404 = arith.constant 2 : index
    %c10_405 = arith.constant 10 : index
    %851 = memref.load %arg11[%c2_404, %c10_405] : memref<3x16xf32, #tpu.memory_space<smem>>
    %852 = vector.broadcast %851 : f32 to vector<1x1024xf32>
    %853 = arith.addf %850, %852 : vector<1x1024xf32>
    %cst_406 = arith.constant 0.000000e+00 : f32
    %854 = vector.broadcast %cst_406 : f32 to vector<1x1024xf32>
    %855 = arith.cmpf oge, %853, %854 : vector<1x1024xf32>
    %cst_407 = arith.constant 0.00999999977 : f32
    %856 = vector.broadcast %cst_407 : f32 to vector<1x1024xf32>
    %857 = arith.mulf %856, %853 : vector<1x1024xf32>
    %858 = arith.select %855, %853, %857 : vector<1x1024xi1>, vector<1x1024xf32>
    %c2_408 = arith.constant 2 : index
    %c10_409 = arith.constant 10 : index
    %859 = memref.load %arg12[%c2_408, %c10_409] : memref<3x16xf32, #tpu.memory_space<smem>>
    %860 = vector.broadcast %859 : f32 to vector<1x1024xf32>
    %861 = arith.mulf %858, %860 : vector<1x1024xf32>
    %862 = arith.addf %847, %861 : vector<1x1024xf32>
    %c2_410 = arith.constant 2 : index
    %c11_411 = arith.constant 11 : index
    %863 = memref.load %arg10[%c2_410, %c11_411] : memref<3x16xf32, #tpu.memory_space<smem>>
    %864 = vector.broadcast %863 : f32 to vector<1x1024xf32>
    %865 = arith.mulf %696, %864 : vector<1x1024xf32>
    %c2_412 = arith.constant 2 : index
    %c11_413 = arith.constant 11 : index
    %866 = memref.load %arg11[%c2_412, %c11_413] : memref<3x16xf32, #tpu.memory_space<smem>>
    %867 = vector.broadcast %866 : f32 to vector<1x1024xf32>
    %868 = arith.addf %865, %867 : vector<1x1024xf32>
    %cst_414 = arith.constant 0.000000e+00 : f32
    %869 = vector.broadcast %cst_414 : f32 to vector<1x1024xf32>
    %870 = arith.cmpf oge, %868, %869 : vector<1x1024xf32>
    %cst_415 = arith.constant 0.00999999977 : f32
    %871 = vector.broadcast %cst_415 : f32 to vector<1x1024xf32>
    %872 = arith.mulf %871, %868 : vector<1x1024xf32>
    %873 = arith.select %870, %868, %872 : vector<1x1024xi1>, vector<1x1024xf32>
    %c2_416 = arith.constant 2 : index
    %c11_417 = arith.constant 11 : index
    %874 = memref.load %arg12[%c2_416, %c11_417] : memref<3x16xf32, #tpu.memory_space<smem>>
    %875 = vector.broadcast %874 : f32 to vector<1x1024xf32>
    %876 = arith.mulf %873, %875 : vector<1x1024xf32>
    %877 = arith.addf %862, %876 : vector<1x1024xf32>
    %c2_418 = arith.constant 2 : index
    %c12_419 = arith.constant 12 : index
    %878 = memref.load %arg10[%c2_418, %c12_419] : memref<3x16xf32, #tpu.memory_space<smem>>
    %879 = vector.broadcast %878 : f32 to vector<1x1024xf32>
    %880 = arith.mulf %696, %879 : vector<1x1024xf32>
    %c2_420 = arith.constant 2 : index
    %c12_421 = arith.constant 12 : index
    %881 = memref.load %arg11[%c2_420, %c12_421] : memref<3x16xf32, #tpu.memory_space<smem>>
    %882 = vector.broadcast %881 : f32 to vector<1x1024xf32>
    %883 = arith.addf %880, %882 : vector<1x1024xf32>
    %cst_422 = arith.constant 0.000000e+00 : f32
    %884 = vector.broadcast %cst_422 : f32 to vector<1x1024xf32>
    %885 = arith.cmpf oge, %883, %884 : vector<1x1024xf32>
    %cst_423 = arith.constant 0.00999999977 : f32
    %886 = vector.broadcast %cst_423 : f32 to vector<1x1024xf32>
    %887 = arith.mulf %886, %883 : vector<1x1024xf32>
    %888 = arith.select %885, %883, %887 : vector<1x1024xi1>, vector<1x1024xf32>
    %c2_424 = arith.constant 2 : index
    %c12_425 = arith.constant 12 : index
    %889 = memref.load %arg12[%c2_424, %c12_425] : memref<3x16xf32, #tpu.memory_space<smem>>
    %890 = vector.broadcast %889 : f32 to vector<1x1024xf32>
    %891 = arith.mulf %888, %890 : vector<1x1024xf32>
    %892 = arith.addf %877, %891 : vector<1x1024xf32>
    %c2_426 = arith.constant 2 : index
    %c13_427 = arith.constant 13 : index
    %893 = memref.load %arg10[%c2_426, %c13_427] : memref<3x16xf32, #tpu.memory_space<smem>>
    %894 = vector.broadcast %893 : f32 to vector<1x1024xf32>
    %895 = arith.mulf %696, %894 : vector<1x1024xf32>
    %c2_428 = arith.constant 2 : index
    %c13_429 = arith.constant 13 : index
    %896 = memref.load %arg11[%c2_428, %c13_429] : memref<3x16xf32, #tpu.memory_space<smem>>
    %897 = vector.broadcast %896 : f32 to vector<1x1024xf32>
    %898 = arith.addf %895, %897 : vector<1x1024xf32>
    %cst_430 = arith.constant 0.000000e+00 : f32
    %899 = vector.broadcast %cst_430 : f32 to vector<1x1024xf32>
    %900 = arith.cmpf oge, %898, %899 : vector<1x1024xf32>
    %cst_431 = arith.constant 0.00999999977 : f32
    %901 = vector.broadcast %cst_431 : f32 to vector<1x1024xf32>
    %902 = arith.mulf %901, %898 : vector<1x1024xf32>
    %903 = arith.select %900, %898, %902 : vector<1x1024xi1>, vector<1x1024xf32>
    %c2_432 = arith.constant 2 : index
    %c13_433 = arith.constant 13 : index
    %904 = memref.load %arg12[%c2_432, %c13_433] : memref<3x16xf32, #tpu.memory_space<smem>>
    %905 = vector.broadcast %904 : f32 to vector<1x1024xf32>
    %906 = arith.mulf %903, %905 : vector<1x1024xf32>
    %907 = arith.addf %892, %906 : vector<1x1024xf32>
    %c2_434 = arith.constant 2 : index
    %c14_435 = arith.constant 14 : index
    %908 = memref.load %arg10[%c2_434, %c14_435] : memref<3x16xf32, #tpu.memory_space<smem>>
    %909 = vector.broadcast %908 : f32 to vector<1x1024xf32>
    %910 = arith.mulf %696, %909 : vector<1x1024xf32>
    %c2_436 = arith.constant 2 : index
    %c14_437 = arith.constant 14 : index
    %911 = memref.load %arg11[%c2_436, %c14_437] : memref<3x16xf32, #tpu.memory_space<smem>>
    %912 = vector.broadcast %911 : f32 to vector<1x1024xf32>
    %913 = arith.addf %910, %912 : vector<1x1024xf32>
    %cst_438 = arith.constant 0.000000e+00 : f32
    %914 = vector.broadcast %cst_438 : f32 to vector<1x1024xf32>
    %915 = arith.cmpf oge, %913, %914 : vector<1x1024xf32>
    %cst_439 = arith.constant 0.00999999977 : f32
    %916 = vector.broadcast %cst_439 : f32 to vector<1x1024xf32>
    %917 = arith.mulf %916, %913 : vector<1x1024xf32>
    %918 = arith.select %915, %913, %917 : vector<1x1024xi1>, vector<1x1024xf32>
    %c2_440 = arith.constant 2 : index
    %c14_441 = arith.constant 14 : index
    %919 = memref.load %arg12[%c2_440, %c14_441] : memref<3x16xf32, #tpu.memory_space<smem>>
    %920 = vector.broadcast %919 : f32 to vector<1x1024xf32>
    %921 = arith.mulf %918, %920 : vector<1x1024xf32>
    %922 = arith.addf %907, %921 : vector<1x1024xf32>
    %c2_442 = arith.constant 2 : index
    %c15_443 = arith.constant 15 : index
    %923 = memref.load %arg10[%c2_442, %c15_443] : memref<3x16xf32, #tpu.memory_space<smem>>
    %924 = vector.broadcast %923 : f32 to vector<1x1024xf32>
    %925 = arith.mulf %696, %924 : vector<1x1024xf32>
    %c2_444 = arith.constant 2 : index
    %c15_445 = arith.constant 15 : index
    %926 = memref.load %arg11[%c2_444, %c15_445] : memref<3x16xf32, #tpu.memory_space<smem>>
    %927 = vector.broadcast %926 : f32 to vector<1x1024xf32>
    %928 = arith.addf %925, %927 : vector<1x1024xf32>
    %cst_446 = arith.constant 0.000000e+00 : f32
    %929 = vector.broadcast %cst_446 : f32 to vector<1x1024xf32>
    %930 = arith.cmpf oge, %928, %929 : vector<1x1024xf32>
    %cst_447 = arith.constant 0.00999999977 : f32
    %931 = vector.broadcast %cst_447 : f32 to vector<1x1024xf32>
    %932 = arith.mulf %931, %928 : vector<1x1024xf32>
    %933 = arith.select %930, %928, %932 : vector<1x1024xi1>, vector<1x1024xf32>
    %c2_448 = arith.constant 2 : index
    %c15_449 = arith.constant 15 : index
    %934 = memref.load %arg12[%c2_448, %c15_449] : memref<3x16xf32, #tpu.memory_space<smem>>
    %935 = vector.broadcast %934 : f32 to vector<1x1024xf32>
    %936 = arith.mulf %933, %935 : vector<1x1024xf32>
    %937 = arith.addf %922, %936 : vector<1x1024xf32>
    %c2_450 = arith.constant 2 : index
    %c0_451 = arith.constant 0 : index
    %938 = memref.load %arg13[%c2_450, %c0_451] : memref<3x1xf32, #tpu.memory_space<smem>>
    %939 = vector.broadcast %938 : f32 to vector<1x1024xf32>
    %940 = arith.addf %937, %939 : vector<1x1024xf32>
    %c0_452 = arith.constant 0 : index
    %c0_453 = arith.constant 0 : index
    %c0_454 = arith.constant 0 : index
    %941 = vector.load %arg18[%c0_452, %c0_453, %c0_454] : memref<1x3x1024xf32, #tpu.memory_space<vmem>>, vector<1x3x1024xf32>
    %942 = vector.shape_cast %940 : vector<1x1024xf32> to vector<1x1x1024xf32>
    %943 = vector.broadcast %942 : vector<1x1x1024xf32> to vector<1x3x1024xf32>
    %944 = arith.mulf %941, %943 : vector<1x3x1024xf32>
    %c0_455 = arith.constant 0 : index
    %c0_456 = arith.constant 0 : index
    %c0_457 = arith.constant 0 : index
    %945 = vector.load %arg21[%c0_455, %c0_456, %c0_457] : memref<1x3x1024xf32, #tpu.memory_space<vmem>>, vector<1x3x1024xf32>
    tpu.vector_store %arg21[%c0_455, %c0_456, %c0_457], %944 {strides = array<i32>} : memref<1x3x1024xf32, #tpu.memory_space<vmem>>, vector<1x3x1024xf32>,
    return
  }
  func.func @transform_0(%arg0: i32) -> (i32, i32, i32, i32) {
    %c0_i32 = arith.constant 0 : i32
    %c0_i32_0 = arith.constant 0 : i32
    %c0_i32_1 = arith.constant 0 : i32
    %c0_i32_2 = arith.constant 0 : i32
    return %arg0, %c0_i32, %c0_i32_0, %c0_i32_1 : i32, i32, i32, i32
  }
  func.func @transform_1(%arg0: i32) -> (i32, i32) {
    %c0_i32 = arith.constant 0 : i32
    %c0_i32_0 = arith.constant 0 : i32
    %c0_i32_1 = arith.constant 0 : i32
    return %c0_i32, %c0_i32_0 : i32, i32
  }
  func.func @transform_2(%arg0: i32) -> (i32, i32) {
    %c0_i32 = arith.constant 0 : i32
    %c0_i32_0 = arith.constant 0 : i32
    %c0_i32_1 = arith.constant 0 : i32
    return %c0_i32, %c0_i32_0 : i32, i32
  }
  func.func @transform_3(%arg0: i32) -> (i32, i32, i32) {
    %c0_i32 = arith.constant 0 : i32
    %c0_i32_0 = arith.constant 0 : i32
    %c0_i32_1 = arith.constant 0 : i32
    %c0_i32_2 = arith.constant 0 : i32
    return %c0_i32, %c0_i32_0, %c0_i32_1 : i32, i32, i32
  }
  func.func @transform_4(%arg0: i32) -> (i32, i32, i32) {
    %c0_i32 = arith.constant 0 : i32
    %c0_i32_0 = arith.constant 0 : i32
    %c0_i32_1 = arith.constant 0 : i32
    %c0_i32_2 = arith.constant 0 : i32
    return %c0_i32, %c0_i32_0, %c0_i32_1 : i32, i32, i32
  }
  func.func @transform_5(%arg0: i32) -> (i32, i32, i32) {
    %c0_i32 = arith.constant 0 : i32
    %c0_i32_0 = arith.constant 0 : i32
    %c0_i32_1 = arith.constant 0 : i32
    %c0_i32_2 = arith.constant 0 : i32
    return %c0_i32, %c0_i32_0, %c0_i32_1 : i32, i32, i32
  }
  func.func @transform_6(%arg0: i32) -> (i32, i32, i32) {
    %c0_i32 = arith.constant 0 : i32
    %c0_i32_0 = arith.constant 0 : i32
    %c0_i32_1 = arith.constant 0 : i32
    %c0_i32_2 = arith.constant 0 : i32
    return %c0_i32, %c0_i32_0, %c0_i32_1 : i32, i32, i32
  }
  func.func @transform_7(%arg0: i32) -> (i32, i32) {
    %c0_i32 = arith.constant 0 : i32
    %c0_i32_0 = arith.constant 0 : i32
    %c0_i32_1 = arith.constant 0 : i32
    return %c0_i32, %c0_i32_0 : i32, i32
  }
  func.func @transform_8(%arg0: i32) -> (i32, i32) {
    %c0_i32 = arith.constant 0 : i32
    %c0_i32_0 = arith.constant 0 : i32
    %c0_i32_1 = arith.constant 0 : i32
    return %c0_i32, %c0_i32_0 : i32, i32
  }
  func.func @transform_9(%arg0: i32) -> (i32, i32) {
    %c0_i32 = arith.constant 0 : i32
    %c0_i32_0 = arith.constant 0 : i32
    %c0_i32_1 = arith.constant 0 : i32
    return %c0_i32, %c0_i32_0 : i32, i32
  }
  func.func @transform_10(%arg0: i32) -> (i32, i32) {
    %c0_i32 = arith.constant 0 : i32
    %c0_i32_0 = arith.constant 0 : i32
    %c0_i32_1 = arith.constant 0 : i32
    return %c0_i32, %c0_i32_0 : i32, i32
  }
  func.func @transform_11(%arg0: i32) -> (i32, i32) {
    %c0_i32 = arith.constant 0 : i32
    %c0_i32_0 = arith.constant 0 : i32
    %c0_i32_1 = arith.constant 0 : i32
    return %c0_i32, %c0_i32_0 : i32, i32
  }
  func.func @transform_12(%arg0: i32) -> (i32, i32) {
    %c0_i32 = arith.constant 0 : i32
    %c0_i32_0 = arith.constant 0 : i32
    %c0_i32_1 = arith.constant 0 : i32
    return %c0_i32, %c0_i32_0 : i32, i32
  }
  func.func @transform_13(%arg0: i32) -> (i32, i32) {
    %c0_i32 = arith.constant 0 : i32
    %c0_i32_0 = arith.constant 0 : i32
    %c0_i32_1 = arith.constant 0 : i32
    return %c0_i32, %c0_i32_0 : i32, i32
  }
  func.func @transform_14(%arg0: i32) -> (i32, i32) {
    %c0_i32 = arith.constant 0 : i32
    %c0_i32_0 = arith.constant 0 : i32
    %c0_i32_1 = arith.constant 0 : i32
    return %c0_i32, %c0_i32_0 : i32, i32
  }
  func.func @transform_15(%arg0: i32) -> (i32, i32, i32) {
    %c0_i32 = arith.constant 0 : i32
    %c0_i32_0 = arith.constant 0 : i32
    %c0_i32_1 = arith.constant 0 : i32
    return %arg0, %c0_i32, %c0_i32_0 : i32, i32, i32
  }
  func.func @transform_16(%arg0: i32) -> (i32, i32, i32) {
    %c0_i32 = arith.constant 0 : i32
    %c0_i32_0 = arith.constant 0 : i32
    %c0_i32_1 = arith.constant 0 : i32
    return %arg0, %c0_i32, %c0_i32_0 : i32, i32, i32
  }
  func.func @transform_17(%arg0: i32) -> (i32, i32, i32) {
    %c0_i32 = arith.constant 0 : i32
    %c0_i32_0 = arith.constant 0 : i32
    %c0_i32_1 = arith.constant 0 : i32
    return %arg0, %c0_i32, %c0_i32_0 : i32, i32, i32
  }
  func.func @transform_18(%arg0: i32) -> (i32, i32, i32) {
    %c0_i32 = arith.constant 0 : i32
    %c0_i32_0 = arith.constant 0 : i32
    %c0_i32_1 = arith.constant 0 : i32
    return %arg0, %c0_i32, %c0_i32_0 : i32, i32, i32
  }
  func.func @transform_19(%arg0: i32) -> (i32, i32, i32) {
    %c0_i32 = arith.constant 0 : i32
    %c0_i32_0 = arith.constant 0 : i32
    %c0_i32_1 = arith.constant 0 : i32
    return %arg0, %c0_i32, %c0_i32_0 : i32, i32, i32
  }
  func.func @transform_20(%arg0: i32) -> (i32, i32, i32) {
    %c0_i32 = arith.constant 0 : i32
    %c0_i32_0 = arith.constant 0 : i32
    %c0_i32_1 = arith.constant 0 : i32
    return %arg0, %c0_i32, %c0_i32_0 : i32, i32, i32
  }
}

</mosaic_0001>

<bundles_post_ra>
// kernel: _lambda_.1
= control target key start
LH: loop header
LB: loop body
LE: loop exit
PB: predicated region body
PF: predicated region fallthrough
CT: control target
= control target key end

     0   :  { %s13879_s0 = inlined_call_operand.vmem [shape: f32[2,10,24,64], index: 0, kind: input, shape index: {}]   ;;  %s13880_s1 = inlined_call_operand.vmem [shape: f32[576,64], index: 1, kind: input, shape index: {}]   ;;  %s13881_s2 = inlined_call_operand.vmem [shape: f32[1,64], index: 2, kind: input, shape index: {}]   ;;  %s13882_s3 = inlined_call_operand.vmem [shape: f32[2,576,64], index: 3, kind: input, shape index: {}]   ;;  %s13883_s4 = inlined_call_operand.vmem [shape: f32[2,1,64], index: 4, kind: input, shape index: {}]   ;;  %s13884_s5 = inlined_call_operand.vmem [shape: f32[2,576,64], index: 5, kind: input, shape index: {}]   ;;  %s13885_s6 = inlined_call_operand.vmem [shape: f32[2,1,64], index: 6, kind: input, shape index: {}]   ;;  %s13886_s7 = inlined_call_operand.vmem [shape: f32[1,576], index: 7, kind: input, shape index: {}]   ;;  %s13887_s8 = inlined_call_operand.<no memory space> [shape: f32[1,1], index: 8, kind: input, shape index: {}]   ;;  %s13888_s9 = inlined_call_operand.vmem [shape: f32[3,16], index: 9, kind: input, shape index: {}]   ;;  %s13889_s10 = inlined_call_operand.vmem [shape: f32[3,16], index: 10, kind: input, shape index: {}]   ;;  %s13890_s11 = inlined_call_operand.vmem [shape: f32[3,16], index: 11, kind: input, shape index: {}]   ;;  %s13891_s12 = inlined_call_operand.vmem [shape: f32[3,1], index: 12, kind: input, shape index: {}]   ;;  %s13892_s13 = inlined_call_operand.vmem [shape: f32[64,256], index: 13, kind: input, shape index: {}]   ;;  %s13893_s14 = inlined_call_operand.vmem [shape: f32[256,1024], index: 14, kind: input, shape index: {}]   ;;  %s13894_s15 = inlined_call_operand.vmem [shape: f32[2,3,64], index: 15, kind: input, shape index: {}]   ;;  %s13895_s16 = inlined_call_operand.vmem [shape: f32[2,3,256], index: 16, kind: input, shape index: {}]   ;;  %s13896_s17 = inlined_call_operand.vmem [shape: f32[2,3,1024], index: 17, kind: input, shape index: {}]   ;;  %s13897_s18 = inlined_call_operand.vmem [shape: f32[2,3,64], index: 18, kind: output, shape index: {0}]   ;;  %s13898_s19 = inlined_call_operand.vmem [shape: f32[2,3,256], index: 19, kind: output, shape index: {1}]   ;;  %s13899_s20 = inlined_call_operand.vmem [shape: f32[2,3,1024], index: 20, kind: output, shape index: {2}]  }
   0x1   :  { %14076 = sst [smem:[#allocation88_spill]] %s13879_s0 }
   0x2   :  { %14077 = sst [smem:[#allocation89_spill]] %s13880_s1 }
   0x3   :  { %14078 = sst [smem:[#allocation90_spill]] %s13881_s2 }
   0x4   :  { %14079 = sst [smem:[#allocation91_spill]] %s13882_s3 }
   0x5   :  { %14080 = sst [smem:[#allocation92_spill]] %s13883_s4 }
   0x6   :  { %14081 = sst [smem:[#allocation93_spill]] %s13884_s5 }
   0x7   :  { %14082 = sst [smem:[#allocation94_spill]] %s13885_s6 }
   0x8   :  { %14083 = sst [smem:[#allocation95_spill]] %s13886_s7 }
   0x9   :  { %14084 = sst [smem:[#allocation96_spill]] %s13888_s9 }
   0xa   :  { %14085 = sst [smem:[#allocation97_spill]] %s13889_s10 }
   0xb   :  { %14086 = sst [smem:[#allocation98_spill]] %s13890_s11 }
   0xc   :  { %14087 = sst [smem:[#allocation99_spill]] %s13891_s12 }
   0xd   :  { %14088 = sst [smem:[#allocation100_spill]] %s13892_s13 }
   0xe   :  { %14089 = sst [smem:[#allocation101_spill]] %s13893_s14 }
   0xf   :  { %14090 = sst [smem:[#allocation102_spill]] %s13894_s15 }
  0x10   :  { %14091 = sst [smem:[#allocation103_spill]] %s13895_s16 }
  0x11   :  { %14092 = sst [smem:[#allocation104_spill]] %s13896_s17 }
  0x12   :  { %14093 = sst [smem:[#allocation105_spill]] %s13897_s18 }
  0x13   :  { %14094 = sst [smem:[#allocation106_spill]] %s13898_s19 }
  0x14   :  { %14095 = sst [smem:[#allocation107_spill]] %s13899_s20 }
  0x15   :  { %26 = sst [smem:[#allocation2]] %s13887_s8 }
  0x16   :  { %27 = vsyncpa [#allocation4], 0 }
  0x17   :  { %28 = vsyncpa [#allocation6], 0 }
  0x18   :  { %29 = vsyncpa [#allocation9], 0  ;;  %s9052_s23 = smov 0  }
  0x19 LB: > { %14096 = sst [smem:[#allocation13_spill]] %s8934_s23  ;;  %s14097_s10 = sld [smem:[#allocation97_spill]]  ;;  %s8934_s23 = sphi %s9052_s23, %s35_s23  }
  0x1a   : > { %s9061_s3 = sadd.s32 4294967295, %s8934_s23   ;;  %p6612_p0 = scmp.ge.s32.totalorder %s8934_s23, 1 }
  0x1b   : > { %p516_p1 = scmp.lt.s32.totalorder %s8934_s23, 3  ;;  %p8547_p2 = scmp.eq.s32.totalorder %s9061_s3, 0 }
  0x1c   : > { %s14099_s9 = sld [smem:[#allocation96_spill]]  ;;  %s14100_s11 = sld [smem:[#allocation98_spill]] }
  0x1d   : > { %p9066_p3 = pnand %p6612_p0, %p516_p1  ;;  %s14102_s12 = sld [smem:[#allocation99_spill]] }
  0x1f   : > { %s564_s25 = sshll.u32 %s14097_s10, 4  ;;  %p8534_p4 = pneg %p9066_p3  ;;  %s565_s25 = int_to_ptr.vmem [resolvable:$true] %s564_s25 }
  0x20   : > { %s8856_s24 = scalar_lea.vmem %s565_s25, 64  ;;  %p8864_p10 = scmp.lt.s32.totalorder %s565_s25, %s565_s25 }
  0x21   : > { %p9084_p5 = pnand %p8547_p2, %p8534_p4  ;;  %p8857_p6 = scmp.ne.s32.totalorder %s565_s25, %s8856_s24 }
  0x22   : > { %s553_s28 = sshll.u32 %s14099_s9, 4  ;;  %s575_s30 = sshll.u32 %s14100_s11, 4  ;;  %s9073_s28 = int_to_ptr.vmem [resolvable:$true] %s553_s28  ;;  %s9080_s30 = int_to_ptr.vmem [resolvable:$true] %s575_s30 }
  0x23   : > { %s586_s22 = sshll.u32 %s14102_s12, 4  ;;  %p8858_p7 = pneg %p9084_p5  ;;  %s9091_s22 = int_to_ptr.vmem [resolvable:$true] %s586_s22 }
  0x24   : > { %p8865_p11 = scmp.lt.s32.totalorder %s8856_s24, %s8856_s24 }
  0x25   : > { %p8859_p8 = pnand %p8858_p7, %p8857_p6 }
  0x26   : > { %p8866_p12 = por %p8865_p11, %p8864_p10 }
  0x27   : > { %p8860_p9 = pneg %p8859_p8 }
  0x29   : > { %p8867_p13 = pnand %p8866_p12, %p8860_p9 }
  0x2b   : > { %8870 = shalt.err (!%p8867_p13)
}
  0x2c   : > { %s8936_s2 = smov [#allocation5]   ;;  %s8871_s26 = scalar_lea.vmem %s9073_s28, 64 }
  0x2d   : > { %8540 = dma.vmem_to_smem (!%p9084_p5), %s565_s25, 64, %s8936_s2, [#allocation6]  }
  0x2e   : > { %p8872_p0 = scmp.ne.s32.totalorder %s9073_s28, %s8871_s26  ;;  %p8879_p6 = scmp.lt.s32.totalorder %s9073_s28, %s9073_s28 }
  0x2f   : > { %p8880_p8 = scmp.lt.s32.totalorder %s8871_s26, %s8871_s26 }
  0x30   : > { %p8874_p1 = pnand %p8872_p0, %p8858_p7 }
  0x31   : > { %p8881_p10 = por %p8880_p8, %p8879_p6 }
  0x32   : > { %p8875_p4 = pneg %p8874_p1 }
  0x34   : > { %p8882_p9 = pnand %p8881_p10, %p8875_p4 }
  0x36   : > { %8885 = shalt.err (!%p8882_p9)
}
  0x37   : > { %s8937_s27 = smov [#allocation3]   ;;  %s8886_s25 = scalar_lea.vmem %s9080_s30, 64 }
  0x38   : > { %8537 = dma.vmem_to_smem (!%p9084_p5), %s9073_s28, 64, %s8937_s27, [#allocation4]  }
  0x39   : > { %p8887_p11 = scmp.ne.s32.totalorder %s9080_s30, %s8886_s25  ;;  %p8894_p0 = scmp.lt.s32.totalorder %s9080_s30, %s9080_s30 }
  0x3a   : > { %p8895_p1 = scmp.lt.s32.totalorder %s8886_s25, %s8886_s25 }
  0x3b   : > { %p8889_p12 = pnand %p8887_p11, %p8858_p7 }
  0x3c   : > { %p8896_p4 = por %p8895_p1, %p8894_p0 }
  0x3d   : > { %p8890_p13 = pneg %p8889_p12 }
  0x3f   : > { %p8897_p6 = pnand %p8896_p4, %p8890_p13 }
  0x41   : > { %8900 = shalt.err (!%p8897_p6)
}
  0x42   : > { %s8938_s4 = smov [#allocation7]   ;;  %s8901_s28 = scalar_lea.vmem %s9091_s22, 64 }
  0x43   : > { %8543 = dma.vmem_to_smem (!%p9084_p5), %s9080_s30, 64, %s8938_s4, [#allocation6]  }
  0x44   : > { %p8902_p8 = scmp.ne.s32.totalorder %s9091_s22, %s8901_s28  ;;  %p8909_p11 = scmp.lt.s32.totalorder %s9091_s22, %s9091_s22 }
  0x45   : > { %p8910_p12 = scmp.lt.s32.totalorder %s8901_s28, %s8901_s28 }
  0x46   : > { %p8904_p10 = pnand %p8902_p8, %p8858_p7 }
  0x47   : > { %p8911_p13 = por %p8910_p12, %p8909_p11 }
  0x48   : > { %p8905_p9 = pneg %p8904_p10 }
  0x4a   : > { %p8912_p0 = pnand %p8911_p13, %p8905_p9 }
  0x4c   : > { %8915 = shalt.err (!%p8912_p0)
}
  0x4d   : > { %s8939_s29 = smov [#allocation8]   ;;  %636 = sbr.rel (%p9066_p3) target bundleno = 3216 (0xc90), region = 92 }
  0x4e   : > { %8546 = dma.vmem_to_smem (!%p9084_p5), %s9091_s22, 64, %s8939_s29, [#allocation9]  }
  0x54   : > { %8921 = dma.done.wait (%p8547_p2), [#allocation4], 64  }
  0x55   : > { %8923 = vsyncadd (%p8547_p2), [#allocation4], 4294967232 }
  0x56   : > { %8925 = dma.done.wait (%p8547_p2), [#allocation6], 128  }
  0x57   : > { %8927 = vsyncadd (%p8547_p2), [#allocation6], 4294967168 }
  0x58   : > { %8929 = dma.done.wait (%p8547_p2), [#allocation9], 64  }
  0x59   : > { %8931 = vsyncadd (%p8547_p2), [#allocation9], 4294967232 }
  0x5a   : > { %654 = sfence }
  0x5b   : > { %p730_p3 = scmp.lt.s32.totalorder %s9061_s3, 1  ;;  %s14103_s0 = sld [smem:[#allocation89_spill]]  ;;  %vm882_vm0 = vcmask 1040384   ;;  %vm923_vm1 = vcmask 1046528   ;;  %vm1054_vm2 = vcmask 523264  }
  0x5c   : > { %s14105_s1 = sld [smem:[#allocation88_spill]]  ;;  %s13903_s24 = smov 64  }
  0x5d   : > { %s14412_s3 = smov (!%p730_p3, %s9061_s3), 1  ;;  %s14106_s30 = sld [smem:[#allocation91_spill]] }
  0x5e   : > { %14104 = sst [smem:[#allocation14_spill]] %s14412_s3  ;;  %s8517_s26 = smul.u32 240, %s14412_s3 }
  0x5f   : > { %s14107_s21 = sld [smem:[#allocation90_spill]]  ;;  %s14108_s5 = sld [smem:[#allocation93_spill]] }
  0x60   : > { %s14111_s6 = sld [smem:[#allocation94_spill]]  ;;  %s14112_s7 = sld [smem:[#allocation95_spill]] }
  0x61   : > { %v809_v0 = vld [vmem:[%s14103_s0 + $0x80] sm:$0xff]  ;;  %v810_v1 = vld [vmem:[%s14103_s0 + $0x88] sm:$0xff]  ;;  %v811_v5 = vld [vmem:[%s14103_s0 + $0x90] sm:$0xff]  ;;  %s14114_s13 = sld [smem:[#allocation100_spill]]  ;;  %s14115_s14 = sld [smem:[#allocation101_spill]] }
  0x62   : > { %v7792_v2 = vpack.c.bf16 %v810_v1, %v809_v0  ;;  %v793_v3 = vld [vmem:[%s14103_s0] sm:$0xff]  ;;  %v794_v4 = vld [vmem:[%s14103_s0 + $0x8] sm:$0xff]  ;;  %v812_v7 = vld [vmem:[%s14103_s0 + $0x98] sm:$0xff]  ;;  %s9191_s22 = scalar_lea.vmem %s14105_s1, %s8517_s26  ;;  %s14110_s1 = smov 64  }
  0x63   : > { %v7794_v6 = vpack.c.bf16 %v794_v4, %v793_v3  ;;  %v795_v8 = vld [vmem:[%s14103_s0 + $0x10] sm:$0xff]  ;;  %v796_v9 = vld [vmem:[%s14103_s0 + $0x18] sm:$0xff]  ;;  %v7796_v10 = vpack.c.bf16 %v812_v7, %v811_v5  ;;  %v813_v11 = vld [vmem:[%s14103_s0 + $0xa0] sm:$0xff]  ;;  %s11717_s27 = sld [smem:[#allocation2]]  ;;  %s11719_s25 = sld [smem:[#allocation3]] }
  0x64   : > { %7793 = vmatprep.subr.bf16.mxu0 %v7792_v2  ;;  %v814_v12 = vld [vmem:[%s14103_s0 + $0xa8] sm:$0xff]  ;;  %v7798_v13 = vpack.c.bf16 %v796_v9, %v795_v8  ;;  %v797_v15 = vld [vmem:[%s14103_s0 + $0x20] sm:$0xff]  ;;  %v815_v17 = vld [vmem:[%s14103_s0 + $0xb0] sm:$0xff]  ;;  %s11721_s4 = sld [smem:[#allocation5]]  ;;  %s11723_s28 = sld [smem:[#allocation3 + $0x1]] }
  0x65   : > { %7795 = vmatpush3.bf16.msra.mxu0 %v7794_v6  ;;  %v7800_v14 = vpack.c.bf16 %v814_v12, %v813_v11  ;;  %v798_v16 = vld [vmem:[%s14103_s0 + $0x28] sm:$0xff]  ;;  %v816_v18 = vld [vmem:[%s14103_s0 + $0xb8] sm:$0xff]  ;;  %v799_v19 = vld [vmem:[%s14103_s0 + $0x30] sm:$0xff]  ;;  %s11725_s26 = sld [smem:[#allocation5 + $0x1]]  ;;  %s11729_s29 = sld [smem:[#allocation5 + $0x2]] }
  0x66   : > { %7797 = vmatprep.subr.bf16.mxu0 %v7796_v10  ;;  %v800_v20 = vld [vmem:[%s14103_s0 + $0x38] sm:$0xff]  ;;  %v9204_v22 = vld [vmem:[%s9191_s22 + $0x20] sm:$0xff]  ;;  %v818_v24 = vld [vmem:[%s14103_s0 + $0xc8] sm:$0xff]  ;;  %v7802_v30 = vpack.c.bf16 %v798_v16, %v797_v15  ;;  %v7804_v36 = vpack.c.bf16 %v816_v18, %v815_v17  ;;  %s11731_s9 = sld [smem:[#allocation3 + $0x3]]  ;;  %s11737_s2 = sld [smem:[#allocation5 + $0x4]] }
  0x67   : > { %v766_v21 = vld [vmem:[%s9191_s22 + $0x18] sm:$0xff]  ;;  %v817_v23 = vld [vmem:[%s14103_s0 + $0xc0] sm:$0xff]  ;;  %v9213_v25 = vld [vmem:[%s9191_s22 + $0x8] sm:$0xff]  ;;  %v887_v27 = vrot.slane %v9204_v22, 7  ;;  %v7806_v37 = vpack.c.bf16 %v800_v20, %v799_v19  ;;  %s11733_s8 = sld [smem:[#allocation5 + $0x3]]  ;;  %s11749_s10 = sld [smem:[#allocation3 + $0x5]] }
  0x68   : > { %v886_v26 = vrot.slane %v766_v21, 7  ;;  %v769_v28 = vld [vmem:[%s9191_s22 + $0x30] sm:$0xff]  ;;  %v9218_v29 = vld [vmem:[%s9191_s22 + $0x38] sm:$0xff]  ;;  %v772_v33 = vld [vmem:[%s9191_s22 + $0x48] sm:$0xff]  ;;  %v7808_v56 = vpack.c.bf16 %v818_v24, %v817_v23  ;;  %v927_v23 = vrot.slane %v9204_v22, 1  ;;  %s11751_s11 = sld [smem:[#allocation5 + $0x5]] }
  0x69   : > { %7799 = vmatpush3.bf16.msra.mxu0 %v7798_v13  ;;  %v889_v31 = vrot.slane %v769_v28, 7  ;;  %v890_v32 = vrot.slane %v9218_v29, 7  ;;  %v9223_v34 = vld [vmem:[%s9191_s22 + $0x50] sm:$0xff]  ;;  %v775_v35 = vld [vmem:[%s9191_s22 + $0x60] sm:$0xff]  ;;  %v892_v39 = vrot.slane %v772_v33, 7  ;;  %v9231_v41 = vld [vmem:[%s9191_s22 + $0x68] sm:$0xff] }
  0x6a   : > { %7801 = vmatprep.subr.bf16.mxu0 %v7800_v14  ;;  %v9227_v38 = vsel %vm882_vm0, %v886_v26, %v887_v27  ;;  %v893_v40 = vrot.slane %v9223_v34, 7  ;;  %v895_v42 = vrot.slane %v775_v35, 7  ;;  %v778_v43 = vld [vmem:[%s9191_s22 + $0x78] sm:$0xff]  ;;  %v9235_v44 = vld [vmem:[%s9191_s22 + $0x80] sm:$0xff]  ;;  %v896_v47 = vrot.slane %v9231_v41, 7  ;;  %v781_v49 = vld [vmem:[%s9191_s22 + $0x90] sm:$0xff] }
  0x6b   : > { %v8571_v45 = vpack.i.bf16 %v9213_v25, %v9227_v38  ;;  %v9240_v46 = vsel %vm882_vm0, %v889_v31, %v890_v32  ;;  %v898_v48 = vrot.slane %v778_v43, 7  ;;  %v9245_v50 = vld [vmem:[%s9191_s22 + $0x98] sm:$0xff]  ;;  %v784_v51 = vld [vmem:[%s9191_s22 + $0xa8] sm:$0xff]  ;;  %v899_v53 = vrot.slane %v9235_v44, 7  ;;  %v9253_v55 = vld [vmem:[%s9191_s22 + $0xb0] sm:$0xff]  ;;  %s11753_s12 = sld [smem:[#allocation7 + $0x5]] }
  0x6c   : > { %v9249_v52 = vsel %vm882_vm0, %v892_v39, %v893_v40  ;;  %v901_v54 = vrot.slane %v781_v49, 7  ;;  %v801_v57 = vld [vmem:[%s14103_s0 + $0x40] sm:$0xff]  ;;  %v8576_v58 = vpack.i.bf16 %v9204_v22, %v9240_v46  ;;  %v9264_v60 = vsel %vm882_vm0, %v895_v42, %v896_v47  ;;  %v9269_v63 = vld [vmem:[%s9191_s22 + $0xc8] sm:$0xff]  ;;  %v819_v12 = vld [vmem:[%s14103_s0 + $0xd0] sm:$0xff]  ;;  %s11761_s23 = sld [smem:[#allocation3 + $0x7]]  ;;  %s11767_s19 = sld [smem:[#allocation3 + $0x8]] }
  0x6d   : > { %7803 = vmatpush3.bf16.msra.mxu0 %v7802_v30  ;;  %8572 = vrot.lane.b32.xlu0 %v8571_v45, %s13903_s24  ;;  %v8581_v59 = vpack.i.bf16 %v9218_v29, %v9249_v52  ;;  %v902_v61 = vrot.slane %v9245_v50, 7  ;;  %v787_v62 = vld [vmem:[%s9191_s22 + $0xc0] sm:$0xff]  ;;  %v802_v0 = vld [vmem:[%s14103_s0 + $0x48] sm:$0xff]  ;;  %v9275_v1 = vsel %vm882_vm0, %v898_v48, %v899_v53  ;;  %v904_v2 = vrot.slane %v784_v51, 7  ;;  %v820_v14 = vld [vmem:[%s14103_s0 + $0xd8] sm:$0xff]  ;;  %s11763_s20 = sld [smem:[#allocation5 + $0x7]] }
  0x6e   : > { %7805 = vmatprep.subr.bf16.mxu0 %v7804_v36  ;;  %v905_v3 = vrot.slane %v9253_v55, 7  ;;  %v8586_v4 = vpack.i.bf16 %v9223_v34, %v9264_v60  ;;  %v958_v6 = vrot.slane %v787_v62, 7  ;;  %v959_v7 = vrot.slane %v9269_v63, 7  ;;  %v768_v11 = vld [vmem:[%s9191_s22 + $0x28] sm:$0xff]  ;;  %v803_v15 = vld [vmem:[%s14103_s0 + $0x50] sm:$0xff]  ;;  %v804_v16 = vld [vmem:[%s14103_s0 + $0x58] sm:$0xff] }
  0x6f   : > { %8582 = vrot.lane.b32.xlu1 %v8581_v59, %s13903_s24  ;;  %v9282_v5 = vsel %vm882_vm0, %v901_v54, %v902_v61  ;;  %v7810_v8 = vpack.c.bf16 %v802_v0, %v801_v57  ;;  %v8591_v9 = vpack.i.bf16 %v9231_v41, %v9275_v1  ;;  %v821_v18 = vld [vmem:[%s14103_s0 + $0xe0] sm:$0xff]  ;;  %v822_v19 = vld [vmem:[%s14103_s0 + $0xe8] sm:$0xff]  ;;  %v928_v24 = vrot.slane %v768_v11, 1  ;;  %v774_v32 = vld [vmem:[%s9191_s22 + $0x58] sm:$0xff]  ;;  %s11765_s17 = sld [smem:[#allocation7 + $0x7]]  ;;  %s11769_s16 = sld [smem:[#allocation5 + $0x8]] }
  0x70   : > { %v9289_v10 = vsel %vm882_vm0, %v904_v2, %v905_v3  ;;  %v8596_v13 = vpack.i.bf16 %v9235_v44, %v9282_v5  ;;  %v9308_v17 = vsel %vm882_vm0, %v958_v6, %v959_v7  ;;  %v771_v21 = vld [vmem:[%s9191_s22 + $0x40] sm:$0xff]  ;;  %v7812_v26 = vpack.c.bf16 %v820_v14, %v819_v12  ;;  %v806_v30 = vld [vmem:[%s14103_s0 + $0x68] sm:$0xff]  ;;  %v823_v35 = vld [vmem:[%s14103_s0 + $0xf0] sm:$0xff]  ;;  %s11771_s18 = sld [smem:[#allocation7 + $0x8]]  ;;  %s11773_s15 = sld [smem:[#allocation3 + $0x9]] }
  0x71   : > { %7807 = vmatpush3.bf16.msra.mxu0 %v7806_v37  ;;  %8577 = vrot.lane.b32.xlu0 %v8576_v58, %s13903_s24  ;;  %v8601_v20 = vpack.i.bf16 %v9245_v50, %v9289_v10  ;;  %v7814_v27 = vpack.c.bf16 %v804_v16, %v803_v15  ;;  %v805_v28 = vld [vmem:[%s14103_s0 + $0x60] sm:$0xff]  ;;  %v8606_v31 = vpack.i.bf16 %v9253_v55, %v9308_v17  ;;  %v824_v36 = vld [vmem:[%s14103_s0 + $0xf8] sm:$0xff]  ;;  %v930_v37 = vrot.slane %v9218_v29, 1  ;;  %v777_v40 = vld [vmem:[%s9191_s22 + $0x70] sm:$0xff]  ;;  %s11777_s3 = sld [smem:[#allocation7 + $0x9]] }
  0x72   : > { %7809 = vmatprep.subr.bf16.mxu0 %v7808_v56  ;;  %v7816_v33 = vpack.c.bf16 %v822_v19, %v821_v18  ;;  %v931_v39 = vrot.slane %v771_v21, 1  ;;  %v7818_v42 = vpack.c.bf16 %v806_v30, %v805_v28  ;;  %v9341_v43 = vsel %vm923_vm1, %v927_v23, %v928_v24  ;;  %v780_v48 = vld [vmem:[%s9191_s22 + $0x88] sm:$0xff]  ;;  %v807_v51 = vld [vmem:[%s14103_s0 + $0x70] sm:$0xff]  ;;  %v808_v53 = vld [vmem:[%s14103_s0 + $0x78] sm:$0xff] }
  0x73   : > { %8587 = vrot.lane.b32.xlu1 %v8586_v4, %s13903_s24  ;;  %v933_v45 = vrot.slane %v9223_v34, 1  ;;  %v934_v47 = vrot.slane %v774_v32, 1  ;;  %v7820_v49 = vpack.c.bf16 %v824_v36, %v823_v35  ;;  %v786_v54 = vld [vmem:[%s9191_s22 + $0xb8] sm:$0xff]  ;;  %v841_v56 = vld [vmem:[%s14103_s0 + $0x180] sm:$0xff]  ;;  %v842_v57 = vld [vmem:[%s14103_s0 + $0x188] sm:$0xff]  ;;  %v936_v59 = vrot.slane %v9231_v41, 1 }
  0x74   : > { %v9360_v58 = vsel %vm923_vm1, %v930_v37, %v931_v39  ;;  %v937_v61 = vrot.slane %v777_v40, 1  ;;  %v939_v62 = vrot.slane %v9235_v44, 1  ;;  %v940_v0 = vrot.slane %v780_v48, 1  ;;  %v783_v2 = vld [vmem:[%s9191_s22 + $0xa0] sm:$0xff]  ;;  %v789_v3 = vld [vmem:[%s9191_s22 + $0xd0] sm:$0xff]  ;;  %v826_v35 = vld [vmem:[%s14103_s0 + $0x108] sm:$0xff] }
  0x75   : > { %7811 = vmatpush3.bf16.msra.mxu0 %v7810_v8  ;;  %8592 = vrot.lane.b32.xlu0 %v8591_v9, %s13903_s24  ;;  %v7822_v4 = vpack.c.bf16 %v808_v53, %v807_v51  ;;  %v9369_v6 = vsel %vm923_vm1, %v933_v45, %v934_v47  ;;  %v945_v7 = vrot.slane %v9253_v55, 1  ;;  %v946_v8 = vrot.slane %v786_v54, 1  ;;  %v844_v40 = vld [vmem:[%s14103_s0 + $0x198] sm:$0xff]  ;;  %14116 = sst [smem:[#allocation16_spill]] %s11763_s20 }
  0x76   : > { %7813 = vmatprep.subr.bf16.mxu0 %v7812_v26  ;;  %v7824_v9 = vpack.c.bf16 %v842_v57, %v841_v56  ;;  %v942_v11 = vrot.slane %v9245_v50, 1  ;;  %v9376_v12 = vsel %vm923_vm1, %v936_v59, %v937_v61  ;;  %v962_v14 = vrot.slane %v9269_v63, 1  ;;  %v765_v26 = vld [vmem:[%s9191_s22 + $0x10] sm:$0xff]  ;;  %v828_v57 = vld [vmem:[%s14103_s0 + $0x118] sm:$0xff]  ;;  %v845_v59 = vld [vmem:[%s14103_s0 + $0x1a0] sm:$0xff]  ;;  %14117 = sst [smem:[#allocation17_spill]] %s11765_s17 }
  0x77   : > { %8597 = vrot.lane.b32.xlu1 %v8596_v13, %s13903_s24  ;;  %v943_v13 = vrot.slane %v783_v2, 1  ;;  %v963_v15 = vrot.slane %v789_v3, 1  ;;  %v9382_v16 = vsel %vm923_vm1, %v939_v62, %v940_v0  ;;  %v9385_v18 = vsel %vm923_vm1, %v945_v7, %v946_v8  ;;  %v846_v61 = vld [vmem:[%s14103_s0 + $0x1a8] sm:$0xff]  ;;  %14118 = sst [smem:[#allocation18_spill]] %s11773_s15  ;;  %s11779_s17 = sld [smem:[#allocation3 + $0xa]] }
  0x78   : > { %v8611_v23 = vpack.i.bf16 %v9385_v18, %v9269_v63  ;;  %v884_v28 = vrot.slane %v9213_v25, 7  ;;  %v924_v30 = vrot.slane %v9213_v25, 1  ;;  %v843_v25 = vld [vmem:[%s14103_s0 + $0x190] sm:$0xff]  ;;  %v7832_v8 = vpack.c.bf16 %v846_v61, %v845_v59  ;;  %s11781_s20 = sld [smem:[#allocation5 + $0xa]] }
  0x79   : > { %8602 = vrot.lane.b32.xlu0 %v8601_v20, %s13903_s24  ;;  %7815 = vmatpush3.bf16.msra.mxu0 %v7814_v27  ;;  %v9390_v19 = vsel %vm923_vm1, %v942_v11, %v943_v13  ;;  %v9393_v20 = vld [vmem:[%s9191_s22 + $0xe0] sm:$0xff]  ;;  %v9396_v21 = vsel %vm923_vm1, %v962_v14, %v963_v15  ;;  %v7828_v56 = vpack.c.bf16 %v844_v40, %v843_v25  ;;  %s11787_s15 = sld [smem:[#allocation7 + $0xa]] }
  0x7a   : > { %7817 = vmatprep.subr.bf16.mxu0 %v7816_v33  ;;  %v8616_v24 = vpack.i.bf16 %v9396_v21, %v9393_v20  ;;  %v763_v27 = vld [vmem:[%s9191_s22] sm:$0xff] }
  0x7b   : > { %8607 = vrot.lane.b32.xlu1 %v8606_v31, %s13903_s24  ;;  %v925_v31 = vrot.slane %v765_v26, 1  ;;  %v883_v32 = vrot.slane %v763_v27, 7  ;;  %v825_v33 = vld [vmem:[%s14103_s0 + $0x100] sm:$0xff] }
  0x7c   : > { %v7826_v47 = vpack.c.bf16 %v826_v35, %v825_v33  ;;  %v829_v15 = vld [vmem:[%s14103_s0 + $0x120] sm:$0xff]  ;;  %v831_v33 = vld [vmem:[%s14103_s0 + $0x130] sm:$0xff]  ;;  %v832_v35 = vld [vmem:[%s14103_s0 + $0x138] sm:$0xff] }
  0x7d   : > { %1024 = vrot.lane.b32.xlu0 %v9341_v43, %s13903_s24  ;;  %7819 = vmatpush3.bf16.msra.mxu0 %v7818_v42  ;;  %v926_v37 = vsel %vm923_vm1, %v924_v30, %v925_v31  ;;  %v885_v39 = vsel %vm882_vm0, %v883_v32, %v884_v28  ;;  %v7838_v40 = vpack.c.bf16 %v832_v35, %v831_v33  ;;  %v857_v33 = vld [vmem:[%s14103_s0 + $0x200] sm:$0xff] }
  0x7e   : > { %7821 = vmatprep.subr.bf16.mxu0 %v7820_v49  ;;  %v827_v49 = vld [vmem:[%s14103_s0 + $0x110] sm:$0xff] }
  0x7f   : > { %1026 = vrot.lane.b32.xlu1 %v9360_v58, %s13903_s24 }
  0x81   : > { %1028 = vrot.lane.b32.xlu0 %v9369_v6, %s13903_s24  ;;  %7823 = vmatpush3.bf16.msra.mxu0 %v7822_v4  ;;  %v7830_v4 = vpack.c.bf16 %v828_v57, %v827_v49  ;;  %v834_v49 = vld [vmem:[%s14103_s0 + $0x148] sm:$0xff] }
  0x82   : > { %7825 = vmatprep.subr.bf16.mxu0 %v7824_v9 }
  0x83   : > { %1030 = vrot.lane.b32.xlu1 %v9376_v12, %s13903_s24 }
  0x85   : > { %1032 = vrot.lane.b32.xlu0 %v9382_v16, %s13903_s24 }
  0x87   : > { %1034 = vrot.lane.b32.xlu1 %v9390_v19, %s13903_s24 }
  0x89   : > { %8612 = vrot.lane.b32.xlu0 %v8611_v23, %s13903_s24  ;;  %v830_v23 = vld [vmem:[%s14103_s0 + $0x128] sm:$0xff] }
  0x8a   : > { %v7834_v28 = vpack.c.bf16 %v830_v23, %v829_v15  ;;  %v837_v15 = vld [vmem:[%s14103_s0 + $0x160] sm:$0xff]  ;;  %v838_v23 = vld [vmem:[%s14103_s0 + $0x168] sm:$0xff] }
  0x8b   : > { %8617 = vrot.lane.b32.xlu1 %v8616_v24, %s13903_s24 }
  0xdf   : > { %v8573_v36 = vpop.permute.xlu0 %8572 }
  0xe0   : > { %v8575_v42 = vunpack.i.h.bf16 %v8573_v36  ;;  %v8574_v45 = vunpack.i.l.bf16 %v8573_v36 }
  0xe1   : > { %v8583_v48 = vpop.permute.xlu1 %8582 }
  0xe2   : > { %v1063_v51 = vsel %vm1054_vm2, %v926_v37, %v8574_v45  ;;  %v1055_v53 = vsel %vm1054_vm2, %v885_v39, %v8575_v42  ;;  %v8584_v54 = vunpack.i.l.bf16 %v8583_v48  ;;  %v8585_v3 = vunpack.i.h.bf16 %v8583_v48  ;;  %v850_v37 = vld [vmem:[%s14103_s0 + $0x1c8] sm:$0xff]  ;;  %v833_v48 = vld [vmem:[%s14103_s0 + $0x140] sm:$0xff] }
  0xe3   : > { %v8578_v62 = vpop.permute.xlu0 %8577  ;;  %1167 = vmatprep.mubr.f32.mxu0 %v1063_v51  ;;  %v7842_v57 = vpack.c.bf16 %v834_v49, %v833_v48  ;;  %v862_v48 = vld [vmem:[%s14103_s0 + $0x228] sm:$0xff] }
  0xe4   : > { %v8580_v0 = vunpack.i.h.bf16 %v8578_v62  ;;  %v8579_v2 = vunpack.i.l.bf16 %v8578_v62  ;;  %1168 = vmatmul.mubr.f32.vlgmr.msra.gmra.mrb[0].mxu0 %v1055_v53  ;;  %v1065_v14 = vsel %vm1054_vm2, %v9360_v58, %v8584_v54  ;;  %v9460_v27 = vsel %vm1054_vm2, %v9240_v46, %v8585_v3  ;;  %v849_v46 = vld [vmem:[%s14103_s0 + $0x1c0] sm:$0xff]  ;;  %v852_v53 = vld [vmem:[%s14103_s0 + $0x1d8] sm:$0xff] }
  0xe5   : > { %7827 = vmatpush3.bf16.msra.mxu0 %v7826_v47  ;;  %v8588_v7 = vpop.permute.xlu1 %8587  ;;  %v7840_v47 = vpack.c.bf16 %v850_v37, %v849_v46 }
  0xe6   : > { %v1064_v9 = vsel %vm1054_vm2, %v9341_v43, %v8579_v2  ;;  %7829 = vmatprep.subr.bf16.mxu0 %v7828_v56  ;;  %v1056_v11 = vsel %vm1054_vm2, %v9227_v38, %v8580_v0  ;;  %v8589_v13 = vunpack.i.l.bf16 %v8588_v7  ;;  %v847_v43 = vld [vmem:[%s14103_s0 + $0x1b0] sm:$0xff]  ;;  %v848_v38 = vld [vmem:[%s14103_s0 + $0x1b8] sm:$0xff]  ;;  %v8590_v26 = vunpack.i.h.bf16 %v8588_v7 }
  0xe7   : > { %1172 = vmatprep.mubr.f32.mxu0 %v1064_v9  ;;  %v8593_v24 = vpop.permute.xlu0 %8592  ;;  %v7836_v32 = vpack.c.bf16 %v848_v38, %v847_v43  ;;  %v835_v0 = vld [vmem:[%s14103_s0 + $0x150] sm:$0xff]  ;;  %v836_v2 = vld [vmem:[%s14103_s0 + $0x158] sm:$0xff] }
  0xe8   : > { %1173 = vmatmul.mubr.f32.gmra.mrb[2].mxu0 %v1056_v11  ;;  %v8594_v30 = vunpack.i.l.bf16 %v8593_v24  ;;  %v1066_v31 = vsel %vm1054_vm2, %v9369_v6, %v8589_v13  ;;  %v8595_v39 = vunpack.i.h.bf16 %v8593_v24  ;;  %v9479_v25 = vsel %vm1054_vm2, %v9249_v52, %v8590_v26  ;;  %v851_v52 = vld [vmem:[%s14103_s0 + $0x1d0] sm:$0xff] }
  0xe9   : > { %7831 = vmatpush3.bf16.msra.mxu0 %v7830_v4  ;;  %1177 = vmatprep.mubr.f32.mxu0 %v1065_v14  ;;  %v8598_v36 = vpop.permute.xlu1 %8597  ;;  %v7844_v62 = vpack.c.bf16 %v852_v53, %v851_v52  ;;  %v854_v4 = vld [vmem:[%s14103_s0 + $0x1e8] sm:$0xff]  ;;  %v7846_v9 = vpack.c.bf16 %v836_v2, %v835_v0  ;;  %v855_v24 = vld [vmem:[%s14103_s0 + $0x1f0] sm:$0xff]  ;;  %v7850_v26 = vpack.c.bf16 %v838_v23, %v837_v15  ;;  %v864_v52 = vld [vmem:[%s14103_s0 + $0x238] sm:$0xff] }
  0xea   : > { %7833 = vmatprep.subr.bf16.mxu0 %v7832_v8  ;;  %v8599_v42 = vunpack.i.l.bf16 %v8598_v36  ;;  %v1067_v45 = vsel %vm1054_vm2, %v9376_v12, %v8594_v30  ;;  %v8600_v54 = vunpack.i.h.bf16 %v8598_v36  ;;  %v9498_v56 = vsel %vm1054_vm2, %v9264_v60, %v8595_v39  ;;  %v853_v60 = vld [vmem:[%s14103_s0 + $0x1e0] sm:$0xff]  ;;  %v859_v39 = vld [vmem:[%s14103_s0 + $0x210] sm:$0xff]  ;;  %v1445_v23 = vld [vmem:[%s14106_s30 + $0x18] sm:$0xff] }
  0xeb   : > { %v8603_v51 = vpop.permute.xlu0 %8602  ;;  %v7848_v14 = vpack.c.bf16 %v854_v4, %v853_v60  ;;  %v1444_v15 = vld [vmem:[%s14106_s30 + $0x10] sm:$0xff] }
  0xec   : > { %1178 = vmatmul.mubr.f32.gmra.mrb[4].mxu0 %v9460_v27  ;;  %v8604_v59 = vunpack.i.l.bf16 %v8603_v51  ;;  %v1068_v61 = vsel %vm1054_vm2, %v9382_v16, %v8599_v42  ;;  %v8605_v7 = vunpack.i.h.bf16 %v8603_v51  ;;  %v1060_v8 = vsel %vm1054_vm2, %v9275_v1, %v8600_v54  ;;  %v856_v1 = vld [vmem:[%s14103_s0 + $0x1f8] sm:$0xff]  ;;  %v863_v51 = vld [vmem:[%s14103_s0 + $0x230] sm:$0xff] }
  0xed   : > { %7835 = vmatpush3.bf16.msra.mxu0 %v7834_v28  ;;  %1182 = vmatprep.mubr.f32.mxu0 %v1066_v31  ;;  %v8608_v3 = vpop.permute.xlu1 %8607  ;;  %v7852_v30 = vpack.c.bf16 %v856_v1, %v855_v24  ;;  %v839_v31 = vld [vmem:[%s14103_s0 + $0x170] sm:$0xff]  ;;  %v7868_v54 = vpack.c.bf16 %v864_v52, %v863_v51  ;;  %v1462_v24 = vld [vmem:[%s14106_s30 + $0xa0] sm:$0xff]  ;;  %v1463_v1 = vld [vmem:[%s14106_s30 + $0xa8] sm:$0xff] }
  0xee   : > { %7837 = vmatprep.subr.bf16.mxu0 %v7836_v32  ;;  %v8609_v11 = vunpack.i.l.bf16 %v8608_v3  ;;  %v1069_v13 = vsel %vm1054_vm2, %v9390_v19, %v8604_v59  ;;  %v8610_v43 = vunpack.i.h.bf16 %v8608_v3  ;;  %v1061_v38 = vsel %vm1054_vm2, %v9282_v5, %v8605_v7  ;;  %v840_v32 = vld [vmem:[%s14103_s0 + $0x178] sm:$0xff]  ;;  %v858_v5 = vld [vmem:[%s14103_s0 + $0x208] sm:$0xff]  ;;  %v1494_v52 = vld [vmem:[%s14106_s30 + $0x1a0] sm:$0xff] }
  0xef   : > { %v7854_v36 = vpack.c.bf16 %v840_v32, %v839_v31  ;;  %v1025_v46 = vpop.permute.xlu0 %1024  ;;  %v7856_v37 = vpack.c.bf16 %v858_v5, %v857_v33  ;;  %v968_v3 = vrot.slane %v9393_v20, 7  ;;  %v1490_v31 = vld [vmem:[%s14106_s30 + $0x180] sm:$0xff]  ;;  %v1491_v32 = vld [vmem:[%s14106_s30 + $0x188] sm:$0xff]  ;;  %v1465_v33 = vld [vmem:[%s14106_s30 + $0xb8] sm:$0xff] }
  0xf0   : > { %1183 = vmatmul.mubr.f32.gmra.mrb[6].mxu0 %v9479_v25  ;;  %v1070_v28 = vsel %vm1054_vm2, %v9385_v18, %v8609_v11  ;;  %v1062_v35 = vsel %vm1054_vm2, %v9289_v10, %v8610_v43  ;;  %v1071_v42 = vsel %vm1054_vm2, %v9204_v22, %v1025_v46  ;;  %v7878_v43 = vpack.c.bf16 %v1445_v23, %v1444_v15 }
  0xf1   : > { %7839 = vmatpush3.bf16.msra.mxu0 %v7838_v40  ;;  %1187 = vmatprep.mubr.f32.mxu0 %v1067_v45  ;;  %v860_v40 = vld [vmem:[%s14103_s0 + $0x218] sm:$0xff]  ;;  %v1027_v10 = vpop.permute.xlu1 %1026  ;;  %v7904_v5 = vpack.c.bf16 %v1491_v32, %v1490_v31 }
  0xf2   : > { %7841 = vmatprep.subr.bf16.mxu0 %v7840_v47  ;;  %v7860_v45 = vpack.c.bf16 %v860_v40, %v859_v39  ;;  %v861_v47 = vld [vmem:[%s14103_s0 + $0x220] sm:$0xff]  ;;  %v1492_v39 = vld [vmem:[%s14106_s30 + $0x190] sm:$0xff]  ;;  %v1493_v40 = vld [vmem:[%s14106_s30 + $0x198] sm:$0xff]  ;;  %s11741_s0 = sld [smem:[#allocation7 + $0x1]] }
  0xf3   : > { %v1029_v49 = vpop.permute.xlu0 %1028  ;;  %v7864_v22 = vpack.c.bf16 %v862_v48, %v861_v47  ;;  %v1449_v47 = vld [vmem:[%s14106_s30 + $0x38] sm:$0xff]  ;;  %v7908_v48 = vpack.c.bf16 %v1493_v40, %v1492_v39  ;;  %v6634_v39 = vld [vmem:[%s14107_s21] ss:$0 sm:$0xff]  ;;  %s11735_s21 = sld [smem:[#allocation3 + $0x4]] }
  0xf4   : > { %1188 = vmatmul.mubr.f32.gmra.mrb[8].mxu0 %v9498_v56 }
  0xf5   : > { %7843 = vmatpush3.bf16.msra.mxu0 %v7842_v57  ;;  %1192 = vmatprep.mubr.f32.mxu0 %v1068_v61 }
  0xf6   : > { %7845 = vmatprep.subr.bf16.mxu0 %v7844_v62  ;;  %v790_v62 = vld [vmem:[%s9191_s22 + $0xd8] sm:$0xff] }
  0xf7   : > { %v1033_v53 = vpop.permute.xlu0 %1032  ;;  %v967_v2 = vrot.slane %v790_v62, 7 }
  0xf8   : > { %1193 = vmatmul.mubr.f32.gmra.mrb[10].mxu0 %v1060_v8 }
  0xf9   : > { %7847 = vmatpush3.bf16.msra.mxu0 %v7846_v9  ;;  %1197 = vmatprep.mubr.f32.mxu0 %v1069_v13 }
  0xfa   : > { %7849 = vmatprep.subr.bf16.mxu0 %v7848_v14 }
  0xfb   : > { %v8613_v61 = vpop.permute.xlu0 %8612 }
  0xfc   : > { %1198 = vmatmul.mubr.f32.gmra.mrb[12].mxu0 %v1061_v38  ;;  %v8615_v60 = vunpack.i.h.bf16 %v8613_v61 }
  0xfd   : > { %7851 = vmatpush3.bf16.msra.mxu0 %v7850_v26  ;;  %1202 = vmatprep.mubr.f32.mxu0 %v1070_v28  ;;  %v1447_v26 = vld [vmem:[%s14106_s30 + $0x28] sm:$0xff]  ;;  %v7880_v28 = vpack.c.bf16 %v1463_v1, %v1462_v24 }
  0xfe   : > { %7853 = vmatprep.subr.bf16.mxu0 %v7852_v30  ;;  %v1077_v9 = vsel %vm1054_vm2, %v9253_v55, %v8615_v60  ;;  %v973_v55 = vrot.slane %v9393_v20, 1  ;;  %v1460_v20 = vld [vmem:[%s14106_s30 + $0x90] sm:$0xff] }
  0xff   : > { %v1464_v30 = vld [vmem:[%s14106_s30 + $0xb0] sm:$0xff] }
 0x100   : > { %1203 = vmatmul.mubr.f32.gmra.mrb[14].mxu0 %v1062_v35 }
 0x101   : > { %7855 = vmatpush3.bf16.msra.mxu0 %v7854_v36  ;;  %1272 = vmatprep.mubr.f32.mxu0 %v9460_v27  ;;  %v1072_v27 = vsel %vm1054_vm2, %v9218_v29, %v1027_v10  ;;  %v1031_v29 = vpop.permute.xlu1 %1030  ;;  %v1475_v36 = vld [vmem:[%s14106_s30 + $0x108] sm:$0xff]  ;;  %v7884_v10 = vpack.c.bf16 %v1465_v33, %v1464_v30 }
 0x102   : > { %7857 = vmatprep.subr.bf16.mxu0 %v7856_v37  ;;  %v1074_v57 = vsel %vm1054_vm2, %v9231_v41, %v1031_v29  ;;  %v1478_v29 = vld [vmem:[%s14106_s30 + $0x120] sm:$0xff] }
 0x104   : > { %1273 = vmatmul.mubr.f32.vlgmr.msra.gmra.mrb[16].mxu0 %v1071_v42  ;;  %v1476_v42 = vld [vmem:[%s14106_s30 + $0x110] sm:$0xff] }
 0x105   : > { %7859 = vmatpush3.bf16.msra.mxu0 %v7856_v37  ;;  %1277 = vmatprep.mubr.f32.mxu0 %v9479_v25  ;;  %v1073_v25 = vsel %vm1054_vm2, %v9223_v34, %v1029_v49  ;;  %v1035_v59 = vpop.permute.xlu1 %1034  ;;  %v1075_v34 = vsel %vm1054_vm2, %v9235_v44, %v1033_v53  ;;  %v1466_v49 = vld [vmem:[%s14106_s30 + $0xc0] sm:$0xff]  ;;  %v1479_v53 = vld [vmem:[%s14106_s30 + $0x128] sm:$0xff] }
 0x106   : > { %7861 = vmatprep.subr.bf16.mxu0 %v7860_v45  ;;  %v1076_v41 = vsel %vm1054_vm2, %v9245_v50, %v1035_v59  ;;  %v1451_v59 = vld [vmem:[%s14106_s30 + $0x48] sm:$0xff] }
 0x108   : > { %1278 = vmatmul.mubr.f32.gmra.mrb[18].mxu0 %v1072_v27  ;;  %v1477_v27 = vld [vmem:[%s14106_s30 + $0x118] sm:$0xff] }
 0x109   : > { %1282 = vmatprep.mubr.f32.mxu0 %v9498_v56  ;;  %7863 = vmatpush3.bf16.msra.mxu0 %v7860_v45  ;;  %v8614_v56 = vunpack.i.l.bf16 %v8613_v61  ;;  %v8618_v0 = vpop.permute.xlu1 %8617  ;;  %v1448_v45 = vld [vmem:[%s14106_s30 + $0x30] sm:$0xff]  ;;  %v7910_v51 = vpack.c.bf16 %v1477_v27, %v1476_v42 }
 0x10a   : > { %7865 = vmatprep.subr.bf16.mxu0 %v7864_v22  ;;  %v8619_v4 = vunpack.i.l.bf16 %v8618_v0  ;;  %v8620_v44 = vunpack.i.h.bf16 %v8618_v0  ;;  %v1496_v0 = vld [vmem:[%s14106_s30 + $0x1b0] sm:$0xff] }
 0x10b   : > { %v1079_v7 = vsel %vm1054_vm2, %v9308_v17, %v8614_v56  ;;  %v792_v17 = vld [vmem:[%s9191_s22 + $0xe8] sm:$0xff]  ;;  %v7914_v56 = vpack.c.bf16 %v1479_v53, %v1478_v29  ;;  %s14109_s22 = sld [smem:[#allocation92_spill]] }
 0x10c   : > { %1283 = vmatmul.mubr.f32.gmra.mrb[20].mxu0 %v1073_v25  ;;  %v1078_v50 = vsel %vm1054_vm2, %v9269_v63, %v8620_v44  ;;  %v974_v63 = vrot.slane %v792_v17, 1  ;;  %v1495_v25 = vld [vmem:[%s14106_s30 + $0x1a8] sm:$0xff]  ;;  %v1452_v44 = vld [vmem:[%s14106_s30 + $0x50] sm:$0xff] }
 0x10d   : > { %1287 = vmatprep.mubr.f32.mxu0 %v1060_v8  ;;  %7867 = vmatpush3.bf16.msra.mxu0 %v7864_v22  ;;  %v969_v8 = vsel %vm882_vm0, %v967_v2, %v968_v3  ;;  %v1467_v22 = vld [vmem:[%s14106_s30 + $0xc8] sm:$0xff]  ;;  %v7912_v61 = vpack.c.bf16 %v1495_v25, %v1494_v52  ;;  %v1497_v2 = vld [vmem:[%s14106_s30 + $0x1b8] sm:$0xff] }
 0x10e   : > { %7869 = vmatprep.subr.bf16.mxu0 %v7868_v54  ;;  %v1080_v11 = vsel %vm1054_vm2, %v969_v8, %v8619_v4  ;;  %v7888_v62 = vpack.c.bf16 %v1467_v22, %v1466_v49  ;;  %v1469_v3 = vld [vmem:[%s14106_s30 + $0xd8] sm:$0xff]  ;;  %v7916_v60 = vpack.c.bf16 %v1497_v2, %v1496_v0  ;;  %v1471_v17 = vld [vmem:[%s14106_s30 + $0xe8] sm:$0xff] }
 0x10f   : > { %v1481_v4 = vld [vmem:[%s14106_s30 + $0x138] sm:$0xff] }
 0x110   : > { %1288 = vmatmul.mubr.f32.gmra.mrb[22].mxu0 %v1074_v57  ;;  %v1450_v57 = vld [vmem:[%s14106_s30 + $0x40] sm:$0xff] }
 0x111   : > { %1292 = vmatprep.mubr.f32.mxu0 %v1061_v38  ;;  %7871 = vmatpush3.bf16.msra.mxu0 %v7868_v54  ;;  %v1446_v38 = vld [vmem:[%s14106_s30 + $0x20] sm:$0xff]  ;;  %v7886_v54 = vpack.c.bf16 %v1449_v47, %v1448_v45 }
 0x112   : > { %v7882_v37 = vpack.c.bf16 %v1447_v26, %v1446_v38  ;;  %7905 = vmatprep.subr.bf16.mxu0 %v7904_v5 }
 0x114   : > { %1293 = vmatmul.mubr.f32.gmra.mrb[24].mxu0 %v1075_v34  ;;  %v1468_v34 = vld [vmem:[%s14106_s30 + $0xd0] sm:$0xff] }
 0x115   : > { %1297 = vmatprep.mubr.f32.mxu0 %v1062_v35  ;;  %v1474_v35 = vld [vmem:[%s14106_s30 + $0x100] sm:$0xff]  ;;  %v7892_v8 = vpack.c.bf16 %v1469_v3, %v1468_v34 }
 0x116   : > { %v7906_v46 = vpack.c.bf16 %v1475_v36, %v1474_v35 }
 0x118   : > { %1298 = vmatmul.mubr.f32.gmra.mrb[26].mxu0 %v1076_v41  ;;  %v1480_v41 = vld [vmem:[%s14106_s30 + $0x130] sm:$0xff] }
 0x119   : > { %1302 = vmatprep.mubr.f32.mxu0 %v1079_v7  ;;  %v7890_v7 = vpack.c.bf16 %v1451_v59, %v1450_v57 }
 0x11c   : > { %1303 = vmatmul.mubr.f32.gmra.mrb[28].mxu0 %v1077_v9  ;;  %v1453_v9 = vld [vmem:[%s14106_s30 + $0x58] sm:$0xff] }
 0x11d   : > { %1307 = vmatprep.mubr.f32.mxu0 %v1080_v11  ;;  %v7918_v11 = vpack.c.bf16 %v1481_v4, %v1480_v41 }
 0x120   : > { %1308 = vmatmul.mubr.f32.gmra.mrb[30].mxu0 %v1078_v50  ;;  %v1470_v50 = vld [vmem:[%s14106_s30 + $0xe0] sm:$0xff] }
 0x121   : > { %7649 = vmatprep.mubr.msk.f32.mxu0 %vm1054_vm2, %v9360_v58  ;;  %v975_v58 = vsel %vm923_vm1, %v973_v55, %v974_v63  ;;  %v7894_v55 = vpack.c.bf16 %v1453_v9, %v1452_v44  ;;  %v7896_v63 = vpack.c.bf16 %v1471_v17, %v1470_v50 }
 0x124   : > { %7650 = vmatmul.mubr.msk.f32.vlgmr.msra.gmra.mrb[32].mxu0 %vm1054_vm2, %v9369_v6  ;;  %v1458_v6 = vld [vmem:[%s14106_s30 + $0x80] sm:$0xff] }
 0x125   : > { %7652 = vmatprep.mubr.msk.f32.mxu0 %vm1054_vm2, %v9376_v12  ;;  %v1459_v12 = vld [vmem:[%s14106_s30 + $0x88] sm:$0xff]  ;;  %7907 = vmatpush3.bf16.msra.mxu0 %v7906_v46 }
 0x126   : > { %7909 = vmatprep.subr.bf16.mxu0 %v7908_v48 }
 0x128   : > { %7653 = vmatmul.mubr.msk.f32.gmra.mrb[34].mxu0 %vm1054_vm2, %v9382_v16  ;;  %v1442_v16 = vld [vmem:[%s14106_s30] sm:$0xff] }
 0x129   : > { %7655 = vmatprep.mubr.msk.f32.mxu0 %vm1054_vm2, %v9390_v19  ;;  %v1443_v19 = vld [vmem:[%s14106_s30 + $0x8] sm:$0xff]  ;;  %7911 = vmatpush3.bf16.msra.mxu0 %v7910_v51 }
 0x12a   : > { %v7874_v13 = vpack.c.bf16 %v1443_v19, %v1442_v16  ;;  %7913 = vmatprep.subr.bf16.mxu0 %v7912_v61 }
 0x12c   : > { %7656 = vmatmul.mubr.msk.f32.gmra.mrb[36].mxu0 %vm1054_vm2, %v9385_v18  ;;  %v7872_v18 = vpack.c.bf16 %v1459_v12, %v1458_v6  ;;  %v1455_v6 = vld [vmem:[%s14106_s30 + $0x68] sm:$0xff] }
 0x12d   : > { %7658 = vmatprep.mubr.msk.f32.mxu0 %vm1054_vm2, %v9396_v21  ;;  %v1461_v21 = vld [vmem:[%s14106_s30 + $0x98] sm:$0xff]  ;;  %7915 = vmatpush3.bf16.msra.mxu0 %v7914_v56 }
 0x12e   : > { %v7876_v14 = vpack.c.bf16 %v1461_v21, %v1460_v20  ;;  %7873 = vmatprep.subr.bf16.mxu1 %v7872_v18  ;;  %7917 = vmatprep.subr.bf16.mxu0 %v7916_v60 }
 0x12f   : > { %7875 = vmatpush3.bf16.msra.mxu1 %v7874_v13 }
 0x130   : > { %7659 = vmatmul.mubr.msk.f32.gmra.mrb[38].mxu0 %vm1054_vm2, %v975_v58  ;;  %7877 = vmatprep.subr.bf16.mxu1 %v7876_v14  ;;  %v1454_v58 = vld [vmem:[%s14106_s30 + $0x60] sm:$0xff] }
 0x131   : > { %7919 = vmatpush3.bf16.msra.mxu0 %v7918_v11  ;;  %v7898_v16 = vpack.c.bf16 %v1455_v6, %v1454_v58 }
 0x133   : > { %7879 = vmatpush3.bf16.msra.mxu1 %v7878_v43 }
 0x134   : > { %7881 = vmatprep.subr.bf16.mxu1 %v7880_v28 }
 0x137   : > { %7883 = vmatpush3.bf16.msra.mxu1 %v7882_v37 }
 0x138   : > { %7885 = vmatprep.subr.bf16.mxu1 %v7884_v10 }
 0x13b   : > { %7887 = vmatpush3.bf16.msra.mxu1 %v7886_v54 }
 0x13c   : > { %7889 = vmatprep.subr.bf16.mxu1 %v7888_v62 }
 0x13f   : > { %7891 = vmatpush3.bf16.msra.mxu1 %v7890_v7 }
 0x140   : > { %7893 = vmatprep.subr.bf16.mxu1 %v7892_v8 }
 0x143   : > { %7895 = vmatpush3.bf16.msra.mxu1 %v7894_v55 }
 0x144   : > { %7897 = vmatprep.subr.bf16.mxu1 %v7896_v63 }
 0x147   : > { %7899 = vmatpush3.bf16.msra.mxu1 %v7898_v16  ;;  %v1472_v16 = vld [vmem:[%s14106_s30 + $0xf0] sm:$0xff] }
 0x1b7   : > { %v7016_v12 = vpop.f32.mrb[0].mxu0 }
 0x1b8   : > { %v7017_v18 = vpop.f32.mrb[1].mxu0 }
 0x1b9   : > { %v7018_v19 = vadd.f32 %v7017_v18, %v7016_v12  ;;  %v1473_v18 = vld [vmem:[%s14106_s30 + $0xf8] sm:$0xff] }
 0x1bb   : > { %v7019_v20 = vpop.f32.mrb[2].mxu0  ;;  %v1170_v10 = vadd.f32 %v7018_v19, %v6634_v39  ;;  %v7900_v19 = vpack.c.bf16 %v1473_v18, %v1472_v16 }
 0x1bc   : > { %v7020_v21 = vpop.f32.mrb[3].mxu0 }
 0x1bd   : > { %v7021_v13 = vadd.f32 %v7020_v21, %v7019_v20  ;;  %7901 = vmatprep.subr.bf16.mxu1 %v7900_v19 }
 0x1bf   : > { %v7022_v14 = vpop.f32.mrb[4].mxu0  ;;  %v1175_v49 = vadd.f32 %v7021_v13, %v6634_v39 }
 0x1c0   : > { %v7023_v15 = vpop.f32.mrb[5].mxu0 }
 0x1c1   : > { %v7024_v23 = vadd.f32 %v7023_v15, %v7022_v14  ;;  %v1456_v15 = vld [vmem:[%s14106_s30 + $0x70] sm:$0xff] }
 0x1c3   : > { %v7025_v24 = vpop.f32.mrb[6].mxu0  ;;  %v1180_v29 = vadd.f32 %v7024_v23, %v6634_v39  ;;  %v1457_v23 = vld [vmem:[%s14106_s30 + $0x78] sm:$0xff] }
 0x1c4   : > { %v7026_v1 = vpop.f32.mrb[7].mxu0 }
 0x1c5   : > { %v7027_v43 = vadd.f32 %v7026_v1, %v7025_v24  ;;  %v1498_v24 = vld [vmem:[%s14106_s30 + $0x1c0] sm:$0xff] }
 0x1c7   : > { %v7028_v38 = vpop.f32.mrb[8].mxu0  ;;  %v1185_v61 = vadd.f32 %v7027_v43, %v6634_v39  ;;  %v8941_v43 = vmov 0.0  }
 0x1c8   : > { %v7029_v26 = vpop.f32.mrb[9].mxu0 }
 0x1c9   : > { %v7030_v28 = vadd.f32 %v7029_v26, %v7028_v38  ;;  %v9767_v38 = vrot.slane %v8941_v43, 7  ;;  %v7902_v26 = vpack.c.bf16 %v1457_v23, %v1456_v15  ;;  %v1502_v15 = vld [vmem:[%s14106_s30 + $0x1e0] sm:$0xff]  ;;  %v1503_v23 = vld [vmem:[%s14106_s30 + $0x1e8] sm:$0xff] }
 0x1cb   : > { %v7031_v30 = vpop.f32.mrb[10].mxu0  ;;  %v1190_v2 = vadd.f32 %v7030_v28, %v6634_v39  ;;  %v1499_v28 = vld [vmem:[%s14106_s30 + $0x1c8] sm:$0xff]  ;;  %7903 = vmatpush3.bf16.msra.mxu1 %v7902_v26 }
 0x1cc   : > { %v7032_v31 = vpop.f32.mrb[11].mxu0 }
 0x1cd   : > { %v7033_v32 = vadd.f32 %v7032_v31, %v7031_v30  ;;  %v1482_v30 = vld [vmem:[%s14106_s30 + $0x140] sm:$0xff]  ;;  %v1483_v31 = vld [vmem:[%s14106_s30 + $0x148] sm:$0xff] }
 0x1cf   : > { %v7034_v33 = vpop.f32.mrb[12].mxu0  ;;  %v1195_v7 = vadd.f32 %v7033_v32, %v6634_v39 }
 0x1d0   : > { %v7035_v5 = vpop.f32.mrb[13].mxu0 }
 0x1d1   : > { %v7036_v35 = vadd.f32 %v7035_v5, %v7034_v33  ;;  %v7920_v33 = vpack.c.bf16 %v1499_v28, %v1498_v24  ;;  %v7922_v5 = vpack.c.bf16 %v1483_v31, %v1482_v30  ;;  %v1486_v30 = vld [vmem:[%s14106_s30 + $0x160] sm:$0xff]  ;;  %v1487_v31 = vld [vmem:[%s14106_s30 + $0x168] sm:$0xff] }
 0x1d3   : > { %v7037_v36 = vpop.f32.mrb[14].mxu0  ;;  %v1200_v50 = vadd.f32 %v7036_v35, %v6634_v39  ;;  %v1506_v35 = vld [vmem:[%s14106_s30 + $0x200] sm:$0xff]  ;;  %7921 = vmatprep.subr.bf16.mxu0 %v7920_v33 }
 0x1d4   : > { %v7038_v46 = vpop.f32.mrb[15].mxu0  ;;  %7923 = vmatpush3.bf16.msra.mxu0 %v7922_v5  ;;  %v7928_v5 = vpack.c.bf16 %v1503_v23, %v1502_v15 }
 0x1d5   : > { %v7039_v37 = vadd.f32 %v7038_v46, %v7037_v36  ;;  %v1507_v36 = vld [vmem:[%s14106_s30 + $0x208] sm:$0xff] }
 0x1d7   : > { %v7072_v40 = vpop.f32.mrb[16].mxu0  ;;  %v1205_v6 = vadd.f32 %v7039_v37, %v6634_v39  ;;  %v9784_v39 = vpack.c.bf16 %v1507_v36, %v1506_v35  ;;  %v1504_v35 = vld [vmem:[%s14106_s30 + $0x1f0] sm:$0xff]  ;;  %v1505_v36 = vld [vmem:[%s14106_s30 + $0x1f8] sm:$0xff] }
 0x1d8   : > { %v7073_v42 = vpop.f32.mrb[17].mxu0 }
 0x1d9   : > { %v7074_v45 = vadd.f32 %v7073_v42, %v7072_v40  ;;  %v1500_v40 = vld [vmem:[%s14106_s30 + $0x1d0] sm:$0xff]  ;;  %v1501_v42 = vld [vmem:[%s14106_s30 + $0x1d8] sm:$0xff]  ;;  %7937 = vmatprep.subr.bf16.mxu1 %v9784_v39 }
 0x1db   : > { %v7075_v47 = vpop.f32.mrb[18].mxu0  ;;  %v1275_v48 = vadd.f32 %v7074_v45, %v1170_v10 }
 0x1dc   : > { %v7076_v27 = vpop.f32.mrb[19].mxu0 }
 0x1dd   : > { %v7077_v22 = vadd.f32 %v7076_v27, %v7075_v47 }
 0x1df   : > { %v7078_v51 = vpop.f32.mrb[20].mxu0  ;;  %v1280_v52 = vadd.f32 %v7077_v22, %v1175_v49 }
 0x1e0   : > { %v7079_v25 = vpop.f32.mrb[21].mxu0 }
 0x1e1   : > { %v7080_v53 = vadd.f32 %v7079_v25, %v7078_v51 }
 0x1e3   : > { %v7081_v54 = vpop.f32.mrb[22].mxu0  ;;  %v1285_v57 = vadd.f32 %v7080_v53, %v1180_v29 }
 0x1e4   : > { %v7082_v59 = vpop.f32.mrb[23].mxu0 }
 0x1e5   : > { %v7083_v62 = vadd.f32 %v7082_v59, %v7081_v54 }
 0x1e7   : > { %v7084_v34 = vpop.f32.mrb[24].mxu0  ;;  %v1290_v56 = vadd.f32 %v7083_v62, %v1185_v61 }
 0x1e8   : > { %v7085_v0 = vpop.f32.mrb[25].mxu0 }
 0x1e9   : > { %v7086_v3 = vadd.f32 %v7085_v0, %v7084_v34 }
 0x1eb   : > { %v7087_v60 = vpop.f32.mrb[26].mxu0  ;;  %v9745_v41 = vadd.f32 %v7086_v3, %v1190_v2 }
 0x1ec   : > { %v7088_v4 = vpop.f32.mrb[27].mxu0 }
 0x1ed   : > { %v7089_v8 = vadd.f32 %v7088_v4, %v7087_v60 }
 0x1ef   : > { %v7090_v44 = vpop.f32.mrb[28].mxu0  ;;  %v1300_v9 = vadd.f32 %v7089_v8, %v1195_v7 }
 0x1f0   : > { %v7091_v11 = vpop.f32.mrb[29].mxu0 }
 0x1f1   : > { %v7092_v17 = vadd.f32 %v7091_v11, %v7090_v44 }
 0x1f3   : > { %v7093_v55 = vpop.f32.mrb[30].mxu0  ;;  %v9747_v63 = vadd.f32 %v7092_v17, %v1200_v50 }
 0x1f4   : > { %v7094_v58 = vpop.f32.mrb[31].mxu0 }
 0x1f5   : > { %v7095_v12 = vadd.f32 %v7094_v58, %v7093_v55 }
 0x1f7   : > { %v7651_v20 = vpop.f32.mrb[32].mxu0  ;;  %v9755_v21 = vadd.f32 %v7095_v12, %v1205_v6 }
 0x1f8   : > { %v1385_v13 = vadd.f32 %v7651_v20, %v1280_v52  ;;  %v1379_v14 = vpop.f32.mrb[33].mxu0 }
 0x1f9   : > { %v1380_v1 = vadd.f32 %v1379_v14, %v1275_v48  ;;  %v7924_v48 = vpack.c.bf16 %v1501_v42, %v1500_v40  ;;  %v1485_v14 = vld [vmem:[%s14106_s30 + $0x158] sm:$0xff]  ;;  %v9897_v40 = vrot.slane %v8941_v43, 1 }
 0x1fa   : > { %vm1419_vm3 = vcmp.ge.f32.partialorder %v1385_v13, 0.0  ;;  %v1427_v32 = vmul.f32 0.01, %v1385_v13 }
 0x1fb   : > { %vm1418_vm4 = vcmp.ge.f32.partialorder %v1380_v1, 0.0  ;;  %v1426_v46 = vmul.f32 0.01, %v1380_v1  ;;  %v7654_v37 = vpop.f32.mrb[34].mxu0  ;;  %7925 = vmatprep.subr.bf16.mxu0 %v7924_v48 }
 0x1fc   : > { %v9792_v10 = vsel %vm1419_vm3, %v1385_v13, %v1427_v32  ;;  %v1395_v45 = vadd.f32 %v7654_v37, %v1290_v56  ;;  %v1389_v47 = vpop.f32.mrb[35].mxu0 }
 0x1fd   : > { %v9794_v27 = vsel %vm1418_vm4, %v1380_v1, %v1426_v46  ;;  %v1390_v49 = vadd.f32 %v1389_v47, %v1285_v57  ;;  %v1527_v22 = vrot.slane %v9792_v10, 7  ;;  %v7930_v47 = vpack.c.bf16 %v1487_v31, %v1486_v30  ;;  %v1511_v30 = vld [vmem:[%s14106_s30 + $0x228] sm:$0xff] }
 0x1fe   : > { %vm1421_vm5 = vcmp.ge.f32.partialorder %v1395_v45, 0.0  ;;  %v1429_v51 = vmul.f32 0.01, %v1395_v45  ;;  %v1525_v52 = vrot.slane %v9794_v27, 7  ;;  %v1549_v48 = vrot.slane %v9794_v27, 1 }
 0x1ff   : > { %vm1420_vm6 = vcmp.ge.f32.partialorder %v1390_v49, 0.0  ;;  %v1428_v25 = vmul.f32 0.01, %v1390_v49  ;;  %v7657_v29 = vpop.f32.mrb[36].mxu0  ;;  %v9801_v53 = vsel %vm882_vm0, %v9767_v38, %v1527_v22  ;;  %v1488_v22 = vld [vmem:[%s14106_s30 + $0x170] sm:$0xff] }
 0x200   : > { %v9803_v54 = vsel %vm1421_vm5, %v1395_v45, %v1429_v51  ;;  %v1405_v57 = vadd.f32 %v7657_v29, %v1300_v9  ;;  %v1399_v59 = vpop.f32.mrb[37].mxu0  ;;  %v8626_v61 = vpack.i.bf16 %v9794_v27, %v9801_v53  ;;  %v9809_v62 = vsel %vm882_vm0, %v9767_v38, %v1525_v52  ;;  %v1489_v51 = vld [vmem:[%s14106_s30 + $0x178] sm:$0xff] }
 0x201   : > { %v9811_v34 = vsel %vm1420_vm6, %v1390_v49, %v1428_v25  ;;  %v1400_v56 = vadd.f32 %v1399_v59, %v9745_v41  ;;  %v8621_v0 = vpack.i.bf16 %v8941_v43, %v9809_v62  ;;  %v1531_v2 = vrot.slane %v9803_v54, 7 }
 0x202   : > { %vm1423_vm7 = vcmp.ge.f32.partialorder %v1405_v57, 0.0  ;;  %v1431_v3 = vmul.f32 0.01, %v1405_v57  ;;  %8627 = vrot.lane.b32.xlu1 %v8626_v61, %s13903_s24  ;;  %v1529_v60 = vrot.slane %v9811_v34, 7  ;;  %v1551_v45 = vrot.slane %v9792_v10, 1 }
 0x203   : > { %vm1422_vm8 = vcmp.ge.f32.partialorder %v1400_v56, 0.0  ;;  %v1430_v4 = vmul.f32 0.01, %v1400_v56  ;;  %v7660_v7 = vpop.f32.mrb[38].mxu0  ;;  %8622 = vrot.lane.b32.xlu0 %v8621_v0, %s13903_s24  ;;  %v9822_v8 = vsel %vm882_vm0, %v9767_v38, %v1531_v2  ;;  %v7932_v49 = vpack.c.bf16 %v1505_v36, %v1504_v35 }
 0x204   : > { %v9824_v41 = vsel %vm1423_vm7, %v1405_v57, %v1431_v3  ;;  %v1415_v44 = vadd.f32 %v7660_v7, %v9755_v21  ;;  %v1409_v9 = vpop.f32.mrb[39].mxu0  ;;  %v8636_v11 = vpack.i.bf16 %v9811_v34, %v9822_v8  ;;  %v9831_v50 = vsel %vm882_vm0, %v9767_v38, %v1529_v60 }
 0x205   : > { %v9833_v17 = vsel %vm1422_vm8, %v1400_v56, %v1430_v4  ;;  %v1410_v55 = vadd.f32 %v1409_v9, %v9747_v63  ;;  %v8631_v58 = vpack.i.bf16 %v9792_v10, %v9831_v50  ;;  %v1535_v6 = vrot.slane %v9824_v41, 7  ;;  %v1484_v63 = vld [vmem:[%s14106_s30 + $0x150] sm:$0xff] }
 0x206   : > { %vm1425_vm9 = vcmp.ge.f32.partialorder %v1415_v44, 0.0  ;;  %v1433_v12 = vmul.f32 0.01, %v1415_v44  ;;  %8637 = vrot.lane.b32.xlu1 %v8636_v11, %s13903_s24  ;;  %v1533_v16 = vrot.slane %v9833_v17, 7  ;;  %v7926_v33 = vpack.c.bf16 %v1485_v14, %v1484_v63 }
 0x207   : > { %vm1424_vm10 = vcmp.ge.f32.partialorder %v1410_v55, 0.0  ;;  %v1432_v18 = vmul.f32 0.01, %v1410_v55  ;;  %8632 = vrot.lane.b32.xlu0 %v8631_v58, %s13903_s24  ;;  %v9844_v19 = vsel %vm882_vm0, %v9767_v38, %v1535_v6  ;;  %v9913_v52 = vsel %vm923_vm1, %v1551_v45, %v9897_v40  ;;  %v1508_v6 = vld [vmem:[%s14106_s30 + $0x210] sm:$0xff] }
 0x208   : > { %v9849_v20 = vsel %vm1425_vm9, %v1415_v44, %v1433_v12  ;;  %v8646_v21 = vpack.i.bf16 %v9833_v17, %v9844_v19  ;;  %v9855_v13 = vsel %vm882_vm0, %v9767_v38, %v1533_v16  ;;  %7927 = vmatpush3.bf16.msra.mxu0 %v7926_v33  ;;  %v1555_v25 = vrot.slane %v9803_v54, 1  ;;  %v1509_v12 = vld [vmem:[%s14106_s30 + $0x218] sm:$0xff] }
 0x209   : > { %v9866_v24 = vsel %vm1424_vm10, %v1410_v55, %v1432_v18  ;;  %v8641_v1 = vpack.i.bf16 %v9803_v54, %v9855_v13  ;;  %v1572_v26 = vrot.slane %v9849_v20, 7  ;;  %7929 = vmatprep.subr.bf16.mxu0 %v7928_v5  ;;  %v7934_v29 = vpack.c.bf16 %v1489_v51, %v1488_v22 }
 0x20a   : > { %8647 = vrot.lane.b32.xlu1 %v8646_v21, %s13903_s24  ;;  %v1537_v28 = vrot.slane %v9866_v24, 7  ;;  %v1550_v57 = vsel %vm923_vm1, %v1549_v48, %v9897_v40  ;;  %v1553_v59 = vrot.slane %v9811_v34, 1  ;;  %v9924_v61 = vsel %vm923_vm1, %v1555_v25, %v9897_v40 }
 0x20b   : > { %8642 = vrot.lane.b32.xlu0 %v8641_v1, %s13903_s24  ;;  %v9882_v32 = vsel %vm882_vm0, %v9767_v38, %v1572_v26  ;;  %v1559_v56 = vrot.slane %v9824_v41, 1  ;;  %v1557_v2 = vrot.slane %v9833_v17, 1  ;;  %v1561_v3 = vrot.slane %v9866_v24, 1 }
 0x20c   : > { %v8656_v46 = vpack.i.bf16 %v9866_v24, %v9882_v32  ;;  %v9894_v37 = vsel %vm882_vm0, %v9767_v38, %v1537_v28  ;;  %7931 = vmatpush3.bf16.msra.mxu0 %v7930_v47  ;;  %v9931_v0 = vsel %vm923_vm1, %v1553_v59, %v9897_v40  ;;  %v1574_v4 = vrot.slane %v9849_v20, 1  ;;  %v1510_v28 = vld [vmem:[%s14106_s30 + $0x220] sm:$0xff]  ;;  %v1512_v47 = vld [vmem:[%s14106_s30 + $0x230] sm:$0xff] }
 0x20d   : > { %v8651_v42 = vpack.i.bf16 %v9824_v41, %v9894_v37  ;;  %7933 = vmatprep.subr.bf16.mxu0 %v7932_v49  ;;  %v9939_v60 = vsel %vm923_vm1, %v1559_v56, %v9897_v40  ;;  %v9946_v7 = vsel %vm923_vm1, %v1557_v2, %v9897_v40  ;;  %v9950_v44 = vsel %vm923_vm1, %v1561_v3, %v9897_v40 }
 0x20e   : > { %8657 = vrot.lane.b32.xlu1 %v8656_v46, %s13903_s24  ;;  %v9956_v9 = vsel %vm923_vm1, %v1574_v4, %v9897_v40  ;;  %v8661_v11 = vpack.i.bf16 %v9950_v44, %v9849_v20  ;;  %v7940_v23 = vpack.c.bf16 %v1509_v12, %v1508_v6  ;;  %v7944_v46 = vpack.c.bf16 %v1511_v30, %v1510_v28 }
 0x20f   : > { %8652 = vrot.lane.b32.xlu0 %v8651_v42, %s13903_s24 }
 0x210   : > { %7935 = vmatpush3.bf16.msra.mxu0 %v7934_v29 }
 0x212   : > { %1627 = vrot.lane.b32.xlu1 %v9913_v52, %s13903_s24 }
 0x213   : > { %1625 = vrot.lane.b32.xlu0 %v1550_v57, %s13903_s24 }
 0x216   : > { %1631 = vrot.lane.b32.xlu1 %v9924_v61, %s13903_s24 }
 0x217   : > { %1629 = vrot.lane.b32.xlu0 %v9931_v0, %s13903_s24 }
 0x21a   : > { %1635 = vrot.lane.b32.xlu1 %v9939_v60, %s13903_s24 }
 0x21b   : > { %1633 = vrot.lane.b32.xlu0 %v9946_v7, %s13903_s24 }
 0x21e   : > { %1639 = vrot.lane.b32.xlu1 %v9956_v9, %s13903_s24 }
 0x21f   : > { %8662 = vrot.lane.b32.xlu0 %v8661_v11, %s13903_s24  ;;  %s11727_s24 = sld [smem:[#allocation3 + $0x2]] }
 0x274   : > { %v8628_v55 = vpop.permute.xlu1 %8627 }
 0x275   : > { %v8623_v58 = vpop.permute.xlu0 %8622  ;;  %v8629_v16 = vunpack.i.l.bf16 %v8628_v55  ;;  %v8630_v1 = vunpack.i.h.bf16 %v8628_v55 }
 0x276   : > { %v8625_v18 = vunpack.i.h.bf16 %v8623_v58  ;;  %v8624_v63 = vunpack.i.l.bf16 %v8623_v58 }
 0x277   : > { %v1661_v5 = vsel %vm1054_vm2, %v1550_v57, %v8629_v16  ;;  %v1653_v45 = vsel %vm1054_vm2, %v9809_v62, %v8630_v1 }
 0x278   : > { %v9971_v21 = vsel %vm1054_vm2, %v9767_v38, %v8625_v18  ;;  %v8638_v14 = vpop.permute.xlu1 %8637  ;;  %v1660_v15 = vsel %vm1054_vm2, %v9897_v40, %v8624_v63 }
 0x279   : > { %v8633_v26 = vpop.permute.xlu0 %8632  ;;  %1763 = vmatprep.mubr.f32.mxu1 %v1660_v15  ;;  %v8639_v48 = vunpack.i.l.bf16 %v8638_v14  ;;  %v8640_v22 = vunpack.i.h.bf16 %v8638_v14 }
 0x27a   : > { %v8635_v31 = vunpack.i.h.bf16 %v8633_v26  ;;  %v8634_v33 = vunpack.i.l.bf16 %v8633_v26  ;;  %1764 = vmatmul.mubr.f32.vlgmr.msra.gmra.mrb[0].mxu1 %v9971_v21 }
 0x27b   : > { %7939 = vmatpush3.bf16.msra.mxu1 %v9784_v39  ;;  %1768 = vmatprep.mubr.f32.mxu1 %v1661_v5  ;;  %v1513_v39 = vld [vmem:[%s14106_s30 + $0x238] sm:$0xff]  ;;  %v1663_v29 = vsel %vm1054_vm2, %v9931_v0, %v8639_v48  ;;  %v1655_v56 = vsel %vm1054_vm2, %v9831_v50, %v8640_v22  ;;  %v2040_v48 = vld [vmem:[%s14108_s5 + $0x10] sm:$0xff]  ;;  %v2059_v22 = vld [vmem:[%s14108_s5 + $0xa8] sm:$0xff] }
 0x27c   : > { %v8648_v35 = vpop.permute.xlu1 %8647  ;;  %v1654_v36 = vsel %vm1054_vm2, %v9801_v53, %v8635_v31  ;;  %7941 = vmatprep.subr.bf16.mxu1 %v7940_v23  ;;  %v1662_v53 = vsel %vm1054_vm2, %v9913_v52, %v8634_v33  ;;  %v7948_v49 = vpack.c.bf16 %v1513_v39, %v1512_v47 }
 0x27d   : > { %v8643_v42 = vpop.permute.xlu0 %8642  ;;  %1868 = vmatprep.mubr.f32.mxu0 %v1654_v36  ;;  %v8649_v2 = vunpack.i.l.bf16 %v8648_v35  ;;  %v8650_v55 = vunpack.i.h.bf16 %v8648_v35 }
 0x27e   : > { %1769 = vmatmul.mubr.f32.gmra.mrb[2].mxu1 %v1653_v45  ;;  %v8644_v25 = vunpack.i.l.bf16 %v8643_v42  ;;  %v8645_v57 = vunpack.i.h.bf16 %v8643_v42  ;;  %v2057_v45 = vld [vmem:[%s14108_s5 + $0x98] sm:$0xff] }
 0x27f   : > { %1773 = vmatprep.mubr.f32.mxu1 %v1662_v53  ;;  %7943 = vmatpush3.bf16.msra.mxu1 %v7940_v23  ;;  %v1665_v50 = vsel %vm1054_vm2, %v9946_v7, %v8649_v2  ;;  %v1657_v63 = vsel %vm1054_vm2, %v9855_v13, %v8650_v55  ;;  %v2041_v53 = vld [vmem:[%s14108_s5 + $0x18] sm:$0xff]  ;;  %v2087_v2 = vld [vmem:[%s14108_s5 + $0x188] sm:$0xff] }
 0x280   : > { %7945 = vmatprep.subr.bf16.mxu1 %v7944_v46  ;;  %v8658_v51 = vpop.permute.xlu1 %8657  ;;  %v1664_v4 = vsel %vm1054_vm2, %v9924_v61, %v8644_v25  ;;  %v1656_v6 = vsel %vm1054_vm2, %v9822_v8, %v8645_v57  ;;  %v2042_v25 = vld [vmem:[%s14108_s5 + $0x20] sm:$0xff]  ;;  %v2060_v57 = vld [vmem:[%s14108_s5 + $0xb0] sm:$0xff] }
 0x281   : > { %v8653_v62 = vpop.permute.xlu0 %8652  ;;  %v8659_v14 = vunpack.i.l.bf16 %v8658_v51  ;;  %v8660_v26 = vunpack.i.h.bf16 %v8658_v51  ;;  %v7958_v51 = vpack.c.bf16 %v2041_v53, %v2040_v48  ;;  %v2051_v48 = vld [vmem:[%s14108_s5 + $0x68] sm:$0xff]  ;;  %v2068_v53 = vld [vmem:[%s14108_s5 + $0xf0] sm:$0xff] }
 0x282   : > { %1774 = vmatmul.mubr.f32.gmra.mrb[4].mxu1 %v1654_v36  ;;  %v8654_v12 = vunpack.i.l.bf16 %v8653_v62  ;;  %v8655_v18 = vunpack.i.h.bf16 %v8653_v62 }
 0x283   : > { %1778 = vmatprep.mubr.f32.mxu1 %v1663_v29  ;;  %7947 = vmatpush3.bf16.msra.mxu1 %v7944_v46  ;;  %v1667_v13 = vsel %vm1054_vm2, %v9950_v44, %v8659_v14  ;;  %v1659_v33 = vsel %vm1054_vm2, %v9894_v37, %v8660_v26  ;;  %v2043_v29 = vld [vmem:[%s14108_s5 + $0x28] sm:$0xff]  ;;  %v2090_v26 = vld [vmem:[%s14108_s5 + $0x1a0] sm:$0xff] }
 0x284   : > { %7949 = vmatprep.subr.bf16.mxu1 %v7948_v49  ;;  %v1628_v11 = vpop.permute.xlu1 %1627  ;;  %v1666_v8 = vsel %vm1054_vm2, %v9939_v60, %v8654_v12  ;;  %v1658_v28 = vsel %vm1054_vm2, %v9844_v19, %v8655_v18  ;;  %v7962_v55 = vpack.c.bf16 %v2043_v29, %v2042_v25  ;;  %v2088_v12 = vld [vmem:[%s14108_s5 + $0x190] sm:$0xff]  ;;  %v2062_v18 = vld [vmem:[%s14108_s5 + $0xc0] sm:$0xff]  ;;  %v2063_v14 = vld [vmem:[%s14108_s5 + $0xc8] sm:$0xff] }
 0x285   : > { %v1626_v59 = vpop.permute.xlu0 %1625  ;;  %v1669_v16 = vsel %vm1054_vm2, %v9792_v10, %v1628_v11  ;;  %v2071_v11 = vld [vmem:[%s14108_s5 + $0x108] sm:$0xff] }
 0x286   : > { %v1668_v3 = vsel %vm1054_vm2, %v9794_v27, %v1626_v59  ;;  %1779 = vmatmul.mubr.f32.gmra.mrb[6].mxu1 %v1655_v56  ;;  %v2061_v59 = vld [vmem:[%s14108_s5 + $0xb8] sm:$0xff] }
 0x287   : > { %1783 = vmatprep.mubr.f32.mxu1 %v1664_v4  ;;  %1869 = vmatmul.mubr.f32.vlgmr.msra.gmra.mrb[40].mxu0 %v1668_v3  ;;  %v2070_v4 = vld [vmem:[%s14108_s5 + $0x100] sm:$0xff] }
 0x288   : > { %1873 = vmatprep.mubr.f32.mxu0 %v1655_v56  ;;  %7951 = vmatpush3.bf16.msra.mxu1 %v7948_v49  ;;  %v1632_v1 = vpop.permute.xlu1 %1631  ;;  %v2058_v49 = vld [vmem:[%s14108_s5 + $0xa0] sm:$0xff] }
 0x289   : > { %v1630_v58 = vpop.permute.xlu0 %1629  ;;  %v1671_v30 = vsel %vm1054_vm2, %v9803_v54, %v1632_v1  ;;  %v7960_v62 = vpack.c.bf16 %v2059_v22, %v2058_v49  ;;  %v2086_v56 = vld [vmem:[%s14108_s5 + $0x180] sm:$0xff]  ;;  %v2069_v49 = vld [vmem:[%s14108_s5 + $0xf8] sm:$0xff] }
 0x28a   : > { %1784 = vmatmul.mubr.f32.gmra.mrb[8].mxu1 %v1656_v6  ;;  %v1670_v23 = vsel %vm1054_vm2, %v9811_v34, %v1630_v58  ;;  %v7984_v3 = vpack.c.bf16 %v2087_v2, %v2086_v56  ;;  %v2044_v58 = vld [vmem:[%s14108_s5 + $0x30] sm:$0xff] }
 0x28b   : > { %1788 = vmatprep.mubr.f32.mxu1 %v1665_v50  ;;  %1874 = vmatmul.mubr.f32.gmra.mrb[42].mxu0 %v1669_v16  ;;  %v7964_v50 = vpack.c.bf16 %v2061_v59, %v2060_v57  ;;  %v2045_v16 = vld [vmem:[%s14108_s5 + $0x38] sm:$0xff] }
 0x28c   : > { %1878 = vmatprep.mubr.f32.mxu0 %v1656_v6  ;;  %v1636_v35 = vpop.permute.xlu1 %1635  ;;  %v7986_v6 = vpack.c.bf16 %v2071_v11, %v2070_v4  ;;  %7985 = vmatprep.subr.bf16.mxu1 %v7984_v3  ;;  %v10186_v11 = vld [vmem:[%s14109_s22] ss:$0 sm:$0xff] }
 0x28d   : > { %v1634_v15 = vpop.permute.xlu0 %1633  ;;  %v1673_v46 = vsel %vm1054_vm2, %v9824_v41, %v1636_v35  ;;  %v2047_v35 = vld [vmem:[%s14108_s5 + $0x48] sm:$0xff] }
 0x28e   : > { %1789 = vmatmul.mubr.f32.gmra.mrb[10].mxu1 %v1657_v63  ;;  %v1672_v5 = vsel %vm1054_vm2, %v9833_v17, %v1634_v15 }
 0x28f   : > { %1793 = vmatprep.mubr.f32.mxu1 %v1666_v8  ;;  %1879 = vmatmul.mubr.f32.gmra.mrb[44].mxu0 %v1670_v23  ;;  %v2072_v8 = vld [vmem:[%s14108_s5 + $0x110] sm:$0xff]  ;;  %v2073_v23 = vld [vmem:[%s14108_s5 + $0x118] sm:$0xff] }
 0x290   : > { %1883 = vmatprep.mubr.f32.mxu0 %v1657_v63  ;;  %v1640_v42 = vpop.permute.xlu1 %1639  ;;  %v2089_v63 = vld [vmem:[%s14108_s5 + $0x198] sm:$0xff]  ;;  %v7990_v1 = vpack.c.bf16 %v2073_v23, %v2072_v8 }
 0x291   : > { %v8663_v31 = vpop.permute.xlu0 %8662  ;;  %v7988_v15 = vpack.c.bf16 %v2089_v63, %v2088_v12 }
 0x292   : > { %1794 = vmatmul.mubr.f32.gmra.mrb[12].mxu1 %v1658_v28  ;;  %v8664_v19 = vunpack.i.l.bf16 %v8663_v31  ;;  %v8665_v36 = vunpack.i.h.bf16 %v8663_v31 }
 0x293   : > { %1798 = vmatprep.mubr.f32.mxu1 %v1667_v13  ;;  %1884 = vmatmul.mubr.f32.gmra.mrb[46].mxu0 %v1671_v30  ;;  %v7966_v13 = vpack.c.bf16 %v2045_v16, %v2044_v58  ;;  %v2046_v30 = vld [vmem:[%s14108_s5 + $0x40] sm:$0xff] }
 0x294   : > { %1888 = vmatprep.mubr.f32.mxu0 %v1658_v28  ;;  %v1676_v37 = vsel %vm1054_vm2, %v9882_v32, %v8664_v19  ;;  %v1675_v32 = vsel %vm1054_vm2, %v9849_v20, %v1640_v42  ;;  %v2091_v28 = vld [vmem:[%s14108_s5 + $0x1a8] sm:$0xff]  ;;  %v2064_v19 = vld [vmem:[%s14108_s5 + $0xd0] sm:$0xff]  ;;  %v2093_v42 = vld [vmem:[%s14108_s5 + $0x1b8] sm:$0xff] }
 0x295   : > { %v7992_v31 = vpack.c.bf16 %v2091_v28, %v2090_v26 }
 0x296   : > { %1799 = vmatmul.mubr.f32.gmra.mrb[14].mxu1 %v1659_v33 }
 0x297   : > { %1889 = vmatmul.mubr.f32.gmra.mrb[48].mxu0 %v1672_v5  ;;  %7677 = vmatprep.mubr.msk.f32.mxu1 %vm1054_vm2, %v9913_v52  ;;  %v1674_v52 = vsel %vm1054_vm2, %v9866_v24, %v8665_v36  ;;  %v7968_v5 = vpack.c.bf16 %v2063_v14, %v2062_v18  ;;  %v2075_v36 = vld [vmem:[%s14108_s5 + $0x128] sm:$0xff] }
 0x298   : > { %1893 = vmatprep.mubr.f32.mxu0 %v1659_v33  ;;  %v2074_v33 = vld [vmem:[%s14108_s5 + $0x120] sm:$0xff] }
 0x29a   : > { %7678 = vmatmul.mubr.msk.f32.vlgmr.msra.gmra.mrb[16].mxu1 %vm1054_vm2, %v9931_v0  ;;  %v2055_v0 = vld [vmem:[%s14108_s5 + $0x88] sm:$0xff] }
 0x29b   : > { %1894 = vmatmul.mubr.f32.gmra.mrb[50].mxu0 %v1673_v46  ;;  %7680 = vmatprep.mubr.msk.f32.mxu1 %vm1054_vm2, %v9924_v61  ;;  %v2054_v61 = vld [vmem:[%s14108_s5 + $0x80] sm:$0xff]  ;;  %v2065_v46 = vld [vmem:[%s14108_s5 + $0xd8] sm:$0xff] }
 0x29c   : > { %1898 = vmatprep.mubr.f32.mxu0 %v1676_v37  ;;  %7987 = vmatpush3.bf16.msra.mxu1 %v7986_v6  ;;  %v7994_v37 = vpack.c.bf16 %v2075_v36, %v2074_v33 }
 0x29d   : > { %7989 = vmatprep.subr.bf16.mxu1 %v7988_v15 }
 0x29e   : > { %7681 = vmatmul.mubr.msk.f32.gmra.mrb[18].mxu1 %vm1054_vm2, %v9946_v7  ;;  %v7952_v7 = vpack.c.bf16 %v2055_v0, %v2054_v61  ;;  %v7970_v61 = vpack.c.bf16 %v2047_v35, %v2046_v30  ;;  %v7972_v0 = vpack.c.bf16 %v2065_v46, %v2064_v19 }
 0x29f   : > { %1899 = vmatmul.mubr.f32.gmra.mrb[52].mxu0 %v1674_v52  ;;  %7683 = vmatprep.mubr.msk.f32.mxu1 %vm1054_vm2, %v9939_v60  ;;  %v2038_v60 = vld [vmem:[%s14108_s5] sm:$0xff]  ;;  %v2092_v52 = vld [vmem:[%s14108_s5 + $0x1b0] sm:$0xff] }
 0x2a0   : > { %1903 = vmatprep.mubr.f32.mxu0 %v9971_v21  ;;  %7953 = vmatprep.subr.bf16.mxu0 %v7952_v7  ;;  %v2049_v7 = vld [vmem:[%s14108_s5 + $0x58] sm:$0xff] }
 0x2a1   : > { %7991 = vmatpush3.bf16.msra.mxu1 %v7990_v1 }
 0x2a2   : > { %7684 = vmatmul.mubr.msk.f32.gmra.mrb[20].mxu1 %vm1054_vm2, %v9950_v44  ;;  %v2039_v44 = vld [vmem:[%s14108_s5 + $0x8] sm:$0xff]  ;;  %7993 = vmatprep.subr.bf16.mxu1 %v7992_v31 }
 0x2a3   : > { %1904 = vmatmul.mubr.f32.gmra.mrb[54].mxu0 %v1675_v32  ;;  %7686 = vmatprep.mubr.msk.f32.mxu1 %vm1054_vm2, %v9956_v9  ;;  %v2056_v9 = vld [vmem:[%s14108_s5 + $0x90] sm:$0xff]  ;;  %v7954_v47 = vpack.c.bf16 %v2039_v44, %v2038_v60  ;;  %v7996_v32 = vpack.c.bf16 %v2093_v42, %v2092_v52  ;;  %v2066_v44 = vld [vmem:[%s14108_s5 + $0xe0] sm:$0xff] }
 0x2a4   : > { %v7956_v39 = vpack.c.bf16 %v2057_v45, %v2056_v9  ;;  %v2048_v60 = vld [vmem:[%s14108_s5 + $0x50] sm:$0xff]  ;;  %v2067_v9 = vld [vmem:[%s14108_s5 + $0xe8] sm:$0xff] }
 0x2a5   : > { %7955 = vmatpush3.bf16.msra.mxu0 %v7954_v47  ;;  %7995 = vmatpush3.bf16.msra.mxu1 %v7994_v37  ;;  %v7974_v45 = vpack.c.bf16 %v2049_v7, %v2048_v60  ;;  %v7976_v47 = vpack.c.bf16 %v2067_v9, %v2066_v44 }
 0x2a6   : > { %7687 = vmatmul.mubr.msk.f32.gmra.mrb[22].mxu1 %vm1054_vm2, %v9897_v40  ;;  %7957 = vmatprep.subr.bf16.mxu0 %v7956_v39  ;;  %v2050_v39 = vld [vmem:[%s14108_s5 + $0x60] sm:$0xff] }
 0x2a7   : > { %7997 = vmatprep.subr.bf16.mxu1 %v7996_v32  ;;  %v7978_v22 = vpack.c.bf16 %v2051_v48, %v2050_v39 }
 0x2a9   : > { %7959 = vmatpush3.bf16.msra.mxu0 %v7958_v51  ;;  %v7980_v51 = vpack.c.bf16 %v2069_v49, %v2068_v53  ;;  %v2052_v49 = vld [vmem:[%s14108_s5 + $0x70] sm:$0xff] }
 0x2aa   : > { %7961 = vmatprep.subr.bf16.mxu0 %v7960_v62 }
 0x2ad   : > { %7963 = vmatpush3.bf16.msra.mxu0 %v7962_v55 }
 0x2ae   : > { %7965 = vmatprep.subr.bf16.mxu0 %v7964_v50 }
 0x2b1   : > { %7967 = vmatpush3.bf16.msra.mxu0 %v7966_v13 }
 0x2b2   : > { %7969 = vmatprep.subr.bf16.mxu0 %v7968_v5 }
 0x2b5   : > { %7971 = vmatpush3.bf16.msra.mxu0 %v7970_v61 }
 0x2b6   : > { %7973 = vmatprep.subr.bf16.mxu0 %v7972_v0 }
 0x2b9   : > { %7975 = vmatpush3.bf16.msra.mxu0 %v7974_v45 }
 0x2ba   : > { %7977 = vmatprep.subr.bf16.mxu0 %v7976_v47 }
 0x2bd   : > { %7979 = vmatpush3.bf16.msra.mxu0 %v7978_v22  ;;  %v2053_v22 = vld [vmem:[%s14108_s5 + $0x78] sm:$0xff] }
 0x2be   : > { %7981 = vmatprep.subr.bf16.mxu0 %v7980_v51  ;;  %v2076_v51 = vld [vmem:[%s14108_s5 + $0x130] sm:$0xff] }
 0x34d   : > { %v7144_v62 = vpop.f32.mrb[0].mxu1 }
 0x34e   : > { %v7145_v25 = vpop.f32.mrb[1].mxu1 }
 0x34f   : > { %v7146_v29 = vadd.f32 %v7145_v25, %v7144_v62  ;;  %v7982_v25 = vpack.c.bf16 %v2053_v22, %v2052_v49 }
 0x351   : > { %v7147_v57 = vpop.f32.mrb[2].mxu1  ;;  %v1766_v16 = vadd.f32 %v7146_v29, %v10186_v11  ;;  %v2077_v29 = vld [vmem:[%s14108_s5 + $0x138] sm:$0xff]  ;;  %7983 = vmatpush3.bf16.msra.mxu0 %v7982_v25 }
 0x352   : > { %v7148_v59 = vpop.f32.mrb[3].mxu1 }
 0x353   : > { %v7149_v56 = vadd.f32 %v7148_v59, %v7147_v57  ;;  %v2094_v57 = vld [vmem:[%s14108_s5 + $0x1c0] sm:$0xff]  ;;  %v2095_v59 = vld [vmem:[%s14108_s5 + $0x1c8] sm:$0xff] }
 0x355   : > { %v7150_v2 = vpop.f32.mrb[4].mxu1  ;;  %v1771_v26 = vadd.f32 %v7149_v56, %v10186_v11 }
 0x356   : > { %v7151_v3 = vpop.f32.mrb[5].mxu1 }
 0x357   : > { %v7152_v4 = vadd.f32 %v7151_v3, %v7150_v2 }
 0x359   : > { %v7153_v55 = vpop.f32.mrb[6].mxu1  ;;  %v1776_v19 = vadd.f32 %v7152_v4, %v10186_v11 }
 0x35a   : > { %v7154_v58 = vpop.f32.mrb[7].mxu1  ;;  %v7200_v6 = vpop.f32.mrb[40].mxu0 }
 0x35b   : > { %v7155_v12 = vadd.f32 %v7154_v58, %v7153_v55  ;;  %v7201_v50 = vpop.f32.mrb[41].mxu0  ;;  %v7998_v55 = vpack.c.bf16 %v2077_v29, %v2076_v51  ;;  %v8000_v58 = vpack.c.bf16 %v2095_v59, %v2094_v57 }
 0x35c   : > { %v7202_v18 = vadd.f32 %v7201_v50, %v7200_v6  ;;  %v2102_v6 = vld [vmem:[%s14108_s5 + $0x200] sm:$0xff] }
 0x35d   : > { %v7156_v63 = vpop.f32.mrb[8].mxu1  ;;  %v1781_v0 = vadd.f32 %v7155_v12, %v10186_v11  ;;  %v2103_v12 = vld [vmem:[%s14108_s5 + $0x208] sm:$0xff]  ;;  %7999 = vmatpush3.bf16.msra.mxu1 %v7998_v55 }
 0x35e   : > { %v7157_v14 = vpop.f32.mrb[9].mxu1  ;;  %v7203_v15 = vpop.f32.mrb[42].mxu0  ;;  %v1871_v8 = vadd.f32 %v7202_v18, %v1766_v16  ;;  %v10217_v18 = vpack.c.bf16 %v2103_v12, %v2102_v6  ;;  %8001 = vmatprep.subr.bf16.mxu1 %v8000_v58 }
 0x35f   : > { %v7158_v23 = vadd.f32 %v7157_v14, %v7156_v63  ;;  %v7204_v1 = vpop.f32.mrb[43].mxu0 }
 0x360   : > { %v7205_v28 = vadd.f32 %v7204_v1, %v7203_v15  ;;  %v2079_v1 = vld [vmem:[%s14108_s5 + $0x148] sm:$0xff]  ;;  %8017 = vmatprep.subr.bf16.mxu0 %v10217_v18 }
 0x361   : > { %v7159_v13 = vpop.f32.mrb[10].mxu1  ;;  %v1786_v48 = vadd.f32 %v7158_v23, %v10186_v11  ;;  %v2078_v23 = vld [vmem:[%s14108_s5 + $0x140] sm:$0xff] }
 0x362   : > { %v7160_v30 = vpop.f32.mrb[11].mxu1  ;;  %v7206_v31 = vpop.f32.mrb[44].mxu0  ;;  %v1876_v33 = vadd.f32 %v7205_v28, %v1771_v26  ;;  %v8002_v28 = vpack.c.bf16 %v2079_v1, %v2078_v23 }
 0x363   : > { %v7161_v5 = vadd.f32 %v7160_v30, %v7159_v13  ;;  %v7207_v35 = vpop.f32.mrb[45].mxu0  ;;  %v2096_v13 = vld [vmem:[%s14108_s5 + $0x1d0] sm:$0xff]  ;;  %v2097_v30 = vld [vmem:[%s14108_s5 + $0x1d8] sm:$0xff] }
 0x364   : > { %v7208_v36 = vadd.f32 %v7207_v35, %v7206_v31  ;;  %8003 = vmatpush3.bf16.msra.mxu1 %v8002_v28 }
 0x365   : > { %v7162_v46 = vpop.f32.mrb[12].mxu1  ;;  %v1791_v63 = vadd.f32 %v7161_v5, %v10186_v11 }
 0x366   : > { %v7163_v37 = vpop.f32.mrb[13].mxu1  ;;  %v7209_v52 = vpop.f32.mrb[46].mxu0  ;;  %v1881_v42 = vadd.f32 %v7208_v36, %v1776_v19  ;;  %v8004_v36 = vpack.c.bf16 %v2097_v30, %v2096_v13 }
 0x367   : > { %v7164_v32 = vadd.f32 %v7163_v37, %v7162_v46  ;;  %v7210_v61 = vpop.f32.mrb[47].mxu0 }
 0x368   : > { %v7211_v60 = vadd.f32 %v7210_v61, %v7209_v52  ;;  %8005 = vmatprep.subr.bf16.mxu1 %v8004_v36  ;;  %v2098_v36 = vld [vmem:[%s14108_s5 + $0x1e0] sm:$0xff] }
 0x369   : > { %v7165_v7 = vpop.f32.mrb[14].mxu1 }
 0x36a   : > { %v7166_v44 = vpop.f32.mrb[15].mxu1  ;;  %v7212_v9 = vpop.f32.mrb[48].mxu0  ;;  %v1886_v45 = vadd.f32 %v7211_v60, %v1781_v0  ;;  %v1796_v0 = vadd.f32 %v7164_v32, %v10186_v11 }
 0x36b   : > { %v7167_v47 = vadd.f32 %v7166_v44, %v7165_v7  ;;  %v7213_v39 = vpop.f32.mrb[49].mxu0 }
 0x36c   : > { %v7214_v53 = vadd.f32 %v7213_v39, %v7212_v9 }
 0x36d   : > { %v7679_v62 = vpop.f32.mrb[16].mxu1 }
 0x36e   : > { %v1981_v56 = vadd.f32 %v7679_v62, %v1876_v33  ;;  %v7215_v2 = vpop.f32.mrb[50].mxu0  ;;  %v1975_v3 = vpop.f32.mrb[17].mxu1  ;;  %v1891_v4 = vadd.f32 %v7214_v53, %v1786_v48  ;;  %v1801_v48 = vadd.f32 %v7167_v47, %v10186_v11 }
 0x36f   : > { %v1976_v50 = vadd.f32 %v1975_v3, %v1871_v8  ;;  %v7216_v16 = vpop.f32.mrb[51].mxu0 }
 0x370   : > { %vm2015_vm11 = vcmp.ge.f32.partialorder %v1981_v56, 0.0  ;;  %v2023_v14 = vmul.f32 0.01, %v1981_v56  ;;  %v7217_v15 = vadd.f32 %v7216_v16, %v7215_v2 }
 0x371   : > { %vm2014_vm12 = vcmp.ge.f32.partialorder %v1976_v50, 0.0  ;;  %v2022_v8 = vmul.f32 0.01, %v1976_v50  ;;  %v7682_v26 = vpop.f32.mrb[18].mxu1 }
 0x372   : > { %v10233_v31 = vsel %vm2015_vm11, %v1981_v56, %v2023_v14  ;;  %v1991_v33 = vadd.f32 %v7682_v26, %v1886_v45  ;;  %v7218_v5 = vpop.f32.mrb[52].mxu0  ;;  %v1985_v35 = vpop.f32.mrb[19].mxu1  ;;  %v1896_v19 = vadd.f32 %v7217_v15, %v1791_v63 }
 0x373   : > { %v2120_v46 = vrot.slane %v10233_v31, 7  ;;  %v10236_v37 = vsel %vm2014_vm12, %v1976_v50, %v2022_v8  ;;  %v1986_v52 = vadd.f32 %v1985_v35, %v1881_v42  ;;  %v7219_v61 = vpop.f32.mrb[53].mxu0 }
 0x374   : > { %v2118_v60 = vrot.slane %v10236_v37, 7  ;;  %vm2017_vm13 = vcmp.ge.f32.partialorder %v1991_v33, 0.0  ;;  %v2025_v7 = vmul.f32 0.01, %v1991_v33  ;;  %v7220_v9 = vadd.f32 %v7219_v61, %v7218_v5 }
 0x375   : > { %vm2016_vm14 = vcmp.ge.f32.partialorder %v1986_v52, 0.0  ;;  %v2024_v44 = vmul.f32 0.01, %v1986_v52  ;;  %v7685_v45 = vpop.f32.mrb[20].mxu1  ;;  %v10242_v39 = vsel %vm882_vm0, %v9767_v38, %v2120_v46  ;;  %v2099_v46 = vld [vmem:[%s14108_s5 + $0x1e8] sm:$0xff] }
 0x376   : > { %v10245_v42 = vsel %vm2017_vm13, %v1991_v33, %v2025_v7  ;;  %v2001_v53 = vadd.f32 %v7685_v45, %v1896_v19  ;;  %v7221_v32 = vpop.f32.mrb[54].mxu0  ;;  %v1995_v49 = vpop.f32.mrb[21].mxu1  ;;  %v10249_v22 = vsel %vm882_vm0, %v9767_v38, %v2118_v60  ;;  %v1901_v3 = vadd.f32 %v7220_v9, %v1796_v0  ;;  %v2080_v33 = vld [vmem:[%s14108_s5 + $0x150] sm:$0xff]  ;;  %v2081_v19 = vld [vmem:[%s14108_s5 + $0x158] sm:$0xff]  ;;  %v2082_v60 = vld [vmem:[%s14108_s5 + $0x160] sm:$0xff] }
 0x377   : > { %v2124_v51 = vrot.slane %v10245_v42, 7  ;;  %v10252_v62 = vsel %vm2016_vm14, %v1986_v52, %v2024_v44  ;;  %v1996_v25 = vadd.f32 %v1995_v49, %v1891_v4  ;;  %v7222_v29 = vpop.f32.mrb[55].mxu0  ;;  %v8666_v57 = vpack.i.bf16 %v10242_v39, %v10249_v22 }
 0x378   : > { %v2122_v11 = vrot.slane %v10252_v62, 7  ;;  %vm2019_vm15 = vcmp.ge.f32.partialorder %v2001_v53, 0.0  ;;  %v2027_v47 = vmul.f32 0.01, %v2001_v53  ;;  %v7223_v59 = vadd.f32 %v7222_v29, %v7221_v32  ;;  %v2101_v32 = vld [vmem:[%s14108_s5 + $0x1f8] sm:$0xff] }
 0x379   : > { %vm2018_vm3 = vcmp.ge.f32.partialorder %v1996_v25, 0.0  ;;  %v2026_v56 = vmul.f32 0.01, %v1996_v25  ;;  %v7688_v2 = vpop.f32.mrb[22].mxu1  ;;  %8667 = vrot.lane.b32.xlu0 %v8666_v57, %s14110_s1  ;;  %v10260_v55 = vsel %vm882_vm0, %v9767_v38, %v2124_v51  ;;  %v2139_v7 = vrot.slane %v10236_v37, 1 }
 0x37a   : > { %v10262_v4 = vsel %vm2019_vm15, %v2001_v53, %v2027_v47  ;;  %v1906_v58 = vadd.f32 %v7223_v59, %v1801_v48  ;;  %v2005_v6 = vpop.f32.mrb[23].mxu1  ;;  %v10266_v12 = vsel %vm882_vm0, %v9767_v38, %v2122_v11  ;;  %v8676_v50 = vpack.i.bf16 %v10260_v55, %v10233_v31  ;;  %v2083_v48 = vld [vmem:[%s14108_s5 + $0x168] sm:$0xff]  ;;  %v2100_v53 = vld [vmem:[%s14108_s5 + $0x1f0] sm:$0xff]  ;;  %v2085_v59 = vld [vmem:[%s14108_s5 + $0x178] sm:$0xff] }
 0x37b   : > { %v2128_v16 = vrot.slane %v10262_v4, 7  ;;  %v10271_v63 = vsel %vm2018_vm3, %v1996_v25, %v2026_v56  ;;  %v2006_v14 = vadd.f32 %v2005_v6, %v1901_v3  ;;  %v8671_v15 = vpack.i.bf16 %v10266_v12, %v10236_v37  ;;  %v2084_v47 = vld [vmem:[%s14108_s5 + $0x170] sm:$0xff] }
 0x37c   : > { %v2126_v23 = vrot.slane %v10271_v63, 7  ;;  %v2011_v1 = vadd.f32 %v7688_v2, %v1906_v58  ;;  %v8006_v9 = vpack.c.bf16 %v2081_v19, %v2080_v33  ;;  %v8008_v45 = vpack.c.bf16 %v2099_v46, %v2098_v36  ;;  %v2104_v46 = vld [vmem:[%s14108_s5 + $0x210] sm:$0xff] }
 0x37d   : > { %vm2020_vm4 = vcmp.ge.f32.partialorder %v2006_v14, 0.0  ;;  %v2028_v8 = vmul.f32 0.01, %v2006_v14  ;;  %8672 = vrot.lane.b32.xlu1 %v8671_v15, %s14110_s1  ;;  %8677 = vrot.lane.b32.xlu0 %v8676_v50, %s14110_s1  ;;  %v10280_v26 = vsel %vm882_vm0, %v9767_v38, %v2128_v16  ;;  %v2141_v29 = vrot.slane %v10233_v31, 1 }
 0x37e   : > { %vm2021_vm5 = vcmp.ge.f32.partialorder %v2011_v1, 0.0  ;;  %v2029_v28 = vmul.f32 0.01, %v2011_v1  ;;  %v10284_v13 = vsel %vm882_vm0, %v9767_v38, %v2126_v23  ;;  %v8686_v30 = vpack.i.bf16 %v10280_v26, %v10245_v42  ;;  %8007 = vmatpush3.bf16.msra.mxu1 %v8006_v9 }
 0x37f   : > { %v10291_v5 = vsel %vm2020_vm4, %v2006_v14, %v2028_v8  ;;  %v8681_v35 = vpack.i.bf16 %v10284_v13, %v10252_v62  ;;  %8009 = vmatprep.subr.bf16.mxu1 %v8008_v45  ;;  %v8010_v57 = vpack.c.bf16 %v2083_v48, %v2082_v60  ;;  %v8012_v11 = vpack.c.bf16 %v2101_v32, %v2100_v53  ;;  %v2106_v53 = vld [vmem:[%s14108_s5 + $0x220] sm:$0xff]  ;;  %v2107_v32 = vld [vmem:[%s14108_s5 + $0x228] sm:$0xff] }
 0x380   : > { %v10304_v52 = vsel %vm2021_vm5, %v2011_v1, %v2029_v28  ;;  %v2130_v61 = vrot.slane %v10291_v5, 7  ;;  %v2140_v56 = vsel %vm923_vm1, %v2139_v7, %v9897_v40  ;;  %v2143_v3 = vrot.slane %v10252_v62, 1 }
 0x381   : > { %v2161_v0 = vrot.slane %v10304_v52, 7  ;;  %8682 = vrot.lane.b32.xlu1 %v8681_v35, %s14110_s1  ;;  %8687 = vrot.lane.b32.xlu0 %v8686_v30, %s14110_s1  ;;  %v8701_v2 = vpack.i.bf16 %v2140_v56, %v10291_v5  ;;  %v8014_v58 = vpack.c.bf16 %v2085_v59, %v2084_v47  ;;  %v10351_v6 = vsel %vm923_vm1, %v2141_v29, %v9897_v40 }
 0x382   : > { %v10316_v44 = vsel %vm882_vm0, %v9767_v38, %v2130_v61  ;;  %8011 = vmatpush3.bf16.msra.mxu1 %v8010_v57  ;;  %v2145_v50 = vrot.slane %v10245_v42, 1  ;;  %v2151_v16 = vrot.slane %v10291_v5, 1  ;;  %v10359_v14 = vsel %vm923_vm1, %v2143_v3, %v9897_v40  ;;  %v2105_v61 = vld [vmem:[%s14108_s5 + $0x218] sm:$0xff] }
 0x383   : > { %v8691_v49 = vpack.i.bf16 %v10316_v44, %v10271_v63  ;;  %v10331_v51 = vsel %vm882_vm0, %v9767_v38, %v2161_v0  ;;  %8013 = vmatprep.subr.bf16.mxu1 %v8012_v11  ;;  %v2147_v15 = vrot.slane %v10271_v63, 1  ;;  %v2149_v1 = vrot.slane %v10262_v4, 1 }
 0x384   : > { %v8696_v25 = vpack.i.bf16 %v10331_v51, %v10262_v4  ;;  %v10366_v23 = vsel %vm923_vm1, %v2145_v50, %v9897_v40  ;;  %v10377_v28 = vsel %vm923_vm1, %v2151_v16, %v9897_v40  ;;  %v2163_v33 = vrot.slane %v10304_v52, 1 }
 0x385   : > { %8692 = vrot.lane.b32.xlu1 %v8691_v49, %s14110_s1  ;;  %v10373_v8 = vsel %vm923_vm1, %v2147_v15, %v9897_v40  ;;  %v10383_v30 = vsel %vm923_vm1, %v2149_v1, %v9897_v40  ;;  %v8706_v35 = vpack.i.bf16 %v10377_v28, %v10304_v52  ;;  %v8020_v9 = vpack.c.bf16 %v2105_v61, %v2104_v46 }
 0x386   : > { %8697 = vrot.lane.b32.xlu0 %v8696_v25, %s14110_s1  ;;  %8015 = vmatpush3.bf16.msra.mxu1 %v8014_v58  ;;  %v10393_v19 = vsel %vm923_vm1, %v2163_v33, %v9897_v40  ;;  %v8024_v59 = vpack.c.bf16 %v2107_v32, %v2106_v53  ;;  %v2108_v58 = vld [vmem:[%s14108_s5 + $0x230] sm:$0xff] }
 0x389   : > { %8702 = vrot.lane.b32.xlu1 %v8701_v2, %s14110_s1 }
 0x38a   : > { %2213 = vrot.lane.b32.xlu0 %v10351_v6, %s14110_s1 }
 0x38d   : > { %2215 = vrot.lane.b32.xlu1 %v10359_v14, %s14110_s1 }
 0x38e   : > { %2217 = vrot.lane.b32.xlu0 %v10366_v23, %s14110_s1 }
 0x391   : > { %2219 = vrot.lane.b32.xlu1 %v10373_v8, %s14110_s1 }
 0x392   : > { %2221 = vrot.lane.b32.xlu0 %v10383_v30, %s14110_s1 }
 0x395   : > { %8707 = vrot.lane.b32.xlu1 %v8706_v35, %s14110_s1 }
 0x396   : > { %2225 = vrot.lane.b32.xlu0 %v10393_v19, %s14110_s1 }
 0x3eb   : > { %v8668_v36 = vpop.permute.xlu0 %8667 }
 0x3ec   : > { %v8670_v0 = vunpack.i.h.bf16 %v8668_v36  ;;  %v8669_v60 = vunpack.i.l.bf16 %v8668_v36 }
 0x3ee   : > { %v2245_v7 = vsel %vm1054_vm2, %v9897_v40, %v8669_v60  ;;  %v2246_v57 = vsel %vm1054_vm2, %v2140_v56, %v8670_v0 }
 0x3ef   : > { %v8673_v45 = vpop.permute.xlu1 %8672  ;;  %v8678_v48 = vpop.permute.xlu0 %8677  ;;  %2346 = vmatprep.mubr.f32.mxu0 %v2245_v7 }
 0x3f0   : > { %v8675_v49 = vunpack.i.h.bf16 %v8673_v45  ;;  %v8674_v25 = vunpack.i.l.bf16 %v8673_v45  ;;  %v8679_v29 = vunpack.i.l.bf16 %v8678_v48  ;;  %2347 = vmatmul.mubr.f32.vlgmr.msra.gmra.mrb[56].mxu0 %v9971_v21  ;;  %v8680_v56 = vunpack.i.h.bf16 %v8678_v48 }
 0x3f1   : > { %8019 = vmatpush3.bf16.msra.mxu0 %v10217_v18  ;;  %2351 = vmatprep.mubr.f32.mxu0 %v2246_v57  ;;  %v2109_v18 = vld [vmem:[%s14108_s5 + $0x238] sm:$0xff] }
 0x3f2   : > { %v2239_v11 = vsel %vm1054_vm2, %v10242_v39, %v8679_v29  ;;  %v2238_v47 = vsel %vm1054_vm2, %v10249_v22, %v8674_v25  ;;  %8021 = vmatprep.subr.bf16.mxu0 %v8020_v9  ;;  %v2247_v39 = vsel %vm1054_vm2, %v10351_v6, %v8675_v49  ;;  %v8028_v22 = vpack.c.bf16 %v2109_v18, %v2108_v58 }
 0x3f3   : > { %v8683_v2 = vpop.permute.xlu1 %8682  ;;  %v8688_v3 = vpop.permute.xlu0 %8687  ;;  %2451 = vmatprep.mubr.f32.mxu1 %v2239_v11  ;;  %v2248_v1 = vsel %vm1054_vm2, %v10359_v14, %v8680_v56 }
 0x3f4   : > { %2352 = vmatmul.mubr.f32.gmra.mrb[58].mxu0 %v2238_v47  ;;  %v8684_v50 = vunpack.i.l.bf16 %v8683_v2  ;;  %v8685_v15 = vunpack.i.h.bf16 %v8683_v2  ;;  %v8689_v35 = vunpack.i.l.bf16 %v8688_v3  ;;  %v8690_v61 = vunpack.i.h.bf16 %v8688_v3 }
 0x3f5   : > { %2356 = vmatprep.mubr.f32.mxu0 %v2247_v39  ;;  %8023 = vmatpush3.bf16.msra.mxu0 %v8020_v9  ;;  %v6663_v39 = vld [vmem:[%s14106_s30 + $0x250] sm:$0xff] }
 0x3f6   : > { %8025 = vmatprep.subr.bf16.mxu0 %v8024_v59  ;;  %v2240_v46 = vsel %vm1054_vm2, %v10266_v12, %v8684_v50  ;;  %v2249_v60 = vsel %vm1054_vm2, %v10366_v23, %v8685_v15  ;;  %v2241_v48 = vsel %vm1054_vm2, %v10260_v55, %v8689_v35  ;;  %v2250_v12 = vsel %vm1054_vm2, %v10373_v8, %v8690_v61  ;;  %v6681_v50 = vld [vmem:[%s14106_s30 + $0x2e0] sm:$0xff]  ;;  %v6666_v35 = vld [vmem:[%s14106_s30 + $0x268] sm:$0xff] }
 0x3f7   : > { %v8693_v16 = vpop.permute.xlu1 %8692  ;;  %v6709_v61 = vld [vmem:[%s14106_s30 + $0x3c0] sm:$0xff] }
 0x3f8   : > { %2357 = vmatmul.mubr.f32.gmra.mrb[60].mxu0 %v2239_v11  ;;  %v8698_v33 = vpop.permute.xlu0 %8697  ;;  %v8694_v9 = vunpack.i.l.bf16 %v8693_v16  ;;  %v8695_v53 = vunpack.i.h.bf16 %v8693_v16  ;;  %v6682_v16 = vld [vmem:[%s14106_s30 + $0x2e8] sm:$0xff] }
 0x3f9   : > { %2361 = vmatprep.mubr.f32.mxu0 %v2248_v1  ;;  %8027 = vmatpush3.bf16.msra.mxu0 %v8024_v59  ;;  %v8699_v25 = vunpack.i.l.bf16 %v8698_v33  ;;  %v8700_v29 = vunpack.i.h.bf16 %v8698_v33  ;;  %v8040_v1 = vpack.c.bf16 %v6682_v16, %v6681_v50  ;;  %v6665_v33 = vld [vmem:[%s14106_s30 + $0x260] sm:$0xff]  ;;  %v6692_v50 = vld [vmem:[%s14106_s30 + $0x338] sm:$0xff] }
 0x3fa   : > { %8029 = vmatprep.subr.bf16.mxu0 %v8028_v22  ;;  %v2251_v55 = vsel %vm1054_vm2, %v10383_v30, %v8695_v53 }
 0x3fb   : > { %v8703_v36 = vpop.permute.xlu1 %8702 }
 0x3fc   : > { %v8705_v0 = vunpack.i.h.bf16 %v8703_v36  ;;  %2362 = vmatmul.mubr.f32.gmra.mrb[62].mxu0 %v2240_v46  ;;  %v2214_v45 = vpop.permute.xlu0 %2213  ;;  %v8704_v47 = vunpack.i.l.bf16 %v8703_v36  ;;  %v6683_v36 = vld [vmem:[%s14106_s30 + $0x2f0] sm:$0xff] }
 0x3fd   : > { %2366 = vmatprep.mubr.f32.mxu0 %v2249_v60  ;;  %8031 = vmatpush3.bf16.msra.mxu0 %v8028_v22  ;;  %v2254_v49 = vsel %vm1054_vm2, %v10233_v31, %v2214_v45  ;;  %v2243_v31 = vsel %vm1054_vm2, %v10280_v26, %v8699_v25  ;;  %v6664_v22 = vld [vmem:[%s14106_s30 + $0x258] sm:$0xff]  ;;  %v8042_v45 = vpack.c.bf16 %v6666_v35, %v6665_v33  ;;  %v6685_v25 = vld [vmem:[%s14106_s30 + $0x300] sm:$0xff] }
 0x3fe   : > { %v2253_v7 = vsel %vm1054_vm2, %v10236_v37, %v8705_v0  ;;  %v2242_v37 = vsel %vm1054_vm2, %v10284_v13, %v8694_v9  ;;  %v2252_v13 = vsel %vm1054_vm2, %v10377_v28, %v8700_v29  ;;  %v2244_v3 = vsel %vm1054_vm2, %v10316_v44, %v8704_v47  ;;  %v6710_v0 = vld [vmem:[%s14106_s30 + $0x3c8] sm:$0xff] }
 0x3ff   : > { %2452 = vmatmul.mubr.f32.vlgmr.msra.gmra.mrb[24].mxu1 %v2253_v7  ;;  %v2216_v32 = vpop.permute.xlu1 %2215  ;;  %v8038_v15 = vpack.c.bf16 %v6664_v22, %v6663_v39  ;;  %v8064_v60 = vpack.c.bf16 %v6710_v0, %v6709_v61  ;;  %v6693_v7 = vld [vmem:[%s14106_s30 + $0x340] sm:$0xff]  ;;  %v6694_v9 = vld [vmem:[%s14106_s30 + $0x348] sm:$0xff]  ;;  %v6691_v22 = vld [vmem:[%s14106_s30 + $0x330] sm:$0xff] }
 0x400   : > { %2367 = vmatmul.mubr.f32.gmra.mrb[64].mxu0 %v2241_v48  ;;  %2456 = vmatprep.mubr.f32.mxu1 %v2240_v46  ;;  %v2255_v11 = vsel %vm1054_vm2, %v10252_v62, %v2216_v32  ;;  %v2218_v59 = vpop.permute.xlu0 %2217  ;;  %v6684_v46 = vld [vmem:[%s14106_s30 + $0x2f8] sm:$0xff]  ;;  %v8066_v53 = vpack.c.bf16 %v6694_v9, %v6693_v7  ;;  %v6711_v32 = vld [vmem:[%s14106_s30 + $0x3d0] sm:$0xff]  ;;  %v6686_v29 = vld [vmem:[%s14106_s30 + $0x308] sm:$0xff] }
 0x401   : > { %2371 = vmatprep.mubr.f32.mxu0 %v2250_v12  ;;  %v2256_v2 = vsel %vm1054_vm2, %v10245_v42, %v2218_v59  ;;  %v8044_v12 = vpack.c.bf16 %v6684_v46, %v6683_v36  ;;  %8065 = vmatprep.subr.bf16.mxu0 %v8064_v60  ;;  %v6713_v59 = vld [vmem:[%s14106_s30 + $0x3e0] sm:$0xff]  ;;  %v6674_v39 = vld [vmem:[%s14106_s30 + $0x2a8] sm:$0xff] }
 0x403   : > { %2457 = vmatmul.mubr.f32.gmra.mrb[26].mxu1 %v2254_v49  ;;  %v2220_v57 = vpop.permute.xlu1 %2219  ;;  %v6668_v49 = vld [vmem:[%s14106_s30 + $0x278] sm:$0xff] }
 0x404   : > { %2372 = vmatmul.mubr.f32.gmra.mrb[66].mxu0 %v2242_v37  ;;  %2461 = vmatprep.mubr.f32.mxu1 %v2241_v48  ;;  %v2257_v26 = vsel %vm1054_vm2, %v10271_v63, %v2220_v57  ;;  %v2222_v58 = vpop.permute.xlu0 %2221  ;;  %v6667_v48 = vld [vmem:[%s14106_s30 + $0x270] sm:$0xff] }
 0x405   : > { %2376 = vmatprep.mubr.f32.mxu0 %v2251_v55  ;;  %v2258_v44 = vsel %vm1054_vm2, %v10262_v4, %v2222_v58  ;;  %v6695_v57 = vld [vmem:[%s14106_s30 + $0x350] sm:$0xff]  ;;  %v6670_v58 = vld [vmem:[%s14106_s30 + $0x288] sm:$0xff] }
 0x407   : > { %2462 = vmatmul.mubr.f32.gmra.mrb[28].mxu1 %v2255_v11  ;;  %v8708_v62 = vpop.permute.xlu1 %8707  ;;  %v6696_v11 = vld [vmem:[%s14106_s30 + $0x358] sm:$0xff] }
 0x408   : > { %2377 = vmatmul.mubr.f32.gmra.mrb[68].mxu0 %v2243_v31  ;;  %2466 = vmatprep.mubr.f32.mxu1 %v2242_v37  ;;  %v8709_v18 = vunpack.i.l.bf16 %v8708_v62  ;;  %v8710_v42 = vunpack.i.h.bf16 %v8708_v62  ;;  %v6712_v37 = vld [vmem:[%s14106_s30 + $0x3d8] sm:$0xff]  ;;  %v8070_v47 = vpack.c.bf16 %v6696_v11, %v6695_v57  ;;  %v6697_v62 = vld [vmem:[%s14106_s30 + $0x360] sm:$0xff] }
 0x409   : > { %2381 = vmatprep.mubr.f32.mxu0 %v2252_v13  ;;  %v8068_v55 = vpack.c.bf16 %v6712_v37, %v6711_v32  ;;  %v8046_v13 = vpack.c.bf16 %v6668_v49, %v6667_v48  ;;  %v10616_v48 = vld [vmem:[%s14111_s6] ss:$0 sm:$0xff] }
 0x40a   : > { %v2259_v63 = vsel %vm1054_vm2, %v10291_v5, %v8710_v42  ;;  %v6677_v5 = vld [vmem:[%s14106_s30 + $0x2c0] sm:$0xff]  ;;  %v6698_v42 = vld [vmem:[%s14106_s30 + $0x368] sm:$0xff] }
 0x40b   : > { %2467 = vmatmul.mubr.f32.gmra.mrb[30].mxu1 %v2256_v2  ;;  %v6669_v2 = vld [vmem:[%s14106_s30 + $0x280] sm:$0xff] }
 0x40c   : > { %2382 = vmatmul.mubr.f32.gmra.mrb[70].mxu0 %v2244_v3  ;;  %2471 = vmatprep.mubr.f32.mxu1 %v2243_v31  ;;  %v6714_v31 = vld [vmem:[%s14106_s30 + $0x3e8] sm:$0xff] }
 0x40d   : > { %7705 = vmatprep.mubr.msk.f32.mxu0 %vm1054_vm2, %v10351_v6  ;;  %v2261_v6 = vsel %vm1054_vm2, %v10331_v51, %v8709_v18  ;;  %v6678_v51 = vld [vmem:[%s14106_s30 + $0x2c8] sm:$0xff]  ;;  %v6687_v18 = vld [vmem:[%s14106_s30 + $0x310] sm:$0xff] }
 0x40f   : > { %2472 = vmatmul.mubr.f32.gmra.mrb[32].mxu1 %v2257_v26  ;;  %v8048_v26 = vpack.c.bf16 %v6686_v29, %v6685_v25 }
 0x410   : > { %2476 = vmatprep.mubr.f32.mxu1 %v2244_v3  ;;  %7706 = vmatmul.mubr.msk.f32.vlgmr.msra.gmra.mrb[72].mxu0 %vm1054_vm2, %v10359_v14  ;;  %v2226_v14 = vpop.permute.xlu0 %2225  ;;  %v8072_v3 = vpack.c.bf16 %v6714_v31, %v6713_v59 }
 0x411   : > { %7708 = vmatprep.mubr.msk.f32.mxu0 %vm1054_vm2, %v10366_v23  ;;  %v2260_v4 = vsel %vm1054_vm2, %v10304_v52, %v2226_v14  ;;  %v6661_v23 = vld [vmem:[%s14106_s30 + $0x240] sm:$0xff]  ;;  %v6662_v52 = vld [vmem:[%s14106_s30 + $0x248] sm:$0xff]  ;;  %8067 = vmatpush3.bf16.msra.mxu0 %v8066_v53  ;;  %v6716_v14 = vld [vmem:[%s14106_s30 + $0x3f8] sm:$0xff] }
 0x412   : > { %8069 = vmatprep.subr.bf16.mxu0 %v8068_v55 }
 0x413   : > { %2477 = vmatmul.mubr.f32.gmra.mrb[34].mxu1 %v2258_v44  ;;  %v6688_v44 = vld [vmem:[%s14106_s30 + $0x318] sm:$0xff] }
 0x414   : > { %2481 = vmatprep.mubr.f32.mxu1 %v2261_v6  ;;  %7709 = vmatmul.mubr.msk.f32.gmra.mrb[74].mxu0 %vm1054_vm2, %v10373_v8  ;;  %v8032_v8 = vpack.c.bf16 %v6678_v51, %v6677_v5  ;;  %v8074_v6 = vpack.c.bf16 %v6698_v42, %v6697_v62  ;;  %v8050_v5 = vpack.c.bf16 %v6670_v58, %v6669_v2 }
 0x415   : > { %7711 = vmatprep.mubr.msk.f32.mxu0 %vm1054_vm2, %v10383_v30  ;;  %v6680_v30 = vld [vmem:[%s14106_s30 + $0x2d8] sm:$0xff]  ;;  %8071 = vmatpush3.bf16.msra.mxu0 %v8070_v47  ;;  %v8052_v51 = vpack.c.bf16 %v6688_v44, %v6687_v18 }
 0x416   : > { %8033 = vmatprep.subr.bf16.mxu1 %v8032_v8  ;;  %8073 = vmatprep.subr.bf16.mxu0 %v8072_v3  ;;  %v6672_v8 = vld [vmem:[%s14106_s30 + $0x298] sm:$0xff] }
 0x417   : > { %2482 = vmatmul.mubr.f32.gmra.mrb[36].mxu1 %v2259_v63  ;;  %v6715_v63 = vld [vmem:[%s14106_s30 + $0x3f0] sm:$0xff] }
 0x418   : > { %2486 = vmatprep.mubr.f32.mxu1 %v9971_v21  ;;  %7712 = vmatmul.mubr.msk.f32.gmra.mrb[76].mxu0 %vm1054_vm2, %v10377_v28  ;;  %v6679_v28 = vld [vmem:[%s14106_s30 + $0x2d0] sm:$0xff] }
 0x419   : > { %7714 = vmatprep.mubr.msk.f32.mxu0 %vm1054_vm2, %v10393_v19  ;;  %v8034_v19 = vpack.c.bf16 %v6662_v52, %v6661_v23  ;;  %v8036_v56 = vpack.c.bf16 %v6680_v30, %v6679_v28  ;;  %v6671_v23 = vld [vmem:[%s14106_s30 + $0x290] sm:$0xff]  ;;  %v6689_v52 = vld [vmem:[%s14106_s30 + $0x320] sm:$0xff]  ;;  %v6690_v28 = vld [vmem:[%s14106_s30 + $0x328] sm:$0xff]  ;;  %8075 = vmatpush3.bf16.msra.mxu0 %v8074_v6 }
 0x41a   : > { %v8054_v30 = vpack.c.bf16 %v6672_v8, %v6671_v23 }
 0x41b   : > { %2487 = vmatmul.mubr.f32.gmra.mrb[38].mxu1 %v2260_v4  ;;  %v8076_v4 = vpack.c.bf16 %v6716_v14, %v6715_v63 }
 0x41c   : > { %7715 = vmatmul.mubr.msk.f32.gmra.mrb[78].mxu0 %vm1054_vm2, %v9897_v40  ;;  %8035 = vmatpush3.bf16.msra.mxu1 %v8034_v19  ;;  %v8056_v19 = vpack.c.bf16 %v6690_v28, %v6689_v52 }
 0x41d   : > { %8037 = vmatprep.subr.bf16.mxu1 %v8036_v56  ;;  %8077 = vmatprep.subr.bf16.mxu0 %v8076_v4  ;;  %v6673_v56 = vld [vmem:[%s14106_s30 + $0x2a0] sm:$0xff] }
 0x41e   : > { %v8058_v16 = vpack.c.bf16 %v6674_v39, %v6673_v56  ;;  %v6699_v56 = vld [vmem:[%s14106_s30 + $0x370] sm:$0xff] }
 0x420   : > { %8039 = vmatpush3.bf16.msra.mxu1 %v8038_v15  ;;  %v8060_v15 = vpack.c.bf16 %v6692_v50, %v6691_v22 }
 0x421   : > { %8041 = vmatprep.subr.bf16.mxu1 %v8040_v1 }
 0x424   : > { %8043 = vmatpush3.bf16.msra.mxu1 %v8042_v45 }
 0x425   : > { %8045 = vmatprep.subr.bf16.mxu1 %v8044_v12 }
 0x428   : > { %8047 = vmatpush3.bf16.msra.mxu1 %v8046_v13 }
 0x429   : > { %8049 = vmatprep.subr.bf16.mxu1 %v8048_v26 }
 0x42c   : > { %8051 = vmatpush3.bf16.msra.mxu1 %v8050_v5 }
 0x42d   : > { %8053 = vmatprep.subr.bf16.mxu1 %v8052_v51 }
 0x430   : > { %8055 = vmatpush3.bf16.msra.mxu1 %v8054_v30  ;;  %v6675_v30 = vld [vmem:[%s14106_s30 + $0x2b0] sm:$0xff] }
 0x431   : > { %8057 = vmatprep.subr.bf16.mxu1 %v8056_v19  ;;  %v6676_v19 = vld [vmem:[%s14106_s30 + $0x2b8] sm:$0xff] }
 0x432   : > { %v8062_v50 = vpack.c.bf16 %v6676_v19, %v6675_v30  ;;  %v6721_v30 = vld [vmem:[%s14106_s30 + $0x420] sm:$0xff]  ;;  %v6722_v19 = vld [vmem:[%s14106_s30 + $0x428] sm:$0xff] }
 0x434   : > { %8059 = vmatpush3.bf16.msra.mxu1 %v8058_v16  ;;  %v6700_v16 = vld [vmem:[%s14106_s30 + $0x378] sm:$0xff] }
 0x435   : > { %8061 = vmatprep.subr.bf16.mxu1 %v8060_v15  ;;  %v6717_v15 = vld [vmem:[%s14106_s30 + $0x400] sm:$0xff] }
 0x438   : > { %8063 = vmatpush3.bf16.msra.mxu1 %v8062_v50 }
 0x4c3   : > { %v7272_v1 = vpop.f32.mrb[56].mxu0 }
 0x4c4   : > { %v7273_v33 = vpop.f32.mrb[57].mxu0 }
 0x4c5   : > { %v7274_v35 = vadd.f32 %v7273_v33, %v7272_v1  ;;  %v6718_v1 = vld [vmem:[%s14106_s30 + $0x408] sm:$0xff] }
 0x4c7   : > { %v7275_v36 = vpop.f32.mrb[58].mxu0  ;;  %v2349_v25 = vadd.f32 %v7274_v35, %v10616_v48 }
 0x4c8   : > { %v7276_v46 = vpop.f32.mrb[59].mxu0 }
 0x4c9   : > { %v7277_v61 = vadd.f32 %v7276_v46, %v7275_v36  ;;  %v8078_v36 = vpack.c.bf16 %v6700_v16, %v6699_v56  ;;  %v8080_v46 = vpack.c.bf16 %v6718_v1, %v6717_v15 }
 0x4cb   : > { %v7278_v0 = vpop.f32.mrb[60].mxu0  ;;  %v2354_v31 = vadd.f32 %v7277_v61, %v10616_v48  ;;  %v6725_v61 = vld [vmem:[%s14106_s30 + $0x440] sm:$0xff]  ;;  %8079 = vmatpush3.bf16.msra.mxu0 %v8078_v36  ;;  %v8088_v36 = vpack.c.bf16 %v6722_v19, %v6721_v30 }
 0x4cc   : > { %v7279_v60 = vpop.f32.mrb[61].mxu0  ;;  %8081 = vmatprep.subr.bf16.mxu0 %v8080_v46 }
 0x4cd   : > { %v7280_v7 = vadd.f32 %v7279_v60, %v7278_v0  ;;  %v6726_v0 = vld [vmem:[%s14106_s30 + $0x448] sm:$0xff] }
 0x4cf   : > { %v7281_v9 = vpop.f32.mrb[62].mxu0  ;;  %v2359_v42 = vadd.f32 %v7280_v7, %v10616_v48 }
 0x4d0   : > { %v7282_v45 = vpop.f32.mrb[63].mxu0 }
 0x4d1   : > { %v7283_v53 = vadd.f32 %v7282_v45, %v7281_v9 }
 0x4d2   : > { %v7328_v32 = vpop.f32.mrb[24].mxu1 }
 0x4d3   : > { %v7284_v12 = vpop.f32.mrb[64].mxu0  ;;  %v7329_v49 = vpop.f32.mrb[25].mxu1  ;;  %v2364_v23 = vadd.f32 %v7283_v53, %v10616_v48  ;;  %v10649_v53 = vpack.c.bf16 %v6726_v0, %v6725_v61 }
 0x4d4   : > { %v7330_v37 = vadd.f32 %v7329_v49, %v7328_v32  ;;  %v7285_v29 = vpop.f32.mrb[65].mxu0  ;;  %v6702_v49 = vld [vmem:[%s14106_s30 + $0x388] sm:$0xff] }
 0x4d5   : > { %v7286_v55 = vadd.f32 %v7285_v29, %v7284_v12  ;;  %v6701_v12 = vld [vmem:[%s14106_s30 + $0x380] sm:$0xff]  ;;  %8097 = vmatprep.subr.bf16.mxu1 %v10649_v53 }
 0x4d6   : > { %v7331_v57 = vpop.f32.mrb[26].mxu1  ;;  %v2454_v11 = vadd.f32 %v7330_v37, %v2349_v25 }
 0x4d7   : > { %v7287_v47 = vpop.f32.mrb[66].mxu0  ;;  %v7332_v59 = vpop.f32.mrb[27].mxu1  ;;  %v2369_v60 = vadd.f32 %v7286_v55, %v10616_v48  ;;  %v8082_v55 = vpack.c.bf16 %v6702_v49, %v6701_v12 }
 0x4d8   : > { %v7333_v13 = vadd.f32 %v7332_v59, %v7331_v57  ;;  %v7288_v2 = vpop.f32.mrb[67].mxu0  ;;  %v6719_v57 = vld [vmem:[%s14106_s30 + $0x410] sm:$0xff] }
 0x4d9   : > { %v7289_v3 = vadd.f32 %v7288_v2, %v7287_v47  ;;  %8083 = vmatpush3.bf16.msra.mxu0 %v8082_v55  ;;  %v6723_v55 = vld [vmem:[%s14106_s30 + $0x430] sm:$0xff] }
 0x4da   : > { %v7334_v62 = vpop.f32.mrb[28].mxu1  ;;  %v2459_v26 = vadd.f32 %v7333_v13, %v2354_v31 }
 0x4db   : > { %v7290_v58 = vpop.f32.mrb[68].mxu0  ;;  %v7335_v18 = vpop.f32.mrb[29].mxu1  ;;  %v2374_v13 = vadd.f32 %v7289_v3, %v10616_v48 }
 0x4dc   : > { %v7336_v44 = vadd.f32 %v7335_v18, %v7334_v62  ;;  %v7291_v6 = vpop.f32.mrb[69].mxu0 }
 0x4dd   : > { %v7292_v63 = vadd.f32 %v7291_v6, %v7290_v58 }
 0x4de   : > { %v7337_v14 = vpop.f32.mrb[30].mxu1  ;;  %v2464_v4 = vadd.f32 %v7336_v44, %v2359_v42  ;;  %v6703_v44 = vld [vmem:[%s14106_s30 + $0x390] sm:$0xff] }
 0x4df   : > { %v7293_v5 = vpop.f32.mrb[70].mxu0  ;;  %v7338_v51 = vpop.f32.mrb[31].mxu1 }
 0x4e0   : > { %v7339_v8 = vadd.f32 %v7338_v51, %v7337_v14  ;;  %v7294_v52 = vpop.f32.mrb[71].mxu0 }
 0x4e1   : > { %v10622_v28 = vadd.f32 %v7294_v52, %v7293_v5 }
 0x4e2   : > { %v7340_v39 = vpop.f32.mrb[32].mxu1  ;;  %v2469_v22 = vadd.f32 %v7339_v8, %v2364_v23 }
 0x4e3   : > { %v7341_v33 = vpop.f32.mrb[33].mxu1  ;;  %v7707_v35 = vpop.f32.mrb[72].mxu0 }
 0x4e4   : > { %v7342_v7 = vadd.f32 %v7341_v33, %v7340_v39  ;;  %v2564_v9 = vadd.f32 %v7707_v35, %v2459_v26  ;;  %v2558_v45 = vpop.f32.mrb[73].mxu0 }
 0x4e5   : > { %v2559_v32 = vadd.f32 %v2558_v45, %v2454_v11  ;;  %v6720_v11 = vld [vmem:[%s14106_s30 + $0x418] sm:$0xff] }
 0x4e6   : > { %v10658_v25 = vadd.f32 %v2564_v9, %v9792_v10  ;;  %v7343_v37 = vpop.f32.mrb[34].mxu1  ;;  %v2474_v29 = vadd.f32 %v7342_v7, %v2369_v60  ;;  %v8084_v31 = vpack.c.bf16 %v6720_v11, %v6719_v57  ;;  %v2384_v7 = vadd.f32 %v10622_v28, %v10616_v48  ;;  %v6724_v57 = vld [vmem:[%s14106_s30 + $0x438] sm:$0xff] }
 0x4e7   : > { %v10668_v47 = vadd.f32 %v2559_v32, %v9794_v27  ;;  %v7344_v59 = vpop.f32.mrb[35].mxu1  ;;  %v7710_v10 = vpop.f32.mrb[74].mxu0  ;;  %v6704_v27 = vld [vmem:[%s14106_s30 + $0x398] sm:$0xff] }
 0x4e8   : > { %v7345_v2 = vadd.f32 %v7344_v59, %v7343_v37  ;;  %v2574_v62 = vadd.f32 %v7710_v10, %v2469_v22  ;;  %v2568_v26 = vpop.f32.mrb[75].mxu0  ;;  %v2689_v58 = vrot.slane %v10658_v25, 7  ;;  %8085 = vmatprep.subr.bf16.mxu0 %v8084_v31  ;;  %v6705_v37 = vld [vmem:[%s14106_s30 + $0x3a0] sm:$0xff] }
 0x4e9   : > { %v2569_v18 = vadd.f32 %v2568_v26, %v2464_v4  ;;  %v2687_v42 = vrot.slane %v10668_v47, 7  ;;  %v2379_v4 = vadd.f32 %v7292_v63, %v10616_v48 }
 0x4ea   : > { %v10680_v6 = vadd.f32 %v2574_v62, %v9803_v54  ;;  %v7346_v3 = vpop.f32.mrb[36].mxu1  ;;  %v2479_v14 = vadd.f32 %v7345_v2, %v2374_v13  ;;  %v10684_v5 = vsel %vm882_vm0, %v9767_v38, %v2689_v58  ;;  %v8086_v54 = vpack.c.bf16 %v6704_v27, %v6703_v44  ;;  %v6707_v62 = vld [vmem:[%s14106_s30 + $0x3b0] sm:$0xff] }
 0x4eb   : > { %v10688_v51 = vadd.f32 %v2569_v18, %v9811_v34  ;;  %v7347_v23 = vpop.f32.mrb[37].mxu1  ;;  %v7713_v8 = vpop.f32.mrb[76].mxu0  ;;  %v10692_v52 = vsel %vm882_vm0, %v9767_v38, %v2687_v42  ;;  %v8092_v58 = vpack.c.bf16 %v6724_v57, %v6723_v55  ;;  %v2708_v44 = vrot.slane %v10668_v47, 1 }
 0x4ec   : > { %v7348_v56 = vadd.f32 %v7347_v23, %v7346_v3  ;;  %v2584_v63 = vadd.f32 %v7713_v8, %v2479_v14  ;;  %v2578_v39 = vpop.f32.mrb[77].mxu0  ;;  %v8711_v34 = vpack.i.bf16 %v10684_v5, %v10692_v52  ;;  %v2693_v22 = vrot.slane %v10680_v6, 7  ;;  %8087 = vmatpush3.bf16.msra.mxu0 %v8086_v54 }
 0x4ed   : > { %v2579_v50 = vadd.f32 %v2578_v39, %v2474_v29  ;;  %v2691_v16 = vrot.slane %v10688_v51, 7  ;;  %8089 = vmatprep.subr.bf16.mxu0 %v8088_v36  ;;  %v6706_v29 = vld [vmem:[%s14106_s30 + $0x3a8] sm:$0xff]  ;;  %v2709_v23 = vsel %vm923_vm1, %v2708_v44, %v9897_v40  ;;  %v2710_v54 = vrot.slane %v10658_v25, 1 }
 0x4ee   : > { %v10705_v15 = vadd.f32 %v2584_v63, %v9824_v41  ;;  %v7349_v1 = vpop.f32.mrb[38].mxu1  ;;  %8712 = vrot.lane.b32.xlu1 %v8711_v34, %s14110_s1  ;;  %v2484_v33 = vadd.f32 %v7348_v56, %v2379_v4  ;;  %v10710_v35 = vsel %vm882_vm0, %v9767_v38, %v2693_v22  ;;  %v8090_v2 = vpack.c.bf16 %v6706_v29, %v6705_v37  ;;  %v6729_v29 = vld [vmem:[%s14106_s30 + $0x460] sm:$0xff] }
 0x4ef   : > { %v10713_v46 = vadd.f32 %v2579_v50, %v9833_v17  ;;  %v7350_v61 = vpop.f32.mrb[39].mxu1  ;;  %v7716_v0 = vpop.f32.mrb[78].mxu0  ;;  %v10717_v60 = vsel %vm882_vm0, %v9767_v38, %v2691_v16  ;;  %v8721_v41 = vpack.i.bf16 %v10710_v35, %v10658_v25  ;;  %v2712_v30 = vrot.slane %v10688_v51, 1 }
 0x4f0   : > { %v7351_v9 = vadd.f32 %v7350_v61, %v7349_v1  ;;  %v2588_v45 = vpop.f32.mrb[79].mxu0  ;;  %v8716_v32 = vpack.i.bf16 %v10717_v60, %v10668_v47  ;;  %v2697_v17 = vrot.slane %v10705_v15, 7  ;;  %8091 = vmatpush3.bf16.msra.mxu0 %v8090_v2  ;;  %v10792_v19 = vsel %vm923_vm1, %v2710_v54, %v9897_v40 }
 0x4f1   : > { %v2589_v12 = vadd.f32 %v2588_v45, %v2484_v33  ;;  %v2695_v49 = vrot.slane %v10713_v46, 7  ;;  %8093 = vmatprep.subr.bf16.mxu0 %v8092_v58  ;;  %v2714_v56 = vrot.slane %v10680_v6, 1  ;;  %v10799_v63 = vsel %vm923_vm1, %v2712_v30, %v9897_v40  ;;  %v6732_v58 = vld [vmem:[%s14106_s30 + $0x478] sm:$0xff] }
 0x4f2   : > { %v2489_v48 = vadd.f32 %v7351_v9, %v2384_v7  ;;  %8717 = vrot.lane.b32.xlu0 %v8716_v32, %s14110_s1  ;;  %8722 = vrot.lane.b32.xlu1 %v8721_v41, %s14110_s1  ;;  %v10737_v28 = vsel %vm882_vm0, %v9767_v38, %v2697_v17  ;;  %v2716_v39 = vrot.slane %v10713_v46, 1  ;;  %v2718_v50 = vrot.slane %v10705_v15, 1  ;;  %v6727_v7 = vld [vmem:[%s14106_s30 + $0x450] sm:$0xff]  ;;  %v6728_v9 = vld [vmem:[%s14106_s30 + $0x458] sm:$0xff] }
 0x4f3   : > { %v10746_v11 = vadd.f32 %v2589_v12, %v9866_v24  ;;  %v10750_v59 = vsel %vm882_vm0, %v9767_v38, %v2695_v49  ;;  %v8731_v10 = vpack.i.bf16 %v10737_v28, %v10680_v6  ;;  %v6708_v24 = vld [vmem:[%s14106_s30 + $0x3b8] sm:$0xff]  ;;  %v10807_v22 = vsel %vm923_vm1, %v2714_v56, %v9897_v40 }
 0x4f4   : > { %v2594_v31 = vadd.f32 %v7716_v0, %v2489_v48  ;;  %v8726_v13 = vpack.i.bf16 %v10750_v59, %v10688_v51  ;;  %v8094_v27 = vpack.c.bf16 %v6708_v24, %v6707_v62  ;;  %v10814_v16 = vsel %vm923_vm1, %v2716_v39, %v9897_v40  ;;  %v6730_v48 = vld [vmem:[%s14106_s30 + $0x468] sm:$0xff] }
 0x4f5   : > { %v2699_v26 = vrot.slane %v10746_v11, 7  ;;  %v8746_v8 = vpack.i.bf16 %v2709_v23, %v10746_v11  ;;  %v2720_v34 = vrot.slane %v10746_v11, 1  ;;  %v10824_v33 = vsel %vm923_vm1, %v2718_v50, %v9897_v40 }
 0x4f6   : > { %v10764_v18 = vadd.f32 %v2594_v31, %v9849_v20  ;;  %8727 = vrot.lane.b32.xlu0 %v8726_v13, %s14110_s1  ;;  %8732 = vrot.lane.b32.xlu1 %v8731_v10, %s14110_s1  ;;  %v8100_v12 = vpack.c.bf16 %v6728_v9, %v6727_v7  ;;  %v8104_v62 = vpack.c.bf16 %v6730_v48, %v6729_v29 }
 0x4f7   : > { %v10770_v42 = vsel %vm882_vm0, %v9767_v38, %v2699_v26  ;;  %8095 = vmatpush3.bf16.msra.mxu0 %v8094_v27  ;;  %v10818_v1 = vsel %vm923_vm1, %v2720_v34, %v9897_v40  ;;  %v6731_v26 = vld [vmem:[%s14106_s30 + $0x470] sm:$0xff]  ;;  %s11759_s30 = sld [smem:[#allocation7 + $0x6]] }
 0x4f8   : > { %v8736_v3 = vpack.i.bf16 %v10770_v42, %v10713_v46  ;;  %v2730_v14 = vrot.slane %v10764_v18, 7  ;;  %v8751_v36 = vpack.i.bf16 %v10818_v1, %v10764_v18  ;;  %v2732_v61 = vrot.slane %v10764_v18, 1 }
 0x4f9   : > { %v8108_v44 = vpack.c.bf16 %v6732_v58, %v6731_v26  ;;  %v6761_v26 = vld [vmem:[%s14108_s5 + $0x2d0] sm:$0xff]  ;;  %v6762_v58 = vld [vmem:[%s14108_s5 + $0x2d8] sm:$0xff] }
 0x4fa   : > { %8737 = vrot.lane.b32.xlu0 %v8736_v3, %s14110_s1  ;;  %v10779_v20 = vsel %vm882_vm0, %v9767_v38, %v2730_v14  ;;  %v10834_v0 = vsel %vm923_vm1, %v2732_v61, %v9897_v40 }
 0x4fb   : > { %v8741_v4 = vpack.i.bf16 %v10779_v20, %v10705_v15 }
 0x4fd   : > { %8742 = vrot.lane.b32.xlu1 %v8741_v4, %s14110_s1 }
 0x4fe   : > { %8747 = vrot.lane.b32.xlu0 %v8746_v8, %s14110_s1 }
 0x501   : > { %2782 = vrot.lane.b32.xlu1 %v10792_v19, %s14110_s1 }
 0x502   : > { %2784 = vrot.lane.b32.xlu0 %v10799_v63, %s14110_s1 }
 0x505   : > { %2786 = vrot.lane.b32.xlu1 %v10807_v22, %s14110_s1 }
 0x506   : > { %2788 = vrot.lane.b32.xlu0 %v10814_v16, %s14110_s1 }
 0x509   : > { %2790 = vrot.lane.b32.xlu1 %v10824_v33, %s14110_s1 }
 0x50a   : > { %8752 = vrot.lane.b32.xlu0 %v8751_v36, %s14110_s1 }
 0x50d   : > { %2794 = vrot.lane.b32.xlu1 %v10834_v0, %s14110_s1 }
 0x560   : > { %v8713_v41 = vpop.permute.xlu1 %8712 }
 0x561   : > { %v8715_v45 = vunpack.i.h.bf16 %v8713_v41  ;;  %v8714_v32 = vunpack.i.l.bf16 %v8713_v41 }
 0x563   : > { %v2814_v17 = vsel %vm1054_vm2, %v9897_v40, %v8714_v32  ;;  %v2815_v31 = vsel %vm1054_vm2, %v2709_v23, %v8715_v45 }
 0x564   : > { %v8718_v49 = vpop.permute.xlu0 %8717  ;;  %v8723_v37 = vpop.permute.xlu1 %8722  ;;  %2915 = vmatprep.mubr.f32.mxu1 %v2814_v17 }
 0x565   : > { %v8720_v55 = vunpack.i.h.bf16 %v8718_v49  ;;  %v8719_v57 = vunpack.i.l.bf16 %v8718_v49  ;;  %v8724_v10 = vunpack.i.l.bf16 %v8723_v37  ;;  %2916 = vmatmul.mubr.f32.vlgmr.msra.gmra.mrb[40].mxu1 %v9971_v21 }
 0x566   : > { %8099 = vmatpush3.bf16.msra.mxu1 %v10649_v53  ;;  %2920 = vmatprep.mubr.f32.mxu1 %v2815_v31  ;;  %v8725_v53 = vunpack.i.h.bf16 %v8723_v37 }
 0x567   : > { %v2808_v13 = vsel %vm1054_vm2, %v10684_v5, %v8724_v10  ;;  %v2807_v2 = vsel %vm1054_vm2, %v10692_v52, %v8719_v57  ;;  %8101 = vmatprep.subr.bf16.mxu1 %v8100_v12  ;;  %v2816_v5 = vsel %vm1054_vm2, %v10792_v19, %v8720_v55 }
 0x568   : > { %v8728_v24 = vpop.permute.xlu0 %8727  ;;  %3020 = vmatprep.mubr.f32.mxu0 %v2808_v13  ;;  %v8733_v52 = vpop.permute.xlu1 %8732  ;;  %v2817_v4 = vsel %vm1054_vm2, %v10799_v63, %v8725_v53 }
 0x569   : > { %2921 = vmatmul.mubr.f32.gmra.mrb[42].mxu1 %v2807_v2  ;;  %v8729_v27 = vunpack.i.l.bf16 %v8728_v24  ;;  %v8730_v14 = vunpack.i.h.bf16 %v8728_v24  ;;  %v8734_v8 = vunpack.i.l.bf16 %v8733_v52  ;;  %v8735_v56 = vunpack.i.h.bf16 %v8733_v52  ;;  %v6745_v52 = vld [vmem:[%s14108_s5 + $0x250] sm:$0xff] }
 0x56a   : > { %2925 = vmatprep.mubr.f32.mxu1 %v2816_v5  ;;  %8103 = vmatpush3.bf16.msra.mxu1 %v8100_v12  ;;  %v8116_v5 = vpack.c.bf16 %v6762_v58, %v6761_v26  ;;  %v6753_v58 = vld [vmem:[%s14108_s5 + $0x290] sm:$0xff] }
 0x56b   : > { %8105 = vmatprep.subr.bf16.mxu1 %v8104_v62  ;;  %v2809_v30 = vsel %vm1054_vm2, %v10717_v60, %v8729_v27  ;;  %v2818_v34 = vsel %vm1054_vm2, %v10807_v22, %v8730_v14  ;;  %v2810_v41 = vsel %vm1054_vm2, %v10710_v35, %v8734_v8  ;;  %v2819_v60 = vsel %vm1054_vm2, %v10814_v16, %v8735_v56  ;;  %v6763_v27 = vld [vmem:[%s14108_s5 + $0x2e0] sm:$0xff]  ;;  %v6792_v56 = vld [vmem:[%s14108_s5 + $0x3c8] sm:$0xff] }
 0x56c   : > { %v8738_v3 = vpop.permute.xlu0 %8737 }
 0x56d   : > { %2926 = vmatmul.mubr.f32.gmra.mrb[44].mxu1 %v2808_v13  ;;  %v8739_v36 = vunpack.i.l.bf16 %v8738_v3  ;;  %v8740_v7 = vunpack.i.h.bf16 %v8738_v3  ;;  %v6764_v3 = vld [vmem:[%s14108_s5 + $0x2e8] sm:$0xff] }
 0x56e   : > { %2930 = vmatprep.mubr.f32.mxu1 %v2817_v4  ;;  %8107 = vmatpush3.bf16.msra.mxu1 %v8104_v62  ;;  %v6747_v4 = vld [vmem:[%s14108_s5 + $0x260] sm:$0xff]  ;;  %v8120_v8 = vpack.c.bf16 %v6764_v3, %v6763_v27 }
 0x56f   : > { %v8743_v23 = vpop.permute.xlu1 %8742  ;;  %8109 = vmatprep.subr.bf16.mxu1 %v8108_v44  ;;  %v2811_v17 = vsel %vm1054_vm2, %v10750_v59, %v8739_v36  ;;  %v2820_v35 = vsel %vm1054_vm2, %v10824_v33, %v8740_v7  ;;  %v6776_v36 = vld [vmem:[%s14108_s5 + $0x348] sm:$0xff]  ;;  %v6794_v7 = vld [vmem:[%s14108_s5 + $0x3d8] sm:$0xff] }
 0x570   : > { %v8748_v54 = vpop.permute.xlu0 %8747  ;;  %v8744_v32 = vunpack.i.l.bf16 %v8743_v23  ;;  %v8745_v12 = vunpack.i.h.bf16 %v8743_v23  ;;  %v6791_v23 = vld [vmem:[%s14108_s5 + $0x3c0] sm:$0xff] }
 0x571   : > { %v8750_v39 = vunpack.i.h.bf16 %v8748_v54  ;;  %2931 = vmatmul.mubr.f32.gmra.mrb[46].mxu1 %v2809_v30  ;;  %v8749_v29 = vunpack.i.l.bf16 %v8748_v54  ;;  %v6748_v54 = vld [vmem:[%s14108_s5 + $0x268] sm:$0xff] }
 0x572   : > { %2935 = vmatprep.mubr.f32.mxu1 %v2818_v34  ;;  %8111 = vmatpush3.bf16.msra.mxu1 %v8108_v44  ;;  %v2812_v55 = vsel %vm1054_vm2, %v10737_v28, %v8744_v32  ;;  %v2821_v59 = vsel %vm1054_vm2, %v10818_v1, %v8745_v12  ;;  %v6746_v44 = vld [vmem:[%s14108_s5 + $0x258] sm:$0xff]  ;;  %v8144_v34 = vpack.c.bf16 %v6792_v56, %v6791_v23  ;;  %v6777_v32 = vld [vmem:[%s14108_s5 + $0x350] sm:$0xff]  ;;  %v6756_v23 = vld [vmem:[%s14108_s5 + $0x2a8] sm:$0xff] }
 0x573   : > { %v2822_v50 = vsel %vm1054_vm2, %v10668_v47, %v8750_v39  ;;  %v2783_v61 = vpop.permute.xlu1 %2782  ;;  %v2813_v10 = vsel %vm1054_vm2, %v10770_v42, %v8749_v29  ;;  %v8118_v14 = vpack.c.bf16 %v6746_v44, %v6745_v52  ;;  %v6766_v39 = vld [vmem:[%s14108_s5 + $0x2f8] sm:$0xff]  ;;  %v6771_v52 = vld [vmem:[%s14108_s5 + $0x320] sm:$0xff]  ;;  %v6772_v44 = vld [vmem:[%s14108_s5 + $0x328] sm:$0xff] }
 0x574   : > { %3021 = vmatmul.mubr.f32.vlgmr.msra.gmra.mrb[80].mxu0 %v2822_v50  ;;  %v2785_v9 = vpop.permute.xlu0 %2784  ;;  %v2823_v45 = vsel %vm1054_vm2, %v10658_v25, %v2783_v61  ;;  %v6775_v50 = vld [vmem:[%s14108_s5 + $0x340] sm:$0xff]  ;;  %8145 = vmatprep.subr.bf16.mxu1 %v8144_v34  ;;  %v6750_v12 = vld [vmem:[%s14108_s5 + $0x278] sm:$0xff] }
 0x575   : > { %2936 = vmatmul.mubr.f32.gmra.mrb[48].mxu1 %v2810_v41  ;;  %3025 = vmatprep.mubr.f32.mxu0 %v2809_v30  ;;  %v2824_v37 = vsel %vm1054_vm2, %v10688_v51, %v2785_v9  ;;  %v6765_v30 = vld [vmem:[%s14108_s5 + $0x2f0] sm:$0xff]  ;;  %v8146_v61 = vpack.c.bf16 %v6776_v36, %v6775_v50  ;;  %v8122_v9 = vpack.c.bf16 %v6748_v54, %v6747_v4  ;;  %v6755_v4 = vld [vmem:[%s14108_s5 + $0x2a0] sm:$0xff]  ;;  %v6774_v54 = vld [vmem:[%s14108_s5 + $0x338] sm:$0xff] }
 0x576   : > { %2940 = vmatprep.mubr.f32.mxu1 %v2819_v60  ;;  %v6749_v60 = vld [vmem:[%s14108_s5 + $0x270] sm:$0xff] }
 0x577   : > { %v2787_v48 = vpop.permute.xlu1 %2786 }
 0x578   : > { %3026 = vmatmul.mubr.f32.gmra.mrb[82].mxu0 %v2823_v45  ;;  %v2789_v49 = vpop.permute.xlu0 %2788  ;;  %v2825_v57 = vsel %vm1054_vm2, %v10680_v6, %v2787_v48  ;;  %v6795_v48 = vld [vmem:[%s14108_s5 + $0x3e0] sm:$0xff] }
 0x579   : > { %2941 = vmatmul.mubr.f32.gmra.mrb[50].mxu1 %v2811_v17  ;;  %3030 = vmatprep.mubr.f32.mxu0 %v2810_v41  ;;  %v2826_v28 = vsel %vm1054_vm2, %v10713_v46, %v2789_v49  ;;  %v6793_v41 = vld [vmem:[%s14108_s5 + $0x3d0] sm:$0xff]  ;;  %v6778_v49 = vld [vmem:[%s14108_s5 + $0x358] sm:$0xff] }
 0x57a   : > { %2945 = vmatprep.mubr.f32.mxu1 %v2820_v35  ;;  %v8148_v45 = vpack.c.bf16 %v6794_v7, %v6793_v41  ;;  %v6767_v35 = vld [vmem:[%s14108_s5 + $0x300] sm:$0xff]  ;;  %v8150_v29 = vpack.c.bf16 %v6778_v49, %v6777_v32 }
 0x57b   : > { %v2791_v13 = vpop.permute.xlu1 %2790 }
 0x57c   : > { %3031 = vmatmul.mubr.f32.gmra.mrb[84].mxu0 %v2824_v37  ;;  %v8753_v31 = vpop.permute.xlu0 %8752  ;;  %v2827_v62 = vsel %vm1054_vm2, %v10705_v15, %v2791_v13  ;;  %v6768_v37 = vld [vmem:[%s14108_s5 + $0x308] sm:$0xff]  ;;  %v6797_v13 = vld [vmem:[%s14108_s5 + $0x3f0] sm:$0xff] }
 0x57d   : > { %2946 = vmatmul.mubr.f32.gmra.mrb[52].mxu1 %v2812_v55  ;;  %3035 = vmatprep.mubr.f32.mxu0 %v2811_v17  ;;  %v8754_v2 = vunpack.i.l.bf16 %v8753_v31  ;;  %v8755_v42 = vunpack.i.h.bf16 %v8753_v31  ;;  %v8124_v17 = vpack.c.bf16 %v6766_v39, %v6765_v30  ;;  %v8126_v31 = vpack.c.bf16 %v6750_v12, %v6749_v60 }
 0x57e   : > { %2950 = vmatprep.mubr.f32.mxu1 %v2821_v59  ;;  %v8138_v30 = vpack.c.bf16 %v6756_v23, %v6755_v4 }
 0x57f   : > { %v2795_v24 = vpop.permute.xlu1 %2794 }
 0x580   : > { %3036 = vmatmul.mubr.f32.gmra.mrb[86].mxu0 %v2825_v57  ;;  %v6779_v57 = vld [vmem:[%s14108_s5 + $0x360] sm:$0xff] }
 0x581   : > { %2951 = vmatmul.mubr.f32.gmra.mrb[54].mxu1 %v2813_v10  ;;  %3040 = vmatprep.mubr.f32.mxu0 %v2812_v55  ;;  %v6796_v55 = vld [vmem:[%s14108_s5 + $0x3e8] sm:$0xff] }
 0x582   : > { %7733 = vmatprep.mubr.msk.f32.mxu1 %vm1054_vm2, %v10792_v19  ;;  %v2830_v19 = vsel %vm1054_vm2, %v10779_v20, %v8754_v2  ;;  %v2829_v20 = vsel %vm1054_vm2, %v10764_v18, %v2795_v24  ;;  %v8152_v59 = vpack.c.bf16 %v6796_v55, %v6795_v48  ;;  %v8128_v2 = vpack.c.bf16 %v6768_v37, %v6767_v35  ;;  %v6770_v24 = vld [vmem:[%s14108_s5 + $0x318] sm:$0xff] }
 0x584   : > { %3041 = vmatmul.mubr.f32.gmra.mrb[88].mxu0 %v2826_v28  ;;  %v6751_v28 = vld [vmem:[%s14108_s5 + $0x280] sm:$0xff] }
 0x585   : > { %3045 = vmatprep.mubr.f32.mxu0 %v2813_v10  ;;  %7734 = vmatmul.mubr.msk.f32.vlgmr.msra.gmra.mrb[56].mxu1 %vm1054_vm2, %v10799_v63  ;;  %v2828_v63 = vsel %vm1054_vm2, %v10746_v11, %v8755_v42  ;;  %v6780_v10 = vld [vmem:[%s14108_s5 + $0x368] sm:$0xff] }
 0x586   : > { %7736 = vmatprep.mubr.msk.f32.mxu1 %vm1054_vm2, %v10807_v22  ;;  %v6759_v22 = vld [vmem:[%s14108_s5 + $0x2c0] sm:$0xff]  ;;  %8147 = vmatpush3.bf16.msra.mxu1 %v8146_v61  ;;  %v6752_v42 = vld [vmem:[%s14108_s5 + $0x288] sm:$0xff] }
 0x587   : > { %8149 = vmatprep.subr.bf16.mxu1 %v8148_v45 }
 0x588   : > { %3046 = vmatmul.mubr.f32.gmra.mrb[90].mxu0 %v2827_v62  ;;  %v6769_v62 = vld [vmem:[%s14108_s5 + $0x310] sm:$0xff] }
 0x589   : > { %3050 = vmatprep.mubr.f32.mxu0 %v2830_v19  ;;  %7737 = vmatmul.mubr.msk.f32.gmra.mrb[58].mxu1 %vm1054_vm2, %v10814_v16  ;;  %v6760_v16 = vld [vmem:[%s14108_s5 + $0x2c8] sm:$0xff]  ;;  %v8154_v19 = vpack.c.bf16 %v6780_v10, %v6779_v57  ;;  %v8132_v26 = vpack.c.bf16 %v6770_v24, %v6769_v62 }
 0x58a   : > { %7739 = vmatprep.mubr.msk.f32.mxu1 %vm1054_vm2, %v10824_v33  ;;  %v8112_v33 = vpack.c.bf16 %v6760_v16, %v6759_v22  ;;  %8151 = vmatpush3.bf16.msra.mxu1 %v8150_v29  ;;  %v6781_v22 = vld [vmem:[%s14108_s5 + $0x370] sm:$0xff]  ;;  %v6782_v16 = vld [vmem:[%s14108_s5 + $0x378] sm:$0xff] }
 0x58b   : > { %8153 = vmatprep.subr.bf16.mxu1 %v8152_v59 }
 0x58c   : > { %3051 = vmatmul.mubr.f32.gmra.mrb[92].mxu0 %v2828_v63  ;;  %8113 = vmatprep.subr.bf16.mxu0 %v8112_v33  ;;  %v6798_v63 = vld [vmem:[%s14108_s5 + $0x3f8] sm:$0xff]  ;;  %v6800_v33 = vld [vmem:[%s14108_s5 + $0x408] sm:$0xff] }
 0x58d   : > { %3055 = vmatprep.mubr.f32.mxu0 %v9971_v21  ;;  %7740 = vmatmul.mubr.msk.f32.gmra.mrb[60].mxu1 %vm1054_vm2, %v10818_v1  ;;  %v6743_v1 = vld [vmem:[%s14108_s5 + $0x240] sm:$0xff] }
 0x58e   : > { %7742 = vmatprep.mubr.msk.f32.mxu1 %vm1054_vm2, %v10834_v0  ;;  %v6744_v0 = vld [vmem:[%s14108_s5 + $0x248] sm:$0xff]  ;;  %8155 = vmatpush3.bf16.msra.mxu1 %v8154_v19 }
 0x58f   : > { %v8114_v53 = vpack.c.bf16 %v6744_v0, %v6743_v1  ;;  %v6799_v1 = vld [vmem:[%s14108_s5 + $0x400] sm:$0xff]  ;;  %v8130_v0 = vpack.c.bf16 %v6752_v42, %v6751_v28 }
 0x590   : > { %3056 = vmatmul.mubr.f32.gmra.mrb[94].mxu0 %v2829_v20  ;;  %v8156_v20 = vpack.c.bf16 %v6798_v63, %v6797_v13  ;;  %v8160_v27 = vpack.c.bf16 %v6800_v33, %v6799_v1 }
 0x591   : > { %7743 = vmatmul.mubr.msk.f32.gmra.mrb[62].mxu1 %vm1054_vm2, %v9897_v40  ;;  %8115 = vmatpush3.bf16.msra.mxu0 %v8114_v53  ;;  %v6754_v53 = vld [vmem:[%s14108_s5 + $0x298] sm:$0xff] }
 0x592   : > { %8117 = vmatprep.subr.bf16.mxu0 %v8116_v5  ;;  %v8158_v5 = vpack.c.bf16 %v6782_v16, %v6781_v22  ;;  %8157 = vmatprep.subr.bf16.mxu1 %v8156_v20  ;;  %v8134_v3 = vpack.c.bf16 %v6754_v53, %v6753_v58 }
 0x594   : > { %8159 = vmatpush3.bf16.msra.mxu1 %v8158_v5 }
 0x595   : > { %8119 = vmatpush3.bf16.msra.mxu0 %v8118_v14  ;;  %v8136_v14 = vpack.c.bf16 %v6772_v44, %v6771_v52  ;;  %8161 = vmatprep.subr.bf16.mxu1 %v8160_v27 }
 0x596   : > { %8121 = vmatprep.subr.bf16.mxu0 %v8120_v8  ;;  %v6773_v8 = vld [vmem:[%s14108_s5 + $0x330] sm:$0xff] }
 0x597   : > { %v8140_v56 = vpack.c.bf16 %v6774_v54, %v6773_v8  ;;  %v6757_v8 = vld [vmem:[%s14108_s5 + $0x2b0] sm:$0xff]  ;;  %v6758_v54 = vld [vmem:[%s14108_s5 + $0x2b8] sm:$0xff] }
 0x599   : > { %8123 = vmatpush3.bf16.msra.mxu0 %v8122_v9 }
 0x59a   : > { %8125 = vmatprep.subr.bf16.mxu0 %v8124_v17  ;;  %v11069_v17 = vld [vmem:[%s14109_s22 + $0x1] ss:$0 sm:$0xff]  ;;  %s11757_s22 = sld [smem:[#allocation5 + $0x6]] }
 0x59d   : > { %8127 = vmatpush3.bf16.msra.mxu0 %v8126_v31 }
 0x59e   : > { %8129 = vmatprep.subr.bf16.mxu0 %v8128_v2 }
 0x5a1   : > { %8131 = vmatpush3.bf16.msra.mxu0 %v8130_v0 }
 0x5a2   : > { %8133 = vmatprep.subr.bf16.mxu0 %v8132_v26 }
 0x5a5   : > { %8135 = vmatpush3.bf16.msra.mxu0 %v8134_v3 }
 0x5a6   : > { %8137 = vmatprep.subr.bf16.mxu0 %v8136_v14 }
 0x5a9   : > { %8139 = vmatpush3.bf16.msra.mxu0 %v8138_v30  ;;  %v6783_v30 = vld [vmem:[%s14108_s5 + $0x380] sm:$0xff] }
 0x5aa   : > { %8141 = vmatprep.subr.bf16.mxu0 %v8140_v56 }
 0x638   : > { %v7400_v39 = vpop.f32.mrb[40].mxu1 }
 0x639   : > { %v7401_v34 = vpop.f32.mrb[41].mxu1 }
 0x63a   : > { %v7402_v50 = vadd.f32 %v7401_v34, %v7400_v39 }
 0x63c   : > { %v7403_v36 = vpop.f32.mrb[42].mxu1  ;;  %v2918_v29 = vadd.f32 %v7402_v50, %v11069_v17 }
 0x63d   : > { %v7404_v61 = vpop.f32.mrb[43].mxu1 }
 0x63e   : > { %v7405_v41 = vadd.f32 %v7404_v61, %v7403_v36  ;;  %v8142_v36 = vpack.c.bf16 %v6758_v54, %v6757_v8  ;;  %v6784_v61 = vld [vmem:[%s14108_s5 + $0x388] sm:$0xff] }
 0x640   : > { %v7406_v7 = vpop.f32.mrb[44].mxu1  ;;  %v2923_v13 = vadd.f32 %v7405_v41, %v11069_v17  ;;  %v6801_v41 = vld [vmem:[%s14108_s5 + $0x410] sm:$0xff]  ;;  %8143 = vmatpush3.bf16.msra.mxu0 %v8142_v36 }
 0x641   : > { %v7407_v9 = vpop.f32.mrb[45].mxu1 }
 0x642   : > { %v7408_v60 = vadd.f32 %v7407_v9, %v7406_v7  ;;  %v6802_v7 = vld [vmem:[%s14108_s5 + $0x418] sm:$0xff] }
 0x644   : > { %v7409_v45 = vpop.f32.mrb[46].mxu1  ;;  %v2928_v22 = vadd.f32 %v7408_v60, %v11069_v17  ;;  %v8162_v60 = vpack.c.bf16 %v6784_v61, %v6783_v30 }
 0x645   : > { %v7410_v32 = vpop.f32.mrb[47].mxu1 }
 0x646   : > { %v7411_v12 = vadd.f32 %v7410_v32, %v7409_v45  ;;  %v8164_v45 = vpack.c.bf16 %v6802_v7, %v6801_v41  ;;  %v6807_v32 = vld [vmem:[%s14108_s5 + $0x440] sm:$0xff]  ;;  %8163 = vmatpush3.bf16.msra.mxu1 %v8162_v60 }
 0x647   : > { %v7456_v35 = vpop.f32.mrb[80].mxu0 }
 0x648   : > { %v7412_v49 = vpop.f32.mrb[48].mxu1  ;;  %v7457_v37 = vpop.f32.mrb[81].mxu0  ;;  %v2933_v5 = vadd.f32 %v7411_v12, %v11069_v17  ;;  %v6808_v12 = vld [vmem:[%s14108_s5 + $0x448] sm:$0xff]  ;;  %8165 = vmatprep.subr.bf16.mxu1 %v8164_v45 }
 0x649   : > { %v7458_v48 = vadd.f32 %v7457_v37, %v7456_v35  ;;  %v7413_v55 = vpop.f32.mrb[49].mxu1 }
 0x64a   : > { %v7414_v59 = vadd.f32 %v7413_v55, %v7412_v49 }
 0x64b   : > { %v7459_v57 = vpop.f32.mrb[82].mxu0  ;;  %v3023_v10 = vadd.f32 %v7458_v48, %v2918_v29  ;;  %v11102_v29 = vpack.c.bf16 %v6808_v12, %v6807_v32 }
 0x64c   : > { %v7415_v31 = vpop.f32.mrb[50].mxu1  ;;  %v7460_v28 = vpop.f32.mrb[83].mxu0  ;;  %v2938_v56 = vadd.f32 %v7414_v59, %v11069_v17 }
 0x64d   : > { %v7461_v2 = vadd.f32 %v7460_v28, %v7459_v57  ;;  %v7416_v42 = vpop.f32.mrb[51].mxu1  ;;  %8177 = vmatprep.subr.bf16.mxu0 %v11102_v29 }
 0x64e   : > { %v7417_v62 = vadd.f32 %v7416_v42, %v7415_v31 }
 0x64f   : > { %v7462_v19 = vpop.f32.mrb[84].mxu0  ;;  %v3028_v63 = vadd.f32 %v7461_v2, %v2923_v13 }
 0x650   : > { %v7418_v24 = vpop.f32.mrb[52].mxu1  ;;  %v7463_v20 = vpop.f32.mrb[85].mxu0  ;;  %v2943_v13 = vadd.f32 %v7417_v62, %v11069_v17 }
 0x651   : > { %v7464_v16 = vadd.f32 %v7463_v20, %v7462_v19  ;;  %v7419_v1 = vpop.f32.mrb[53].mxu1 }
 0x652   : > { %v7420_v33 = vadd.f32 %v7419_v1, %v7418_v24 }
 0x653   : > { %v7465_v0 = vpop.f32.mrb[86].mxu0  ;;  %v3033_v26 = vadd.f32 %v7464_v16, %v2928_v22 }
 0x654   : > { %v7421_v58 = vpop.f32.mrb[54].mxu1  ;;  %v7466_v53 = vpop.f32.mrb[87].mxu0  ;;  %v2948_v62 = vadd.f32 %v7420_v33, %v11069_v17 }
 0x655   : > { %v7467_v52 = vadd.f32 %v7466_v53, %v7465_v0  ;;  %v7422_v44 = vpop.f32.mrb[55].mxu1 }
 0x656   : > { %v11075_v27 = vadd.f32 %v7422_v44, %v7421_v58 }
 0x657   : > { %v7468_v3 = vpop.f32.mrb[88].mxu0  ;;  %v3038_v14 = vadd.f32 %v7467_v52, %v2933_v5 }
 0x658   : > { %v7469_v4 = vpop.f32.mrb[89].mxu0  ;;  %v7735_v23 = vpop.f32.mrb[56].mxu1 }
 0x659   : > { %v7470_v39 = vadd.f32 %v7469_v4, %v7468_v3  ;;  %v3133_v34 = vadd.f32 %v7735_v23, %v3028_v63  ;;  %v3127_v50 = vpop.f32.mrb[57].mxu1 }
 0x65a   : > { %v3128_v9 = vadd.f32 %v3127_v50, %v3023_v10 }
 0x65b   : > { %vm3167_vm6 = vcmp.ge.f32.partialorder %v3133_v34, 0.0  ;;  %v3175_v35 = vmul.f32 0.01, %v3133_v34  ;;  %v7471_v49 = vpop.f32.mrb[90].mxu0  ;;  %v3043_v37 = vadd.f32 %v7470_v39, %v2938_v56  ;;  %v2953_v39 = vadd.f32 %v11075_v27, %v11069_v17 }
 0x65c   : > { %vm3166_vm7 = vcmp.ge.f32.partialorder %v3128_v9, 0.0  ;;  %v3174_v48 = vmul.f32 0.01, %v3128_v9  ;;  %v7472_v55 = vpop.f32.mrb[91].mxu0  ;;  %v7738_v59 = vpop.f32.mrb[58].mxu1 }
 0x65d   : > { %v11104_v57 = vsel %vm3167_vm6, %v3133_v34, %v3175_v35  ;;  %v7473_v10 = vadd.f32 %v7472_v55, %v7471_v49  ;;  %v3143_v31 = vadd.f32 %v7738_v59, %v3038_v14  ;;  %v3137_v28 = vpop.f32.mrb[59].mxu1  ;;  %v6785_v35 = vld [vmem:[%s14108_s5 + $0x390] sm:$0xff]  ;;  %v6804_v55 = vld [vmem:[%s14108_s5 + $0x428] sm:$0xff] }
 0x65e   : > { %v3274_v2 = vrot.slane %v11104_v57, 7  ;;  %v11109_v42 = vsel %vm3166_vm7, %v3128_v9, %v3174_v48  ;;  %v3138_v19 = vadd.f32 %v3137_v28, %v3033_v26  ;;  %v6803_v48 = vld [vmem:[%s14108_s5 + $0x420] sm:$0xff] }
 0x65f   : > { %v3272_v63 = vrot.slane %v11109_v42, 7  ;;  %vm3169_vm8 = vcmp.ge.f32.partialorder %v3143_v31, 0.0  ;;  %v3177_v24 = vmul.f32 0.01, %v3143_v31  ;;  %v7474_v20 = vpop.f32.mrb[92].mxu0  ;;  %v3048_v1 = vadd.f32 %v7473_v10, %v2943_v13 }
 0x660   : > { %vm3168_vm9 = vcmp.ge.f32.partialorder %v3138_v19, 0.0  ;;  %v3176_v22 = vmul.f32 0.01, %v3138_v19  ;;  %v7475_v16 = vpop.f32.mrb[93].mxu0  ;;  %v7741_v0 = vpop.f32.mrb[60].mxu1  ;;  %v11114_v58 = vsel %vm882_vm0, %v9767_v38, %v3274_v2  ;;  %v3293_v28 = vrot.slane %v11109_v42, 1 }
 0x661   : > { %v11117_v53 = vsel %vm3169_vm8, %v3143_v31, %v3177_v24  ;;  %v7476_v5 = vadd.f32 %v7475_v16, %v7474_v20  ;;  %v3147_v26 = vpop.f32.mrb[61].mxu1  ;;  %v11121_v52 = vsel %vm882_vm0, %v9767_v38, %v3272_v63  ;;  %v3153_v14 = vadd.f32 %v7741_v0, %v3048_v1  ;;  %v6788_v16 = vld [vmem:[%s14108_s5 + $0x3a8] sm:$0xff] }
 0x662   : > { %v3278_v44 = vrot.slane %v11117_v53, 7  ;;  %v11124_v3 = vsel %vm3168_vm9, %v3138_v19, %v3176_v22  ;;  %v3148_v4 = vadd.f32 %v3147_v26, %v3043_v37  ;;  %v8756_v33 = vpack.i.bf16 %v11114_v58, %v11121_v52  ;;  %v6786_v37 = vld [vmem:[%s14108_s5 + $0x398] sm:$0xff]  ;;  %v6787_v22 = vld [vmem:[%s14108_s5 + $0x3a0] sm:$0xff] }
 0x663   : > { %v3276_v23 = vrot.slane %v11124_v3, 7  ;;  %v7477_v8 = vpop.f32.mrb[94].mxu0  ;;  %v3053_v54 = vadd.f32 %v7476_v5, %v2948_v62  ;;  %vm3171_vm10 = vcmp.ge.f32.partialorder %v3153_v14, 0.0  ;;  %v3179_v30 = vmul.f32 0.01, %v3153_v14  ;;  %v6805_v62 = vld [vmem:[%s14108_s5 + $0x430] sm:$0xff] }
 0x664   : > { %vm3170_vm11 = vcmp.ge.f32.partialorder %v3148_v4, 0.0  ;;  %v3178_v56 = vmul.f32 0.01, %v3148_v4  ;;  %v7478_v34 = vpop.f32.mrb[95].mxu0  ;;  %v7744_v50 = vpop.f32.mrb[62].mxu1  ;;  %8757 = vrot.lane.b32.xlu0 %v8756_v33, %s14110_s1  ;;  %v11138_v61 = vsel %vm882_vm0, %v9767_v38, %v3278_v44  ;;  %v8166_v24 = vpack.c.bf16 %v6786_v37, %v6785_v35  ;;  %v6806_v5 = vld [vmem:[%s14108_s5 + $0x438] sm:$0xff] }
 0x665   : > { %v11134_v36 = vsel %vm882_vm0, %v9767_v38, %v3276_v23  ;;  %v11140_v41 = vsel %vm3171_vm10, %v3153_v14, %v3179_v30  ;;  %v7479_v9 = vadd.f32 %v7478_v34, %v7477_v8  ;;  %v3157_v60 = vpop.f32.mrb[63].mxu1  ;;  %v8766_v12 = vpack.i.bf16 %v11138_v61, %v11104_v57  ;;  %v6789_v30 = vld [vmem:[%s14108_s5 + $0x3b0] sm:$0xff] }
 0x666   : > { %v11142_v7 = vsel %vm3170_vm11, %v3148_v4, %v3178_v56  ;;  %v8761_v17 = vpack.i.bf16 %v11134_v36, %v11109_v42  ;;  %v3282_v27 = vrot.slane %v11140_v41, 7  ;;  %v3158_v32 = vadd.f32 %v3157_v60, %v3053_v54  ;;  %8167 = vmatpush3.bf16.msra.mxu1 %v8166_v24  ;;  %v6790_v56 = vld [vmem:[%s14108_s5 + $0x3b8] sm:$0xff] }
 0x667   : > { %v3280_v45 = vrot.slane %v11142_v7, 7  ;;  %v3058_v49 = vadd.f32 %v7479_v9, %v2953_v39  ;;  %v8168_v20 = vpack.c.bf16 %v6804_v55, %v6803_v48  ;;  %v3294_v14 = vsel %vm923_vm1, %v3293_v28, %v9897_v40  ;;  %v6810_v24 = vld [vmem:[%s14108_s5 + $0x458] sm:$0xff] }
 0x668   : > { %8762 = vrot.lane.b32.xlu1 %v8761_v17, %s14110_s1  ;;  %vm3172_vm12 = vcmp.ge.f32.partialorder %v3158_v32, 0.0  ;;  %v3180_v59 = vmul.f32 0.01, %v3158_v32  ;;  %8767 = vrot.lane.b32.xlu0 %v8766_v12, %s14110_s1  ;;  %v11170_v31 = vsel %vm882_vm0, %v9767_v38, %v3282_v27  ;;  %v8170_v4 = vpack.c.bf16 %v6788_v16, %v6787_v22 }
 0x669   : > { %v11166_v10 = vsel %vm882_vm0, %v9767_v38, %v3280_v45  ;;  %v3163_v13 = vadd.f32 %v7744_v50, %v3058_v49  ;;  %v8776_v19 = vpack.i.bf16 %v11170_v31, %v11117_v53  ;;  %8169 = vmatprep.subr.bf16.mxu1 %v8168_v20  ;;  %v8786_v33 = vpack.i.bf16 %v3294_v14, %v11140_v41 }
 0x66a   : > { %v8771_v2 = vpack.i.bf16 %v11166_v10, %v11124_v3  ;;  %v11177_v63 = vsel %vm3172_vm12, %v3158_v32, %v3180_v59  ;;  %v8172_v54 = vpack.c.bf16 %v6806_v5, %v6805_v62  ;;  %v3295_v39 = vrot.slane %v11104_v57, 1  ;;  %8171 = vmatpush3.bf16.msra.mxu1 %v8170_v4  ;;  %v6811_v4 = vld [vmem:[%s14108_s5 + $0x460] sm:$0xff] }
 0x66b   : > { %vm3173_vm13 = vcmp.ge.f32.partialorder %v3163_v13, 0.0  ;;  %v3181_v1 = vmul.f32 0.01, %v3163_v13  ;;  %v3284_v0 = vrot.slane %v11177_v63, 7  ;;  %v8174_v9 = vpack.c.bf16 %v6790_v56, %v6789_v30 }
 0x66c   : > { %8772 = vrot.lane.b32.xlu1 %v8771_v2, %s14110_s1  ;;  %8777 = vrot.lane.b32.xlu0 %v8776_v19, %s14110_s1  ;;  %v3297_v60 = vrot.slane %v11124_v3, 1  ;;  %v11224_v17 = vsel %vm923_vm1, %v3295_v39, %v9897_v40  ;;  %v3299_v27 = vrot.slane %v11117_v53, 1  ;;  %v3305_v32 = vrot.slane %v11177_v63, 1  ;;  %v6809_v19 = vld [vmem:[%s14108_s5 + $0x450] sm:$0xff] }
 0x66d   : > { %v11194_v26 = vsel %vm3173_vm13, %v3163_v13, %v3181_v1  ;;  %v11198_v44 = vsel %vm882_vm0, %v9767_v38, %v3284_v0  ;;  %8173 = vmatprep.subr.bf16.mxu1 %v8172_v54  ;;  %v3301_v35 = vrot.slane %v11142_v7, 1  ;;  %v3303_v49 = vrot.slane %v11140_v41, 1 }
 0x66e   : > { %v3315_v23 = vrot.slane %v11194_v26, 7  ;;  %v8781_v8 = vpack.i.bf16 %v11198_v44, %v11142_v7  ;;  %8175 = vmatpush3.bf16.msra.mxu1 %v8174_v9  ;;  %v11232_v45 = vsel %vm923_vm1, %v3297_v60, %v9897_v40  ;;  %v11237_v12 = vsel %vm923_vm1, %v3299_v27, %v9897_v40  ;;  %v6813_v60 = vld [vmem:[%s14108_s5 + $0x470] sm:$0xff] }
 0x66f   : > { %v11247_v37 = vsel %vm923_vm1, %v3301_v35, %v9897_v40  ;;  %v11251_v48 = vsel %vm923_vm1, %v3303_v49, %v9897_v40  ;;  %v11255_v55 = vsel %vm923_vm1, %v3305_v32, %v9897_v40  ;;  %v3317_v59 = vrot.slane %v11194_v26, 1 }
 0x670   : > { %8782 = vrot.lane.b32.xlu1 %v8781_v8, %s14110_s1  ;;  %8787 = vrot.lane.b32.xlu0 %v8786_v33, %s14110_s1  ;;  %v11217_v34 = vsel %vm882_vm0, %v9767_v38, %v3315_v23  ;;  %v8796_v28 = vpack.i.bf16 %v11255_v55, %v11194_v26  ;;  %v8180_v0 = vpack.c.bf16 %v6810_v24, %v6809_v19  ;;  %v6812_v23 = vld [vmem:[%s14108_s5 + $0x468] sm:$0xff] }
 0x671   : > { %v8791_v50 = vpack.i.bf16 %v11177_v63, %v11217_v34  ;;  %v11266_v13 = vsel %vm923_vm1, %v3317_v59, %v9897_v40 }
 0x674   : > { %8792 = vrot.lane.b32.xlu1 %v8791_v50, %s14110_s1  ;;  %3367 = vrot.lane.b32.xlu0 %v11224_v17, %s14110_s1  ;;  %v8184_v50 = vpack.c.bf16 %v6812_v23, %v6811_v4 }
 0x678   : > { %3369 = vrot.lane.b32.xlu1 %v11232_v45, %s14110_s1  ;;  %3371 = vrot.lane.b32.xlu0 %v11237_v12, %s14110_s1 }
 0x67c   : > { %3373 = vrot.lane.b32.xlu1 %v11247_v37, %s14110_s1  ;;  %3375 = vrot.lane.b32.xlu0 %v11251_v48, %s14110_s1 }
 0x680   : > { %8797 = vrot.lane.b32.xlu1 %v8796_v28, %s14110_s1  ;;  %3379 = vrot.lane.b32.xlu0 %v11266_v13, %s14110_s1 }
 0x6d6   : > { %v8758_v2 = vpop.permute.xlu0 %8757 }
 0x6d7   : > { %v8760_v20 = vunpack.i.h.bf16 %v8758_v2  ;;  %v8759_v22 = vunpack.i.l.bf16 %v8758_v2 }
 0x6d9   : > { %v3399_v1 = vsel %vm1054_vm2, %v9897_v40, %v8759_v22  ;;  %v3400_v54 = vsel %vm1054_vm2, %v3294_v14, %v8760_v20 }
 0x6da   : > { %v8763_v16 = vpop.permute.xlu1 %8762  ;;  %v8768_v5 = vpop.permute.xlu0 %8767  ;;  %3500 = vmatprep.mubr.f32.mxu0 %v3399_v1 }
 0x6db   : > { %v8764_v62 = vunpack.i.l.bf16 %v8763_v16  ;;  %v8765_v8 = vunpack.i.h.bf16 %v8763_v16  ;;  %v8769_v33 = vunpack.i.l.bf16 %v8768_v5  ;;  %3501 = vmatmul.mubr.f32.vlgmr.msra.gmra.mrb[96].mxu0 %v9971_v21  ;;  %v8770_v14 = vunpack.i.h.bf16 %v8768_v5 }
 0x6dc   : > { %8179 = vmatpush3.bf16.msra.mxu0 %v11102_v29  ;;  %3505 = vmatprep.mubr.f32.mxu0 %v3400_v54  ;;  %v6814_v29 = vld [vmem:[%s14108_s5 + $0x478] sm:$0xff]  ;;  %s11743_s5 = sld [smem:[#allocation7 + $0x2]] }
 0x6dd   : > { %v3392_v30 = vsel %vm1054_vm2, %v11121_v52, %v8764_v62  ;;  %v3393_v39 = vsel %vm1054_vm2, %v11114_v58, %v8769_v33  ;;  %8181 = vmatprep.subr.bf16.mxu0 %v8180_v0  ;;  %v3401_v52 = vsel %vm1054_vm2, %v11224_v17, %v8765_v8  ;;  %v8188_v58 = vpack.c.bf16 %v6814_v29, %v6813_v60 }
 0x6de   : > { %v8773_v56 = vpop.permute.xlu1 %8772  ;;  %v8778_v9 = vpop.permute.xlu0 %8777  ;;  %3605 = vmatprep.mubr.f32.mxu1 %v3393_v39  ;;  %v3402_v28 = vsel %vm1054_vm2, %v11232_v45, %v8770_v14 }
 0x6df   : > { %3506 = vmatmul.mubr.f32.gmra.mrb[98].mxu0 %v3392_v30  ;;  %v8774_v27 = vunpack.i.l.bf16 %v8773_v56  ;;  %v8775_v49 = vunpack.i.h.bf16 %v8773_v56  ;;  %v8779_v19 = vunpack.i.l.bf16 %v8778_v9  ;;  %v8780_v16 = vunpack.i.h.bf16 %v8778_v9 }
 0x6e0   : > { %3510 = vmatprep.mubr.f32.mxu0 %v3401_v52  ;;  %8183 = vmatpush3.bf16.msra.mxu0 %v8180_v0 }
 0x6e1   : > { %8185 = vmatprep.subr.bf16.mxu0 %v8184_v50  ;;  %v3394_v22 = vsel %vm1054_vm2, %v11134_v36, %v8774_v27  ;;  %v3403_v1 = vsel %vm1054_vm2, %v11237_v12, %v8775_v49  ;;  %v3395_v5 = vsel %vm1054_vm2, %v11138_v61, %v8779_v19  ;;  %v3404_v36 = vsel %vm1054_vm2, %v11247_v37, %v8780_v16 }
 0x6e2   : > { %v8783_v32 = vpop.permute.xlu1 %8782  ;;  %v8788_v35 = vpop.permute.xlu0 %8787 }
 0x6e3   : > { %v8790_v59 = vunpack.i.h.bf16 %v8788_v35  ;;  %3511 = vmatmul.mubr.f32.gmra.mrb[100].mxu0 %v3393_v39  ;;  %v8785_v4 = vunpack.i.h.bf16 %v8783_v32  ;;  %v8789_v8 = vunpack.i.l.bf16 %v8788_v35 }
 0x6e4   : > { %3515 = vmatprep.mubr.f32.mxu0 %v3402_v28  ;;  %8187 = vmatpush3.bf16.msra.mxu0 %v8184_v50 }
 0x6e5   : > { %v3407_v2 = vsel %vm1054_vm2, %v11109_v42, %v8790_v59  ;;  %8189 = vmatprep.subr.bf16.mxu0 %v8188_v58  ;;  %v8784_v42 = vunpack.i.l.bf16 %v8783_v32  ;;  %v3405_v61 = vsel %vm1054_vm2, %v11251_v48, %v8785_v4 }
 0x6e6   : > { %v8793_v24 = vpop.permute.xlu1 %8792  ;;  %v3368_v20 = vpop.permute.xlu0 %3367  ;;  %3606 = vmatmul.mubr.f32.vlgmr.msra.gmra.mrb[64].mxu1 %v3407_v2 }
 0x6e7   : > { %3516 = vmatmul.mubr.f32.gmra.mrb[102].mxu0 %v3394_v22  ;;  %3610 = vmatprep.mubr.f32.mxu1 %v3394_v22  ;;  %v3408_v0 = vsel %vm1054_vm2, %v11104_v57, %v3368_v20  ;;  %v3396_v57 = vsel %vm1054_vm2, %v11166_v10, %v8784_v42  ;;  %v8794_v30 = vunpack.i.l.bf16 %v8793_v24  ;;  %v8795_v39 = vunpack.i.h.bf16 %v8793_v24 }
 0x6e8   : > { %3520 = vmatprep.mubr.f32.mxu0 %v3403_v1  ;;  %8191 = vmatpush3.bf16.msra.mxu0 %v8188_v58 }
 0x6e9   : > { %v3406_v10 = vsel %vm1054_vm2, %v11255_v55, %v8794_v30 }
 0x6ea   : > { %v3370_v62 = vpop.permute.xlu1 %3369  ;;  %3611 = vmatmul.mubr.f32.gmra.mrb[66].mxu1 %v3408_v0  ;;  %v3372_v33 = vpop.permute.xlu0 %3371 }
 0x6eb   : > { %3521 = vmatmul.mubr.f32.gmra.mrb[104].mxu0 %v3395_v5  ;;  %3615 = vmatprep.mubr.f32.mxu1 %v3395_v5  ;;  %v3409_v23 = vsel %vm1054_vm2, %v11124_v3, %v3370_v62  ;;  %v3410_v56 = vsel %vm1054_vm2, %v11117_v53, %v3372_v33  ;;  %v3397_v3 = vsel %vm1054_vm2, %v11170_v31, %v8789_v8 }
 0x6ec   : > { %3525 = vmatprep.mubr.f32.mxu0 %v3404_v36  ;;  %v3398_v53 = vsel %vm1054_vm2, %v11198_v44, %v8795_v39 }
 0x6ee   : > { %v3374_v54 = vpop.permute.xlu1 %3373  ;;  %3616 = vmatmul.mubr.f32.gmra.mrb[68].mxu1 %v3409_v23  ;;  %v3376_v60 = vpop.permute.xlu0 %3375 }
 0x6ef   : > { %3526 = vmatmul.mubr.f32.gmra.mrb[106].mxu0 %v3396_v57  ;;  %3620 = vmatprep.mubr.f32.mxu1 %v3396_v57  ;;  %v3411_v9 = vsel %vm1054_vm2, %v11142_v7, %v3374_v54  ;;  %v3412_v14 = vsel %vm1054_vm2, %v11140_v41, %v3376_v60 }
 0x6f0   : > { %3530 = vmatprep.mubr.f32.mxu0 %v3405_v61 }
 0x6f2   : > { %3621 = vmatmul.mubr.f32.gmra.mrb[70].mxu1 %v3410_v56  ;;  %v8798_v50 = vpop.permute.xlu1 %8797  ;;  %v3380_v44 = vpop.permute.xlu0 %3379 }
 0x6f3   : > { %3531 = vmatmul.mubr.f32.gmra.mrb[108].mxu0 %v3397_v3  ;;  %3625 = vmatprep.mubr.f32.mxu1 %v3397_v3  ;;  %v8799_v29 = vunpack.i.l.bf16 %v8798_v50  ;;  %v8800_v31 = vunpack.i.h.bf16 %v8798_v50  ;;  %v3414_v41 = vsel %vm1054_vm2, %v11194_v26, %v3380_v44 }
 0x6f4   : > { %3535 = vmatprep.mubr.f32.mxu0 %v3406_v10 }
 0x6f5   : > { %v3415_v52 = vsel %vm1054_vm2, %v11217_v34, %v8799_v29  ;;  %v3413_v7 = vsel %vm1054_vm2, %v11177_v63, %v8800_v31 }
 0x6f6   : > { %3626 = vmatmul.mubr.f32.gmra.mrb[72].mxu1 %v3411_v9 }
 0x6f7   : > { %3536 = vmatmul.mubr.f32.gmra.mrb[110].mxu0 %v3398_v53  ;;  %3630 = vmatprep.mubr.f32.mxu1 %v3398_v53 }
 0x6f8   : > { %7761 = vmatprep.mubr.msk.f32.mxu0 %vm1054_vm2, %v11224_v17 }
 0x6fa   : > { %3631 = vmatmul.mubr.f32.gmra.mrb[74].mxu1 %v3412_v14 }
 0x6fb   : > { %3635 = vmatprep.mubr.f32.mxu1 %v3415_v52  ;;  %7762 = vmatmul.mubr.msk.f32.vlgmr.msra.gmra.mrb[112].mxu0 %vm1054_vm2, %v11232_v45 }
 0x6fc   : > { %7764 = vmatprep.mubr.msk.f32.mxu0 %vm1054_vm2, %v11237_v12 }
 0x6fe   : > { %3636 = vmatmul.mubr.f32.gmra.mrb[76].mxu1 %v3413_v7 }
 0x6ff   : > { %3640 = vmatprep.mubr.f32.mxu1 %v9971_v21  ;;  %7765 = vmatmul.mubr.msk.f32.gmra.mrb[114].mxu0 %vm1054_vm2, %v11247_v37 }
 0x700   : > { %7767 = vmatprep.mubr.msk.f32.mxu0 %vm1054_vm2, %v11251_v48 }
 0x702   : > { %3641 = vmatmul.mubr.f32.gmra.mrb[78].mxu1 %v3414_v41 }
 0x703   : > { %7768 = vmatmul.mubr.msk.f32.gmra.mrb[116].mxu0 %vm1054_vm2, %v11255_v55  ;;  %v11359_v55 = vld [vmem:[%s14111_s6 + $0x1] ss:$0 sm:$0xff]  ;;  %s11745_s6 = sld [smem:[#allocation7 + $0x3]] }
 0x704   : > { %7770 = vmatprep.mubr.msk.f32.mxu0 %vm1054_vm2, %v11266_v13 }
 0x707   : > { %7771 = vmatmul.mubr.msk.f32.gmra.mrb[118].mxu0 %vm1054_vm2, %v9897_v40 }
 0x708   : > { %4466 = vmatprep.mubr.f32.mxu0 %v8941_v43 }
 0x7ae   : > { %v7528_v63 = vpop.f32.mrb[96].mxu0 }
 0x7af   : > { %v7529_v34 = vpop.f32.mrb[97].mxu0 }
 0x7b0   : > { %v7530_v17 = vadd.f32 %v7529_v34, %v7528_v63 }
 0x7b2   : > { %v7531_v45 = vpop.f32.mrb[98].mxu0  ;;  %v3503_v35 = vadd.f32 %v7530_v17, %v11359_v55 }
 0x7b3   : > { %v7532_v12 = vpop.f32.mrb[99].mxu0 }
 0x7b4   : > { %v7533_v37 = vadd.f32 %v7532_v12, %v7531_v45 }
 0x7b6   : > { %v7534_v48 = vpop.f32.mrb[100].mxu0  ;;  %v3508_v22 = vadd.f32 %v7533_v37, %v11359_v55 }
 0x7b7   : > { %v7535_v26 = vpop.f32.mrb[101].mxu0 }
 0x7b8   : > { %v7536_v58 = vadd.f32 %v7535_v26, %v7534_v48 }
 0x7b9   : > { %v7584_v13 = vpop.f32.mrb[64].mxu1 }
 0x7ba   : > { %v7537_v27 = vpop.f32.mrb[102].mxu0  ;;  %v7585_v32 = vpop.f32.mrb[65].mxu1  ;;  %v3513_v36 = vadd.f32 %v7536_v58, %v11359_v55 }
 0x7bb   : > { %v7586_v49 = vadd.f32 %v7585_v32, %v7584_v13  ;;  %v7538_v59 = vpop.f32.mrb[103].mxu0 }
 0x7bc   : > { %v7539_v28 = vadd.f32 %v7538_v59, %v7537_v27 }
 0x7bd   : > { %v7587_v2 = vpop.f32.mrb[66].mxu1  ;;  %v3608_v19 = vadd.f32 %v7586_v49, %v3503_v35 }
 0x7be   : > { %v7540_v24 = vpop.f32.mrb[104].mxu0  ;;  %v7588_v20 = vpop.f32.mrb[67].mxu1  ;;  %v3518_v56 = vadd.f32 %v7539_v28, %v11359_v55 }
 0x7bf   : > { %v7589_v16 = vadd.f32 %v7588_v20, %v7587_v2  ;;  %v7541_v1 = vpop.f32.mrb[105].mxu0 }
 0x7c0   : > { %v7542_v0 = vadd.f32 %v7541_v1, %v7540_v24 }
 0x7c1   : > { %v7590_v42 = vpop.f32.mrb[68].mxu1  ;;  %v3613_v62 = vadd.f32 %v7589_v16, %v3508_v22 }
 0x7c2   : > { %v7543_v5 = vpop.f32.mrb[106].mxu0  ;;  %v7591_v4 = vpop.f32.mrb[69].mxu1  ;;  %v3523_v53 = vadd.f32 %v7542_v0, %v11359_v55 }
 0x7c3   : > { %v7592_v23 = vadd.f32 %v7591_v4, %v7590_v42  ;;  %v7544_v8 = vpop.f32.mrb[107].mxu0 }
 0x7c4   : > { %v7545_v33 = vadd.f32 %v7544_v8, %v7543_v5 }
 0x7c5   : > { %v7593_v54 = vpop.f32.mrb[70].mxu1  ;;  %v3618_v57 = vadd.f32 %v7592_v23, %v3513_v36 }
 0x7c6   : > { %v7546_v30 = vpop.f32.mrb[108].mxu0  ;;  %v7594_v61 = vpop.f32.mrb[71].mxu1  ;;  %v3528_v34 = vadd.f32 %v7545_v33, %v11359_v55 }
 0x7c7   : > { %v7595_v39 = vadd.f32 %v7594_v61, %v7593_v54  ;;  %v7547_v3 = vpop.f32.mrb[109].mxu0 }
 0x7c8   : > { %v7548_v50 = vadd.f32 %v7547_v3, %v7546_v30 }
 0x7c9   : > { %v7596_v10 = vpop.f32.mrb[72].mxu1  ;;  %v3623_v9 = vadd.f32 %v7595_v39, %v3518_v56 }
 0x7ca   : > { %v7549_v60 = vpop.f32.mrb[110].mxu0  ;;  %v7597_v29 = vpop.f32.mrb[73].mxu1  ;;  %v3533_v35 = vadd.f32 %v7548_v50, %v11359_v55 }
 0x7cb   : > { %v7598_v31 = vadd.f32 %v7597_v29, %v7596_v10  ;;  %v7550_v14 = vpop.f32.mrb[111].mxu0 }
 0x7cc   : > { %v7551_v52 = vadd.f32 %v7550_v14, %v7549_v60 }
 0x7cd   : > { %v7599_v7 = vpop.f32.mrb[74].mxu1  ;;  %v3628_v44 = vadd.f32 %v7598_v31, %v3523_v53 }
 0x7ce   : > { %v7600_v41 = vpop.f32.mrb[75].mxu1  ;;  %v7763_v63 = vpop.f32.mrb[112].mxu0 }
 0x7cf   : > { %v7601_v17 = vadd.f32 %v7600_v41, %v7599_v7  ;;  %v3718_v45 = vadd.f32 %v7763_v63, %v3613_v62  ;;  %v3712_v12 = vpop.f32.mrb[113].mxu0  ;;  %v3538_v62 = vadd.f32 %v7551_v52, %v11359_v55 }
 0x7d0   : > { %v3713_v37 = vadd.f32 %v3712_v12, %v3608_v19 }
 0x7d1   : > { %v11368_v48 = vadd.f32 %v3718_v45, %v10658_v25  ;;  %v7602_v26 = vpop.f32.mrb[76].mxu1  ;;  %v3633_v58 = vadd.f32 %v7601_v17, %v3528_v34 }
 0x7d2   : > { %v11371_v13 = vadd.f32 %v3713_v37, %v10668_v47  ;;  %v7603_v27 = vpop.f32.mrb[77].mxu1  ;;  %v7766_v32 = vpop.f32.mrb[114].mxu0 }
 0x7d3   : > { %v7604_v49 = vadd.f32 %v7603_v27, %v7602_v26  ;;  %v3728_v59 = vadd.f32 %v7766_v32, %v3623_v9  ;;  %v3722_v28 = vpop.f32.mrb[115].mxu0  ;;  %v3768_v2 = vrot.slane %v11368_v48, 7  ;;  %v3789_v52 = vrot.slane %v11368_v48, 1 }
 0x7d4   : > { %v3723_v24 = vadd.f32 %v3722_v28, %v3618_v57  ;;  %3814 = vrot.lane.b32.xlu0 %v11371_v13, %s14110_s1  ;;  %v3766_v25 = vrot.slane %v11371_v13, 7  ;;  %v3787_v63 = vrot.slane %v11371_v13, 1 }
 0x7d5   : > { %v11379_v19 = vadd.f32 %v3728_v59, %v10680_v6  ;;  %v7605_v47 = vpop.f32.mrb[78].mxu1  ;;  %v11383_v20 = vsel %vm882_vm0, %v9767_v38, %v3768_v2  ;;  %v3638_v22 = vadd.f32 %v7604_v49, %v3533_v35  ;;  %v11472_v27 = vsel %vm923_vm1, %v3789_v52, %v9897_v40 }
 0x7d6   : > { %v11386_v16 = vadd.f32 %v3723_v24, %v10688_v51  ;;  %v7606_v1 = vpop.f32.mrb[79].mxu1  ;;  %v7769_v0 = vpop.f32.mrb[116].mxu0  ;;  %v11390_v42 = vsel %vm882_vm0, %v9767_v38, %v3766_v25  ;;  %v3788_v49 = vsel %vm923_vm1, %v3787_v63, %v9897_v40  ;;  %v3914_v25 = vlaneseq }
 0x7d7   : > { %v7607_v5 = vadd.f32 %v7606_v1, %v7605_v47  ;;  %v3738_v6 = vadd.f32 %v7769_v0, %v3633_v58  ;;  %v3732_v4 = vpop.f32.mrb[117].mxu0  ;;  %v8801_v36 = vpack.i.bf16 %v11383_v20, %v11390_v42  ;;  %v3772_v55 = vrot.slane %v11379_v19, 7  ;;  %v11506_v0 = vld [vmem:[%s14112_s7] sm:$0x1f]  ;;  %s11747_s7 = sld [smem:[#allocation7 + $0x4]] }
 0x7d8   : > { %v3733_v23 = vadd.f32 %v3732_v4, %v3628_v44  ;;  %v8811_v8 = vpack.i.bf16 %v11386_v16, %v11368_v48  ;;  %v3770_v51 = vrot.slane %v11386_v16, 7  ;;  %v3793_v50 = vrot.slane %v11379_v19, 1 }
 0x7d9   : > { %v11399_v33 = vadd.f32 %v3738_v6, %v10705_v15  ;;  %8802 = vrot.lane.b32.xlu1 %v8801_v36, %s14110_s1  ;;  %v3643_v54 = vadd.f32 %v7607_v5, %v3538_v62  ;;  %v11413_v15 = vsel %vm882_vm0, %v9767_v38, %v3772_v55  ;;  %v3791_v60 = vrot.slane %v11386_v16, 1 }
 0x7da   : > { %v11404_v57 = vadd.f32 %v3733_v23, %v10713_v46  ;;  %v7772_v30 = vpop.f32.mrb[118].mxu0  ;;  %8812 = vrot.lane.b32.xlu0 %v8811_v8, %s14110_s1  ;;  %v11409_v61 = vsel %vm882_vm0, %v9767_v38, %v3770_v51  ;;  %v11458_v12 = vsel %vm923_vm1, %v3793_v50, %v9897_v40  ;;  %v8836_v59 = vpack.i.bf16 %v11472_v27, %v3788_v49 }
 0x7db   : > { %v3748_v56 = vadd.f32 %v7772_v30, %v3643_v54  ;;  %v3742_v39 = vpop.f32.mrb[119].mxu0  ;;  %v3776_v3 = vrot.slane %v11399_v33, 7  ;;  %v8806_v46 = vpack.i.bf16 %v11413_v15, %v11409_v61  ;;  %v11454_v45 = vsel %vm923_vm1, %v3791_v60, %v9897_v40 }
 0x7dc   : > { %v3743_v10 = vadd.f32 %v3742_v39, %v3638_v22  ;;  %v8821_v9 = vpack.i.bf16 %v11404_v57, %v11379_v19  ;;  %v3774_v53 = vrot.slane %v11404_v57, 7  ;;  %v8841_v58 = vpack.i.bf16 %v11458_v12, %v11454_v45 }
 0x7dd   : > { %v11423_v29 = vadd.f32 %v3748_v56, %v10764_v18  ;;  %v11428_v31 = vsel %vm882_vm0, %v9767_v38, %v3776_v3  ;;  %8807 = vrot.lane.b32.xlu1 %v8806_v46, %s14110_s1  ;;  %v3797_v32 = vrot.slane %v11399_v33, 1  ;;  %v3795_v35 = vrot.slane %v11404_v57, 1 }
 0x7de   : > { %v11431_v14 = vadd.f32 %v3743_v10, %v10746_v11  ;;  %8822 = vrot.lane.b32.xlu0 %v8821_v9, %s14110_s1  ;;  %v11438_v7 = vsel %vm882_vm0, %v9767_v38, %v3774_v53  ;;  %v11500_v1 = vshrl.u32 %v3914_v25, 7 }
 0x7df   : > { %v3809_v18 = vrot.slane %v11423_v29, 7  ;;  %v8816_v44 = vpack.i.bf16 %v11428_v31, %v11438_v7  ;;  %v11489_v2 = vsel %vm923_vm1, %v3795_v35, %v9897_v40  ;;  %v11493_v24 = vsel %vm923_vm1, %v3797_v32, %v9897_v40 }
 0x7e0   : > { %v8831_v41 = vpack.i.bf16 %v11431_v14, %v11399_v33  ;;  %v3778_v11 = vrot.slane %v11431_v14, 7  ;;  %v3799_v34 = vrot.slane %v11431_v14, 1  ;;  %v8846_v47 = vpack.i.bf16 %v11493_v24, %v11489_v2 }
 0x7e1   : > { %v11450_v17 = vsel %vm882_vm0, %v9767_v38, %v3809_v18  ;;  %8817 = vrot.lane.b32.xlu1 %v8816_v44, %s14110_s1  ;;  %v3811_v22 = vrot.slane %v11423_v29, 1  ;;  %v3920_v62 = vsub.s32 1, %v11500_v1  ;;  %v3928_v4 = vsub.s32 3, %v11500_v1 }
 0x7e2   : > { %8832 = vrot.lane.b32.xlu0 %v8831_v41, %s14110_s1  ;;  %v11464_v37 = vsel %vm882_vm0, %v9767_v38, %v3778_v11  ;;  %v11480_v38 = vsel %vm923_vm1, %v3799_v34, %v9897_v40  ;;  %v3924_v36 = vsub.s32 2, %v11500_v1  ;;  %v3932_v51 = vsub.s32 4, %v11500_v1  ;;  %vm8226_vm0 = vmpackc.low %vm1054_vm2, %vm1054_vm2 }
 0x7e3   : > { %v8826_v26 = vpack.i.bf16 %v11450_v17, %v11464_v37  ;;  %v8851_v28 = vpack.i.bf16 %v11480_v38, %v11423_v29  ;;  %v11511_v5 = vsel %vm923_vm1, %v3811_v22, %v9897_v40  ;;  %v3921_v6 = vrot.slane %v11506_v0, %v3920_v62 }
 0x7e4   : > { %v11519_v23 = vrot.slane %v11506_v0, %v3928_v4  ;;  %v11522_v8 = vrot.slane %v11506_v0, %v3924_v36  ;;  %v11526_v54 = vrot.slane %v11506_v0, %v3932_v51  ;;  %vm8943_vm1 = vmmov 0  }
 0x7e5   : > { %8827 = vrot.lane.b32.xlu1 %v8826_v26, %s14110_s1  ;;  %4018 = vmatprep.mubr.f32.mxu1 %v3921_v6 }
 0x7e6   : > { %8842 = vrot.lane.b32.xlu0 %v8841_v58, %s14110_s1 }
 0x7e9   : > { %8837 = vrot.lane.b32.xlu1 %v8836_v59, %s14110_s1 }
 0x7ea   : > { %8852 = vrot.lane.b32.xlu0 %v8851_v28, %s14110_s1 }
 0x7ed   : > { %8847 = vrot.lane.b32.xlu1 %v8846_v47, %s14110_s1 }
 0x7f1   : > { %3873 = vrot.lane.b32.xlu1 %v11511_v5, %s14110_s1  ;;  %s11739_s1 = sld [smem:[#allocation7]] }
 0x846   : > { %v3815_v55 = vpop.permute.xlu0 %3814 }
 0x847   : > { %v3886_v3 = vsel %vm1054_vm2, %v11390_v42, %v3815_v55 }
 0x848   : > { %v8194_v60 = vpack.c.bf16 %v3886_v3, %v9971_v21 }
 0x84b   : > { %v8803_v30 = vpop.permute.xlu1 %8802 }
 0x84c   : > { %v8805_v56 = vunpack.i.h.bf16 %v8803_v30  ;;  %v8804_v39 = vunpack.i.l.bf16 %v8803_v30  ;;  %v8813_v50 = vpop.permute.xlu0 %8812 }
 0x84d   : > { %v8815_v52 = vunpack.i.h.bf16 %v8813_v50  ;;  %v8814_v18 = vunpack.i.l.bf16 %v8813_v50 }
 0x84e   : > { %v3893_v10 = vsel %vm1054_vm2, %v9897_v40, %v8804_v39  ;;  %v3894_v46 = vsel %vm1054_vm2, %v3788_v49, %v8805_v56 }
 0x84f   : > { %v8192_v9 = vpack.c.bf16 %v3894_v46, %v3893_v10  ;;  %v8808_v53 = vpop.permute.xlu1 %8807  ;;  %v3888_v26 = vsel %vm1054_vm2, %v11409_v61, %v8815_v52  ;;  %v3887_v58 = vsel %vm1054_vm2, %v11383_v20, %v8814_v18 }
 0x850   : > { %v8810_v44 = vunpack.i.h.bf16 %v8808_v53  ;;  %v8809_v41 = vunpack.i.l.bf16 %v8808_v53  ;;  %v8823_v49 = vpop.permute.xlu0 %8822  ;;  %v8198_v25 = vpack.c.bf16 %v3888_v26, %v3887_v58  ;;  %v11559_v53 = vsub.s32 0, %v11500_v1 }
 0x851   : > { %8193 = vmatprep.subr.bf16.mxu1 %v8192_v9  ;;  %v8825_v22 = vunpack.i.h.bf16 %v8823_v49  ;;  %v8824_v62 = vunpack.i.l.bf16 %v8823_v49 }
 0x852   : > { %8195 = vmatpush1.bf16.xpose.msra.mxu1 %v8194_v60  ;;  %v3895_v11 = vsel %vm1054_vm2, %v11472_v27, %v8809_v41  ;;  %v3896_v42 = vsel %vm1054_vm2, %v11454_v45, %v8810_v44  ;;  %14113 = vst [vmem:[#allocation15_spill] sm:$0xff] %v11559_v53 }
 0x853   : > { %v8818_v63 = vpop.permute.xlu1 %8817  ;;  %v8196_v34 = vpack.c.bf16 %v3896_v42, %v3895_v11  ;;  %v3890_v20 = vsel %vm1054_vm2, %v11438_v7, %v8825_v22  ;;  %v3889_v36 = vsel %vm1054_vm2, %v11413_v15, %v8824_v62 }
 0x854   : > { %v8820_v32 = vunpack.i.h.bf16 %v8818_v63  ;;  %v8819_v35 = vunpack.i.l.bf16 %v8818_v63  ;;  %v8833_v51 = vpop.permute.xlu0 %8832  ;;  %v8202_v56 = vpack.c.bf16 %v3890_v20, %v3889_v36  ;;  %v4398_v20 = vld [vmem:[%s14114_s13 + $0x78] sm:$0xff] }
 0x855   : > { %8197 = vmatprep.subr.bf16.mxu1 %v8196_v34  ;;  %v8835_v39 = vunpack.i.h.bf16 %v8833_v51  ;;  %v8834_v3 = vunpack.i.l.bf16 %v8833_v51 }
 0x856   : > { %v3897_v59 = vsel %vm1054_vm2, %v11458_v12, %v8819_v35  ;;  %v3898_v28 = vsel %vm1054_vm2, %v11489_v2, %v8820_v32 }
 0x857   : > { %v8828_v47 = vpop.permute.xlu1 %8827  ;;  %v8200_v6 = vpack.c.bf16 %v3898_v28, %v3897_v59  ;;  %v3892_v10 = vsel %vm1054_vm2, %v11464_v37, %v8835_v39  ;;  %v3891_v7 = vsel %vm1054_vm2, %v11428_v31, %v8834_v3  ;;  %v3917_v37 = vrot.slane %v11506_v0, %v11559_v53  ;;  %v4813_v39 = vld [vmem:[%s14115_s14 + $0x8] sm:$0xff] }
 0x858   : > { %v8830_v4 = vunpack.i.h.bf16 %v8828_v47  ;;  %v8829_v61 = vunpack.i.l.bf16 %v8828_v47  ;;  %v8206_v46 = vpack.c.bf16 %v3892_v10, %v3891_v7  ;;  %v8843_v44 = vpop.permute.xlu0 %8842  ;;  %v4394_v47 = vld [vmem:[%s14114_s13 + $0x58] sm:$0xff]  ;;  %v4821_v3 = vld [vmem:[%s14115_s14 + $0x48] sm:$0xff] }
 0x859   : > { %v8845_v41 = vunpack.i.h.bf16 %v8843_v44  ;;  %v8844_v11 = vunpack.i.l.bf16 %v8843_v44  ;;  %v8256_v10 = vpack.c.bf16 %v4821_v3, %v4813_v39  ;;  %v4823_v7 = vld [vmem:[%s14115_s14 + $0x58] sm:$0xff]  ;;  %v4830_v44 = vld [vmem:[%s14115_s14 + $0x90] sm:$0xff]  ;;  %v4272_v39 = vstv %s11769_s16  ;;  %s6878_s16 = sld [smem:[#allocation7 + $0xf]] }
 0x85a   : > { %8199 = vmatpush1.bf16.xpose.msra.mxu1 %v8198_v25  ;;  %v3899_v55 = vsel %vm1054_vm2, %v11493_v24, %v8829_v61  ;;  %v3900_v30 = vsel %vm1054_vm2, %v11480_v38, %v8830_v4  ;;  %v4393_v4 = vld [vmem:[%s14114_s13 + $0x50] sm:$0xff]  ;;  %v4396_v61 = vld [vmem:[%s14114_s13 + $0x68] sm:$0xff]  ;;  %v4278_v3 = vstv %s11771_s18  ;;  %s14124_s18 = sld [smem:[#allocation14_spill]] }
 0x85b   : > { %8201 = vmatprep.subr.bf16.mxu1 %v8200_v6  ;;  %v8204_v50 = vpack.c.bf16 %v3900_v30, %v3899_v55  ;;  %v8838_v15 = vpop.permute.xlu1 %8837  ;;  %v3904_v1 = vsel %vm1054_vm2, %v11379_v19, %v8845_v41  ;;  %v4391_v6 = vld [vmem:[%s14114_s13 + $0x40] sm:$0xff]  ;;  %v8252_v51 = vpack.c.bf16 %v4398_v20, %v4396_v61  ;;  %v4397_v30 = vld [vmem:[%s14114_s13 + $0x70] sm:$0xff]  ;;  %v4246_v61 = vstv %s11757_s22  ;;  %s11854_s22 = sld [smem:[#allocation5 + $0xe]] }
 0x85c   : > { %v8840_v9 = vunpack.i.h.bf16 %v8838_v15  ;;  %v8839_v60 = vunpack.i.l.bf16 %v8838_v15  ;;  %v8250_v36 = vpack.c.bf16 %v4393_v4, %v4391_v6  ;;  %v4395_v55 = vld [vmem:[%s14114_s13 + $0x60] sm:$0xff]  ;;  %v4239_v6 = vstv %s11753_s12  ;;  %s11892_s12 = sld [smem:[#allocation7 + $0xd]] }
 0x85d   : > { %v4252_v20 = vstv %s11759_s30  ;;  %s12258_s30 = sld [smem:[#allocation7 + $0x82]] }
 0x85e   : > { %v3902_v52 = vsel %vm1054_vm2, %v11368_v48, %v8840_v9  ;;  %v3901_v18 = vsel %vm1054_vm2, %v11371_v13, %v8839_v60  ;;  %v3903_v48 = vsel %vm1054_vm2, %v11386_v16, %v8844_v11  ;;  %v8853_v13 = vpop.permute.xlu0 %8852  ;;  %v4822_v9 = vld [vmem:[%s14115_s14 + $0x50] sm:$0xff]  ;;  %v4847_v11 = vld [vmem:[%s14115_s14 + $0x118] sm:$0xff] }
 0x85f   : > { %v8210_v31 = vpack.c.bf16 %v3902_v52, %v3901_v18  ;;  %v8848_v42 = vpop.permute.xlu1 %8847  ;;  %v8214_v63 = vpack.c.bf16 %v3904_v1, %v3903_v48  ;;  %v8854_v26 = vunpack.i.l.bf16 %v8853_v13  ;;  %v8855_v49 = vunpack.i.h.bf16 %v8853_v13  ;;  %v4831_v52 = vld [vmem:[%s14115_s14 + $0x98] sm:$0xff]  ;;  %v4854_v13 = vld [vmem:[%s14115_s14 + $0x150] sm:$0xff] }
 0x860   : > { %v8850_v34 = vunpack.i.h.bf16 %v8848_v42  ;;  %v8849_v0 = vunpack.i.l.bf16 %v8848_v42  ;;  %v4839_v18 = vld [vmem:[%s14115_s14 + $0xd8] sm:$0xff]  ;;  %v4846_v42 = vld [vmem:[%s14115_s14 + $0x110] sm:$0xff] }
 0x861   : > { %v3909_v19 = vsel %vm1054_vm2, %v11450_v17, %v8854_v26  ;;  %v3907_v28 = vsel %vm1054_vm2, %v11431_v14, %v8855_v49  ;;  %v8237_v14 = vpack.c.bf16 %v9897_v40, %v11511_v5  ;;  %v4386_v17 = vld [vmem:[%s14114_s13 + $0x18] sm:$0xff]  ;;  %v4385_v40 = vld [vmem:[%s14114_s13 + $0x10] sm:$0xff]  ;;  %v4387_v5 = vld [vmem:[%s14114_s13 + $0x20] sm:$0xff] }
 0x862   : > { %8203 = vmatpush1.bf16.xpose.msra.mxu1 %v8202_v56  ;;  %v3906_v58 = vsel %vm1054_vm2, %v11399_v33, %v8850_v34  ;;  %v8220_v16 = vpack.c.bf16 %v9971_v21, %v3909_v19  ;;  %v8225_v21 = vpack.c.bf16 %v11454_v45, %v11472_v27  ;;  %v4383_v45 = vld [vmem:[%s14114_s13] sm:$0xff]  ;;  %v4388_v27 = vld [vmem:[%s14114_s13 + $0x28] sm:$0xff]  ;;  %v4855_v1 = vld [vmem:[%s14115_s14 + $0x158] sm:$0xff]  ;;  %v8330_v34 = vpack.c.bf16 %v4854_v13, %v4846_v42 }
 0x863   : > { %8205 = vmatprep.subr.bf16.mxu1 %v8204_v50  ;;  %v3874_v35 = vpop.permute.xlu1 %3873  ;;  %v4815_v50 = vld [vmem:[%s14115_s14 + $0x18] sm:$0xff]  ;;  %v8328_v48 = vpack.c.bf16 %v4855_v1, %v4847_v11  ;;  %v4878_v49 = vld [vmem:[%s14115_s14 + $0x210] sm:$0xff]  ;;  %14134 = sst [smem:[#allocation22_spill]] %s12258_s30 }
 0x864   : > { %v3908_v59 = vsel %vm1054_vm2, %v11423_v29, %v3874_v35  ;;  %v8233_v29 = vpack.c.bf16 %v11480_v38, %v11493_v24  ;;  %v4390_v38 = vld [vmem:[%s14114_s13 + $0x38] sm:$0xff]  ;;  %v8320_v15 = vpack.c.bf16 %v4823_v7, %v4815_v50 }
 0x865   : > { %v8222_v33 = vpack.c.bf16 %v3908_v59, %v3907_v28  ;;  %v8244_v24 = vpack.c.bf16 %v4390_v38, %v4388_v27  ;;  %v4879_v19 = vld [vmem:[%s14115_s14 + $0x218] sm:$0xff]  ;;  %v4886_v59 = vld [vmem:[%s14115_s14 + $0x250] sm:$0xff]  ;;  %v4174_v27 = vstv %s11739_s1  ;;  %v4207_v38 = vstv %s11733_s8  ;;  %s12266_s8 = sld [smem:[#allocation3 + $0x84]]  ;;  %s12272_s1 = sld [smem:[#allocation3 + $0x85]] }
 0x866   : > { %v4895_v28 = vld [vmem:[%s14115_s14 + $0x298] sm:$0xff] }
 0x86a   : > { %8207 = vmatpush1.bf16.xpose.msra.mxu1 %v8206_v46 }
 0x86b   : > { %8209 = vmatprep.subr.bf16.mxu1 %v8198_v25  ;;  %v8942_v25 = vmov 0.0|0.0   ;;  %14137 = sst [smem:[#allocation25_spill]] %s12266_s8 }
 0x86c   : > { %14140 = sst [smem:[#allocation28_spill]] %s12272_s1 }
 0x871   : > { %4019 = vmatmul.mubr.f32.vlgmr.msra.gmra.mrb[80].mxu1 %v3917_v37  ;;  %v8324_v37 = vpack.c.bf16 %v4839_v18, %v4831_v52  ;;  %v4304_v52 = vstv %s11787_s15  ;;  %s6624_s15 = sshll.u32 %s14124_s18, 2  ;;  %s12302_s18 = sld [smem:[#allocation3 + $0x8a]] }
 0x872   : > { %8211 = vmatpush1.bf16.xpose.msra.mxu1 %v8210_v31  ;;  %4088 = vmatprep.mubr.f32.mxu1 %v11519_v23  ;;  %v3905_v23 = vsel %vm1054_vm2, %v11404_v57, %v8849_v0  ;;  %v8229_v57 = vpack.c.bf16 %v11489_v2, %v11458_v12  ;;  %v8242_v2 = vpack.c.bf16 %v4385_v40, %v4383_v45  ;;  %v4838_v31 = vld [vmem:[%s14115_s14 + $0xd0] sm:$0xff]  ;;  %v4871_v0 = vld [vmem:[%s14115_s14 + $0x1d8] sm:$0xff]  ;;  %v4191_v45 = vstv %s11727_s24  ;;  %s14125_s24 = sld [smem:[#allocation101_spill]] }
 0x873   : > { %8213 = vmatprep.subr.bf16.mxu1 %v8202_v56  ;;  %v8218_v32 = vpack.c.bf16 %v3906_v58, %v3905_v23  ;;  %v8254_v56 = vpack.c.bf16 %v4397_v30, %v4395_v55  ;;  %v8326_v41 = vpack.c.bf16 %v4838_v31, %v4830_v44  ;;  %v4862_v58 = vld [vmem:[%s14115_s14 + $0x190] sm:$0xff]  ;;  %v4204_v40 = vstv %s11731_s9  ;;  %s12264_s9 = sld [smem:[#allocation7 + $0x83]] }
 0x874   : > { %v4870_v23 = vld [vmem:[%s14115_s14 + $0x1d0] sm:$0xff] }
 0x877   : > { %14154 = sst [smem:[#allocation42_spill]] %s12302_s18 }
 0x879   : > { %14136 = sst [smem:[#allocation24_spill]] %s12264_s9 }
 0x87a   : > { %8215 = vmatpush1.bf16.xpose.msra.mxu1 %v8214_v63  ;;  %v4863_v63 = vld [vmem:[%s14115_s14 + $0x198] sm:$0xff] }
 0x87b   : > { %8217 = vmatprep.subr.bf16.mxu1 %v8206_v46  ;;  %v4814_v46 = vld [vmem:[%s14115_s14 + $0x10] sm:$0xff]  ;;  %v8332_v26 = vpack.c.bf16 %v4871_v0, %v4863_v63 }
 0x87c   : > { %v8322_v60 = vpack.c.bf16 %v4822_v9, %v4814_v46  ;;  %v4291_v46 = vstv %s11777_s3  ;;  %v4295_v9 = vstv %s11779_s17  ;;  %s11843_s17 = sld [smem:[#allocation5 + $0xd]]  ;;  %s12256_s3 = sld [smem:[#allocation5 + $0x82]] }
 0x882   : > { %8219 = vmatpush1.bf16.xpose.msra.mxu1 %v8218_v32  ;;  %v4887_v32 = vld [vmem:[%s14115_s14 + $0x258] sm:$0xff]  ;;  %14133 = sst [smem:[#allocation21_spill]] %s12256_s3 }
 0x883   : > { %8221 = vmatprep.subr.bf16.mxu1 %v8220_v16  ;;  %v8334_v16 = vpack.c.bf16 %v4870_v23, %v4862_v58  ;;  %v8336_v35 = vpack.c.bf16 %v4887_v32, %v4879_v19 }
 0x88a   : > { %8223 = vmatpush1.bf16.xpose.msra.mxu1 %v8222_v33  ;;  %v4903_v33 = vld [vmem:[%s14115_s14 + $0x2d8] sm:$0xff]  ;;  %s11775_s14 = sld [smem:[#allocation5 + $0x9]] }
 0x88b   : > { %8224 = vmatprep.subr.bf16.mxu1 %v8942_v25 }
 0x890   : > { %14119 = sst [smem:[#allocation19_spill]] %s11775_s14  ;;  %s11789_s14 = sld [smem:[#allocation3 + $0xb]] }
 0x891   : > { %4089 = vmatmul.mubr.f32.vlgmr.msra.gmra.mrb[80].mxu1 %v11522_v8  ;;  %v4389_v8 = vld [vmem:[%s14114_s13 + $0x30] sm:$0xff] }
 0x892   : > { %8227 = vmatpush3.bf16.xpose.msk.msra.mxu1 %vm8226_vm0, %v8225_v21  ;;  %7789 = vmatprep.mubr.msk.f32.mxu1 %vm8943_vm1, %v8941_v43  ;;  %v4384_v43 = vld [vmem:[%s14114_s13 + $0x8] sm:$0xff]  ;;  %v8246_v22 = vpack.c.bf16 %v4389_v8, %v4387_v5  ;;  %v8340_v21 = vpack.c.bf16 %v4903_v33, %v4895_v28  ;;  %v4187_v5 = vstv %s11741_s0  ;;  %v4200_v8 = vstv %s11743_s5  ;;  %s11868_s5 = sld [smem:[#allocation5 + $0xf]]  ;;  %s12274_s0 = sld [smem:[#allocation5 + $0x85]] }
 0x893   : > { %8228 = vmatprep.subr.bf16.mxu1 %v8942_v25  ;;  %v8240_v12 = vpack.c.bf16 %v4386_v17, %v4384_v43  ;;  %v4178_v43 = vstv %s11723_s28  ;;  %v4181_v17 = vstv %s11725_s26  ;;  %s14122_s28 = sld [smem:[#allocation18_spill]]  ;;  %s14123_s26 = sld [smem:[#allocation19_spill]] }
 0x895   : > { %8241 = vmatprep.subr.bf16.mxu0 %v8240_v12  ;;  %v4194_v12 = vstv %s11729_s29  ;;  %s12260_s29 = sld [smem:[#allocation3 + $0x83]] }
 0x896   : > { %8243 = vmatpush1.bf16.msra.mxu0 %v8242_v2  ;;  %v4217_v2 = vstv %s11735_s21  ;;  %v4308_v18 = vstv %s11789_s14  ;;  %s11899_s14 = sld [smem:[#allocation7 + $0xe]]  ;;  %s12268_s21 = sld [smem:[#allocation5 + $0x84]] }
 0x897   : > { %8245 = vmatprep.subr.bf16.mxu0 %v8244_v24  ;;  %v4220_v24 = vstv %s11737_s2  ;;  %s12270_s2 = sld [smem:[#allocation7 + $0x84]] }
 0x898   : > { %14141 = sst [smem:[#allocation29_spill]] %s12274_s0 }
 0x899   : > { %v4282_v7 = vstv %s14122_s28  ;;  %s12282_s28 = sld [smem:[#allocation7 + $0x86]] }
 0x89a   : > { %8231 = vmatpush3.bf16.xpose.msk.msra.mxu1 %vm8226_vm0, %v8229_v57  ;;  %8247 = vmatpush1.bf16.msra.mxu0 %v8246_v22  ;;  %v3912_v57 = vstv %s11717_s27  ;;  %s14120_s27 = sld [smem:[#allocation16_spill]]  ;;  %v4230_v22 = vstv %s11749_s10  ;;  %s11830_s10 = sld [smem:[#allocation3 + $0xc]] }
 0x89b   : > { %8232 = vmatprep.subr.bf16.mxu1 %v8942_v25 }
 0x89c   : > { %14138 = sst [smem:[#allocation26_spill]] %s12268_s21 }
 0x89d   : > { %14139 = sst [smem:[#allocation27_spill]] %s12270_s2 }
 0x8a2   : > { %8235 = vmatpush3.bf16.xpose.msk.msra.mxu1 %vm8226_vm0, %v8233_v29  ;;  %v4165_v29 = vstv %s11719_s25  ;;  %s14121_s25 = sld [smem:[#allocation17_spill]] }
 0x8a3   : > { %8236 = vmatprep.subr.bf16.mxu1 %v8942_v25  ;;  %v8338_v25 = vpack.c.bf16 %v4886_v59, %v4878_v49 }
 0x8a8   : > { %v4265_v30 = vstv %s14121_s25  ;;  %s14126_s25 = sld [smem:[#allocation102_spill]] }
 0x8aa   : > { %8239 = vmatpush3.bf16.xpose.msk.msra.mxu1 %vm8226_vm0, %v8237_v14  ;;  %v4168_v14 = vstv %s11721_s4  ;;  %s11799_s4 = sld [smem:[#allocation5 + $0xb]] }
 0x8ab   : > { %8321 = vmatprep.subr.bf16.mxu1 %v8320_v15  ;;  %v4285_v15 = vstv %s14123_s26  ;;  %s12284_s26 = sld [smem:[#allocation3 + $0x87]] }
 0x8b0   : > { %v4311_v42 = vstv %s11799_s4  ;;  %s738_s4 = scalar_lea.vmem %s14126_s25, %s6624_s15  ;;  %s12278_s25 = sld [smem:[#allocation3 + $0x86]] }
 0x8b1   : > { %7790 = vmatmul.mubr.msk.f32.vlgmr.msra.gmra.mrb[80].mxu1 %vm1054_vm2, %v11526_v54  ;;  %v4392_v54 = vld [vmem:[%s14114_s13 + $0x48] sm:$0xff]  ;;  %s11755_s13 = sld [smem:[#allocation3 + $0x6]]  ;;  %14145 = sst [smem:[#allocation33_spill]] %s12284_s26 }
 0x8b2   : > { %v8248_v62 = vpack.c.bf16 %v4394_v47, %v4392_v54  ;;  %8323 = vmatpush1.bf16.msra.mxu1 %v8322_v60  ;;  %v4213_v54 = vstv %s11745_s6  ;;  %v4226_v47 = vstv %s11747_s7  ;;  %v4298_v60 = vstv %s11781_s20  ;;  %s11879_s6 = sld [smem:[#allocation7 + $0xb]]  ;;  %s11886_s7 = sld [smem:[#allocation7 + $0xc]] }
 0x8b3   : > { %8325 = vmatprep.subr.bf16.mxu1 %v8324_v37  ;;  %s4372_s20 = sld [smem:[#allocation8]] }
 0x8b4   : > { %8249 = vmatprep.subr.bf16.mxu0 %v8248_v62  ;;  %v4233_v62 = vstv %s11751_s11  ;;  %s11832_s11 = sld [smem:[#allocation5 + $0xc]] }
 0x8b5   : > { %8251 = vmatpush1.bf16.msra.mxu0 %v8250_v36  ;;  %v4256_v36 = vstv %s11761_s23  ;;  %s11849_s23 = sld [smem:[#allocation3 + $0xf]] }
 0x8b6   : > { %8253 = vmatprep.subr.bf16.mxu0 %v8252_v51  ;;  %8327 = vmatpush1.bf16.msra.mxu1 %v8326_v41  ;;  %v4259_v51 = vstv %s14120_s27  ;;  %s12276_s27 = sld [smem:[#allocation7 + $0x85]]  ;;  %14143 = sst [smem:[#allocation31_spill]] %s12278_s25 }
 0x8b7   : > { %8329 = vmatprep.subr.bf16.mxu1 %v8328_v48  ;;  %v4243_v4 = vstv %s11755_s13  ;;  %s11839_s13 = sld [smem:[#allocation3 + $0xd]] }
 0x8b9   : > { %8255 = vmatpush1.bf16.msra.mxu0 %v8254_v56  ;;  %v4269_v56 = vstv %s11767_s19  ;;  %s11847_s19 = sld [smem:[#allocation3 + $0xe]] }
 0x8ba   : > { %8257 = vmatprep.subr.bf16.mxu0 %v8256_v10  ;;  %8331 = vmatpush1.bf16.msra.mxu1 %v8330_v34 }
 0x8bb   : > { %8333 = vmatprep.subr.bf16.mxu1 %v8332_v26 }
 0x8bc   : > { %14142 = sst [smem:[#allocation30_spill]] %s12276_s27 }
 0x8be   : > { %8335 = vmatpush1.bf16.msra.mxu1 %v8334_v16 }
 0x8bf   : > { %8337 = vmatprep.subr.bf16.mxu1 %v8336_v35 }
 0x8c2   : > { %8339 = vmatpush1.bf16.msra.mxu1 %v8338_v25 }
 0x8c3   : > { %8341 = vmatprep.subr.bf16.mxu1 %v8340_v21 }
 0x984   : > { %v4160_v55 = vpop.f32.mrb[80].mxu1 }
 0x985   : > { %v11817_v50 = vadd.f32 %v4160_v55, %v3912_v57  ;;  %v7791_v10 = vpop.f32.mrb[81].mxu1 }
 0x987   : > { %v4166_v37 = vmul.f32 %v11817_v50, %v4165_v29  ;;  %v4179_v44 = vmul.f32 %v11817_v50, %v4178_v43  ;;  %v4192_v31 = vmul.f32 %v11817_v50, %v4191_v45  ;;  %v4205_v41 = vmul.f32 %v11817_v50, %v4204_v40 }
 0x988   : > { %v4218_v11 = vmul.f32 %v11817_v50, %v4217_v2  ;;  %v4231_v1 = vmul.f32 %v11817_v50, %v4230_v22  ;;  %v4244_v48 = vmul.f32 %v11817_v50, %v4243_v4  ;;  %v4257_v19 = vmul.f32 %v11817_v50, %v4256_v36 }
 0x989   : > { %v4169_v13 = vadd.f32 %v4168_v14, %v4166_v37  ;;  %v4182_v63 = vadd.f32 %v4181_v17, %v4179_v44  ;;  %v4195_v34 = vadd.f32 %v4194_v12, %v4192_v31  ;;  %v4208_v0 = vadd.f32 %v4207_v38, %v4205_v41 }
 0x98a   : > { %v4221_v26 = vadd.f32 %v4220_v24, %v4218_v11  ;;  %v4234_v58 = vadd.f32 %v4233_v62, %v4231_v1  ;;  %v4247_v23 = vadd.f32 %v4246_v61, %v4244_v48  ;;  %v4260_v14 = vadd.f32 %v4259_v51, %v4257_v19 }
 0x98b   : > { %vm4170_vm14 = vcmp.ge.f32.partialorder %v4169_v13, 0.0  ;;  %v4171_v32 = vmul.f32 0.01, %v4169_v13  ;;  %vm4183_vm15 = vcmp.ge.f32.partialorder %v4182_v63, 0.0  ;;  %v4184_v16 = vmul.f32 0.01, %v4182_v63 }
 0x98c   : > { %vm4196_vm3 = vcmp.ge.f32.partialorder %v4195_v34, 0.0  ;;  %v4197_v35 = vmul.f32 0.01, %v4195_v34  ;;  %vm4209_vm4 = vcmp.ge.f32.partialorder %v4208_v0, 0.0  ;;  %v4210_v49 = vmul.f32 0.01, %v4208_v0 }
 0x98d   : > { %v4172_v59 = vsel %vm4170_vm14, %v4169_v13, %v4171_v32  ;;  %v4185_v28 = vsel %vm4183_vm15, %v4182_v63, %v4184_v16  ;;  %vm4222_vm5 = vcmp.ge.f32.partialorder %v4221_v26, 0.0  ;;  %v4223_v33 = vmul.f32 0.01, %v4221_v26 }
 0x98e   : > { %v4175_v25 = vmul.f32 %v4174_v27, %v4172_v59  ;;  %v4188_v21 = vmul.f32 %v4187_v5, %v4185_v28  ;;  %v4198_v57 = vsel %vm4196_vm3, %v4195_v34, %v4197_v35  ;;  %v4211_v29 = vsel %vm4209_vm4, %v4208_v0, %v4210_v49 }
 0x98f   : > { %vm4235_vm6 = vcmp.ge.f32.partialorder %v4234_v58, 0.0  ;;  %v4321_v43 = vstv %s11830_s10  ;;  %v4324_v17 = vstv %s11832_s11  ;;  %v4201_v12 = vmul.f32 %v4200_v8, %v4198_v57  ;;  %s12286_s10 = sld [smem:[#allocation5 + $0x87]] }
 0x990   : > { %v4189_v45 = vadd.f32 %v4188_v21, %v4175_v25  ;;  %v4224_v40 = vsel %vm4222_vm5, %v4221_v26, %v4223_v33  ;;  %v4236_v38 = vmul.f32 0.01, %v4234_v58  ;;  %v4214_v27 = vmul.f32 %v4213_v54, %v4211_v29  ;;  %s12288_s11 = sld [smem:[#allocation7 + $0x87]] }
 0x991   : > { %vm4248_vm7 = vcmp.ge.f32.partialorder %v4247_v23, 0.0  ;;  %v4249_v2 = vmul.f32 0.01, %v4247_v23  ;;  %v4270_v24 = vmul.f32 %v11817_v50, %v4269_v56  ;;  %v4283_v22 = vmul.f32 %v11817_v50, %v4282_v7 }
 0x992   : > { %v4202_v5 = vadd.f32 %v4201_v12, %v4189_v45  ;;  %v4237_v8 = vsel %vm4235_vm6, %v4234_v58, %v4236_v38  ;;  %v4296_v62 = vmul.f32 %v11817_v50, %v4295_v9  ;;  %v4227_v4 = vmul.f32 %v4226_v47, %v4224_v40 }
 0x993   : > { %v4262_v61 = vmul.f32 0.01, %v4260_v14  ;;  %v4273_v54 = vadd.f32 %v4272_v39, %v4270_v24  ;;  %v4334_v36 = vstv %s11839_s13  ;;  %v4240_v55 = vmul.f32 %v4239_v6, %v4237_v8  ;;  %s12290_s13 = sld [smem:[#allocation3 + $0x88]] }
 0x994   : > { %v4215_v51 = vadd.f32 %v4214_v27, %v4202_v5  ;;  %vm4261_vm8 = vcmp.ge.f32.partialorder %v4260_v14, 0.0  ;;  %v4286_v56 = vadd.f32 %v4285_v15, %v4283_v22  ;;  %v4250_v10 = vsel %vm4248_vm7, %v4247_v23, %v4249_v2 }
 0x995   : > { %v4275_v47 = vmul.f32 0.01, %v4273_v54  ;;  %v4299_v7 = vadd.f32 %v4298_v60, %v4296_v62  ;;  %v4309_v39 = vmul.f32 %v11817_v50, %v4308_v18  ;;  %vm4274_vm9 = vcmp.ge.f32.partialorder %v4273_v54, 0.0  ;;  %14146 = sst [smem:[#allocation34_spill]] %s12286_s10  ;;  %s12306_s10 = sld [smem:[#allocation7 + $0x8a]] }
 0x996   : > { %v4228_v9 = vadd.f32 %v4227_v4, %v4215_v51  ;;  %v4288_v6 = vmul.f32 0.01, %v4286_v56  ;;  %v4322_v37 = vmul.f32 %v11817_v50, %v4321_v43  ;;  %v4263_v15 = vsel %vm4261_vm8, %v4260_v14, %v4262_v61  ;;  %v4812_v51 = vld [vmem:[%s14125_s24] sm:$0xff]  ;;  %14147 = sst [smem:[#allocation35_spill]] %s12288_s11  ;;  %s12304_s11 = sld [smem:[#allocation5 + $0x8a]] }
 0x997   : > { %vm4287_vm10 = vcmp.ge.f32.partialorder %v4286_v56, 0.0  ;;  %v4312_v44 = vadd.f32 %v4311_v42, %v4309_v39  ;;  %v4337_v31 = vstv %s11843_s17  ;;  %v4253_v60 = vmul.f32 %v4252_v20, %v4250_v10  ;;  %v4829_v10 = vld [vmem:[%s14125_s24 + $0x88] sm:$0xff]  ;;  %s12292_s17 = sld [smem:[#allocation5 + $0x88]] }
 0x998   : > { %v4241_v41 = vadd.f32 %v4240_v55, %v4228_v9  ;;  %v4347_v11 = vstv %s11847_s19  ;;  %v4360_v1 = vstv %s11849_s23  ;;  %v4276_v18 = vsel %vm4274_vm9, %v4273_v54, %v4275_v47  ;;  %v4820_v55 = vld [vmem:[%s14125_s24 + $0x40] sm:$0xff]  ;;  %v4837_v47 = vld [vmem:[%s14125_s24 + $0xc8] sm:$0xff]  ;;  %s12294_s19 = sld [smem:[#allocation7 + $0x88]]  ;;  %s12296_s23 = sld [smem:[#allocation3 + $0x89]] }
 0x999   : > { %v4301_v48 = vmul.f32 0.01, %v4299_v7  ;;  %v4325_v13 = vadd.f32 %v4324_v17, %v4322_v37  ;;  %v4350_v63 = vstv %s11854_s22  ;;  %v4266_v0 = vmul.f32 %v4265_v30, %v4263_v15  ;;  %v4828_v37 = vld [vmem:[%s14125_s24 + $0x80] sm:$0xff]  ;;  %14148 = sst [smem:[#allocation36_spill]] %s12290_s13  ;;  %s12298_s22 = sld [smem:[#allocation5 + $0x89]] }
 0x99a   : > { %v4254_v34 = vadd.f32 %v4253_v60, %v4241_v41  ;;  %v4289_v42 = vsel %vm4287_vm10, %v4286_v56, %v4288_v6  ;;  %vm4300_vm11 = vcmp.ge.f32.partialorder %v4299_v7, 0.0  ;;  %v4314_v26 = vmul.f32 0.01, %v4312_v44  ;;  %v4836_v15 = vld [vmem:[%s14125_s24 + $0xc0] sm:$0xff]  ;;  %v4853_v41 = vld [vmem:[%s14125_s24 + $0x148] sm:$0xff]  ;;  %s12318_s13 = sld [smem:[#allocation7 + $0x8c]] }
 0x99b   : > { %v4335_v58 = vmul.f32 %v11817_v50, %v4334_v36  ;;  %v4348_v20 = vmul.f32 %v11817_v50, %v4347_v11  ;;  %v4361_v23 = vmul.f32 %v11817_v50, %v4360_v1  ;;  %v4279_v32 = vmul.f32 %v4278_v3, %v4276_v18  ;;  %14156 = sst [smem:[#allocation44_spill]] %s12306_s10  ;;  %s12321_s10 = sld [smem:[#allocation3 + $0x8d]] }
 0x99c   : > { %v4267_v19 = vadd.f32 %v4266_v0, %v4254_v34  ;;  %vm4313_vm12 = vcmp.ge.f32.partialorder %v4312_v44, 0.0  ;;  %v4363_v16 = vstv %s11868_s5  ;;  %v4302_v30 = vsel %vm4300_vm11, %v4299_v7, %v4301_v48  ;;  %v4844_v48 = vld [vmem:[%s14125_s24 + $0x100] sm:$0xff]  ;;  %v4869_v34 = vld [vmem:[%s14125_s24 + $0x1c8] sm:$0xff]  ;;  %s12242_s5 = sld [smem:[#allocation3 + $0x80]]  ;;  %14155 = sst [smem:[#allocation43_spill]] %s12304_s11 }
 0x99d   : > { %v4327_v35 = vmul.f32 0.01, %v4325_v13  ;;  %v4338_v49 = vadd.f32 %v4337_v31, %v4335_v58  ;;  %v4351_v59 = vadd.f32 %v4350_v63, %v4348_v20  ;;  %v4292_v33 = vmul.f32 %v4291_v46, %v4289_v42  ;;  %v4845_v31 = vld [vmem:[%s14125_s24 + $0x108] sm:$0xff]  ;;  %v4868_v58 = vld [vmem:[%s14125_s24 + $0x1c0] sm:$0xff]  ;;  %14149 = sst [smem:[#allocation37_spill]] %s12292_s17  ;;  %s12308_s17 = sld [smem:[#allocation3 + $0x8b]] }
 0x99e   : > { %v4280_v28 = vadd.f32 %v4279_v32, %v4267_v19  ;;  %vm4326_vm13 = vcmp.ge.f32.partialorder %v4325_v13, 0.0  ;;  %v4315_v25 = vsel %vm4313_vm12, %v4312_v44, %v4314_v26  ;;  %v4317_v50 = vstv %s11879_s6  ;;  %v4375_v44 = vld [vmem:[%s738_s4] sm:$0x7]  ;;  %s14127_s6 = sld [smem:[#allocation105_spill]]  ;;  %v4861_v63 = vld [vmem:[%s14125_s24 + $0x188] sm:$0xff]  ;;  %s12280_s4 = sld [smem:[#allocation5 + $0x86]] }
 0x99f   : > { %v4340_v21 = vmul.f32 0.01, %v4338_v49  ;;  %v4364_v57 = vadd.f32 %v4363_v16, %v4361_v23  ;;  %v4305_v29 = vmul.f32 %v4304_v52, %v4302_v30  ;;  %vm4339_vm0 = vcmp.ge.f32.partialorder %v4338_v49, 0.0  ;;  %v4860_v26 = vld [vmem:[%s14125_s24 + $0x180] sm:$0xff]  ;;  %v4877_v20 = vld [vmem:[%s14125_s24 + $0x208] sm:$0xff]  ;;  %14150 = sst [smem:[#allocation38_spill]] %s12294_s19 }
 0x9a0   : > { %v4293_v3 = vadd.f32 %v4292_v33, %v4280_v28  ;;  %v4328_v14 = vsel %vm4326_vm13, %v4325_v13, %v4327_v35  ;;  %v4330_v43 = vstv %s11886_s7  ;;  %v4353_v17 = vmul.f32 0.01, %v4351_v59  ;;  %v4852_v13 = vld [vmem:[%s14125_s24 + $0x140] sm:$0xff]  ;;  %v4885_v23 = vld [vmem:[%s14125_s24 + $0x248] sm:$0xff]  ;;  %14151 = sst [smem:[#allocation39_spill]] %s12296_s23  ;;  %s12310_s19 = sld [smem:[#allocation5 + $0x8b]] }
 0x9a1   : > { %v4318_v12 = vmul.f32 %v4317_v50, %v4315_v25  ;;  %vm4352_vm1 = vcmp.ge.f32.partialorder %v4351_v59, 0.0  ;;  %v4341_v46 = vsel %vm4339_vm0, %v4338_v49, %v4340_v21  ;;  %v4343_v40 = vstv %s11892_s12  ;;  %v4876_v16 = vld [vmem:[%s14125_s24 + $0x200] sm:$0xff]  ;;  %v4893_v35 = vld [vmem:[%s14125_s24 + $0x288] sm:$0xff]  ;;  %v4894_v50 = vld [vmem:[%s14125_s24 + $0x290] sm:$0xff]  ;;  %s12248_s12 = sld [smem:[#allocation3 + $0x81]]  ;;  %14152 = sst [smem:[#allocation40_spill]] %s12298_s22 }
 0x9a2   : > { %v4306_v45 = vadd.f32 %v4305_v29, %v4293_v3  ;;  %v4366_v38 = vmul.f32 0.01, %v4364_v57  ;;  %v4331_v2 = vmul.f32 %v4330_v43, %v4328_v14  ;;  %vm4365_vm14 = vcmp.ge.f32.partialorder %v4364_v57, 0.0  ;;  %v4884_v30 = vld [vmem:[%s14125_s24 + $0x240] sm:$0xff]  ;;  %v4901_v49 = vld [vmem:[%s14125_s24 + $0x2c8] sm:$0xff]  ;;  %14128 = sst [smem:[#allocation16_spill]] %s12242_s5 }
 0x9a3   : > { %v4354_v24 = vsel %vm4352_vm1, %v4351_v59, %v4353_v17  ;;  %v4356_v5 = vstv %s11899_s14  ;;  %v4344_v52 = vmul.f32 %v4343_v40, %v4341_v46  ;;  %v4369_v62 = vstv %s6878_s16  ;;  %v4892_v33 = vld [vmem:[%s14125_s24 + $0x280] sm:$0xff]  ;;  %v4909_v3 = vld [vmem:[%s14125_s24 + $0x308] sm:$0xff]  ;;  %s12250_s14 = sld [smem:[#allocation5 + $0x81]]  ;;  %14157 = sst [smem:[#allocation45_spill]] %s12308_s17 }
 0x9a4   : > { %v4319_v27 = vadd.f32 %v4318_v12, %v4306_v45  ;;  %v4367_v22 = vsel %vm4365_vm14, %v4364_v57, %v4366_v38  ;;  %v4357_v61 = vmul.f32 %v4356_v5, %v4354_v24  ;;  %v4373_v56 = vstv %s4372_s20  ;;  %s752_s7 = scalar_lea.vmem %s14127_s6, %s6624_s15  ;;  %v4900_v25 = vld [vmem:[%s14125_s24 + $0x2c0] sm:$0xff]  ;;  %v4902_v57 = vld [vmem:[%s14125_s24 + $0x2d0] sm:$0xff]  ;;  %v4917_v29 = vld [vmem:[%s14125_s24 + $0x348] sm:$0xff]  ;;  %s12244_s6 = sld [smem:[#allocation5 + $0x80]] }
 0x9a5   : > { %v4370_v36 = vmul.f32 %v4369_v62, %v4367_v22  ;;  %v8258_v39 = vpack.c.bf16 %v4820_v55, %v4812_v51  ;;  %v8260_v6 = vpack.c.bf16 %v4837_v47, %v4829_v10  ;;  %vm4381_vm15 = vcmask 518144   ;;  %v4911_v17 = vld [vmem:[%s14125_s24 + $0x318] sm:$0xff]  ;;  %v4908_v12 = vld [vmem:[%s14125_s24 + $0x300] sm:$0xff]  ;;  %v4910_v38 = vld [vmem:[%s14125_s24 + $0x310] sm:$0xff]  ;;  %s12252_s16 = sld [smem:[#allocation7 + $0x81]]  ;;  %s12254_s20 = sld [smem:[#allocation3 + $0x82]] }
 0x9a6   : > { %v4332_v8 = vadd.f32 %v4331_v2, %v4319_v27  ;;  %v8262_v11 = vpack.c.bf16 %v4836_v15, %v4828_v37  ;;  %v8264_v18 = vpack.c.bf16 %v4853_v41, %v4845_v31  ;;  %v8266_v0 = vpack.c.bf16 %v4852_v13, %v4844_v48  ;;  %v4919_v45 = vld [vmem:[%s14125_s24 + $0x358] sm:$0xff]  ;;  %v4916_v40 = vld [vmem:[%s14125_s24 + $0x340] sm:$0xff]  ;;  %v4918_v27 = vld [vmem:[%s14125_s24 + $0x350] sm:$0xff]  ;;  %s12262_s15 = sld [smem:[#allocation5 + $0x83]]  ;;  %14144 = sst [smem:[#allocation32_spill]] %s12280_s4 }
 0x9a7   : > { %v8268_v42 = vpack.c.bf16 %v4869_v34, %v4861_v63  ;;  %v8270_v19 = vpack.c.bf16 %v4868_v58, %v4860_v26  ;;  %v8272_v32 = vpack.c.bf16 %v4885_v23, %v4877_v20  ;;  %v8274_v59 = vpack.c.bf16 %v4884_v30, %v4876_v16  ;;  %v4925_v5 = vld [vmem:[%s14125_s24 + $0x388] sm:$0xff]  ;;  %v4935_v62 = vld [vmem:[%s14125_s24 + $0x3d8] sm:$0xff]  ;;  %v4934_v51 = vld [vmem:[%s14125_s24 + $0x3d0] sm:$0xff]  ;;  %s12312_s23 = sld [smem:[#allocation7 + $0x8b]]  ;;  %s12314_s22 = sld [smem:[#allocation3 + $0x8c]] }
 0x9a8   : > { %v4345_v4 = vadd.f32 %v4344_v52, %v4332_v8  ;;  %v8276_v28 = vpack.c.bf16 %v4901_v49, %v4893_v35  ;;  %v8278_v21 = vpack.c.bf16 %v4900_v25, %v4892_v33  ;;  %v8342_v14 = vpack.c.bf16 %v4902_v57, %v4894_v50  ;;  %v4933_v8 = vld [vmem:[%s14125_s24 + $0x3c8] sm:$0xff]  ;;  %v4927_v52 = vld [vmem:[%s14125_s24 + $0x398] sm:$0xff]  ;;  %v4948_v37 = vld [vmem:[%s14125_s24 + $0x440] sm:$0xff]  ;;  %14161 = sst [smem:[#allocation49_spill]] %s12318_s13  ;;  %s12323_s17 = sld [smem:[#allocation5 + $0x8d]] }
 0x9a9   : > { %v8280_v43 = vpack.c.bf16 %v4917_v29, %v4909_v3  ;;  %v8344_v46 = vpack.c.bf16 %v4919_v45, %v4911_v17  ;;  %v8282_v2 = vpack.c.bf16 %v4916_v40, %v4908_v12  ;;  %v8346_v24 = vpack.c.bf16 %v4918_v27, %v4910_v38  ;;  %v4941_v55 = vld [vmem:[%s14125_s24 + $0x408] sm:$0xff]  ;;  %v4943_v47 = vld [vmem:[%s14125_s24 + $0x418] sm:$0xff]  ;;  %v4942_v15 = vld [vmem:[%s14125_s24 + $0x410] sm:$0xff]  ;;  %14131 = sst [smem:[#allocation19_spill]] %s12250_s14 }
 0x9aa   : > { %v4358_v54 = vadd.f32 %v4357_v61, %v4345_v4  ;;  %8343 = vmatpush1.bf16.msra.mxu1 %v8342_v14  ;;  %v8284_v22 = vpack.c.bf16 %v4933_v8, %v4925_v5  ;;  %v4924_v4 = vld [vmem:[%s14125_s24 + $0x380] sm:$0xff]  ;;  %v4949_v10 = vld [vmem:[%s14125_s24 + $0x448] sm:$0xff]  ;;  %v4950_v31 = vld [vmem:[%s14125_s24 + $0x450] sm:$0xff]  ;;  %14129 = sst [smem:[#allocation17_spill]] %s12244_s6 }
 0x9ab   : > { %8345 = vmatprep.subr.bf16.mxu1 %v8344_v46  ;;  %v4932_v61 = vld [vmem:[%s14125_s24 + $0x3c0] sm:$0xff]  ;;  %v4957_v41 = vld [vmem:[%s14125_s24 + $0x488] sm:$0xff]  ;;  %v8354_v48 = vpack.c.bf16 %v4950_v31, %v4942_v15  ;;  %v4966_v26 = vld [vmem:[%s14125_s24 + $0x4d0] sm:$0xff]  ;;  %14132 = sst [smem:[#allocation20_spill]] %s12252_s16 }
 0x9ac   : > { %v4371_v7 = vadd.f32 %v4370_v36, %v4358_v54  ;;  %v8348_v54 = vpack.c.bf16 %v4935_v62, %v4927_v52  ;;  %v4926_v36 = vld [vmem:[%s14125_s24 + $0x390] sm:$0xff]  ;;  %v4956_v63 = vld [vmem:[%s14125_s24 + $0x480] sm:$0xff]  ;;  %v4973_v58 = vld [vmem:[%s14125_s24 + $0x508] sm:$0xff]  ;;  %14135 = sst [smem:[#allocation23_spill]] %s12262_s15 }
 0x9ad   : > { %v4964_v34 = vld [vmem:[%s14125_s24 + $0x4c0] sm:$0xff]  ;;  %v4981_v20 = vld [vmem:[%s14125_s24 + $0x548] sm:$0xff]  ;;  %v4975_v23 = vld [vmem:[%s14125_s24 + $0x518] sm:$0xff]  ;;  %14158 = sst [smem:[#allocation46_spill]] %s12312_s23 }
 0x9ae   : > { %v4374_v9 = vadd.f32 %v4373_v56, %v4371_v7  ;;  %v8286_v56 = vpack.c.bf16 %v4932_v61, %v4924_v4  ;;  %v4951_v7 = vld [vmem:[%s14125_s24 + $0x458] sm:$0xff]  ;;  %8347 = vmatpush1.bf16.msra.mxu1 %v8346_v24  ;;  %v8296_v30 = vpack.c.bf16 %v4981_v20, %v4973_v58  ;;  %v4972_v35 = vld [vmem:[%s14125_s24 + $0x500] sm:$0xff]  ;;  %v4982_v33 = vld [vmem:[%s14125_s24 + $0x550] sm:$0xff]  ;;  %14159 = sst [smem:[#allocation47_spill]] %s12314_s22  ;;  %s12329_s22 = sld [smem:[#allocation7 + $0x8d]] }
 0x9af   : > { %8349 = vmatprep.subr.bf16.mxu1 %v8348_v54  ;;  %v4980_v49 = vld [vmem:[%s14125_s24 + $0x540] sm:$0xff]  ;;  %v4989_v25 = vld [vmem:[%s14125_s24 + $0x588] sm:$0xff]  ;;  %v4999_v57 = vld [vmem:[%s14125_s24 + $0x5d8] sm:$0xff] }
 0x9b0   : > { %v4379_v60 = vrot.slane %v4374_v9, %v11559_v53  ;;  %6879 = vmatmul.mubr.msk.f32.vlgmr.msra.gmra.mrb[120].mxu0 %vm1054_vm2, %v4374_v9  ;;  %v8288_v9 = vpack.c.bf16 %v4949_v10, %v4941_v55  ;;  %v4997_v50 = vld [vmem:[%s14125_s24 + $0x5c8] sm:$0xff]  ;;  %v8298_v3 = vpack.c.bf16 %v4980_v49, %v4972_v35  ;;  %v4996_v17 = vld [vmem:[%s14125_s24 + $0x5c0] sm:$0xff]  ;;  %v4990_v45 = vld [vmem:[%s14125_s24 + $0x590] sm:$0xff] }
 0x9b1   : > { %8259 = vmatpush1.bf16.msra.mxu0 %v8258_v39  ;;  %v8350_v39 = vpack.c.bf16 %v4934_v51, %v4926_v36  ;;  %v8300_v14 = vpack.c.bf16 %v4997_v50, %v4989_v25  ;;  %v4998_v46 = vld [vmem:[%s14125_s24 + $0x5d0] sm:$0xff]  ;;  %v5005_v40 = vld [vmem:[%s14125_s24 + $0x608] sm:$0xff]  ;;  %v5007_v27 = vld [vmem:[%s14125_s24 + $0x618] sm:$0xff] }
 0x9b2   : > { %v4380_v1 = vmul.f32 %v4379_v60, %v4375_v44  ;;  %8261 = vmatprep.subr.bf16.mxu0 %v8260_v6  ;;  %v4940_v6 = vld [vmem:[%s14125_s24 + $0x400] sm:$0xff]  ;;  %v8352_v44 = vpack.c.bf16 %v4951_v7, %v4943_v47  ;;  %v4965_v60 = vld [vmem:[%s14125_s24 + $0x4c8] sm:$0xff]  ;;  %v8366_v5 = vpack.c.bf16 %v4998_v46, %v4990_v45  ;;  %v5006_v62 = vld [vmem:[%s14125_s24 + $0x610] sm:$0xff]  ;;  %v4498_v45 = vstv %s12250_s14  ;;  %s14167_s14 = sld [smem:[#allocation35_spill]] }
 0x9b3   : > { %8351 = vmatpush1.bf16.msra.mxu1 %v8350_v39  ;;  %v8292_v13 = vpack.c.bf16 %v4965_v60, %v4957_v41  ;;  %v5013_v38 = vld [vmem:[%s14125_s24 + $0x648] sm:$0xff]  ;;  %v5004_v52 = vld [vmem:[%s14125_s24 + $0x600] sm:$0xff]  ;;  %v5014_v61 = vld [vmem:[%s14125_s24 + $0x650] sm:$0xff]  ;;  %v4514_v46 = vstv %s12254_s20  ;;  %s14170_s20 = sld [smem:[#allocation37_spill]] }
 0x9b4   : > { %4382 = vst.msk [vmem:[%s752_s7] sm:$0x7] %vm4381_vm15, %v4380_v1  ;;  %v4967_v1 = vld [vmem:[%s14125_s24 + $0x4d8] sm:$0xff]  ;;  %8353 = vmatprep.subr.bf16.mxu1 %v8352_v44  ;;  %v8304_v8 = vpack.c.bf16 %v5013_v38, %v5005_v40  ;;  %v5021_v54 = vld [vmem:[%s14125_s24 + $0x688] sm:$0xff]  ;;  %v8370_v10 = vpack.c.bf16 %v5014_v61, %v5006_v62  ;;  %v5020_v7 = vld [vmem:[%s14125_s24 + $0x680] sm:$0xff]  ;;  %s12246_s7 = sld [smem:[#allocation7 + $0x80]] }
 0x9b5   : > { %8263 = vmatpush1.bf16.msra.mxu0 %v8262_v11  ;;  %v4959_v11 = vld [vmem:[%s14125_s24 + $0x498] sm:$0xff]  ;;  %v5029_v36 = vld [vmem:[%s14125_s24 + $0x6c8] sm:$0xff]  ;;  %v5028_v39 = vld [vmem:[%s14125_s24 + $0x6c0] sm:$0xff]  ;;  %14162 = sst [smem:[#allocation50_spill]] %s12329_s22  ;;  %v4518_v40 = vstv %s12256_s3  ;;  %s12347_s3 = sld [smem:[#allocation5 + $0x8f]] }
 0x9b6   : > { %8265 = vmatprep.subr.bf16.mxu0 %v8264_v18  ;;  %v8290_v18 = vpack.c.bf16 %v4948_v37, %v4940_v6  ;;  %v5023_v51 = vld [vmem:[%s14125_s24 + $0x698] sm:$0xff]  ;;  %v8308_v47 = vpack.c.bf16 %v5029_v36, %v5021_v54  ;;  %v5030_v37 = vld [vmem:[%s14125_s24 + $0x6d0] sm:$0xff]  ;;  %v5037_v15 = vld [vmem:[%s14125_s24 + $0x708] sm:$0xff]  ;;  %v8310_v60 = vpack.c.bf16 %v5028_v39, %v5020_v7  ;;  %v4528_v38 = vstv %s12258_s30  ;;  %s14171_s30 = sld [smem:[#allocation38_spill]] }
 0x9b7   : > { %8355 = vmatpush1.bf16.msra.mxu1 %v8354_v48  ;;  %v5031_v55 = vld [vmem:[%s14125_s24 + $0x6d8] sm:$0xff]  ;;  %v5045_v44 = vld [vmem:[%s14125_s24 + $0x748] sm:$0xff]  ;;  %v5044_v48 = vld [vmem:[%s14125_s24 + $0x740] sm:$0xff]  ;;  %v13976_v62 = vstv %s12274_s0 }
 0x9b8   : > { %v8372_v6 = vpack.c.bf16 %v5031_v55, %v5023_v51  ;;  %v5039_v31 = vld [vmem:[%s14125_s24 + $0x718] sm:$0xff]  ;;  %v5054_v35 = vld [vmem:[%s14125_s24 + $0x790] sm:$0xff]  ;;  %v4825_v25 = vld [vmem:[%s14125_s24 + $0x68] sm:$0xff]  ;;  %v13970_v61 = vstv %s12278_s25 }
 0x9b9   : > { %8267 = vmatpush1.bf16.msra.mxu0 %v8266_v0  ;;  %v4958_v0 = vld [vmem:[%s14125_s24 + $0x490] sm:$0xff]  ;;  %v5047_v41 = vld [vmem:[%s14125_s24 + $0x758] sm:$0xff]  ;;  %v13975_v54 = vstv %s12280_s4  ;;  %v4608_v36 = vstv %s12282_s28  ;;  %s13034_s4 = sld [smem:[#allocation5 + $0x102]] }
 0x9ba   : > { %8269 = vmatprep.subr.bf16.mxu0 %v8268_v42  ;;  %v8356_v42 = vpack.c.bf16 %v4967_v1, %v4959_v11  ;;  %v8358_v16 = vpack.c.bf16 %v4966_v26, %v4958_v0  ;;  %v8312_v1 = vpack.c.bf16 %v5045_v44, %v5037_v15  ;;  %v5053_v0 = vld [vmem:[%s14125_s24 + $0x788] sm:$0xff]  ;;  %v5055_v26 = vld [vmem:[%s14125_s24 + $0x798] sm:$0xff]  ;;  %v5062_v49 = vld [vmem:[%s14125_s24 + $0x7d0] sm:$0xff]  ;;  %14130 = sst [smem:[#allocation18_spill]] %s12246_s7  ;;  %v13972_v51 = vstv %s12284_s26  ;;  %s14234_s26 = sld [smem:[#allocation103_spill]] }
 0x9bb   : > { %v5063_v58 = vld [vmem:[%s14125_s24 + $0x7d8] sm:$0xff]  ;;  %v4678_v15 = vstv %s12304_s11  ;;  %s13036_s28 = sld [smem:[#allocation7 + $0x102]]  ;;  %s13044_s11 = sld [smem:[#allocation3 + $0x104]] }
 0x9bc   : > { %8357 = vmatprep.subr.bf16.mxu1 %v8356_v42  ;;  %v5061_v42 = vld [vmem:[%s14125_s24 + $0x7c8] sm:$0xff]  ;;  %v4648_v7 = vstv %s14171_s30  ;;  %s14210_s30 = sld [smem:[#allocation32_spill]] }
 0x9bd   : > { %8271 = vmatpush1.bf16.msra.mxu0 %v8270_v19  ;;  %v4983_v19 = vld [vmem:[%s14125_s24 + $0x558] sm:$0xff]  ;;  %8359 = vmatpush1.bf16.msra.mxu1 %v8358_v16  ;;  %v5060_v16 = vld [vmem:[%s14125_s24 + $0x7c0] sm:$0xff] }
 0x9be   : > { %8273 = vmatprep.subr.bf16.mxu0 %v8272_v32  ;;  %v8294_v32 = vpack.c.bf16 %v4964_v34, %v4956_v63  ;;  %v8376_v63 = vpack.c.bf16 %v5047_v41, %v5039_v31  ;;  %v5046_v34 = vld [vmem:[%s14125_s24 + $0x750] sm:$0xff]  ;;  %v4698_v41 = vstv %s12310_s19  ;;  %s13048_s19 = sld [smem:[#allocation7 + $0x104]] }
 0x9c1   : > { %8275 = vmatpush1.bf16.msra.mxu0 %v8274_v59  ;;  %v4974_v59 = vld [vmem:[%s14125_s24 + $0x510] sm:$0xff] }
 0x9c2   : > { %8277 = vmatprep.subr.bf16.mxu0 %v8276_v28  ;;  %v8360_v28 = vpack.c.bf16 %v4983_v19, %v4975_v23  ;;  %v8362_v29 = vpack.c.bf16 %v4982_v33, %v4974_v59  ;;  %v8316_v19 = vpack.c.bf16 %v5061_v42, %v5053_v0  ;;  %v4817_v33 = vld [vmem:[%s14125_s24 + $0x28] sm:$0xff] }
 0x9c3   : > { %v8384_v50 = vpack.c.bf16 %v4825_v25, %v4817_v33 }
 0x9c4   : > { %8361 = vmatprep.subr.bf16.mxu1 %v8360_v28  ;;  %v8382_v28 = vpack.c.bf16 %v5062_v49, %v5054_v35 }
 0x9c5   : > { %8279 = vmatpush1.bf16.msra.mxu0 %v8278_v21  ;;  %v4991_v21 = vld [vmem:[%s14125_s24 + $0x598] sm:$0xff]  ;;  %8363 = vmatpush1.bf16.msra.mxu1 %v8362_v29  ;;  %v4474_v29 = vstv %s12242_s5  ;;  %s12337_s5 = sld [smem:[#allocation5 + $0x8e]] }
 0x9c6   : > { %8281 = vmatprep.subr.bf16.mxu0 %v8280_v43  ;;  %v4988_v43 = vld [vmem:[%s14125_s24 + $0x580] sm:$0xff]  ;;  %v8364_v12 = vpack.c.bf16 %v4999_v57, %v4991_v21  ;;  %v4819_v21 = vld [vmem:[%s14125_s24 + $0x38] sm:$0xff] }
 0x9c7   : > { %v8302_v24 = vpack.c.bf16 %v4996_v17, %v4988_v43  ;;  %v4827_v57 = vld [vmem:[%s14125_s24 + $0x78] sm:$0xff]  ;;  %v4488_v43 = vstv %s12246_s7  ;;  %v4494_v17 = vstv %s12248_s12  ;;  %s12339_s7 = sld [smem:[#allocation7 + $0x8e]]  ;;  %s14166_s12 = sld [smem:[#allocation34_spill]] }
 0x9c8   : > { %8365 = vmatprep.subr.bf16.mxu1 %v8364_v12  ;;  %v4508_v12 = vstv %s12252_s16  ;;  %s12345_s16 = sld [smem:[#allocation3 + $0x8f]] }
 0x9c9   : > { %8283 = vmatpush1.bf16.msra.mxu0 %v8282_v2  ;;  %v5015_v2 = vld [vmem:[%s14125_s24 + $0x658] sm:$0xff]  ;;  %8367 = vmatpush1.bf16.msra.mxu1 %v8366_v5  ;;  %v13966_v5 = vstv %s12266_s8  ;;  %s14177_s8 = sld [smem:[#allocation45_spill]] }
 0x9ca   : > { %8285 = vmatprep.subr.bf16.mxu0 %v8284_v22  ;;  %v5012_v22 = vld [vmem:[%s14125_s24 + $0x640] sm:$0xff]  ;;  %v8368_v4 = vpack.c.bf16 %v5015_v2, %v5007_v27  ;;  %v4534_v27 = vstv %s12260_s29  ;;  %v13979_v2 = vstv %s12262_s15  ;;  %s12353_s29 = sld [smem:[#allocation7 + $0x8f]]  ;;  %s14176_s15 = sld [smem:[#allocation44_spill]] }
 0x9cb   : > { %14164 = sst [smem:[#allocation52_spill]] %s12337_s5  ;;  %s14172_s5 = sld [smem:[#allocation39_spill]] }
 0x9cc   : > { %8369 = vmatprep.subr.bf16.mxu1 %v8368_v4  ;;  %v4588_v4 = vstv %s12276_s27  ;;  %s14181_s27 = sld [smem:[#allocation52_spill]] }
 0x9cd   : > { %8287 = vmatpush1.bf16.msra.mxu0 %v8286_v56  ;;  %v8306_v56 = vpack.c.bf16 %v5012_v22, %v5004_v52  ;;  %8371 = vmatpush1.bf16.msra.mxu1 %v8370_v10  ;;  %14165 = sst [smem:[#allocation53_spill]] %s12339_s7  ;;  %v4568_v52 = vstv %s12270_s2  ;;  %v13969_v22 = vstv %s12272_s1  ;;  %v13974_v55 = vstv %s14166_s12  ;;  %s13022_s1 = sld [smem:[#allocation5 + $0x100]] }
 0x9ce   : > { %8289 = vmatprep.subr.bf16.mxu0 %v8288_v9  ;;  %v5022_v9 = vld [vmem:[%s14125_s24 + $0x690] sm:$0xff]  ;;  %8373 = vmatprep.subr.bf16.mxu1 %v8372_v6  ;;  %s14182_s25 = sld [smem:[#allocation53_spill]]  ;;  %s13052_s12 = sld [smem:[#allocation5 + $0x105]] }
 0x9cf   : > { %v8374_v11 = vpack.c.bf16 %v5030_v37, %v5022_v9  ;;  %v4674_v37 = vstv %s12302_s18  ;;  %v4694_v31 = vstv %s14177_s8  ;;  %s14232_s18 = sld [smem:[#allocation14_spill]] }
 0x9d0   : > { %v4688_v44 = vstv %s14176_s15  ;;  %s13078_s8 = sld [smem:[#allocation7 + $0x109]] }
 0x9d1   : > { %8291 = vmatpush1.bf16.msra.mxu0 %v8290_v18  ;;  %v5036_v18 = vld [vmem:[%s14125_s24 + $0x700] sm:$0xff]  ;;  %8375 = vmatpush1.bf16.msra.mxu1 %v8374_v11  ;;  %v4654_v39 = vstv %s14172_s5  ;;  %s13030_s5 = sld [smem:[#allocation7 + $0x101]] }
 0x9d2   : > { %8293 = vmatprep.subr.bf16.mxu0 %v8292_v13  ;;  %v5038_v13 = vld [vmem:[%s14125_s24 + $0x710] sm:$0xff]  ;;  %v8314_v20 = vpack.c.bf16 %v5044_v48, %v5036_v18  ;;  %8377 = vmatprep.subr.bf16.mxu1 %v8376_v63  ;;  %v4728_v18 = vstv %s12318_s13  ;;  %v4734_v48 = vstv %s12321_s10  ;;  %v4748_v63 = vstv %s12329_s22  ;;  %s14189_s22 = sld [smem:[#allocation23_spill]]  ;;  %s13042_s10 = sld [smem:[#allocation7 + $0x103]] }
 0x9d3   : > { %v8378_v23 = vpack.c.bf16 %v5046_v34, %v5038_v13  ;;  %v4738_v13 = vstv %s12323_s17  ;;  %v4758_v0 = vstv %s14181_s27  ;;  %s14191_s27 = sld [smem:[#allocation29_spill]]  ;;  %s13046_s17 = sld [smem:[#allocation5 + $0x104]] }
 0x9d4   : > { %v4768_v42 = vstv %s14182_s25  ;;  %s14190_s25 = sld [smem:[#allocation26_spill]] }
 0x9d5   : > { %8295 = vmatpush1.bf16.msra.mxu0 %v8294_v32  ;;  %v5052_v32 = vld [vmem:[%s14125_s24 + $0x780] sm:$0xff]  ;;  %8379 = vmatpush1.bf16.msra.mxu1 %v8378_v23  ;;  %s12300_s24 = sld [smem:[#allocation7 + $0x89]]  ;;  %v4788_v23 = vstv %s12353_s29  ;;  %s6980_s13 = sshll.u32 %s14232_s18, 3 }
 0x9d6   : > { %8297 = vmatprep.subr.bf16.mxu0 %v8296_v30  ;;  %v8380_v30 = vpack.c.bf16 %v5063_v58, %v5055_v26  ;;  %v8318_v59 = vpack.c.bf16 %v5060_v16, %v5052_v32  ;;  %v4774_v58 = vstv %s12345_s16  ;;  %s13056_s29 = sld [smem:[#allocation3 + $0x106]]  ;;  %14244 = sst [smem:[#allocation21_spill]] %s13078_s8 }
 0x9d7   : > { %s13080_s18 = sld [smem:[#allocation3 + $0x10a]]  ;;  %s13094_s8 = sld [smem:[#allocation5 + $0x10c]] }
 0x9d8   : > { %8381 = vmatprep.subr.bf16.mxu1 %v8380_v30 }
 0x9d9   : > { %8299 = vmatpush1.bf16.msra.mxu0 %v8298_v3  ;;  %8383 = vmatpush1.bf16.msra.mxu1 %v8382_v28  ;;  %v8448_v3 = vpack.c.bf16 %v4827_v57, %v4819_v21 }
 0x9da   : > { %8301 = vmatprep.subr.bf16.mxu0 %v8300_v14  ;;  %v4478_v14 = vstv %s12244_s6  ;;  %s14168_s6 = sld [smem:[#allocation36_spill]] }
 0x9db   : > { %8449 = vmatprep.subr.bf16.mxu1 %v8448_v3  ;;  %14153 = sst [smem:[#allocation41_spill]] %s12300_s24  ;;  %s12316_s24 = sld [smem:[#allocation5 + $0x8c]] }
 0x9dc   : > { %14169 = sst [smem:[#allocation36_spill]] %s12345_s16  ;;  %s14174_s7 = sld [smem:[#allocation41_spill]] }
 0x9dd   : > { %8303 = vmatpush1.bf16.msra.mxu0 %v8302_v24  ;;  %v4548_v24 = vstv %s12264_s9  ;;  %s12355_s9 = sld [smem:[#allocation8 + $0x80]]  ;;  %s13040_s16 = sld [smem:[#allocation5 + $0x103]] }
 0x9de   : > { %8305 = vmatprep.subr.bf16.mxu0 %v8304_v8  ;;  %v13978_v8 = vstv %s12268_s21  ;;  %s14178_s21 = sld [smem:[#allocation47_spill]] }
 0x9e0   : > { %v4634_v10 = vstv %s14168_s6  ;;  %s743_s6 = scalar_lea.vmem %s14234_s26, %s6980_s13  ;;  %s13074_s26 = sld [smem:[#allocation3 + $0x109]] }
 0x9e1   : > { %8307 = vmatpush1.bf16.msra.mxu0 %v8306_v56  ;;  %14160 = sst [smem:[#allocation48_spill]] %s12316_s24  ;;  %s12331_s24 = sld [smem:[#allocation3 + $0x8e]]  ;;  %v4628_v56 = vstv %s14167_s14 }
 0x9e2   : > { %8309 = vmatprep.subr.bf16.mxu0 %v8308_v47  ;;  %s14179_s2 = sld [smem:[#allocation48_spill]]  ;;  %v4638_v47 = vstv %s14170_s20  ;;  %v4668_v6 = vstv %s14174_s7  ;;  %s14184_s7 = sld [smem:[#allocation25_spill]] }
 0x9e3   : > { %14175 = sst [smem:[#allocation37_spill]] %s12355_s9  ;;  %s14211_s14 = sld [smem:[#allocation33_spill]] }
 0x9e4   : > { %v4714_v11 = vstv %s14178_s21  ;;  %s14208_s21 = sld [smem:[#allocation31_spill]]  ;;  %s14221_s9 = sld [smem:[#allocation37_spill]] }
 0x9e5   : > { %8311 = vmatpush1.bf16.msra.mxu0 %v8310_v60  ;;  %v4708_v60 = vstv %s12312_s23  ;;  %s14207_s23 = sld [smem:[#allocation28_spill]]  ;;  %s13054_s20 = sld [smem:[#allocation7 + $0x105]] }
 0x9e6   : > { %8313 = vmatprep.subr.bf16.mxu0 %v8312_v1  ;;  %14242 = sst [smem:[#allocation17_spill]] %s13074_s26 }
 0x9e7   : > { %14163 = sst [smem:[#allocation51_spill]] %s12331_s24  ;;  %s14173_s24 = sld [smem:[#allocation40_spill]] }
 0x9e8   : > { %s14180_s0 = sld [smem:[#allocation51_spill]]  ;;  %v4718_v1 = vstv %s14179_s2  ;;  %s14233_s2 = sld [smem:[#allocation101_spill]] }
 0x9e9   : > { %8315 = vmatpush1.bf16.msra.mxu0 %v8314_v20  ;;  %v4778_v20 = vstv %s12347_s3  ;;  %s13032_s3 = sld [smem:[#allocation3 + $0x102]]  ;;  %s13090_s26 = sld [smem:[#allocation7 + $0x10b]] }
 0x9ea   : > { %8317 = vmatprep.subr.bf16.mxu0 %v8316_v19 }
 0x9ed   : > { %8319 = vmatpush1.bf16.msra.mxu0 %v8318_v59  ;;  %v4658_v9 = vstv %s14173_s24  ;;  %s13024_s24 = sld [smem:[#allocation7 + $0x100]] }
 0x9ee   : > { %8385 = vmatprep.subr.bf16.mxu0 %v8384_v50  ;;  %v4754_v34 = vstv %s14180_s0  ;;  %s13020_s0 = sld [smem:[#allocation3 + $0x100]] }
 0xa83   : > { %v12385_v26 = vpop.f32.mrb[120].mxu0 }
 0xa84   : > { %v12391_v32 = vpop.f32.mrb[121].mxu0  ;;  %v12396_v16 = vmul.f32 %v4474_v29, %v12385_v26  ;;  %v12399_v30 = vmul.f32 %v4494_v17, %v12385_v26  ;;  %v12402_v35 = vmul.f32 %v4514_v46, %v12385_v26  ;;  %v12405_v49 = vmul.f32 %v4534_v27, %v12385_v26 }
 0xa85   : > { %v4476_v59 = vmul.f32 %v4474_v29, %v12391_v32  ;;  %v4496_v28 = vmul.f32 %v4494_v17, %v12391_v32  ;;  %v4516_v33 = vmul.f32 %v4514_v46, %v12391_v32  ;;  %v4536_v25 = vmul.f32 %v4534_v27, %v12391_v32 }
 0xa86   : > { %v4556_v50 = vmul.f32 %v13966_v5, %v12391_v32  ;;  %v4576_v21 = vmul.f32 %v13969_v22, %v12391_v32  ;;  %v4596_v57 = vmul.f32 %v13970_v61, %v12391_v32  ;;  %v4616_v3 = vmul.f32 %v13972_v51, %v12391_v32 }
 0xa87   : > { %v4480_v29 = vadd.f32 %v4478_v14, %v4476_v59  ;;  %v4500_v17 = vadd.f32 %v4498_v45, %v4496_v28  ;;  %v4520_v46 = vadd.f32 %v4518_v40, %v4516_v33  ;;  %v4540_v27 = vadd.f32 %v13979_v2, %v4536_v25 }
 0xa88   : > { %v4560_v19 = vadd.f32 %v13978_v8, %v4556_v50  ;;  %v4580_v5 = vadd.f32 %v13976_v62, %v4576_v21  ;;  %v4600_v22 = vadd.f32 %v13975_v54, %v4596_v57  ;;  %v4620_v61 = vadd.f32 %v13974_v55, %v4616_v3 }
 0xa89   : > { %vm4482_vm2 = vcmp.ge.f32.partialorder %v4480_v29, 0.0  ;;  %v4484_v51 = vmul.f32 0.01, %v4480_v29  ;;  %vm4502_vm3 = vcmp.ge.f32.partialorder %v4500_v17, 0.0  ;;  %v4504_v59 = vmul.f32 0.01, %v4500_v17 }
 0xa8a   : > { %vm4522_vm4 = vcmp.ge.f32.partialorder %v4520_v46, 0.0  ;;  %v4524_v28 = vmul.f32 0.01, %v4520_v46  ;;  %vm4542_vm5 = vcmp.ge.f32.partialorder %v4540_v27, 0.0  ;;  %v4544_v33 = vmul.f32 0.01, %v4540_v27 }
 0xa8b   : > { %v4486_v25 = vsel %vm4482_vm2, %v4480_v29, %v4484_v51  ;;  %v4506_v50 = vsel %vm4502_vm3, %v4500_v17, %v4504_v59  ;;  %vm4562_vm6 = vcmp.ge.f32.partialorder %v4560_v19, 0.0  ;;  %v4564_v21 = vmul.f32 0.01, %v4560_v19 }
 0xa8c   : > { %v4490_v57 = vmul.f32 %v4488_v43, %v4486_v25  ;;  %v4510_v3 = vmul.f32 %v4508_v12, %v4506_v50  ;;  %v4526_v55 = vsel %vm4522_vm4, %v4520_v46, %v4524_v28  ;;  %v4546_v54 = vsel %vm4542_vm5, %v4540_v27, %v4544_v33 }
 0xa8d   : > { %v4530_v62 = vmul.f32 %v4528_v38, %v4526_v55  ;;  %v4550_v8 = vmul.f32 %v4548_v24, %v4546_v54  ;;  %v4566_v2 = vsel %vm4562_vm6, %v4560_v19, %v4564_v21  ;;  %vm4582_vm7 = vcmp.ge.f32.partialorder %v4580_v5, 0.0 }
 0xa8e   : > { %v4512_v51 = vadd.f32 %v4510_v3, %v4490_v57  ;;  %v4570_v29 = vmul.f32 %v4568_v52, %v4566_v2  ;;  %v4584_v17 = vmul.f32 0.01, %v4580_v5  ;;  %vm4602_vm8 = vcmp.ge.f32.partialorder %v4600_v22, 0.0 }
 0xa8f   : > { %v4604_v46 = vmul.f32 0.01, %v4600_v22  ;;  %vm4622_vm9 = vcmp.ge.f32.partialorder %v4620_v61, 0.0  ;;  %v4624_v27 = vmul.f32 0.01, %v4620_v61  ;;  %v4636_v55 = vmul.f32 %v4634_v10, %v12391_v32 }
 0xa90   : > { %v4532_v54 = vadd.f32 %v4530_v62, %v4512_v51  ;;  %v4586_v19 = vsel %vm4582_vm7, %v4580_v5, %v4584_v17  ;;  %v4656_v59 = vmul.f32 %v4654_v39, %v12391_v32  ;;  %v4676_v2 = vmul.f32 %v4674_v37, %v12391_v32 }
 0xa91   : > { %v4590_v28 = vmul.f32 %v4588_v4, %v4586_v19  ;;  %v4606_v33 = vsel %vm4602_vm8, %v4600_v22, %v4604_v46  ;;  %v4626_v25 = vsel %vm4622_vm9, %v4620_v61, %v4624_v27  ;;  %v4640_v50 = vadd.f32 %v4638_v47, %v4636_v55 }
 0xa92   : > { %v4552_v21 = vadd.f32 %v4550_v8, %v4532_v54  ;;  %v4610_v57 = vmul.f32 %v4608_v36, %v4606_v33  ;;  %v4630_v5 = vmul.f32 %v4628_v56, %v4626_v25  ;;  %v4660_v62 = vadd.f32 %v4658_v9, %v4656_v59 }
 0xa93   : > { %vm4642_vm10 = vcmp.ge.f32.partialorder %v4640_v50, 0.0  ;;  %v4644_v3 = vmul.f32 0.01, %v4640_v50  ;;  %v4680_v51 = vadd.f32 %v4678_v15, %v4676_v2  ;;  %v4696_v22 = vmul.f32 %v4694_v31, %v12391_v32 }
 0xa94   : > { %v4572_v61 = vadd.f32 %v4570_v29, %v4552_v21  ;;  %vm4662_vm11 = vcmp.ge.f32.partialorder %v4660_v62, 0.0  ;;  %v4664_v8 = vmul.f32 0.01, %v4660_v62  ;;  %v4716_v17 = vmul.f32 %v4714_v11, %v12391_v32 }
 0xa95   : > { %v4646_v46 = vsel %vm4642_vm10, %v4640_v50, %v4644_v3  ;;  %vm4682_vm12 = vcmp.ge.f32.partialorder %v4680_v51, 0.0  ;;  %v4684_v27 = vmul.f32 0.01, %v4680_v51  ;;  %v4700_v55 = vadd.f32 %v4698_v41, %v4696_v22 }
 0xa96   : > { %v4592_v54 = vadd.f32 %v4590_v28, %v4572_v61  ;;  %v4650_v19 = vmul.f32 %v4648_v7, %v4646_v46  ;;  %v4666_v59 = vsel %vm4662_vm11, %v4660_v62, %v4664_v8  ;;  %v4720_v29 = vadd.f32 %v4718_v1, %v4716_v17 }
 0xa97   : > { %v4670_v2 = vmul.f32 %v4668_v6, %v4666_v59  ;;  %v4686_v33 = vsel %vm4682_vm12, %v4680_v51, %v4684_v27  ;;  %vm4702_vm13 = vcmp.ge.f32.partialorder %v4700_v55, 0.0  ;;  %v4704_v25 = vmul.f32 0.01, %v4700_v55 }
 0xa98   : > { %v4612_v50 = vadd.f32 %v4610_v57, %v4592_v54  ;;  %v4690_v21 = vmul.f32 %v4688_v44, %v4686_v33  ;;  %vm4722_vm0 = vcmp.ge.f32.partialorder %v4720_v29, 0.0  ;;  %v4724_v28 = vmul.f32 0.01, %v4720_v29 }
 0xa99   : > { %v4706_v3 = vsel %vm4702_vm13, %v4700_v55, %v4704_v25  ;;  %v4736_v62 = vmul.f32 %v4734_v48, %v12391_v32  ;;  %v4756_v22 = vmul.f32 %v4754_v34, %v12391_v32  ;;  %v4776_v51 = vmul.f32 %v4774_v58, %v12391_v32 }
 0xa9a   : > { %v4632_v61 = vadd.f32 %v4630_v5, %v4612_v50  ;;  %v4710_v8 = vmul.f32 %v4708_v60, %v4706_v3  ;;  %v4726_v17 = vsel %vm4722_vm0, %v4720_v29, %v4724_v28  ;;  %v4479_v57 = vadd.f32 %v4478_v14, %v12396_v16 }
 0xa9b   : > { %v4730_v46 = vmul.f32 %v4728_v18, %v4726_v17  ;;  %v4740_v27 = vadd.f32 %v4738_v13, %v4736_v62  ;;  %v4760_v55 = vadd.f32 %v4758_v0, %v4756_v22  ;;  %v4780_v54 = vadd.f32 %v4778_v20, %v4776_v51 }
 0xa9c   : > { %v4652_v59 = vadd.f32 %v4650_v19, %v4632_v61  ;;  %vm4481_vm1 = vcmp.ge.f32.partialorder %v4479_v57, 0.0  ;;  %v4483_v32 = vmul.f32 0.01, %v4479_v57  ;;  %v4499_v5 = vadd.f32 %v4498_v45, %v12399_v30 }
 0xa9d   : > { %vm4742_vm14 = vcmp.ge.f32.partialorder %v4740_v27, 0.0  ;;  %v4744_v14 = vmul.f32 0.01, %v4740_v27  ;;  %vm4762_vm15 = vcmp.ge.f32.partialorder %v4760_v55, 0.0  ;;  %v4764_v16 = vmul.f32 0.01, %v4760_v55 }
 0xa9e   : > { %v4672_v29 = vadd.f32 %v4670_v2, %v4652_v59  ;;  %vm4782_vm2 = vcmp.ge.f32.partialorder %v4780_v54, 0.0  ;;  %v4784_v33 = vmul.f32 0.01, %v4780_v54  ;;  %v4485_v19 = vsel %vm4481_vm1, %v4479_v57, %v4483_v32 }
 0xa9f   : > { %v4746_v25 = vsel %vm4742_vm14, %v4740_v27, %v4744_v14  ;;  %v4766_v50 = vsel %vm4762_vm15, %v4760_v55, %v4764_v16  ;;  %v4489_v28 = vmul.f32 %v4488_v43, %v4485_v19  ;;  %vm4501_vm3 = vcmp.ge.f32.partialorder %v4499_v5, 0.0 }
 0xaa0   : > { %v4692_v45 = vadd.f32 %v4690_v21, %v4672_v29  ;;  %v4750_v30 = vmul.f32 %v4748_v63, %v4746_v25  ;;  %v4770_v3 = vmul.f32 %v4768_v42, %v4766_v50  ;;  %v4786_v62 = vsel %vm4782_vm2, %v4780_v54, %v4784_v33 }
 0xaa1   : > { %v4790_v2 = vmul.f32 %v4788_v23, %v4786_v62  ;;  %v4503_v22 = vmul.f32 0.01, %v4499_v5  ;;  %v4519_v51 = vadd.f32 %v4518_v40, %v12402_v35  ;;  %v14209_v61 = vstv %s14189_s22  ;;  %s13050_s22 = sld [smem:[#allocation3 + $0x105]] }
 0xaa2   : > { %v4539_v43 = vadd.f32 %v14209_v61, %v12405_v49  ;;  %v4712_v21 = vadd.f32 %v4710_v8, %v4692_v45  ;;  %v14212_v17 = vstv %s14184_s7  ;;  %v14213_v27 = vstv %s14207_s23  ;;  %s14219_s7 = sld [smem:[#allocation34_spill]]  ;;  %s13058_s23 = sld [smem:[#allocation5 + $0x106]] }
 0xaa3   : > { %v4555_v57 = vmul.f32 %v14212_v17, %v12385_v26  ;;  %v4575_v55 = vmul.f32 %v14213_v27, %v12385_v26  ;;  %v14214_v54 = vstv %s14208_s21  ;;  %v4505_v32 = vsel %vm4501_vm3, %v4499_v5, %v4503_v22  ;;  %s13066_s21 = sld [smem:[#allocation7 + $0x107]] }
 0xaa4   : > { %v4595_v59 = vmul.f32 %v14214_v54, %v12385_v26  ;;  %vm4521_vm4 = vcmp.ge.f32.partialorder %v4519_v51, 0.0  ;;  %v4523_v40 = vmul.f32 0.01, %v4519_v51  ;;  %vm4541_vm5 = vcmp.ge.f32.partialorder %v4539_v43, 0.0 }
 0xaa5   : > { %v4732_v35 = vadd.f32 %v4730_v46, %v4712_v21  ;;  %v4509_v49 = vmul.f32 %v4508_v12, %v4505_v32  ;;  %v4543_v14 = vmul.f32 0.01, %v4539_v43  ;;  %v14215_v8 = vstv %s14190_s25  ;;  %s14236_s25 = sld [smem:[#allocation106_spill]] }
 0xaa6   : > { %v4559_v16 = vadd.f32 %v14215_v8, %v4555_v57  ;;  %v4525_v29 = vsel %vm4521_vm4, %v4519_v51, %v4523_v40  ;;  %v14216_v33 = vstv %s14191_s27  ;;  %v14217_v25 = vstv %s14210_s30  ;;  %s13060_s30 = sld [smem:[#allocation7 + $0x106]]  ;;  %s13068_s27 = sld [smem:[#allocation3 + $0x108]] }
 0xaa7   : > { %v4579_v19 = vadd.f32 %v14216_v33, %v4575_v55  ;;  %v4599_v50 = vadd.f32 %v14217_v25, %v4595_v59  ;;  %v14218_v45 = vstv %s14211_s14  ;;  %v4752_v5 = vadd.f32 %v4750_v30, %v4732_v35  ;;  %s13062_s14 = sld [smem:[#allocation3 + $0x107]] }
 0xaa8   : > { %v4615_v62 = vmul.f32 %v14218_v45, %v12385_v26  ;;  %v4511_v22 = vadd.f32 %v4509_v49, %v4489_v28  ;;  %v4529_v61 = vmul.f32 %v4528_v38, %v4525_v29  ;;  %v4545_v46 = vsel %vm4541_vm5, %v4539_v43, %v4543_v14 }
 0xaa9   : > { %v4549_v12 = vmul.f32 %v4548_v24, %v4545_v46  ;;  %vm4561_vm6 = vcmp.ge.f32.partialorder %v4559_v16, 0.0  ;;  %v4563_v21 = vmul.f32 0.01, %v4559_v16  ;;  %vm4581_vm7 = vcmp.ge.f32.partialorder %v4579_v19, 0.0  ;;  %14238 = sst [smem:[#allocation48_spill]] %s13066_s21 }
 0xaaa   : > { %v4772_v51 = vadd.f32 %v4770_v3, %v4752_v5  ;;  %v4531_v17 = vadd.f32 %v4529_v61, %v4511_v22  ;;  %v4583_v57 = vmul.f32 0.01, %v4579_v19  ;;  %vm4601_vm8 = vcmp.ge.f32.partialorder %v4599_v50, 0.0  ;;  %s13082_s21 = sld [smem:[#allocation5 + $0x10a]] }
 0xaab   : > { %v4565_v27 = vsel %vm4561_vm6, %v4559_v16, %v4563_v21  ;;  %v4603_v30 = vmul.f32 0.01, %v4599_v50  ;;  %v14223_v28 = vstv %s14219_s7  ;;  %v4635_v24 = vmul.f32 %v4634_v10, %v12385_v26  ;;  %s757_s15 = scalar_lea.vmem %s14236_s25, %s6980_s13  ;;  %s13026_s13 = sld [smem:[#allocation3 + $0x101]] }
 0xaac   : > { %v4619_v38 = vadd.f32 %v14223_v28, %v4615_v62  ;;  %v4792_v43 = vadd.f32 %v4790_v2, %v4772_v51  ;;  %v4551_v55 = vadd.f32 %v4549_v12, %v4531_v17  ;;  %v4569_v54 = vmul.f32 %v4568_v52, %v4565_v27  ;;  %s13064_s7 = sld [smem:[#allocation5 + $0x107]]  ;;  %14239 = sst [smem:[#allocation51_spill]] %s13068_s27 }
 0xaad   : > { %v4585_v3 = vsel %vm4581_vm7, %v4579_v19, %v4583_v57  ;;  %v4605_v59 = vsel %vm4601_vm8, %v4599_v50, %v4603_v30  ;;  %v14225_v40 = vstv %s14221_s9  ;;  %v4639_v10 = vadd.f32 %v4638_v47, %v4635_v24  ;;  %s13070_s25 = sld [smem:[#allocation5 + $0x108]]  ;;  %s13096_s27 = sld [smem:[#allocation7 + $0x10c]] }
 0xaae   : > { %vm4621_vm9 = vcmp.ge.f32.partialorder %v4619_v38, 0.0  ;;  %v4623_v32 = vmul.f32 0.01, %v4619_v38  ;;  %v12560_v35 = vadd.f32 %v14225_v40, %v4792_v43  ;;  %v4571_v49 = vadd.f32 %v4569_v54, %v4551_v55  ;;  %v4835_v40 = vld [vmem:[%s14233_s2 + $0xb8] sm:$0xff] }
 0xaaf   : > { %v4589_v14 = vmul.f32 %v4588_v4, %v4585_v3  ;;  %v4655_v52 = vmul.f32 %v4654_v39, %v12385_v26  ;;  %v4675_v8 = vmul.f32 %v4674_v37, %v12385_v26  ;;  %v4695_v16 = vmul.f32 %v4694_v31, %v12385_v26 }
 0xab0   : > { %v4625_v2 = vsel %vm4621_vm9, %v4619_v38, %v4623_v32  ;;  %5132 = vmatprep.mubr.f32.mxu0 %v12560_v35  ;;  %5203 = vmatprep.mubr.f32.mxu1 %v12560_v35  ;;  %v4609_v47 = vmul.f32 %v4608_v36, %v4605_v59  ;;  %vm4641_vm10 = vcmp.ge.f32.partialorder %v4639_v10, 0.0  ;;  %v4643_v33 = vmul.f32 0.01, %v4639_v10  ;;  %v4833_v59 = vld [vmem:[%s14233_s2 + $0xa8] sm:$0xff] }
 0xab1   : > { %v4591_v4 = vadd.f32 %v4589_v14, %v4571_v49  ;;  %v4629_v29 = vmul.f32 %v4628_v56, %v4625_v2  ;;  %v4659_v39 = vadd.f32 %v4658_v9, %v4655_v52  ;;  %v4679_v19 = vadd.f32 %v4678_v15, %v4675_v8  ;;  %v4843_v49 = vld [vmem:[%s14233_s2 + $0xf8] sm:$0xff]  ;;  %v4832_v2 = vld [vmem:[%s14233_s2 + $0xa0] sm:$0xff] }
 0xab2   : > { %v4699_v37 = vadd.f32 %v4698_v41, %v4695_v16  ;;  %v4715_v25 = vmul.f32 %v4714_v11, %v12385_v26  ;;  %v4735_v36 = vmul.f32 %v4734_v48, %v12385_v26  ;;  %v4755_v56 = vmul.f32 %v4754_v34, %v12385_v26  ;;  %v4840_v52 = vld [vmem:[%s14233_s2 + $0xe0] sm:$0xff]  ;;  %14237 = sst [smem:[#allocation45_spill]] %s13064_s7  ;;  %s13084_s7 = sld [smem:[#allocation7 + $0x10a]] }
 0xab3   : > { %v4611_v31 = vadd.f32 %v4609_v47, %v4591_v4  ;;  %v4645_v50 = vsel %vm4641_vm10, %v4639_v10, %v4643_v33  ;;  %vm4661_vm11 = vcmp.ge.f32.partialorder %v4659_v39, 0.0  ;;  %v4663_v9 = vmul.f32 0.01, %v4659_v39  ;;  %v4834_v47 = vld [vmem:[%s14233_s2 + $0xb0] sm:$0xff]  ;;  %v4849_v33 = vld [vmem:[%s14233_s2 + $0x128] sm:$0xff]  ;;  %14240 = sst [smem:[#allocation16_spill]] %s13070_s25 }
 0xab4   : > { %vm4681_vm12 = vcmp.ge.f32.partialorder %v4679_v19, 0.0  ;;  %v4649_v41 = vmul.f32 %v4648_v7, %v4645_v50  ;;  %v4683_v45 = vmul.f32 0.01, %v4679_v19  ;;  %vm4701_vm13 = vcmp.ge.f32.partialorder %v4699_v37, 0.0  ;;  %s13086_s25 = sld [smem:[#allocation3 + $0x10b]]  ;;  %14247 = sst [smem:[#allocation29_spill]] %s13096_s27 }
 0xab5   : > { %v4631_v15 = vadd.f32 %v4629_v29, %v4611_v31  ;;  %v4665_v62 = vsel %vm4661_vm11, %v4659_v39, %v4663_v9  ;;  %v4703_v11 = vmul.f32 0.01, %v4699_v37  ;;  %v4719_v5 = vadd.f32 %v4718_v1, %v4715_v25  ;;  %v4842_v29 = vld [vmem:[%s14233_s2 + $0xf0] sm:$0xff]  ;;  %v4851_v31 = vld [vmem:[%s14233_s2 + $0x138] sm:$0xff]  ;;  %s13117_s27 = sld [smem:[#allocation7 + $0x10d]] }
 0xab6   : > { %v4739_v48 = vadd.f32 %v4738_v13, %v4735_v36  ;;  %v4669_v22 = vmul.f32 %v4668_v6, %v4665_v62  ;;  %v4685_v61 = vsel %vm4681_vm12, %v4679_v19, %v4683_v45  ;;  %v4759_v46 = vadd.f32 %v4758_v0, %v4755_v56  ;;  %v4859_v25 = vld [vmem:[%s14233_s2 + $0x178] sm:$0xff]  ;;  %v4797_v56 = vld [vmem:[%s743_s6] sm:$0x77]  ;;  %s13076_s6 = sld [smem:[#allocation5 + $0x109]] }
 0xab7   : > { %v4651_v34 = vadd.f32 %v4649_v41, %v4631_v15  ;;  %v4705_v12 = vsel %vm4701_vm13, %v4699_v37, %v4703_v11  ;;  %vm4721_vm0 = vcmp.ge.f32.partialorder %v4719_v5, 0.0  ;;  %v4723_v7 = vmul.f32 0.01, %v4719_v5  ;;  %v4857_v37 = vld [vmem:[%s14233_s2 + $0x168] sm:$0xff]  ;;  %v4848_v15 = vld [vmem:[%s14233_s2 + $0x120] sm:$0xff] }
 0xab8   : > { %v4689_v51 = vmul.f32 %v4688_v44, %v4685_v61  ;;  %vm4741_vm1 = vcmp.ge.f32.partialorder %v4739_v48, 0.0  ;;  %v4743_v1 = vmul.f32 0.01, %v4739_v48  ;;  %v4763_v13 = vmul.f32 0.01, %v4759_v46  ;;  %v4856_v41 = vld [vmem:[%s14233_s2 + $0x160] sm:$0xff] }
 0xab9   : > { %v4671_v21 = vadd.f32 %v4669_v22, %v4651_v34  ;;  %v4725_v17 = vsel %vm4721_vm0, %v4719_v5, %v4723_v7  ;;  %v4775_v6 = vmul.f32 %v4774_v58, %v12385_v26  ;;  %v4709_v27 = vmul.f32 %v4708_v60, %v4705_v12  ;;  %v4816_v60 = vld [vmem:[%s14233_s2 + $0x20] sm:$0xff]  ;;  %v4850_v5 = vld [vmem:[%s14233_s2 + $0x130] sm:$0xff]  ;;  %v4865_v34 = vld [vmem:[%s14233_s2 + $0x1a8] sm:$0xff]  ;;  %14245 = sst [smem:[#allocation23_spill]] %s13084_s7  ;;  %s13101_s7 = sld [smem:[#allocation3 + $0x10d]] }
 0xaba   : > { %vm4761_vm14 = vcmp.ge.f32.partialorder %v4759_v46, 0.0  ;;  %v4745_v0 = vsel %vm4741_vm1, %v4739_v48, %v4743_v1  ;;  %v4729_v44 = vmul.f32 %v4728_v18, %v4725_v17  ;;  %v4824_v18 = vld [vmem:[%s14233_s2 + $0x60] sm:$0xff]  ;;  %v4805_v8 = vrot.slane %v12560_v35, %v11559_v53  ;;  %v4858_v48 = vld [vmem:[%s14233_s2 + $0x170] sm:$0xff]  ;;  %v4867_v22 = vld [vmem:[%s14233_s2 + $0x1b8] sm:$0xff]  ;;  %14246 = sst [smem:[#allocation26_spill]] %s13086_s25  ;;  %s13103_s25 = sld [smem:[#allocation5 + $0x10d]] }
 0xabb   : > { %v4691_v57 = vadd.f32 %v4689_v51, %v4671_v21  ;;  %v4779_v30 = vadd.f32 %v4778_v20, %v4775_v6  ;;  %v4765_v38 = vsel %vm4761_vm14, %v4759_v46, %v4763_v13  ;;  %v4749_v55 = vmul.f32 %v4748_v63, %v4745_v0  ;;  %v4818_v63 = vld [vmem:[%s14233_s2 + $0x30] sm:$0xff]  ;;  %v4875_v61 = vld [vmem:[%s14233_s2 + $0x1f8] sm:$0xff]  ;;  %v4864_v21 = vld [vmem:[%s14233_s2 + $0x1a0] sm:$0xff] }
 0xabc   : > { %v4769_v58 = vmul.f32 %v4768_v42, %v4765_v38  ;;  %v4826_v42 = vld [vmem:[%s14233_s2 + $0x70] sm:$0xff]  ;;  %v8386_v14 = vpack.c.bf16 %v4824_v18, %v4816_v60  ;;  %v14235_v16 = vstv %s14221_s9  ;;  %v8452_v19 = vpack.c.bf16 %v4843_v49, %v4835_v40  ;;  %v4872_v51 = vld [vmem:[%s14233_s2 + $0x1e0] sm:$0xff]  ;;  %v4883_v0 = vld [vmem:[%s14233_s2 + $0x238] sm:$0xff]  ;;  %s13038_s9 = sld [smem:[#allocation3 + $0x103]]  ;;  %14243 = sst [smem:[#allocation19_spill]] %s13076_s6 }
 0xabd   : > { %v4711_v28 = vadd.f32 %v4709_v27, %v4691_v57  ;;  %vm4781_vm15 = vcmp.ge.f32.partialorder %v4779_v30, 0.0  ;;  %v4783_v24 = vmul.f32 0.01, %v4779_v30  ;;  %v8450_v10 = vpack.c.bf16 %v4826_v42, %v4818_v63  ;;  %v4866_v13 = vld [vmem:[%s14233_s2 + $0x1b0] sm:$0xff]  ;;  %v4881_v57 = vld [vmem:[%s14233_s2 + $0x228] sm:$0xff]  ;;  %v4880_v38 = vld [vmem:[%s14233_s2 + $0x220] sm:$0xff] }
 0xabe   : > { %v8390_v50 = vpack.c.bf16 %v4840_v52, %v4832_v2  ;;  %v8454_v9 = vpack.c.bf16 %v4842_v29, %v4834_v47  ;;  %v8392_v62 = vpack.c.bf16 %v4857_v37, %v4849_v33  ;;  %v8456_v11 = vpack.c.bf16 %v4859_v25, %v4851_v31  ;;  %v4874_v6 = vld [vmem:[%s14233_s2 + $0x1f0] sm:$0xff]  ;;  %v4889_v27 = vld [vmem:[%s14233_s2 + $0x268] sm:$0xff]  ;;  %v4896_v42 = vld [vmem:[%s14233_s2 + $0x2a0] sm:$0xff]  ;;  %s13092_s6 = sld [smem:[#allocation3 + $0x10c]] }
 0xabf   : > { %v4731_v43 = vadd.f32 %v4729_v44, %v4711_v28  ;;  %v4785_v54 = vsel %vm4781_vm15, %v4779_v30, %v4783_v24  ;;  %v8394_v12 = vpack.c.bf16 %v4856_v41, %v4848_v15  ;;  %v8458_v7 = vpack.c.bf16 %v4858_v48, %v4850_v5  ;;  %v4891_v30 = vld [vmem:[%s14233_s2 + $0x278] sm:$0xff]  ;;  %v4888_v24 = vld [vmem:[%s14233_s2 + $0x260] sm:$0xff]  ;;  %v4905_v60 = vld [vmem:[%s14233_s2 + $0x2e8] sm:$0xff] }
 0xac0   : > { %v4789_v20 = vmul.f32 %v4788_v23, %v4785_v54  ;;  %v4841_v23 = vld [vmem:[%s14233_s2 + $0xe8] sm:$0xff]  ;;  %v8460_v17 = vpack.c.bf16 %v4875_v61, %v4867_v22  ;;  %v8398_v28 = vpack.c.bf16 %v4872_v51, %v4864_v21  ;;  %v8462_v44 = vpack.c.bf16 %v4874_v6, %v4866_v13  ;;  %v4882_v54 = vld [vmem:[%s14233_s2 + $0x230] sm:$0xff]  ;;  %v4915_v2 = vld [vmem:[%s14233_s2 + $0x338] sm:$0xff] }
 0xac1   : > { %v4751_v26 = vadd.f32 %v4749_v55, %v4731_v43  ;;  %v8388_v39 = vpack.c.bf16 %v4841_v23, %v4833_v59  ;;  %v8400_v43 = vpack.c.bf16 %v4889_v27, %v4881_v57  ;;  %v8464_v55 = vpack.c.bf16 %v4891_v30, %v4883_v0  ;;  %v4904_v59 = vld [vmem:[%s14233_s2 + $0x2e0] sm:$0xff]  ;;  %v4898_v40 = vld [vmem:[%s14233_s2 + $0x2b0] sm:$0xff]  ;;  %v4923_v52 = vld [vmem:[%s14233_s2 + $0x378] sm:$0xff] }
 0xac2   : > { %v8402_v18 = vpack.c.bf16 %v4888_v24, %v4880_v38  ;;  %v4906_v49 = vld [vmem:[%s14233_s2 + $0x2f0] sm:$0xff]  ;;  %v4912_v47 = vld [vmem:[%s14233_s2 + $0x320] sm:$0xff]  ;;  %v4929_v31 = vld [vmem:[%s14233_s2 + $0x3a8] sm:$0xff] }
 0xac3   : > { %v4771_v3 = vadd.f32 %v4769_v58, %v4751_v26  ;;  %v4890_v26 = vld [vmem:[%s14233_s2 + $0x270] sm:$0xff]  ;;  %v4897_v58 = vld [vmem:[%s14233_s2 + $0x2a8] sm:$0xff]  ;;  %v4920_v29 = vld [vmem:[%s14233_s2 + $0x360] sm:$0xff] }
 0xac4   : > { %v8466_v63 = vpack.c.bf16 %v4890_v26, %v4882_v54  ;;  %v4922_v37 = vld [vmem:[%s14233_s2 + $0x370] sm:$0xff]  ;;  %v4937_v25 = vld [vmem:[%s14233_s2 + $0x3e8] sm:$0xff]  ;;  %v4928_v15 = vld [vmem:[%s14233_s2 + $0x3a0] sm:$0xff] }
 0xac5   : > { %v4791_v32 = vadd.f32 %v4789_v20, %v4771_v3  ;;  %v4899_v3 = vld [vmem:[%s14233_s2 + $0x2b8] sm:$0xff]  ;;  %v4936_v41 = vld [vmem:[%s14233_s2 + $0x3e0] sm:$0xff]  ;;  %v4938_v5 = vld [vmem:[%s14233_s2 + $0x3f0] sm:$0xff] }
 0xac6   : > { %v4907_v20 = vld [vmem:[%s14233_s2 + $0x2f8] sm:$0xff]  ;;  %v4945_v48 = vld [vmem:[%s14233_s2 + $0x428] sm:$0xff]  ;;  %v8414_v61 = vpack.c.bf16 %v4936_v41, %v4928_v15 }
 0xac7   : > { %v12663_v4 = vadd.f32 %v14235_v16, %v4791_v32  ;;  %v8404_v32 = vpack.c.bf16 %v4905_v60, %v4897_v58  ;;  %v8468_v23 = vpack.c.bf16 %v4907_v20, %v4899_v3  ;;  %v8470_v16 = vpack.c.bf16 %v4906_v49, %v4898_v40  ;;  %v4955_v22 = vld [vmem:[%s14233_s2 + $0x478] sm:$0xff]  ;;  %v4961_v13 = vld [vmem:[%s14233_s2 + $0x4a8] sm:$0xff] }
 0xac8   : > { %v4969_v6 = vld [vmem:[%s14233_s2 + $0x4e8] sm:$0xff]  ;;  %v4963_v57 = vld [vmem:[%s14233_s2 + $0x4b8] sm:$0xff] }
 0xac9   : > { %v4801_v36 = vrot.slane %v12663_v4, %v11559_v53  ;;  %5133 = vmatmul.mubr.f32.vlgmr.msra.gmra.mrb[122].mxu0 %v12663_v4  ;;  %5204 = vmatmul.mubr.f32.vlgmr.msra.gmra.mrb[82].mxu1 %v12663_v4  ;;  %v4971_v27 = vld [vmem:[%s14233_s2 + $0x4f8] sm:$0xff]  ;;  %v8420_v38 = vpack.c.bf16 %v4969_v6, %v4961_v13  ;;  %v4977_v54 = vld [vmem:[%s14233_s2 + $0x528] sm:$0xff] }
 0xaca   : > { %8387 = vmatpush1.bf16.msra.mxu0 %v8386_v14  ;;  %8451 = vmatpush1.bf16.msra.mxu1 %v8450_v10  ;;  %v4913_v14 = vld [vmem:[%s14233_s2 + $0x328] sm:$0xff]  ;;  %v8484_v24 = vpack.c.bf16 %v4971_v27, %v4963_v57  ;;  %v4979_v58 = vld [vmem:[%s14233_s2 + $0x538] sm:$0xff] }
 0xacb   : > { %v4808_v45 = vcombine.low %v4801_v36, %v4805_v8  ;;  %5274 = vmatprep.mubr.f32.mxu0 %v12560_v35  ;;  %5345 = vmatprep.mubr.f32.mxu1 %v12560_v35  ;;  %v4873_v35 = vld [vmem:[%s14233_s2 + $0x1e8] sm:$0xff]  ;;  %v8406_v8 = vpack.c.bf16 %v4904_v59, %v4896_v42  ;;  %v4931_v36 = vld [vmem:[%s14233_s2 + $0x3b8] sm:$0xff] }
 0xacc   : > { %8389 = vmatprep.subr.bf16.mxu0 %v8388_v39  ;;  %8453 = vmatprep.subr.bf16.mxu1 %v8452_v19  ;;  %v8396_v1 = vpack.c.bf16 %v4873_v35, %v4865_v34  ;;  %v4921_v10 = vld [vmem:[%s14233_s2 + $0x368] sm:$0xff]  ;;  %v8472_v39 = vpack.c.bf16 %v4923_v52, %v4915_v2  ;;  %v4914_v19 = vld [vmem:[%s14233_s2 + $0x330] sm:$0xff]  ;;  %v4947_v35 = vld [vmem:[%s14233_s2 + $0x438] sm:$0xff] }
 0xacd   : > { %v4810_v46 = vmul.f32 %v4808_v45, %v4797_v56  ;;  %v8408_v33 = vpack.c.bf16 %v4921_v10, %v4913_v14  ;;  %v4939_v56 = vld [vmem:[%s14233_s2 + $0x3f8] sm:$0xff]  ;;  %v8412_v45 = vpack.c.bf16 %v4937_v25, %v4929_v31  ;;  %v4953_v34 = vld [vmem:[%s14233_s2 + $0x468] sm:$0xff]  ;;  %v8480_v51 = vpack.c.bf16 %v4955_v22, %v4947_v35 }
 0xace   : > { %8391 = vmatpush1.bf16.msra.mxu0 %v8390_v50  ;;  %8455 = vmatpush1.bf16.msra.mxu1 %v8454_v9  ;;  %v8410_v50 = vpack.c.bf16 %v4920_v29, %v4912_v47  ;;  %v8474_v9 = vpack.c.bf16 %v4922_v37, %v4914_v19  ;;  %v8416_v21 = vpack.c.bf16 %v4953_v34, %v4945_v48  ;;  %v4985_v26 = vld [vmem:[%s14233_s2 + $0x568] sm:$0xff]  ;;  %v4987_v60 = vld [vmem:[%s14233_s2 + $0x578] sm:$0xff] }
 0xacf   : > { %4811 = vst [vmem:[%s757_s15] sm:$0x77] %v4810_v46  ;;  %8393 = vmatprep.subr.bf16.mxu0 %v8392_v62  ;;  %8457 = vmatprep.subr.bf16.mxu1 %v8456_v11  ;;  %v8476_v62 = vpack.c.bf16 %v4939_v56, %v4931_v36  ;;  %v4930_v11 = vld [vmem:[%s14233_s2 + $0x3b0] sm:$0xff]  ;;  %v8424_v42 = vpack.c.bf16 %v4985_v26, %v4977_v54  ;;  %v4993_v40 = vld [vmem:[%s14233_s2 + $0x5a8] sm:$0xff]  ;;  %v4995_v14 = vld [vmem:[%s14233_s2 + $0x5b8] sm:$0xff]  ;;  %s13072_s15 = sld [smem:[#allocation7 + $0x108]] }
 0xad0   : > { %v8478_v46 = vpack.c.bf16 %v4938_v5, %v4930_v11  ;;  %v8488_v59 = vpack.c.bf16 %v4987_v60, %v4979_v58  ;;  %v5001_v49 = vld [vmem:[%s14233_s2 + $0x5e8] sm:$0xff]  ;;  %v5003_v10 = vld [vmem:[%s14233_s2 + $0x5f8] sm:$0xff] }
 0xad1   : > { %v8428_v47 = vpack.c.bf16 %v5001_v49, %v4993_v40  ;;  %v8492_v29 = vpack.c.bf16 %v5003_v10, %v4995_v14  ;;  %v5009_v19 = vld [vmem:[%s14233_s2 + $0x628] sm:$0xff]  ;;  %v5011_v31 = vld [vmem:[%s14233_s2 + $0x638] sm:$0xff]  ;;  %v13106_v40 = vstv %s13022_s1  ;;  %v13109_v49 = vstv %s13024_s24  ;;  %s13133_s1 = sld [smem:[#allocation5 + $0x10e]] }
 0xad2   : > { %8395 = vmatpush1.bf16.msra.mxu0 %v8394_v12  ;;  %8459 = vmatpush1.bf16.msra.mxu1 %v8458_v7  ;;  %v4944_v12 = vld [vmem:[%s14233_s2 + $0x420] sm:$0xff]  ;;  %v5017_v37 = vld [vmem:[%s14233_s2 + $0x668] sm:$0xff]  ;;  %v5019_v25 = vld [vmem:[%s14233_s2 + $0x678] sm:$0xff]  ;;  %14248 = vst [vmem:[#allocation54_spill] sm:$0xff] %v13106_v40  ;;  %v13112_v14 = vstv %s13026_s13  ;;  %s13135_s24 = sld [smem:[#allocation7 + $0x10e]]  ;;  %s14260_s13 = sld [smem:[#allocation45_spill]] }
 0xad3   : > { %8397 = vmatprep.subr.bf16.mxu0 %v8396_v1  ;;  %8461 = vmatprep.subr.bf16.mxu1 %v8460_v17  ;;  %v4952_v7 = vld [vmem:[%s14233_s2 + $0x460] sm:$0xff]  ;;  %v4946_v1 = vld [vmem:[%s14233_s2 + $0x430] sm:$0xff]  ;;  %v8432_v15 = vpack.c.bf16 %v5017_v37, %v5009_v19  ;;  %v8496_v41 = vpack.c.bf16 %v5019_v25, %v5011_v31  ;;  %v5025_v11 = vld [vmem:[%s14233_s2 + $0x6a8] sm:$0xff]  ;;  %14249 = vst [vmem:[#allocation55_spill] sm:$0xff] %v13109_v49  ;;  %v13154_v19 = vstv %s13046_s17  ;;  %s14274_s17 = sld [smem:[#allocation26_spill]] }
 0xad4   : > { %v4954_v17 = vld [vmem:[%s14233_s2 + $0x470] sm:$0xff]  ;;  %v8418_v0 = vpack.c.bf16 %v4952_v7, %v4944_v12  ;;  %v5033_v5 = vld [vmem:[%s14233_s2 + $0x6e8] sm:$0xff]  ;;  %v5027_v48 = vld [vmem:[%s14233_s2 + $0x6b8] sm:$0xff]  ;;  %14250 = vst [vmem:[#allocation56_spill] sm:$0xff] %v13112_v14  ;;  %v13157_v37 = vstv %s13048_s19  ;;  %s14279_s19 = sld [smem:[#allocation29_spill]] }
 0xad5   : > { %v8482_v30 = vpack.c.bf16 %v4954_v17, %v4946_v1  ;;  %v5035_v34 = vld [vmem:[%s14233_s2 + $0x6f8] sm:$0xff]  ;;  %v8436_v12 = vpack.c.bf16 %v5033_v5, %v5025_v11  ;;  %v5041_v1 = vld [vmem:[%s14233_s2 + $0x728] sm:$0xff]  ;;  %14241 = sst [smem:[#allocation25_spill]] %s13072_s15  ;;  %14267 = vst [vmem:[#allocation65_spill] sm:$0xff] %v13154_v19  ;;  %v13160_v31 = vstv %s13050_s22  ;;  %v13163_v25 = vstv %s13052_s12 }
 0xad6   : > { %8399 = vmatpush1.bf16.msra.mxu0 %v8398_v28  ;;  %8463 = vmatpush1.bf16.msra.mxu1 %v8462_v44  ;;  %v4960_v28 = vld [vmem:[%s14233_s2 + $0x4a0] sm:$0xff]  ;;  %v8500_v7 = vpack.c.bf16 %v5035_v34, %v5027_v48  ;;  %v5049_v17 = vld [vmem:[%s14233_s2 + $0x768] sm:$0xff]  ;;  %v5043_v13 = vld [vmem:[%s14233_s2 + $0x738] sm:$0xff]  ;;  %s13088_s15 = sld [smem:[#allocation5 + $0x10b]]  ;;  %14270 = vst [vmem:[#allocation66_spill] sm:$0xff] %v13160_v31 }
 0xad7   : > { %8401 = vmatprep.subr.bf16.mxu0 %v8400_v43  ;;  %8465 = vmatprep.subr.bf16.mxu1 %v8464_v55  ;;  %v4968_v44 = vld [vmem:[%s14233_s2 + $0x4e0] sm:$0xff]  ;;  %v4962_v43 = vld [vmem:[%s14233_s2 + $0x4b0] sm:$0xff]  ;;  %v5051_v6 = vld [vmem:[%s14233_s2 + $0x778] sm:$0xff]  ;;  %14256 = sst [smem:[#allocation18_spill]] %s13133_s1  ;;  %s14266_s1 = sld [smem:[#allocation25_spill]]  ;;  %14272 = vst [vmem:[#allocation67_spill] sm:$0xff] %v13163_v25 }
 0xad8   : > { %v4970_v55 = vld [vmem:[%s14233_s2 + $0x4f0] sm:$0xff]  ;;  %v8422_v3 = vpack.c.bf16 %v4968_v44, %v4960_v28  ;;  %v8440_v28 = vpack.c.bf16 %v5049_v17, %v5041_v1  ;;  %v8504_v44 = vpack.c.bf16 %v5051_v6, %v5043_v13  ;;  %v5059_v54 = vld [vmem:[%s14233_s2 + $0x7b8] sm:$0xff]  ;;  %14257 = sst [smem:[#allocation20_spill]] %s13135_s24  ;;  %s14273_s24 = sld [smem:[#allocation23_spill]]  ;;  %v13230_v1 = vstv %s13094_s8 }
 0xad9   : > { %v8486_v20 = vpack.c.bf16 %v4970_v55, %v4962_v43  ;;  %v5057_v43 = vld [vmem:[%s14233_s2 + $0x7a8] sm:$0xff]  ;;  %v5067_v26 = vld [vmem:[%s14233_s2 + $0x7f8] sm:$0xff]  ;;  %s14282_s22 = sld [smem:[#allocation18_spill]]  ;;  %s14283_s12 = sld [smem:[#allocation20_spill]]  ;;  %14287 = vst [vmem:[#allocation76_spill] sm:$0xff] %v13230_v1  ;;  %v13236_v13 = vstv %s13101_s7  ;;  %v13239_v6 = vstv %s13103_s25 }
 0xada   : > { %8403 = vmatpush1.bf16.msra.mxu0 %v8402_v18  ;;  %8467 = vmatpush1.bf16.msra.mxu1 %v8466_v63  ;;  %v4976_v18 = vld [vmem:[%s14233_s2 + $0x520] sm:$0xff]  ;;  %v5065_v55 = vld [vmem:[%s14233_s2 + $0x7e8] sm:$0xff]  ;;  %v13233_v17 = vstv %s14279_s19  ;;  %14289 = vst [vmem:[#allocation78_spill] sm:$0xff] %v13236_v13  ;;  %s14390_s25 = sld [smem:[#allocation107_spill]] }
 0xadb   : > { %8405 = vmatprep.subr.bf16.mxu0 %v8404_v32  ;;  %8469 = vmatprep.subr.bf16.mxu1 %v8468_v23  ;;  %v4984_v63 = vld [vmem:[%s14233_s2 + $0x560] sm:$0xff]  ;;  %v4978_v32 = vld [vmem:[%s14233_s2 + $0x530] sm:$0xff]  ;;  %14288 = vst [vmem:[#allocation77_spill] sm:$0xff] %v13233_v17 }
 0xadc   : > { %v4986_v23 = vld [vmem:[%s14233_s2 + $0x570] sm:$0xff]  ;;  %v8426_v2 = vpack.c.bf16 %v4984_v63, %v4976_v18  ;;  %v8508_v18 = vpack.c.bf16 %v5067_v26, %v5059_v54  ;;  %v5064_v63 = vld [vmem:[%s14233_s2 + $0x7e0] sm:$0xff] }
 0xadd   : > { %v8490_v52 = vpack.c.bf16 %v4986_v23, %v4978_v32  ;;  %v13197_v5 = vstv %s14266_s1 }
 0xade   : > { %8407 = vmatpush1.bf16.msra.mxu0 %v8406_v8  ;;  %8471 = vmatpush1.bf16.msra.mxu1 %v8470_v16  ;;  %v4992_v8 = vld [vmem:[%s14233_s2 + $0x5a0] sm:$0xff]  ;;  %14281 = vst [vmem:[#allocation73_spill] sm:$0xff] %v13197_v5 }
 0xadf   : > { %8409 = vmatprep.subr.bf16.mxu0 %v8408_v33  ;;  %8473 = vmatprep.subr.bf16.mxu1 %v8472_v39  ;;  %v5000_v16 = vld [vmem:[%s14233_s2 + $0x5e0] sm:$0xff]  ;;  %v4994_v33 = vld [vmem:[%s14233_s2 + $0x5b0] sm:$0xff] }
 0xae0   : > { %v5002_v39 = vld [vmem:[%s14233_s2 + $0x5f0] sm:$0xff]  ;;  %v8430_v36 = vpack.c.bf16 %v5000_v16, %v4992_v8  ;;  %v13128_v8 = vstv %s13034_s4  ;;  %v13131_v16 = vstv %s13036_s28  ;;  %s14265_s4 = sld [smem:[#allocation16_spill]]  ;;  %s13151_s28 = sld [smem:[#allocation5 + $0x10f]] }
 0xae1   : > { %v8494_v56 = vpack.c.bf16 %v5002_v39, %v4994_v33  ;;  %14254 = vst [vmem:[#allocation60_spill] sm:$0xff] %v13128_v8  ;;  %14255 = vst [vmem:[#allocation61_spill] sm:$0xff] %v13131_v16  ;;  %v13144_v33 = vstv %s13042_s10  ;;  %v13147_v39 = vstv %s13044_s11  ;;  %s14271_s10 = sld [smem:[#allocation21_spill]] }
 0xae2   : > { %8411 = vmatpush1.bf16.msra.mxu0 %v8410_v50  ;;  %8475 = vmatpush1.bf16.msra.mxu1 %v8474_v9  ;;  %v5008_v50 = vld [vmem:[%s14233_s2 + $0x620] sm:$0xff]  ;;  %14262 = vst [vmem:[#allocation64_spill] sm:$0xff] %v13147_v39  ;;  %s13165_s11 = sld [smem:[#allocation7 + $0x10f]] }
 0xae3   : > { %8413 = vmatprep.subr.bf16.mxu0 %v8412_v45  ;;  %8477 = vmatprep.subr.bf16.mxu1 %v8476_v62  ;;  %v5016_v9 = vld [vmem:[%s14233_s2 + $0x660] sm:$0xff]  ;;  %v5010_v45 = vld [vmem:[%s14233_s2 + $0x630] sm:$0xff] }
 0xae4   : > { %v5018_v62 = vld [vmem:[%s14233_s2 + $0x670] sm:$0xff]  ;;  %v8434_v35 = vpack.c.bf16 %v5016_v9, %v5008_v50  ;;  %v13176_v50 = vstv %s13058_s23  ;;  %v13179_v9 = vstv %s13060_s30 }
 0xae5   : > { %v8498_v22 = vpack.c.bf16 %v5018_v62, %v5010_v45  ;;  %14276 = vst [vmem:[#allocation69_spill] sm:$0xff] %v13176_v50 }
 0xae6   : > { %8415 = vmatpush1.bf16.msra.mxu0 %v8414_v61  ;;  %8479 = vmatpush1.bf16.msra.mxu1 %v8478_v46  ;;  %v5024_v61 = vld [vmem:[%s14233_s2 + $0x6a0] sm:$0xff]  ;;  %v13194_v11 = vstv %s14265_s4 }
 0xae7   : > { %8417 = vmatprep.subr.bf16.mxu0 %v8416_v21  ;;  %8481 = vmatprep.subr.bf16.mxu1 %v8480_v51  ;;  %v5032_v46 = vld [vmem:[%s14233_s2 + $0x6e0] sm:$0xff]  ;;  %v5026_v21 = vld [vmem:[%s14233_s2 + $0x6b0] sm:$0xff] }
 0xae8   : > { %v5034_v51 = vld [vmem:[%s14233_s2 + $0x6f0] sm:$0xff]  ;;  %v8438_v57 = vpack.c.bf16 %v5032_v46, %v5024_v61  ;;  %v13212_v61 = vstv %s13082_s21  ;;  %v13215_v46 = vstv %s14273_s24 }
 0xae9   : > { %v8502_v27 = vpack.c.bf16 %v5034_v51, %v5026_v21  ;;  %14285 = vst [vmem:[#allocation74_spill] sm:$0xff] %v13215_v46  ;;  %v13224_v21 = vstv %s13090_s26  ;;  %v13227_v51 = vstv %s13092_s6 }
 0xaea   : > { %8419 = vmatpush1.bf16.msra.mxu0 %v8418_v0  ;;  %8483 = vmatpush1.bf16.msra.mxu1 %v8482_v30  ;;  %v5040_v0 = vld [vmem:[%s14233_s2 + $0x720] sm:$0xff]  ;;  %14286 = vst [vmem:[#allocation75_spill] sm:$0xff] %v13224_v21 }
 0xaeb   : > { %8421 = vmatprep.subr.bf16.mxu0 %v8420_v38  ;;  %8485 = vmatprep.subr.bf16.mxu1 %v8484_v24  ;;  %v5048_v30 = vld [vmem:[%s14233_s2 + $0x760] sm:$0xff]  ;;  %v5042_v38 = vld [vmem:[%s14233_s2 + $0x730] sm:$0xff] }
 0xaec   : > { %v5050_v24 = vld [vmem:[%s14233_s2 + $0x770] sm:$0xff]  ;;  %v8442_v58 = vpack.c.bf16 %v5048_v30, %v5040_v0  ;;  %v13248_v0 = vstv %s14282_s22  ;;  %v13251_v30 = vstv %s14283_s12 }
 0xaed   : > { %v8506_v60 = vpack.c.bf16 %v5050_v24, %v5042_v38  ;;  %14292 = vst [vmem:[#allocation81_spill] sm:$0xff] %v13251_v30  ;;  %v13259_v38 = vstv %s13151_s28  ;;  %v13262_v24 = vstv %s13165_s11 }
 0xaee   : > { %8423 = vmatpush1.bf16.msra.mxu0 %v8422_v3  ;;  %8487 = vmatpush1.bf16.msra.mxu1 %v8486_v20  ;;  %v5056_v3 = vld [vmem:[%s14233_s2 + $0x7a0] sm:$0xff]  ;;  %v8444_v20 = vpack.c.bf16 %v5065_v55, %v5057_v43  ;;  %14294 = vst [vmem:[#allocation83_spill] sm:$0xff] %v13259_v38  ;;  %14295 = vst [vmem:[#allocation84_spill] sm:$0xff] %v13262_v24 }
 0xaef   : > { %8425 = vmatprep.subr.bf16.mxu0 %v8424_v42  ;;  %8489 = vmatprep.subr.bf16.mxu1 %v8488_v59  ;;  %v5058_v42 = vld [vmem:[%s14233_s2 + $0x7b0] sm:$0xff]  ;;  %v8446_v32 = vpack.c.bf16 %v5064_v63, %v5056_v3 }
 0xaf0   : > { %v5066_v59 = vld [vmem:[%s14233_s2 + $0x7f0] sm:$0xff]  ;;  %s13028_s2 = sld [smem:[#allocation5 + $0x101]] }
 0xaf1   : > { %v8510_v23 = vpack.c.bf16 %v5066_v59, %v5058_v42 }
 0xaf2   : > { %8427 = vmatpush1.bf16.msra.mxu0 %v8426_v2  ;;  %8491 = vmatpush1.bf16.msra.mxu1 %v8490_v52  ;;  %v13122_v2 = vstv %s13030_s5  ;;  %v13125_v52 = vstv %s13032_s3  ;;  %s14263_s5 = sld [smem:[#allocation51_spill]]  ;;  %s13149_s3 = sld [smem:[#allocation3 + $0x10f]] }
 0xaf3   : > { %8429 = vmatprep.subr.bf16.mxu0 %v8428_v47  ;;  %8493 = vmatprep.subr.bf16.mxu1 %v8492_v29  ;;  %14252 = vst [vmem:[#allocation58_spill] sm:$0xff] %v13122_v2  ;;  %14253 = vst [vmem:[#allocation59_spill] sm:$0xff] %v13125_v52  ;;  %v13138_v47 = vstv %s13038_s9  ;;  %v13141_v29 = vstv %s13040_s16  ;;  %s14268_s9 = sld [smem:[#allocation17_spill]]  ;;  %s14269_s16 = sld [smem:[#allocation19_spill]] }
 0xaf4   : > { %14258 = vst [vmem:[#allocation62_spill] sm:$0xff] %v13138_v47  ;;  %14259 = vst [vmem:[#allocation63_spill] sm:$0xff] %v13141_v29 }
 0xaf6   : > { %8431 = vmatpush1.bf16.msra.mxu0 %v8430_v36  ;;  %8495 = vmatpush1.bf16.msra.mxu1 %v8494_v56  ;;  %v13115_v10 = vstv %s13028_s2  ;;  %s14261_s2 = sld [smem:[#allocation48_spill]]  ;;  %v13170_v36 = vstv %s13054_s20  ;;  %v13173_v56 = vstv %s13056_s29 }
 0xaf7   : > { %8433 = vmatprep.subr.bf16.mxu0 %v8432_v15  ;;  %8497 = vmatprep.subr.bf16.mxu1 %v8496_v41  ;;  %14251 = vst [vmem:[#allocation57_spill] sm:$0xff] %v13115_v10  ;;  %14275 = vst [vmem:[#allocation68_spill] sm:$0xff] %v13173_v56  ;;  %v13182_v15 = vstv %s13062_s14  ;;  %v13185_v41 = vstv %s14260_s13  ;;  %s14385_s14 = sld [smem:[#allocation104_spill]] }
 0xaf8   : > { %14264 = sst [smem:[#allocation22_spill]] %s13149_s3  ;;  %14277 = vst [vmem:[#allocation70_spill] sm:$0xff] %v13182_v15  ;;  %14278 = vst [vmem:[#allocation71_spill] sm:$0xff] %v13185_v41  ;;  %v13191_v62 = vstv %s14263_s5 }
 0xaf9   : > { %s13167_s3 = sld [smem:[#allocation8 + $0x100]]  ;;  %v13200_v48 = vstv %s14268_s9  ;;  %v13203_v34 = vstv %s14269_s16 }
 0xafa   : > { %8435 = vmatpush1.bf16.msra.mxu0 %v8434_v35  ;;  %8499 = vmatpush1.bf16.msra.mxu1 %v8498_v22  ;;  %v13206_v35 = vstv %s14271_s10  ;;  %v13209_v22 = vstv %s13080_s18  ;;  %s14284_s20 = sld [smem:[#allocation22_spill]]  ;;  %s14384_s18 = sld [smem:[#allocation14_spill]] }
 0xafb   : > { %8437 = vmatprep.subr.bf16.mxu0 %v8436_v12  ;;  %8501 = vmatprep.subr.bf16.mxu1 %v8500_v7  ;;  %v13218_v12 = vstv %s14274_s17  ;;  %v13221_v7 = vstv %s13088_s15 }
 0xafc   : > { %v13188_v45 = vstv %s14261_s2 }
 0xafd   : > { %14280 = vst [vmem:[#allocation72_spill] sm:$0xff] %v13188_v45 }
 0xafe   : > { %8439 = vmatpush1.bf16.msra.mxu0 %v8438_v57  ;;  %8503 = vmatpush1.bf16.msra.mxu1 %v8502_v27  ;;  %v13242_v57 = vstv %s13117_s27 }
 0xaff   : > { %8441 = vmatprep.subr.bf16.mxu0 %v8440_v28  ;;  %8505 = vmatprep.subr.bf16.mxu1 %v8504_v44  ;;  %14290 = vst [vmem:[#allocation79_spill] sm:$0xff] %v13242_v57  ;;  %v13265_v43 = vstv %s13167_s3 }
 0xb00   : > { %v13256_v44 = vstv %s14284_s20  ;;  %14296 = vst [vmem:[#allocation85_spill] sm:$0xff] %v13265_v43  ;;  %s6981_s29 = sshll.u32 %s14384_s18, 5 }
 0xb01   : > { %14293 = vst [vmem:[#allocation82_spill] sm:$0xff] %v13256_v44  ;;  %s13757_s7 = scalar_lea.vmem %s14385_s14, %s6981_s29  ;;  %s13780_s15 = scalar_lea.vmem %s14390_s25, %s6981_s29 }
 0xb02   : > { %8443 = vmatpush1.bf16.msra.mxu0 %v8442_v58  ;;  %8507 = vmatpush1.bf16.msra.mxu1 %v8506_v60 }
 0xb03   : > { %8445 = vmatprep.subr.bf16.mxu0 %v8444_v20  ;;  %8509 = vmatprep.subr.bf16.mxu1 %v8508_v18 }
 0xb06   : > { %8447 = vmatpush1.bf16.msra.mxu0 %v8446_v32  ;;  %8511 = vmatpush1.bf16.msra.mxu1 %v8510_v23 }
 0xb09   : > { %5275 = vmatmul.mubr.f32.vlgmr.msra.gmra.mrb[124].mxu0 %v12663_v4  ;;  %5346 = vmatmul.mubr.f32.vlgmr.msra.gmra.mrb[84].mxu1 %v12663_v4  ;;  %v13099_v4 = vstv %s13020_s0  ;;  %s13119_s0 = sld [smem:[#allocation3 + $0x10e]] }
 0xb0f   : > { %v13245_v27 = vstv %s13119_s0 }
 0xb10   : > { %14291 = vst [vmem:[#allocation80_spill] sm:$0xff] %v13245_v27 }
 0xb9c   : > { %v13253_v28 = vpop.f32.mrb[122].mxu0  ;;  %v13267_v55 = vpop.f32.mrb[82].mxu1 }
 0xb9d   : > { %v5354_v54 = vmul.f32 %v13099_v4, %v13253_v28  ;;  %v5416_v26 = vmul.f32 %v13112_v14, %v13253_v28  ;;  %v5478_v58 = vmul.f32 %v13125_v52, %v13253_v28  ;;  %v5540_v60 = vmul.f32 %v13138_v47, %v13253_v28  ;;  %v13277_v3 = vpop.f32.mrb[123].mxu0  ;;  %v13279_v20 = vpop.f32.mrb[83].mxu1 }
 0xb9e   : > { %14297 = vst [vmem:[#allocation86_spill] sm:$0xff] %v13277_v3  ;;  %14298 = vst [vmem:[#allocation87_spill] sm:$0xff] %v13279_v20  ;;  %v5602_v18 = vmul.f32 %v13147_v39, %v13253_v28  ;;  %v5664_v63 = vmul.f32 %v13160_v31, %v13253_v28  ;;  %v5726_v42 = vmul.f32 %v13173_v56, %v13253_v28 }
 0xb9f   : > { %v5788_v59 = vmul.f32 %v13182_v15, %v13253_v28  ;;  %v5364_v32 = vadd.f32 %v13106_v40, %v5354_v54  ;;  %v5426_v23 = vadd.f32 %v13115_v10, %v5416_v26  ;;  %v5488_v3 = vadd.f32 %v13128_v8, %v5478_v58 }
 0xba0   : > { %v5550_v20 = vadd.f32 %v13141_v29, %v5540_v60  ;;  %v5612_v53 = vadd.f32 %v13154_v19, %v5602_v18  ;;  %v5674_v43 = vadd.f32 %v13163_v25, %v5664_v63  ;;  %v5736_v31 = vadd.f32 %v13176_v50, %v5726_v42 }
 0xba1   : > { %v5798_v39 = vadd.f32 %v13185_v41, %v5788_v59  ;;  %vm5372_vm2 = vcmp.ge.f32.partialorder %v5364_v32, 0.0  ;;  %v5380_v56 = vmul.f32 0.01, %v5364_v32  ;;  %vm5434_vm3 = vcmp.ge.f32.partialorder %v5426_v23, 0.0 }
 0xba2   : > { %v5442_v15 = vmul.f32 0.01, %v5426_v23  ;;  %vm5496_vm4 = vcmp.ge.f32.partialorder %v5488_v3, 0.0  ;;  %v5504_v54 = vmul.f32 0.01, %v5488_v3  ;;  %vm5558_vm5 = vcmp.ge.f32.partialorder %v5550_v20, 0.0 }
 0xba3   : > { %v5566_v26 = vmul.f32 0.01, %v5550_v20  ;;  %v5388_v47 = vsel %vm5372_vm2, %v5364_v32, %v5380_v56  ;;  %vm5620_vm6 = vcmp.ge.f32.partialorder %v5612_v53, 0.0  ;;  %v5628_v60 = vmul.f32 0.01, %v5612_v53 }
 0xba4   : > { %v5450_v58 = vsel %vm5434_vm3, %v5426_v23, %v5442_v15  ;;  %v5398_v18 = vmul.f32 %v13109_v49, %v5388_v47  ;;  %v5512_v25 = vsel %vm5496_vm4, %v5488_v3, %v5504_v54  ;;  %vm5682_vm7 = vcmp.ge.f32.partialorder %v5674_v43, 0.0 }
 0xba5   : > { %v5460_v63 = vmul.f32 %v13122_v2, %v5450_v58  ;;  %v5574_v42 = vsel %vm5558_vm5, %v5550_v20, %v5566_v26  ;;  %v5522_v59 = vmul.f32 %v13131_v16, %v5512_v25  ;;  %v5636_v50 = vsel %vm5620_vm6, %v5612_v53, %v5628_v60 }
 0xba6   : > { %v5584_v41 = vmul.f32 %v13144_v33, %v5574_v42  ;;  %v5646_v29 = vmul.f32 %v13157_v37, %v5636_v50  ;;  %v5690_v8 = vmul.f32 0.01, %v5674_v43  ;;  %vm5744_vm8 = vcmp.ge.f32.partialorder %v5736_v31, 0.0 }
 0xba7   : > { %v5468_v19 = vadd.f32 %v5460_v63, %v5398_v18  ;;  %v5752_v56 = vmul.f32 0.01, %v5736_v31  ;;  %vm5806_vm9 = vcmp.ge.f32.partialorder %v5798_v39, 0.0  ;;  %v5814_v15 = vmul.f32 0.01, %v5798_v39 }
 0xba8   : > { %v5850_v47 = vmul.f32 %v13191_v62, %v13253_v28  ;;  %v5698_v3 = vsel %vm5682_vm7, %v5674_v43, %v5690_v8  ;;  %v5912_v25 = vmul.f32 %v13200_v48, %v13253_v28  ;;  %v5974_v53 = vmul.f32 %v13209_v22, %v13253_v28 }
 0xba9   : > { %v5530_v32 = vadd.f32 %v5522_v59, %v5468_v19  ;;  %v5708_v20 = vmul.f32 %v13170_v36, %v5698_v3  ;;  %v5760_v23 = vsel %vm5744_vm8, %v5736_v31, %v5752_v56  ;;  %v5822_v50 = vsel %vm5806_vm9, %v5798_v39, %v5814_v15 }
 0xbaa   : > { %v5860_v54 = vadd.f32 %v13194_v11, %v5850_v47  ;;  %v5770_v58 = vmul.f32 %v13179_v9, %v5760_v23  ;;  %v5832_v60 = vmul.f32 %v13188_v45, %v5822_v50  ;;  %v5922_v19 = vadd.f32 %v13203_v34, %v5912_v25 }
 0xbab   : > { %v5592_v26 = vadd.f32 %v5584_v41, %v5530_v32  ;;  %v5984_v43 = vadd.f32 %v13212_v61, %v5974_v53  ;;  %v6036_v18 = vmul.f32 %v13218_v12, %v13253_v28  ;;  %v6098_v39 = vmul.f32 %v13227_v51, %v13253_v28 }
 0xbac   : > { %vm5868_vm10 = vcmp.ge.f32.partialorder %v5860_v54, 0.0  ;;  %v5876_v8 = vmul.f32 0.01, %v5860_v54  ;;  %vm5930_vm11 = vcmp.ge.f32.partialorder %v5922_v19, 0.0  ;;  %v5938_v31 = vmul.f32 0.01, %v5922_v19 }
 0xbad   : > { %v5654_v63 = vadd.f32 %v5646_v29, %v5592_v26  ;;  %vm5992_vm12 = vcmp.ge.f32.partialorder %v5984_v43, 0.0  ;;  %v6000_v42 = vmul.f32 0.01, %v5984_v43  ;;  %v6046_v59 = vadd.f32 %v13221_v7, %v6036_v18 }
 0xbae   : > { %v5884_v41 = vsel %vm5868_vm10, %v5860_v54, %v5876_v8  ;;  %v5946_v47 = vsel %vm5930_vm11, %v5922_v19, %v5938_v31  ;;  %v6108_v32 = vadd.f32 %v13230_v1, %v6098_v39  ;;  %v6160_v26 = vmul.f32 %v13236_v13, %v13253_v28 }
 0xbaf   : > { %v5716_v56 = vadd.f32 %v5708_v20, %v5654_v63  ;;  %v5894_v15 = vmul.f32 %v13197_v5, %v5884_v41  ;;  %v5956_v3 = vmul.f32 %v13206_v35, %v5946_v47  ;;  %v6008_v25 = vsel %vm5992_vm12, %v5984_v43, %v6000_v42 }
 0xbb0   : > { %vm6054_vm13 = vcmp.ge.f32.partialorder %v6046_v59, 0.0  ;;  %v6062_v29 = vmul.f32 0.01, %v6046_v59  ;;  %v6018_v23 = vmul.f32 %v13215_v46, %v6008_v25  ;;  %vm6116_vm0 = vcmp.ge.f32.partialorder %v6108_v32, 0.0 }
 0xbb1   : > { %v5778_v53 = vadd.f32 %v5770_v58, %v5716_v56  ;;  %v6124_v50 = vmul.f32 0.01, %v6108_v32  ;;  %v6222_v20 = vmul.f32 %v13245_v27, %v13253_v28  ;;  %v6284_v19 = vmul.f32 %v13256_v44, %v13253_v28 }
 0xbb2   : > { %v6070_v54 = vsel %vm6054_vm13, %v6046_v59, %v6062_v29  ;;  %v5356_v58 = vmul.f32 %v13099_v4, %v13267_v55  ;;  %v6170_v31 = vadd.f32 %v13239_v6, %v6160_v26  ;;  %v5418_v28 = vmul.f32 %v13112_v14, %v13267_v55 }
 0xbb3   : > { %v5840_v8 = vadd.f32 %v5832_v60, %v5778_v53  ;;  %v6080_v43 = vmul.f32 %v13224_v21, %v6070_v54  ;;  %v6132_v18 = vsel %vm6116_vm0, %v6108_v32, %v6124_v50  ;;  %v6232_v39 = vadd.f32 %v13248_v0, %v6222_v20 }
 0xbb4   : > { %v6142_v63 = vmul.f32 %v13233_v17, %v6132_v18  ;;  %v6294_v41 = vadd.f32 %v13259_v38, %v6284_v19  ;;  %v5366_v59 = vadd.f32 %v13106_v40, %v5356_v58  ;;  %v5480_v60 = vmul.f32 %v13125_v52, %v13267_v55  ;;  %v14299_v52 = vld [vmem:[#allocation60_spill] sm:$0xff] }
 0xbb5   : > { %v5902_v42 = vadd.f32 %v5894_v15, %v5840_v8  ;;  %vm6178_vm1 = vcmp.ge.f32.partialorder %v6170_v31, 0.0  ;;  %v6186_v56 = vmul.f32 0.01, %v6170_v31  ;;  %vm6240_vm14 = vcmp.ge.f32.partialorder %v6232_v39, 0.0 }
 0xbb6   : > { %v6248_v47 = vmul.f32 0.01, %v6232_v39  ;;  %vm6302_vm15 = vcmp.ge.f32.partialorder %v6294_v41, 0.0  ;;  %v6310_v25 = vmul.f32 0.01, %v6294_v41  ;;  %vm5374_vm2 = vcmp.ge.f32.partialorder %v5366_v59, 0.0 }
 0xbb7   : > { %v5964_v32 = vadd.f32 %v5956_v3, %v5902_v42  ;;  %v6194_v29 = vsel %vm6178_vm1, %v6170_v31, %v6186_v56  ;;  %v5382_v50 = vmul.f32 0.01, %v5366_v59  ;;  %v5428_v15 = vadd.f32 %v13115_v10, %v5418_v28 }
 0xbb8   : > { %v6256_v53 = vsel %vm6240_vm14, %v6232_v39, %v6248_v47  ;;  %v6204_v26 = vmul.f32 %v13242_v57, %v6194_v29  ;;  %v6318_v19 = vsel %vm6302_vm15, %v6294_v41, %v6310_v25  ;;  %v5490_v31 = vadd.f32 %v14299_v52, %v5480_v60  ;;  %v14300_v39 = vld [vmem:[#allocation62_spill] sm:$0xff]  ;;  %v14303_v25 = vld [vmem:[#allocation68_spill] sm:$0xff] }
 0xbb9   : > { %v6026_v54 = vadd.f32 %v6018_v23, %v5964_v32  ;;  %v6266_v20 = vmul.f32 %v13251_v30, %v6256_v53  ;;  %v6328_v8 = vmul.f32 %v13262_v24, %v6318_v19  ;;  %v5390_v18 = vsel %vm5374_vm2, %v5366_v59, %v5382_v50  ;;  %v14301_v23 = vld [vmem:[#allocation64_spill] sm:$0xff]  ;;  %v14302_v32 = vld [vmem:[#allocation66_spill] sm:$0xff]  ;;  %v14304_v50 = vld [vmem:[#allocation63_spill] sm:$0xff] }
 0xbba   : > { %vm5436_vm3 = vcmp.ge.f32.partialorder %v5428_v15, 0.0  ;;  %v5444_v58 = vmul.f32 0.01, %v5428_v15  ;;  %v5400_v42 = vmul.f32 %v13109_v49, %v5390_v18  ;;  %v5542_v56 = vmul.f32 %v14300_v39, %v13267_v55  ;;  %v14306_v18 = vld [vmem:[#allocation67_spill] sm:$0xff] }
 0xbbb   : > { %v6088_v3 = vadd.f32 %v6080_v43, %v6026_v54  ;;  %v5604_v47 = vmul.f32 %v14301_v23, %v13267_v55  ;;  %v5666_v41 = vmul.f32 %v14302_v32, %v13267_v55  ;;  %v5728_v59 = vmul.f32 %v14303_v25, %v13267_v55  ;;  %v14305_v54 = vld [vmem:[#allocation65_spill] sm:$0xff]  ;;  %v14308_v32 = vld [vmem:[#allocation70_spill] sm:$0xff] }
 0xbbc   : > { %v5452_v28 = vsel %vm5436_vm3, %v5428_v15, %v5444_v58  ;;  %vm5498_vm4 = vcmp.ge.f32.partialorder %v5490_v31, 0.0  ;;  %v5506_v53 = vmul.f32 0.01, %v5490_v31  ;;  %v5552_v60 = vadd.f32 %v14304_v50, %v5542_v56  ;;  %v14307_v58 = vld [vmem:[#allocation69_spill] sm:$0xff] }
 0xbbd   : > { %v6150_v29 = vadd.f32 %v6142_v63, %v6088_v3  ;;  %v5462_v43 = vmul.f32 %v13122_v2, %v5452_v28  ;;  %v5614_v19 = vadd.f32 %v14305_v54, %v5604_v47  ;;  %v5676_v15 = vadd.f32 %v14306_v18, %v5666_v41 }
 0xbbe   : > { %v5738_v52 = vadd.f32 %v14307_v58, %v5728_v59  ;;  %v5514_v24 = vsel %vm5498_vm4, %v5490_v31, %v5506_v53  ;;  %v5790_v39 = vmul.f32 %v14308_v32, %v13267_v55  ;;  %vm5560_vm5 = vcmp.ge.f32.partialorder %v5552_v60, 0.0  ;;  %v14309_v53 = vld [vmem:[#allocation71_spill] sm:$0xff] }
 0xbbf   : > { %v6212_v23 = vadd.f32 %v6204_v26, %v6150_v29  ;;  %v5470_v49 = vadd.f32 %v5462_v43, %v5400_v42  ;;  %v5524_v63 = vmul.f32 %v13131_v16, %v5514_v24  ;;  %v5568_v3 = vmul.f32 0.01, %v5552_v60 }
 0xbc0   : > { %vm5622_vm6 = vcmp.ge.f32.partialorder %v5614_v19, 0.0  ;;  %v5630_v2 = vmul.f32 0.01, %v5614_v19  ;;  %vm5684_vm7 = vcmp.ge.f32.partialorder %v5676_v15, 0.0  ;;  %v5692_v56 = vmul.f32 0.01, %v5676_v15 }
 0xbc1   : > { %v6274_v28 = vadd.f32 %v6266_v20, %v6212_v23  ;;  %v5532_v47 = vadd.f32 %v5524_v63, %v5470_v49  ;;  %v5576_v54 = vsel %vm5560_vm5, %v5552_v60, %v5568_v3  ;;  %vm5746_vm8 = vcmp.ge.f32.partialorder %v5738_v52, 0.0  ;;  %v14310_v20 = vld [vmem:[#allocation85_spill] sm:$0xff] }
 0xbc2   : > { %v5754_v41 = vmul.f32 0.01, %v5738_v52  ;;  %v5586_v26 = vmul.f32 %v13144_v33, %v5576_v54  ;;  %v5638_v42 = vsel %vm5622_vm6, %v5614_v19, %v5630_v2  ;;  %v5700_v31 = vsel %vm5684_vm7, %v5676_v15, %v5692_v56 }
 0xbc3   : > { %v6336_v59 = vadd.f32 %v6328_v8, %v6274_v28  ;;  %v5648_v29 = vmul.f32 %v13157_v37, %v5638_v42  ;;  %v5710_v24 = vmul.f32 %v13170_v36, %v5700_v31  ;;  %v5800_v16 = vadd.f32 %v14309_v53, %v5790_v39 }
 0xbc4   : > { %v5762_v43 = vsel %vm5746_vm8, %v5738_v52, %v5754_v41  ;;  %v5594_v58 = vadd.f32 %v5586_v26, %v5532_v47  ;;  %v5852_v8 = vmul.f32 %v13191_v62, %v13267_v55  ;;  %v5914_v2 = vmul.f32 %v13200_v48, %v13267_v55  ;;  %v14312_v52 = vld [vmem:[#allocation15_spill] sm:$0xff] }
 0xbc5   : > { %v13368_v23 = vadd.f32 %v14310_v20, %v6336_v59  ;;  %v5772_v49 = vmul.f32 %v13179_v9, %v5762_v43  ;;  %vm5808_vm9 = vcmp.ge.f32.partialorder %v5800_v16, 0.0  ;;  %v5816_v60 = vmul.f32 0.01, %v5800_v16 }
 0xbc6   : > { %v5976_v54 = vmul.f32 %v13209_v22, %v13267_v55  ;;  %v5656_v19 = vadd.f32 %v5648_v29, %v5594_v58  ;;  %v5862_v15 = vadd.f32 %v13194_v11, %v5852_v8  ;;  %v6038_v63 = vmul.f32 %v13218_v12, %v13267_v55 }
 0xbc7   : > { %14311 = vst [vmem:[#allocation67_spill] sm:$0xff] %v13368_v23  ;;  %v5824_v3 = vsel %vm5808_vm9, %v5800_v16, %v5816_v60  ;;  %v5924_v28 = vadd.f32 %v13203_v34, %v5914_v2  ;;  %v6100_v47 = vmul.f32 %v13227_v51, %v13267_v55 }
 0xbc8   : > { %v5986_v56 = vadd.f32 %v13212_v61, %v5976_v54  ;;  %v5718_v41 = vadd.f32 %v5710_v24, %v5656_v19  ;;  %v5834_v59 = vmul.f32 %v13188_v45, %v5824_v3  ;;  %vm5870_vm10 = vcmp.ge.f32.partialorder %v5862_v15, 0.0 }
 0xbc9   : > { %v5878_v26 = vmul.f32 0.01, %v5862_v15  ;;  %vm5932_vm11 = vcmp.ge.f32.partialorder %v5924_v28, 0.0  ;;  %v5940_v58 = vmul.f32 0.01, %v5924_v28  ;;  %v6048_v16 = vadd.f32 %v13221_v7, %v6038_v63 }
 0xbca   : > { %vm5994_vm12 = vcmp.ge.f32.partialorder %v5986_v56, 0.0  ;;  %v6002_v42 = vmul.f32 0.01, %v5986_v56  ;;  %v5780_v31 = vadd.f32 %v5772_v49, %v5718_v41  ;;  %v6110_v43 = vadd.f32 %v13230_v1, %v6100_v47 }
 0xbcb   : > { %v5886_v29 = vsel %vm5870_vm10, %v5862_v15, %v5878_v26  ;;  %v5948_v60 = vsel %vm5932_vm11, %v5924_v28, %v5940_v58  ;;  %v6162_v24 = vmul.f32 %v13236_v13, %v13267_v55  ;;  %vm6056_vm13 = vcmp.ge.f32.partialorder %v6048_v16, 0.0 }
 0xbcc   : > { %v5896_v8 = vmul.f32 %v13197_v5, %v5886_v29  ;;  %v6010_v2 = vsel %vm5994_vm12, %v5986_v56, %v6002_v42  ;;  %v5842_v54 = vadd.f32 %v5834_v59, %v5780_v31  ;;  %v5958_v19 = vmul.f32 %v13206_v35, %v5948_v60  ;;  %v14313_v56 = vld [vmem:[#allocation86_spill] sm:$0xff] }
 0xbcd   : > { %v6020_v3 = vmul.f32 %v13215_v46, %v6010_v2  ;;  %v6064_v39 = vmul.f32 0.01, %v6048_v16  ;;  %vm6118_vm0 = vcmp.ge.f32.partialorder %v6110_v43, 0.0  ;;  %v6126_v49 = vmul.f32 0.01, %v6110_v43 }
 0xbce   : > { %v6172_v15 = vadd.f32 %v13239_v6, %v6162_v24  ;;  %v5904_v63 = vadd.f32 %v5896_v8, %v5842_v54  ;;  %v6224_v47 = vmul.f32 %v13245_v27, %v13267_v55  ;;  %v6286_v28 = vmul.f32 %v13256_v44, %v13267_v55 }
 0xbcf   : > { %v5355_v41 = vmul.f32 %v13099_v4, %v14313_v56  ;;  %v6072_v59 = vsel %vm6056_vm13, %v6048_v16, %v6064_v39  ;;  %v6134_v26 = vsel %vm6118_vm0, %v6110_v43, %v6126_v49  ;;  %v5417_v55 = vmul.f32 %v13112_v14, %v14313_v56 }
 0xbd0   : > { %vm6180_vm1 = vcmp.ge.f32.partialorder %v6172_v15, 0.0  ;;  %v6188_v58 = vmul.f32 0.01, %v6172_v15  ;;  %v5966_v42 = vadd.f32 %v5958_v19, %v5904_v63  ;;  %v6082_v31 = vmul.f32 %v13224_v21, %v6072_v59 }
 0xbd1   : > { %v6144_v29 = vmul.f32 %v13233_v17, %v6134_v26  ;;  %v6234_v8 = vadd.f32 %v13248_v0, %v6224_v47  ;;  %v6296_v2 = vadd.f32 %v13259_v38, %v6286_v28  ;;  %v5365_v24 = vadd.f32 %v13106_v40, %v5355_v41  ;;  %v14314_v47 = vld [vmem:[#allocation59_spill] sm:$0xff] }
 0xbd2   : > { %v6196_v60 = vsel %vm6180_vm1, %v6172_v15, %v6188_v58  ;;  %v6028_v54 = vadd.f32 %v6020_v3, %v5966_v42  ;;  %v5427_v15 = vadd.f32 %v13115_v10, %v5417_v55  ;;  %v5479_v28 = vmul.f32 %v14314_v47, %v14313_v56  ;;  %v14315_v3 = vld [vmem:[#allocation62_spill] sm:$0xff]  ;;  %v14317_v40 = vld [vmem:[#allocation55_spill] sm:$0xff] }
 0xbd3   : > { %v6206_v39 = vmul.f32 %v13242_v57, %v6196_v60  ;;  %vm6242_vm14 = vcmp.ge.f32.partialorder %v6234_v8, 0.0  ;;  %v6250_v16 = vmul.f32 0.01, %v6234_v8  ;;  %vm6304_vm15 = vcmp.ge.f32.partialorder %v6296_v2, 0.0  ;;  %v14316_v60 = vld [vmem:[#allocation84_spill] sm:$0xff] }
 0xbd4   : > { %v6312_v43 = vmul.f32 0.01, %v6296_v2  ;;  %vm5373_vm2 = vcmp.ge.f32.partialorder %v5365_v24, 0.0  ;;  %v5381_v19 = vmul.f32 0.01, %v5365_v24  ;;  %v6090_v49 = vadd.f32 %v6082_v31, %v6028_v54 }
 0xbd5   : > { %v6258_v63 = vsel %vm6242_vm14, %v6234_v8, %v6250_v16  ;;  %v5541_v58 = vmul.f32 %v14315_v3, %v14313_v56  ;;  %vm5435_vm3 = vcmp.ge.f32.partialorder %v5427_v15, 0.0  ;;  %v5443_v31 = vmul.f32 0.01, %v5427_v15  ;;  %v14318_v8 = vld [vmem:[#allocation60_spill] sm:$0xff] }
 0xbd6   : > { %v6268_v41 = vmul.f32 %v13251_v30, %v6258_v63  ;;  %v6320_v59 = vsel %vm6304_vm15, %v6296_v2, %v6312_v43  ;;  %v5389_v26 = vsel %vm5373_vm2, %v5365_v24, %v5381_v19  ;;  %v6152_v42 = vadd.f32 %v6144_v29, %v6090_v49  ;;  %v14319_v16 = vld [vmem:[#allocation64_spill] sm:$0xff]  ;;  %v14320_v2 = vld [vmem:[#allocation66_spill] sm:$0xff] }
 0xbd7   : > { %v6330_v23 = vmul.f32 %v14316_v60, %v6320_v59  ;;  %v5399_v57 = vmul.f32 %v14317_v40, %v5389_v26  ;;  %v5489_v54 = vadd.f32 %v14318_v8, %v5479_v28  ;;  %v5551_v55 = vadd.f32 %v14304_v50, %v5541_v58  ;;  %v14321_v59 = vld [vmem:[#allocation58_spill] sm:$0xff]  ;;  %v14322_v40 = vld [vmem:[#allocation65_spill] sm:$0xff] }
 0xbd8   : > { %v5603_v10 = vmul.f32 %v14319_v16, %v14313_v56  ;;  %v6214_v63 = vadd.f32 %v6206_v39, %v6152_v42  ;;  %v5665_v24 = vmul.f32 %v14320_v2, %v14313_v56  ;;  %v5727_v29 = vmul.f32 %v14303_v25, %v14313_v56  ;;  %v14323_v2 = vld [vmem:[#allocation69_spill] sm:$0xff] }
 0xbd9   : > { %v5789_v43 = vmul.f32 %v14308_v32, %v14313_v56  ;;  %v5451_v19 = vsel %vm5435_vm3, %v5427_v15, %v5443_v31  ;;  %vm5497_vm4 = vcmp.ge.f32.partialorder %v5489_v54, 0.0  ;;  %v5505_v49 = vmul.f32 0.01, %v5489_v54  ;;  %v14324_v32 = vld [vmem:[#allocation61_spill] sm:$0xff] }
 0xbda   : > { %vm5559_vm5 = vcmp.ge.f32.partialorder %v5551_v55, 0.0  ;;  %v6276_v28 = vadd.f32 %v6268_v41, %v6214_v63  ;;  %v5461_v26 = vmul.f32 %v14321_v59, %v5451_v19  ;;  %v5567_v58 = vmul.f32 0.01, %v5551_v55 }
 0xbdb   : > { %v5613_v50 = vadd.f32 %v14322_v40, %v5603_v10  ;;  %v5513_v39 = vsel %vm5497_vm4, %v5489_v54, %v5505_v49  ;;  %v5675_v42 = vadd.f32 %v14306_v18, %v5665_v24  ;;  %v5737_v60 = vadd.f32 %v14323_v2, %v5727_v29 }
 0xbdc   : > { %v5799_v25 = vadd.f32 %v14309_v53, %v5789_v43  ;;  %v6338_v16 = vadd.f32 %v6330_v23, %v6276_v28  ;;  %v5469_v3 = vadd.f32 %v5461_v26, %v5399_v57  ;;  %v5523_v15 = vmul.f32 %v14324_v32, %v5513_v39  ;;  %v13433_v8 = vpop.f32.mrb[124].mxu0  ;;  %v13435_v41 = vpop.f32.mrb[84].mxu1 }
 0xbdd   : > { %v5575_v31 = vsel %vm5559_vm5, %v5551_v55, %v5567_v58  ;;  %14325 = vst [vmem:[#allocation71_spill] sm:$0xff] %v13435_v41  ;;  %vm5621_vm6 = vcmp.ge.f32.partialorder %v5613_v50, 0.0  ;;  %v5629_v10 = vmul.f32 0.01, %v5613_v50  ;;  %vm5683_vm7 = vcmp.ge.f32.partialorder %v5675_v42, 0.0  ;;  %v13438_v54 = vpop.f32.mrb[125].mxu0 }
 0xbde   : > { %v5585_v63 = vmul.f32 %v13144_v33, %v5575_v31  ;;  %14326 = vst [vmem:[#allocation86_spill] sm:$0xff] %v13438_v54  ;;  %v13441_v24 = vadd.f32 %v14310_v20, %v6338_v16  ;;  %v5531_v29 = vadd.f32 %v5523_v15, %v5469_v3  ;;  %v5691_v23 = vmul.f32 0.01, %v5675_v42 }
 0xbdf   : > { %vm5745_vm8 = vcmp.ge.f32.partialorder %v5737_v60, 0.0  ;;  %v5637_v57 = vsel %vm5621_vm6, %v5613_v50, %v5629_v10  ;;  %v5753_v43 = vmul.f32 0.01, %v5737_v60  ;;  %vm5807_vm9 = vcmp.ge.f32.partialorder %v5799_v25, 0.0 }
 0xbe0   : > { %14327 = vst [vmem:[#allocation69_spill] sm:$0xff] %v13441_v24  ;;  %v5815_v55 = vmul.f32 0.01, %v5799_v25  ;;  %v5593_v49 = vadd.f32 %v5585_v63, %v5531_v29  ;;  %v5647_v28 = vmul.f32 %v13157_v37, %v5637_v57  ;;  %v5699_v26 = vsel %vm5683_vm7, %v5675_v42, %v5691_v23 }
 0xbe1   : > { %v5709_v58 = vmul.f32 %v13170_v36, %v5699_v26  ;;  %v5761_v39 = vsel %vm5745_vm8, %v5737_v60, %v5753_v43  ;;  %v5851_v3 = vmul.f32 %v13191_v62, %v14313_v56  ;;  %v5913_v10 = vmul.f32 %v13200_v48, %v14313_v56 }
 0xbe2   : > { %v5823_v31 = vsel %vm5807_vm9, %v5799_v25, %v5815_v55  ;;  %v5655_v16 = vadd.f32 %v5647_v28, %v5593_v49  ;;  %v5771_v50 = vmul.f32 %v13179_v9, %v5761_v39  ;;  %v5975_v42 = vmul.f32 %v13209_v22, %v14313_v56 }
 0xbe3   : > { %v5833_v15 = vmul.f32 %v13188_v45, %v5823_v31  ;;  %v5861_v63 = vadd.f32 %v13194_v11, %v5851_v3  ;;  %v6037_v60 = vmul.f32 %v13218_v12, %v14313_v56  ;;  %v6099_v25 = vmul.f32 %v13227_v51, %v14313_v56 }
 0xbe4   : > { %v5717_v29 = vadd.f32 %v5709_v58, %v5655_v16  ;;  %v5923_v23 = vadd.f32 %v13203_v34, %v5913_v10  ;;  %v6161_v57 = vmul.f32 %v13236_v13, %v14313_v56  ;;  %v6223_v43 = vmul.f32 %v13245_v27, %v14313_v56 }
 0xbe5   : > { %vm5869_vm10 = vcmp.ge.f32.partialorder %v5861_v63, 0.0  ;;  %v5877_v55 = vmul.f32 0.01, %v5861_v63  ;;  %v5985_v49 = vadd.f32 %v13212_v61, %v5975_v42  ;;  %v6047_v28 = vadd.f32 %v13221_v7, %v6037_v60 }
 0xbe6   : > { %v5779_v26 = vadd.f32 %v5771_v50, %v5717_v29  ;;  %vm5931_vm11 = vcmp.ge.f32.partialorder %v5923_v23, 0.0  ;;  %v5939_v39 = vmul.f32 0.01, %v5923_v23  ;;  %v6109_v31 = vadd.f32 %v13230_v1, %v6099_v25 }
 0xbe7   : > { %v5885_v58 = vsel %vm5869_vm10, %v5861_v63, %v5877_v55  ;;  %vm5993_vm12 = vcmp.ge.f32.partialorder %v5985_v49, 0.0  ;;  %v6001_v3 = vmul.f32 0.01, %v5985_v49  ;;  %vm6055_vm13 = vcmp.ge.f32.partialorder %v6047_v28, 0.0 }
 0xbe8   : > { %v5841_v16 = vadd.f32 %v5833_v15, %v5779_v26  ;;  %v5895_v10 = vmul.f32 %v13197_v5, %v5885_v58  ;;  %v5947_v19 = vsel %vm5931_vm11, %v5923_v23, %v5939_v39  ;;  %v6063_v54 = vmul.f32 0.01, %v6047_v28 }
 0xbe9   : > { %v5957_v41 = vmul.f32 %v13206_v35, %v5947_v19  ;;  %v6009_v24 = vsel %vm5993_vm12, %v5985_v49, %v6001_v3  ;;  %vm6117_vm0 = vcmp.ge.f32.partialorder %v6109_v31, 0.0  ;;  %v6125_v42 = vmul.f32 0.01, %v6109_v31 }
 0xbea   : > { %v5903_v60 = vadd.f32 %v5895_v10, %v5841_v16  ;;  %v6019_v50 = vmul.f32 %v13215_v46, %v6009_v24  ;;  %v6071_v29 = vsel %vm6055_vm13, %v6047_v28, %v6063_v54  ;;  %v6171_v25 = vadd.f32 %v13239_v6, %v6161_v57  ;;  %v14328_v54 = vld [vmem:[#allocation87_spill] sm:$0xff]  ;;  %v13485_v10 = vpop.f32.mrb[85].mxu1 }
 0xbeb   : > { %v6081_v63 = vmul.f32 %v13224_v21, %v6071_v29  ;;  %v6133_v55 = vsel %vm6117_vm0, %v6109_v31, %v6125_v42  ;;  %v6233_v15 = vadd.f32 %v13248_v0, %v6223_v43  ;;  %v6285_v23 = vmul.f32 %v13256_v44, %v14313_v56  ;;  %14330 = vst [vmem:[#allocation87_spill] sm:$0xff] %v13485_v10  ;;  %v14331_v29 = vld [vmem:[#allocation54_spill] sm:$0xff]  ;;  %v14338_v10 = vld [vmem:[#allocation55_spill] sm:$0xff] }
 0xbec   : > { %v5965_v26 = vadd.f32 %v5957_v41, %v5903_v60  ;;  %v6143_v19 = vmul.f32 %v13233_v17, %v6133_v55  ;;  %vm6179_vm1 = vcmp.ge.f32.partialorder %v6171_v25, 0.0  ;;  %v6187_v49 = vmul.f32 0.01, %v6171_v25  ;;  %v14329_v41 = vld [vmem:[#allocation79_spill] sm:$0xff]  ;;  %v14334_v17 = vld [vmem:[#allocation62_spill] sm:$0xff] }
 0xbed   : > { %vm6241_vm14 = vcmp.ge.f32.partialorder %v6233_v15, 0.0  ;;  %v6249_v39 = vmul.f32 0.01, %v6233_v15  ;;  %v6295_v24 = vadd.f32 %v13259_v38, %v6285_v23  ;;  %v5357_v57 = vmul.f32 %v13099_v4, %v14328_v54 }
 0xbee   : > { %v6027_v28 = vadd.f32 %v6019_v50, %v5965_v26  ;;  %v6195_v58 = vsel %vm6179_vm1, %v6171_v25, %v6187_v49  ;;  %v5419_v43 = vmul.f32 %v13112_v14, %v14328_v54  ;;  %v5481_v56 = vmul.f32 %v14314_v47, %v14328_v54  ;;  %v14332_v50 = vld [vmem:[#allocation57_spill] sm:$0xff]  ;;  %v14333_v26 = vld [vmem:[#allocation60_spill] sm:$0xff] }
 0xbef   : > { %v6205_v31 = vmul.f32 %v14329_v41, %v6195_v58  ;;  %v6257_v3 = vsel %vm6241_vm14, %v6233_v15, %v6249_v39  ;;  %vm6303_vm15 = vcmp.ge.f32.partialorder %v6295_v24, 0.0  ;;  %v6311_v16 = vmul.f32 0.01, %v6295_v24  ;;  %v14335_v58 = vld [vmem:[#allocation64_spill] sm:$0xff] }
 0xbf0   : > { %v6089_v42 = vadd.f32 %v6081_v63, %v6027_v28  ;;  %v6267_v60 = vmul.f32 %v13251_v30, %v6257_v3  ;;  %v5367_v55 = vadd.f32 %v14331_v29, %v5357_v57  ;;  %v5429_v25 = vadd.f32 %v14332_v50, %v5419_v43  ;;  %v14336_v41 = vld [vmem:[#allocation84_spill] sm:$0xff] }
 0xbf1   : > { %v6319_v23 = vsel %vm6303_vm15, %v6295_v24, %v6311_v16  ;;  %v5491_v49 = vadd.f32 %v14333_v26, %v5481_v56  ;;  %v5543_v47 = vmul.f32 %v14334_v17, %v14328_v54  ;;  %v5605_v15 = vmul.f32 %v14335_v58, %v14328_v54  ;;  %v14337_v24 = vld [vmem:[#allocation63_spill] sm:$0xff] }
 0xbf2   : > { %v6151_v39 = vadd.f32 %v6143_v19, %v6089_v42  ;;  %v6329_v14 = vmul.f32 %v14336_v41, %v6319_v23  ;;  %vm5375_vm2 = vcmp.ge.f32.partialorder %v5367_v55, 0.0  ;;  %v5383_v63 = vmul.f32 0.01, %v5367_v55  ;;  %v14339_v19 = vld [vmem:[#allocation66_spill] sm:$0xff] }
 0xbf3   : > { %vm5437_vm3 = vcmp.ge.f32.partialorder %v5429_v25, 0.0  ;;  %v5445_v28 = vmul.f32 0.01, %v5429_v25  ;;  %vm5499_vm4 = vcmp.ge.f32.partialorder %v5491_v49, 0.0  ;;  %v5507_v57 = vmul.f32 0.01, %v5491_v49 }
 0xbf4   : > { %v6213_v3 = vadd.f32 %v6205_v31, %v6151_v39  ;;  %v5391_v43 = vsel %vm5375_vm2, %v5367_v55, %v5383_v63  ;;  %v5553_v16 = vadd.f32 %v14337_v24, %v5543_v47  ;;  %v5615_v56 = vadd.f32 %v14322_v40, %v5605_v15  ;;  %v14340_v39 = vld [vmem:[#allocation68_spill] sm:$0xff] }
 0xbf5   : > { %v5401_v26 = vmul.f32 %v14338_v10, %v5391_v43  ;;  %v5453_v30 = vsel %vm5437_vm3, %v5429_v25, %v5445_v28  ;;  %v5515_v17 = vsel %vm5499_vm4, %v5491_v49, %v5507_v57  ;;  %v5667_v42 = vmul.f32 %v14339_v19, %v14328_v54  ;;  %v14341_v49 = vld [vmem:[#allocation70_spill] sm:$0xff] }
 0xbf6   : > { %v6275_v23 = vadd.f32 %v6267_v60, %v6213_v3  ;;  %v5463_v41 = vmul.f32 %v14321_v59, %v5453_v30  ;;  %v5525_v58 = vmul.f32 %v14324_v32, %v5515_v17  ;;  %vm5561_vm5 = vcmp.ge.f32.partialorder %v5553_v16, 0.0 }
 0xbf7   : > { %v5569_v50 = vmul.f32 0.01, %v5553_v16  ;;  %vm5623_vm6 = vcmp.ge.f32.partialorder %v5615_v56, 0.0  ;;  %v5631_v31 = vmul.f32 0.01, %v5615_v56  ;;  %v5677_v47 = vadd.f32 %v14306_v18, %v5667_v42 }
 0xbf8   : > { %v6337_v55 = vadd.f32 %v6329_v14, %v6275_v23  ;;  %v5471_v15 = vadd.f32 %v5463_v41, %v5401_v26  ;;  %v5729_v25 = vmul.f32 %v14340_v39, %v14328_v54  ;;  %v5791_v63 = vmul.f32 %v14341_v49, %v14328_v54 }
 0xbf9   : > { %v5577_v28 = vsel %vm5561_vm5, %v5553_v16, %v5569_v50  ;;  %v5639_v60 = vsel %vm5623_vm6, %v5615_v56, %v5631_v31  ;;  %vm5685_vm7 = vcmp.ge.f32.partialorder %v5677_v47, 0.0  ;;  %v5693_v30 = vmul.f32 0.01, %v5677_v47 }
 0xbfa   : > { %v6347_v17 = vadd.f32 %v14310_v20, %v6337_v55  ;;  %v5533_v57 = vadd.f32 %v5525_v58, %v5471_v15  ;;  %v5587_v3 = vmul.f32 %v13144_v33, %v5577_v28  ;;  %v5649_v43 = vmul.f32 %v13157_v37, %v5639_v60 }
 0xbfb   : > { %v5701_v42 = vsel %vm5685_vm7, %v5677_v47, %v5693_v30  ;;  %v5739_v14 = vadd.f32 %v14323_v2, %v5729_v25  ;;  %v5801_v41 = vadd.f32 %v14309_v53, %v5791_v63  ;;  %v5853_v26 = vmul.f32 %v13191_v62, %v14328_v54  ;;  %v14342_v47 = vld [vmem:[#allocation67_spill] sm:$0xff] }
 0xbfc   : > { %v6365_v50 = vrot.slane %v6347_v17, %v14312_v52  ;;  %v5595_v16 = vadd.f32 %v5587_v3, %v5533_v57  ;;  %v5711_v56 = vmul.f32 %v13170_v36, %v5701_v42  ;;  %v5915_v58 = vmul.f32 %v13200_v48, %v14328_v54 }
 0xbfd   : > { %vm5747_vm8 = vcmp.ge.f32.partialorder %v5739_v14, 0.0  ;;  %v5755_v23 = vmul.f32 0.01, %v5739_v14  ;;  %vm5809_vm9 = vcmp.ge.f32.partialorder %v5801_v41, 0.0  ;;  %v5817_v31 = vmul.f32 0.01, %v5801_v41 }
 0xbfe   : > { %v14343_v55 = vrot.slane %v14342_v47, %v14312_v52  ;;  %v5657_v25 = vadd.f32 %v5649_v43, %v5595_v16  ;;  %v5863_v63 = vadd.f32 %v13194_v11, %v5853_v26  ;;  %v5925_v28 = vadd.f32 %v13203_v34, %v5915_v58 }
 0xbff   : > { %v5763_v60 = vsel %vm5747_vm8, %v5739_v14, %v5755_v23  ;;  %v5825_v30 = vsel %vm5809_vm9, %v5801_v41, %v5817_v31  ;;  %v5977_v17 = vmul.f32 %v13209_v22, %v14328_v54  ;;  %v6039_v57 = vmul.f32 %v13218_v12, %v14328_v54 }
 0xc00   : > { %v13522_v15 = vcombine.low %v14343_v55, %v6365_v50  ;;  %v5719_v3 = vadd.f32 %v5711_v56, %v5657_v25  ;;  %v5773_v42 = vmul.f32 %v13179_v9, %v5763_v60  ;;  %v5835_v47 = vmul.f32 %v13188_v45, %v5825_v30 }
 0xc01   : > { %vm5871_vm10 = vcmp.ge.f32.partialorder %v5863_v63, 0.0  ;;  %v5879_v50 = vmul.f32 0.01, %v5863_v63  ;;  %vm5933_vm11 = vcmp.ge.f32.partialorder %v5925_v28, 0.0  ;;  %v5941_v43 = vmul.f32 0.01, %v5925_v28 }
 0xc02   : > { %14344 = vst [vmem:[#allocation54_spill] sm:$0xff] %v13522_v15  ;;  %v5987_v26 = vadd.f32 %v13212_v61, %v5977_v17  ;;  %v5781_v16 = vadd.f32 %v5773_v42, %v5719_v3  ;;  %v6049_v14 = vadd.f32 %v13221_v7, %v6039_v57  ;;  %v6101_v41 = vmul.f32 %v13227_v51, %v14328_v54 }
 0xc03   : > { %v6163_v58 = vmul.f32 %v13236_v13, %v14328_v54  ;;  %v5887_v56 = vsel %vm5871_vm10, %v5863_v63, %v5879_v50  ;;  %v5949_v23 = vsel %vm5933_vm11, %v5925_v28, %v5941_v43  ;;  %v6225_v63 = vmul.f32 %v13245_v27, %v14328_v54 }
 0xc04   : > { %vm5995_vm12 = vcmp.ge.f32.partialorder %v5987_v26, 0.0  ;;  %v6003_v31 = vmul.f32 0.01, %v5987_v26  ;;  %v5843_v55 = vadd.f32 %v5835_v47, %v5781_v16  ;;  %v5897_v25 = vmul.f32 %v13197_v5, %v5887_v56 }
 0xc05   : > { %v5959_v60 = vmul.f32 %v13206_v35, %v5949_v23  ;;  %vm6057_vm13 = vcmp.ge.f32.partialorder %v6049_v14, 0.0  ;;  %v6065_v17 = vmul.f32 0.01, %v6049_v14  ;;  %v6111_v57 = vadd.f32 %v13230_v1, %v6101_v41 }
 0xc06   : > { %v6011_v30 = vsel %vm5995_vm12, %v5987_v26, %v6003_v31  ;;  %v6173_v3 = vadd.f32 %v13239_v6, %v6163_v58  ;;  %v5905_v42 = vadd.f32 %v5897_v25, %v5843_v55  ;;  %v6287_v28 = vmul.f32 %v13256_v44, %v14328_v54  ;;  %v14345_v31 = vld [vmem:[#allocation56_spill] sm:$0xff] }
 0xc07   : > { %v6021_v15 = vmul.f32 %v13215_v46, %v6011_v30  ;;  %v6073_v47 = vsel %vm6057_vm13, %v6049_v14, %v6065_v17  ;;  %vm6119_vm0 = vcmp.ge.f32.partialorder %v6111_v57, 0.0  ;;  %v6127_v50 = vmul.f32 0.01, %v6111_v57  ;;  %v14346_v14 = vld [vmem:[#allocation77_spill] sm:$0xff] }
 0xc08   : > { %vm6181_vm1 = vcmp.ge.f32.partialorder %v6173_v3, 0.0  ;;  %v5967_v43 = vadd.f32 %v5959_v60, %v5905_v42  ;;  %v6083_v26 = vmul.f32 %v13224_v21, %v6073_v47  ;;  %v6189_v16 = vmul.f32 0.01, %v6173_v3  ;;  %v14347_v60 = vld [vmem:[#allocation79_spill] sm:$0xff] }
 0xc09   : > { %v6235_v41 = vadd.f32 %v13248_v0, %v6225_v63  ;;  %v6135_v58 = vsel %vm6119_vm0, %v6111_v57, %v6127_v50  ;;  %v6297_v56 = vadd.f32 %v13259_v38, %v6287_v28  ;;  %v5358_v23 = vmul.f32 %v13099_v4, %v13433_v8  ;;  %v14348_v28 = vld [vmem:[#allocation57_spill] sm:$0xff]  ;;  %v14349_v38 = vld [vmem:[#allocation59_spill] sm:$0xff] }
 0xc0a   : > { %v5420_v55 = vmul.f32 %v14345_v31, %v13433_v8  ;;  %v6029_v54 = vadd.f32 %v6021_v15, %v5967_v43  ;;  %v6145_v25 = vmul.f32 %v14346_v14, %v6135_v58  ;;  %v6197_v30 = vsel %vm6181_vm1, %v6173_v3, %v6189_v16  ;;  %v14350_v15 = vld [vmem:[#allocation62_spill] sm:$0xff]  ;;  %v14351_v3 = vld [vmem:[#allocation64_spill] sm:$0xff] }
 0xc0b   : > { %vm6243_vm14 = vcmp.ge.f32.partialorder %v6235_v41, 0.0  ;;  %v6207_v17 = vmul.f32 %v14347_v60, %v6197_v30  ;;  %v6251_v42 = vmul.f32 0.01, %v6235_v41  ;;  %vm6305_vm15 = vcmp.ge.f32.partialorder %v6297_v56, 0.0  ;;  %v14352_v30 = vld [vmem:[#allocation81_spill] sm:$0xff]  ;;  %v14353_v14 = vld [vmem:[#allocation84_spill] sm:$0xff] }
 0xc0c   : > { %v6313_v47 = vmul.f32 0.01, %v6297_v56  ;;  %v6091_v63 = vadd.f32 %v6083_v26, %v6029_v54  ;;  %v5368_v57 = vadd.f32 %v14331_v29, %v5358_v23  ;;  %v5430_v50 = vadd.f32 %v14348_v28, %v5420_v55  ;;  %v14354_v54 = vld [vmem:[#allocation60_spill] sm:$0xff] }
 0xc0d   : > { %v5482_v21 = vmul.f32 %v14349_v38, %v13433_v8  ;;  %v6259_v44 = vsel %vm6243_vm14, %v6235_v41, %v6251_v42  ;;  %v5544_v43 = vmul.f32 %v14350_v15, %v13433_v8  ;;  %v5606_v16 = vmul.f32 %v14351_v3, %v13433_v8 }
 0xc0e   : > { %v6321_v31 = vsel %vm6305_vm15, %v6297_v56, %v6313_v47  ;;  %v6153_v58 = vadd.f32 %v6145_v25, %v6091_v63  ;;  %v6269_v60 = vmul.f32 %v14352_v30, %v6259_v44  ;;  %vm5376_vm2 = vcmp.ge.f32.partialorder %v5368_v57, 0.0 }
 0xc0f   : > { %v6331_v26 = vmul.f32 %v14353_v14, %v6321_v31  ;;  %v5384_v23 = vmul.f32 0.01, %v5368_v57  ;;  %vm5438_vm3 = vcmp.ge.f32.partialorder %v5430_v50, 0.0  ;;  %v5446_v55 = vmul.f32 0.01, %v5430_v50 }
 0xc10   : > { %v5492_v28 = vadd.f32 %v14354_v54, %v5482_v21  ;;  %v6215_v38 = vadd.f32 %v6207_v17, %v6153_v58  ;;  %v5554_v41 = vadd.f32 %v14337_v24, %v5544_v43  ;;  %v5616_v56 = vadd.f32 %v14322_v40, %v5606_v16 }
 0xc11   : > { %v5668_v42 = vmul.f32 %v14339_v19, %v13433_v8  ;;  %v5392_v47 = vsel %vm5376_vm2, %v5368_v57, %v5384_v23  ;;  %v5454_v25 = vsel %vm5438_vm3, %v5430_v50, %v5446_v55 }
 0xc12   : > { %vm5500_vm4 = vcmp.ge.f32.partialorder %v5492_v28, 0.0  ;;  %v5508_v44 = vmul.f32 0.01, %v5492_v28  ;;  %v6277_v63 = vadd.f32 %v6269_v60, %v6215_v38  ;;  %v5402_v31 = vmul.f32 %v14338_v10, %v5392_v47 }
 0xc13   : > { %v5464_v14 = vmul.f32 %v14321_v59, %v5454_v25  ;;  %vm5562_vm5 = vcmp.ge.f32.partialorder %v5554_v41, 0.0  ;;  %v5570_v21 = vmul.f32 0.01, %v5554_v41  ;;  %vm5624_vm6 = vcmp.ge.f32.partialorder %v5616_v56, 0.0 }
 0xc14   : > { %v5516_v3 = vsel %vm5500_vm4, %v5492_v28, %v5508_v44  ;;  %v5632_v17 = vmul.f32 0.01, %v5616_v56  ;;  %v6339_v43 = vadd.f32 %v6331_v26, %v6277_v63  ;;  %v5678_v40 = vadd.f32 %v14306_v18, %v5668_v42 }
 0xc15   : > { %v5472_v58 = vadd.f32 %v5464_v14, %v5402_v31  ;;  %v5526_v16 = vmul.f32 %v14324_v32, %v5516_v3  ;;  %v5578_v57 = vsel %vm5562_vm5, %v5554_v41, %v5570_v21  ;;  %v5730_v38 = vmul.f32 %v14340_v39, %v13433_v8  ;;  %v14355_v31 = vld [vmem:[#allocation69_spill] sm:$0xff] }
 0xc16   : > { %v5640_v50 = vsel %vm5624_vm6, %v5616_v56, %v5632_v17  ;;  %v5792_v60 = vmul.f32 %v14341_v49, %v13433_v8  ;;  %v6349_v23 = vadd.f32 %v14310_v20, %v6339_v43  ;;  %v5588_v55 = vmul.f32 %v13144_v33, %v5578_v57 }
 0xc17   : > { %v5534_v28 = vadd.f32 %v5526_v16, %v5472_v58  ;;  %v5650_v26 = vmul.f32 %v13157_v37, %v5640_v50  ;;  %vm5686_vm7 = vcmp.ge.f32.partialorder %v5678_v40, 0.0  ;;  %v5694_v14 = vmul.f32 0.01, %v5678_v40 }
 0xc18   : > { %v5740_v3 = vadd.f32 %v14323_v2, %v5730_v38  ;;  %v5802_v41 = vadd.f32 %v14309_v53, %v5792_v60  ;;  %v6373_v56 = vrot.slane %v6349_v23, %v14312_v52  ;;  %v5854_v47 = vmul.f32 %v13191_v62, %v13433_v8 }
 0xc19   : > { %v5596_v42 = vadd.f32 %v5588_v55, %v5534_v28  ;;  %v5916_v25 = vmul.f32 %v13200_v48, %v13433_v8  ;;  %v5702_v44 = vsel %vm5686_vm7, %v5678_v40, %v5694_v14  ;;  %v14356_v21 = vrot.slane %v14355_v31, %v14312_v52 }
 0xc1a   : > { %vm5748_vm8 = vcmp.ge.f32.partialorder %v5740_v3, 0.0  ;;  %v5756_v63 = vmul.f32 0.01, %v5740_v3  ;;  %vm5810_vm9 = vcmp.ge.f32.partialorder %v5802_v41, 0.0  ;;  %v5712_v58 = vmul.f32 %v13170_v36, %v5702_v44 }
 0xc1b   : > { %v13592_v17 = vcombine.low %v14356_v21, %v6373_v56  ;;  %v5658_v43 = vadd.f32 %v5650_v26, %v5596_v42  ;;  %v5818_v16 = vmul.f32 0.01, %v5802_v41  ;;  %v5864_v50 = vadd.f32 %v13194_v11, %v5854_v47 }
 0xc1c   : > { %v5764_v57 = vsel %vm5748_vm8, %v5740_v3, %v5756_v63  ;;  %v5926_v38 = vadd.f32 %v13203_v34, %v5916_v25  ;;  %v5978_v40 = vmul.f32 %v13209_v22, %v13433_v8  ;;  %v6040_v55 = vmul.f32 %v13218_v12, %v13433_v8 }
 0xc1d   : > { %14357 = vst [vmem:[#allocation63_spill] sm:$0xff] %v13592_v17  ;;  %v5720_v60 = vadd.f32 %v5712_v58, %v5658_v43  ;;  %v5774_v23 = vmul.f32 %v13179_v9, %v5764_v57  ;;  %v5826_v28 = vsel %vm5810_vm9, %v5802_v41, %v5818_v16  ;;  %vm5872_vm10 = vcmp.ge.f32.partialorder %v5864_v50, 0.0 }
 0xc1e   : > { %v5836_v26 = vmul.f32 %v13188_v45, %v5826_v28  ;;  %v5880_v14 = vmul.f32 0.01, %v5864_v50  ;;  %vm5934_vm11 = vcmp.ge.f32.partialorder %v5926_v38, 0.0  ;;  %v5942_v56 = vmul.f32 0.01, %v5926_v38 }
 0xc1f   : > { %v5782_v3 = vadd.f32 %v5774_v23, %v5720_v60  ;;  %v5988_v42 = vadd.f32 %v13212_v61, %v5978_v40  ;;  %v6050_v47 = vadd.f32 %v13221_v7, %v6040_v55  ;;  %v6102_v44 = vmul.f32 %v13227_v51, %v13433_v8 }
 0xc20   : > { %v5888_v25 = vsel %vm5872_vm10, %v5864_v50, %v5880_v14  ;;  %v6164_v41 = vmul.f32 %v13236_v13, %v13433_v8  ;;  %v6226_v63 = vmul.f32 %v13245_v27, %v13433_v8  ;;  %v5950_v43 = vsel %vm5934_vm11, %v5926_v38, %v5942_v56  ;;  %v14358_v14 = vld [vmem:[#allocation71_spill] sm:$0xff]  ;;  %v14359_v56 = vld [vmem:[#allocation82_spill] sm:$0xff] }
 0xc21   : > { %v5844_v31 = vadd.f32 %v5836_v26, %v5782_v3  ;;  %v5898_v21 = vmul.f32 %v13197_v5, %v5888_v25  ;;  %vm5996_vm12 = vcmp.ge.f32.partialorder %v5988_v42, 0.0  ;;  %v5960_v58 = vmul.f32 %v13206_v35, %v5950_v43 }
 0xc22   : > { %v6004_v16 = vmul.f32 0.01, %v5988_v42  ;;  %vm6058_vm13 = vcmp.ge.f32.partialorder %v6050_v47, 0.0  ;;  %v6066_v57 = vmul.f32 0.01, %v6050_v47  ;;  %v6112_v40 = vadd.f32 %v13230_v1, %v6102_v44 }
 0xc23   : > { %v5906_v50 = vadd.f32 %v5898_v21, %v5844_v31  ;;  %v6174_v60 = vadd.f32 %v13239_v6, %v6164_v41  ;;  %v6236_v23 = vadd.f32 %v13248_v0, %v6226_v63  ;;  %v5360_v26 = vmul.f32 %v13099_v4, %v14358_v14  ;;  %v14360_v41 = vld [vmem:[#allocation75_spill] sm:$0xff] }
 0xc24   : > { %v6012_v28 = vsel %vm5996_vm12, %v5988_v42, %v6004_v16  ;;  %v6074_v55 = vsel %vm6058_vm13, %v6050_v47, %v6066_v57  ;;  %vm6120_vm0 = vcmp.ge.f32.partialorder %v6112_v40, 0.0  ;;  %v6288_v25 = vmul.f32 %v14359_v56, %v13433_v8  ;;  %v14363_v8 = vld [vmem:[#allocation83_spill] sm:$0xff]  ;;  %v14364_v56 = vld [vmem:[#allocation77_spill] sm:$0xff] }
 0xc25   : > { %v5968_v3 = vadd.f32 %v5960_v58, %v5906_v50  ;;  %v6022_v38 = vmul.f32 %v13215_v46, %v6012_v28  ;;  %v6128_v43 = vmul.f32 0.01, %v6112_v40  ;;  %vm6182_vm1 = vcmp.ge.f32.partialorder %v6174_v60, 0.0  ;;  %v14361_v58 = vld [vmem:[#allocation56_spill] sm:$0xff]  ;;  %v14362_v50 = vld [vmem:[#allocation59_spill] sm:$0xff] }
 0xc26   : > { %v6190_v31 = vmul.f32 0.01, %v6174_v60  ;;  %vm6244_vm14 = vcmp.ge.f32.partialorder %v6236_v23, 0.0  ;;  %v6084_v21 = vmul.f32 %v14360_v41, %v6074_v55  ;;  %v6252_v63 = vmul.f32 0.01, %v6236_v23  ;;  %v14366_v41 = vld [vmem:[#allocation57_spill] sm:$0xff] }
 0xc27   : > { %v6030_v44 = vadd.f32 %v6022_v38, %v5968_v3  ;;  %v5370_v42 = vadd.f32 %v14331_v29, %v5360_v26  ;;  %v6136_v47 = vsel %vm6120_vm0, %v6112_v40, %v6128_v43  ;;  %v5422_v57 = vmul.f32 %v14361_v58, %v14358_v14  ;;  %v14365_v3 = vld [vmem:[#allocation79_spill] sm:$0xff] }
 0xc28   : > { %v6198_v16 = vsel %vm6182_vm1, %v6174_v60, %v6190_v31  ;;  %v5484_v28 = vmul.f32 %v14362_v50, %v14358_v14  ;;  %v6260_v52 = vsel %vm6244_vm14, %v6236_v23, %v6252_v63  ;;  %v6298_v17 = vadd.f32 %v14363_v8, %v6288_v25  ;;  %v14367_v23 = vld [vmem:[#allocation64_spill] sm:$0xff] }
 0xc29   : > { %v6092_v20 = vadd.f32 %v6084_v21, %v6030_v44  ;;  %v6146_v46 = vmul.f32 %v14364_v56, %v6136_v47  ;;  %vm5378_vm15 = vcmp.ge.f32.partialorder %v5370_v42, 0.0  ;;  %v6208_v55 = vmul.f32 %v14365_v3, %v6198_v16 }
 0xc2a   : > { %v5386_v38 = vmul.f32 0.01, %v5370_v42  ;;  %v5432_v26 = vadd.f32 %v14366_v41, %v5422_v57  ;;  %v5494_v40 = vadd.f32 %v14354_v54, %v5484_v28  ;;  %v13633_v60 = vmul.f32 %v14352_v30, %v6260_v52  ;;  %v14368_v28 = vld [vmem:[#allocation65_spill] sm:$0xff] }
 0xc2b   : > { %v5546_v43 = vmul.f32 %v14350_v15, %v14358_v14  ;;  %v5608_v25 = vmul.f32 %v14367_v23, %v14358_v14  ;;  %v5670_v31 = vmul.f32 %v14339_v19, %v14358_v14  ;;  %vm6306_vm2 = vcmp.ge.f32.partialorder %v6298_v17, 0.0 }
 0xc2c   : > { %v6314_v44 = vmul.f32 0.01, %v6298_v17  ;;  %v5394_v21 = vsel %vm5378_vm15, %v5370_v42, %v5386_v38  ;;  %vm5440_vm3 = vcmp.ge.f32.partialorder %v5432_v26, 0.0  ;;  %v6154_v63 = vadd.f32 %v6146_v46, %v6092_v20 }
 0xc2d   : > { %v5448_v47 = vmul.f32 0.01, %v5432_v26  ;;  %vm5502_vm4 = vcmp.ge.f32.partialorder %v5494_v40, 0.0  ;;  %v5510_v16 = vmul.f32 0.01, %v5494_v40  ;;  %v5404_v52 = vmul.f32 %v14338_v10, %v5394_v21 }
 0xc2e   : > { %v5556_v57 = vadd.f32 %v14337_v24, %v5546_v43  ;;  %v5618_v30 = vadd.f32 %v14368_v28, %v5608_v25  ;;  %v5680_v3 = vadd.f32 %v14306_v18, %v5670_v31  ;;  %v5732_v19 = vmul.f32 %v14340_v39, %v14358_v14 }
 0xc2f   : > { %v5456_v23 = vsel %vm5440_vm3, %v5432_v26, %v5448_v47  ;;  %v5518_v8 = vsel %vm5502_vm4, %v5494_v40, %v5510_v16  ;;  %v5794_v42 = vmul.f32 %v14341_v49, %v14358_v14  ;;  %v6322_v46 = vsel %vm6306_vm2, %v6298_v17, %v6314_v44 }
 0xc30   : > { %v5466_v20 = vmul.f32 %v14321_v59, %v5456_v23  ;;  %v5528_v38 = vmul.f32 %v14324_v32, %v5518_v8  ;;  %vm5564_vm5 = vcmp.ge.f32.partialorder %v5556_v57, 0.0  ;;  %v5572_v43 = vmul.f32 0.01, %v5556_v57 }
 0xc31   : > { %vm5626_vm6 = vcmp.ge.f32.partialorder %v5618_v30, 0.0  ;;  %v5634_v25 = vmul.f32 0.01, %v5618_v30  ;;  %vm5688_vm7 = vcmp.ge.f32.partialorder %v5680_v3, 0.0  ;;  %v5696_v26 = vmul.f32 0.01, %v5680_v3 }
 0xc32   : > { %v5474_v31 = vadd.f32 %v5466_v20, %v5404_v52  ;;  %v5742_v40 = vadd.f32 %v14323_v2, %v5732_v19  ;;  %v5804_v21 = vadd.f32 %v14309_v53, %v5794_v42  ;;  %v5580_v47 = vsel %vm5564_vm5, %v5556_v57, %v5572_v43 }
 0xc33   : > { %v5642_v16 = vsel %vm5626_vm6, %v5618_v30, %v5634_v25  ;;  %v5856_v17 = vmul.f32 %v13191_v62, %v14358_v14  ;;  %v5918_v23 = vmul.f32 %v13200_v48, %v14358_v14  ;;  %v6216_v8 = vadd.f32 %v6208_v55, %v6154_v63 }
 0xc34   : > { %v5536_v44 = vadd.f32 %v5528_v38, %v5474_v31  ;;  %v5590_v32 = vmul.f32 %v13144_v33, %v5580_v47  ;;  %v5652_v59 = vmul.f32 %v13157_v37, %v5642_v16  ;;  %v5704_v52 = vsel %vm5688_vm7, %v5680_v3, %v5696_v26 }
 0xc35   : > { %vm5750_vm8 = vcmp.ge.f32.partialorder %v5742_v40, 0.0  ;;  %v5758_v20 = vmul.f32 0.01, %v5742_v40  ;;  %vm5812_vm9 = vcmp.ge.f32.partialorder %v5804_v21, 0.0  ;;  %v5820_v42 = vmul.f32 0.01, %v5804_v21 }
 0xc36   : > { %v5598_v19 = vadd.f32 %v5590_v32, %v5536_v44  ;;  %v5866_v30 = vadd.f32 %v13194_v11, %v5856_v17  ;;  %v5928_v57 = vadd.f32 %v13203_v34, %v5918_v23  ;;  %v5980_v25 = vmul.f32 %v13209_v22, %v14358_v14 }
 0xc37   : > { %v5766_v43 = vsel %vm5750_vm8, %v5742_v40, %v5758_v20  ;;  %v6042_v55 = vmul.f32 %v13218_v12, %v14358_v14  ;;  %v6104_v63 = vmul.f32 %v13227_v51, %v14358_v14  ;;  %v5714_v38 = vmul.f32 %v13170_v36, %v5704_v52 }
 0xc38   : > { %v5660_v3 = vadd.f32 %v5652_v59, %v5598_v19  ;;  %v5828_v31 = vsel %vm5812_vm9, %v5804_v21, %v5820_v42  ;;  %vm5874_vm10 = vcmp.ge.f32.partialorder %v5866_v30, 0.0  ;;  %v5776_v32 = vmul.f32 %v13179_v9, %v5766_v43 }
 0xc39   : > { %v5882_v26 = vmul.f32 0.01, %v5866_v30  ;;  %vm5936_vm11 = vcmp.ge.f32.partialorder %v5928_v57, 0.0  ;;  %v5944_v47 = vmul.f32 0.01, %v5928_v57  ;;  %v5990_v16 = vadd.f32 %v13212_v61, %v5980_v25 }
 0xc3a   : > { %v5722_v40 = vadd.f32 %v5714_v38, %v5660_v3  ;;  %v6052_v17 = vadd.f32 %v13221_v7, %v6042_v55  ;;  %v6114_v23 = vadd.f32 %v13230_v1, %v6104_v63  ;;  %v6278_v44 = vadd.f32 %v13633_v60, %v6216_v8 }
 0xc3b   : > { %v5838_v59 = vmul.f32 %v13188_v45, %v5828_v31  ;;  %v5890_v20 = vsel %vm5874_vm10, %v5866_v30, %v5882_v26  ;;  %v6166_v21 = vmul.f32 %v13236_v13, %v14358_v14  ;;  %v5952_v19 = vsel %vm5936_vm11, %v5928_v57, %v5944_v47  ;;  %v14369_v30 = vld [vmem:[#allocation84_spill] sm:$0xff]  ;;  %v14370_v31 = vld [vmem:[#allocation86_spill] sm:$0xff] }
 0xc3c   : > { %v5784_v52 = vadd.f32 %v5776_v32, %v5722_v40  ;;  %vm5998_vm12 = vcmp.ge.f32.partialorder %v5990_v16, 0.0  ;;  %v6228_v42 = vmul.f32 %v13245_v27, %v14358_v14  ;;  %v5900_v43 = vmul.f32 %v13197_v5, %v5890_v20  ;;  %v14371_v5 = vld [vmem:[#allocation74_spill] sm:$0xff] }
 0xc3d   : > { %v6006_v25 = vmul.f32 0.01, %v5990_v16  ;;  %vm6060_vm13 = vcmp.ge.f32.partialorder %v6052_v17, 0.0  ;;  %v6068_v55 = vmul.f32 0.01, %v6052_v17  ;;  %vm6122_vm0 = vcmp.ge.f32.partialorder %v6114_v23, 0.0 }
 0xc3e   : > { %v5846_v63 = vadd.f32 %v5838_v59, %v5784_v52  ;;  %v6130_v60 = vmul.f32 0.01, %v6114_v23  ;;  %v6176_v8 = vadd.f32 %v13239_v6, %v6166_v21  ;;  %v6332_v3 = vmul.f32 %v14369_v30, %v6322_v46  ;;  %v14377_v30 = vld [vmem:[#allocation79_spill] sm:$0xff] }
 0xc3f   : > { %v6014_v38 = vsel %vm5998_vm12, %v5990_v16, %v6006_v25  ;;  %v5359_v57 = vmul.f32 %v13099_v4, %v14370_v31  ;;  %v5962_v26 = vmul.f32 %v13206_v35, %v5952_v19  ;;  %v6238_v47 = vadd.f32 %v13248_v0, %v6228_v42  ;;  %v14372_v16 = vld [vmem:[#allocation82_spill] sm:$0xff] }
 0xc40   : > { %v5908_v32 = vadd.f32 %v5900_v43, %v5846_v63  ;;  %v13686_v40 = vadd.f32 %v6332_v3, %v6278_v44  ;;  %v6076_v20 = vsel %vm6060_vm13, %v6052_v17, %v6068_v55  ;;  %v6138_v27 = vsel %vm6122_vm0, %v6114_v23, %v6130_v60  ;;  %v14373_v44 = vld [vmem:[#allocation75_spill] sm:$0xff] }
 0xc41   : > { %v6192_v59 = vmul.f32 0.01, %v6176_v8  ;;  %v6024_v45 = vmul.f32 %v14371_v5, %v6014_v38  ;;  %vm6184_vm1 = vcmp.ge.f32.partialorder %v6176_v8, 0.0  ;;  %v5369_v46 = vadd.f32 %v14331_v29, %v5359_v57 }
 0xc42   : > { %v5970_v52 = vadd.f32 %v5962_v26, %v5908_v32  ;;  %v6290_v21 = vmul.f32 %v14372_v16, %v14358_v14  ;;  %v5421_v43 = vmul.f32 %v14361_v58, %v14370_v31  ;;  %v5483_v19 = vmul.f32 %v14362_v50, %v14370_v31  ;;  %v14374_v32 = vld [vmem:[#allocation83_spill] sm:$0xff] }
 0xc43   : > { %v5545_v17 = vmul.f32 %v14350_v15, %v14370_v31  ;;  %v6086_v42 = vmul.f32 %v14373_v44, %v6076_v20  ;;  %v6148_v25 = vmul.f32 %v14364_v56, %v6138_v27  ;;  %v6254_v55 = vmul.f32 0.01, %v6238_v47  ;;  %v14375_v20 = vld [vmem:[#allocation64_spill] sm:$0xff]  ;;  %v14376_v27 = vld [vmem:[#allocation66_spill] sm:$0xff] }
 0xc44   : > { %v6032_v23 = vadd.f32 %v6024_v45, %v5970_v52  ;;  %v6200_v63 = vsel %vm6184_vm1, %v6176_v8, %v6192_v59  ;;  %vm6246_vm14 = vcmp.ge.f32.partialorder %v6238_v47, 0.0  ;;  %vm5377_vm15 = vcmp.ge.f32.partialorder %v5369_v46, 0.0 }
 0xc45   : > { %v5385_v60 = vmul.f32 0.01, %v5369_v46  ;;  %v5431_v3 = vadd.f32 %v14366_v41, %v5421_v43  ;;  %v5493_v38 = vadd.f32 %v14354_v54, %v5483_v19  ;;  %v5555_v57 = vadd.f32 %v14337_v24, %v5545_v17 }
 0xc46   : > { %v6094_v14 = vadd.f32 %v6086_v42, %v6032_v23  ;;  %v13704_v26 = vadd.f32 %v14374_v32, %v6290_v21  ;;  %v5607_v52 = vmul.f32 %v14375_v20, %v14370_v31  ;;  %v5669_v8 = vmul.f32 %v14376_v27, %v14370_v31 }
 0xc47   : > { %v5393_v45 = vsel %vm5377_vm15, %v5369_v46, %v5385_v60  ;;  %v6210_v15 = vmul.f32 %v14377_v30, %v6200_v63  ;;  %v6262_v23 = vsel %vm6246_vm14, %v6238_v47, %v6254_v55  ;;  %vm5439_vm2 = vcmp.ge.f32.partialorder %v5431_v3, 0.0  ;;  %v14379_v63 = vld [vmem:[#allocation81_spill] sm:$0xff] }
 0xc48   : > { %v6156_v59 = vadd.f32 %v6148_v25, %v6094_v14  ;;  %v5403_v43 = vmul.f32 %v14338_v10, %v5393_v45  ;;  %v5447_v19 = vmul.f32 0.01, %v5431_v3  ;;  %vm5501_vm3 = vcmp.ge.f32.partialorder %v5493_v38, 0.0  ;;  %v14382_v10 = vld [vmem:[#allocation58_spill] sm:$0xff] }
 0xc49   : > { %v5509_v17 = vmul.f32 0.01, %v5493_v38  ;;  %vm5563_vm4 = vcmp.ge.f32.partialorder %v5555_v57, 0.0  ;;  %v5571_v21 = vmul.f32 0.01, %v5555_v57  ;;  %v5617_v46 = vadd.f32 %v14368_v28, %v5607_v52 }
 0xc4a   : > { %v5679_v42 = vadd.f32 %v14306_v18, %v5669_v8  ;;  %v5455_v60 = vsel %vm5439_vm2, %v5431_v3, %v5447_v19  ;;  %v5731_v25 = vmul.f32 %v14340_v39, %v14370_v31  ;;  %v5793_v47 = vmul.f32 %v14341_v49, %v14370_v31  ;;  %v14383_v8 = vld [vmem:[#allocation61_spill] sm:$0xff] }
 0xc4b   : > { %v5517_v20 = vsel %vm5501_vm3, %v5493_v38, %v5509_v17  ;;  %v13718_v55 = vadd.f32 %v6210_v15, %v6156_v59  ;;  %v13721_v14 = vmul.f32 %v14379_v63, %v6262_v23  ;;  %v13724_v45 = vmul.f32 0.01, %v13704_v26 }
 0xc4c   : > { %v5465_v52 = vmul.f32 %v14382_v10, %v5455_v60  ;;  %v5579_v28 = vsel %vm5563_vm4, %v5555_v57, %v5571_v21  ;;  %vm5625_vm5 = vcmp.ge.f32.partialorder %v5617_v46, 0.0  ;;  %v5633_v3 = vmul.f32 0.01, %v5617_v46 }
 0xc4d   : > { %14378 = vst [vmem:[#allocation68_spill] sm:$0xff] %v13718_v55  ;;  %14380 = vst [vmem:[#allocation67_spill] sm:$0xff] %v13721_v14  ;;  %vm5687_vm6 = vcmp.ge.f32.partialorder %v5679_v42, 0.0  ;;  %v5527_v19 = vmul.f32 %v14383_v8, %v5517_v20  ;;  %v5695_v17 = vmul.f32 0.01, %v5679_v42  ;;  %v5741_v49 = vadd.f32 %v14323_v2, %v5731_v25 }
 0xc4e   : > { %14381 = vst [vmem:[#allocation60_spill] sm:$0xff] %v13724_v45  ;;  %v5473_v38 = vadd.f32 %v5465_v52, %v5403_v43  ;;  %v5641_v15 = vsel %vm5625_vm5, %v5617_v46, %v5633_v3  ;;  %v5803_v59 = vadd.f32 %v14309_v53, %v5793_v47  ;;  %v5855_v23 = vmul.f32 %v13191_v62, %v14370_v31  ;;  %v14388_v45 = vld [vmem:[#allocation80_spill] sm:$0xff] }
 0xc4f   : > { %v5917_v14 = vmul.f32 %v13200_v48, %v14370_v31  ;;  %v5589_v57 = vmul.f32 %v13144_v33, %v5579_v28  ;;  %v5703_v21 = vsel %vm5687_vm6, %v5679_v42, %v5695_v17  ;;  %vm5749_vm7 = vcmp.ge.f32.partialorder %v5741_v49, 0.0 }
 0xc50   : > { %v5535_v60 = vadd.f32 %v5527_v19, %v5473_v38  ;;  %v5651_v43 = vmul.f32 %v13157_v37, %v5641_v15  ;;  %v5757_v20 = vmul.f32 0.01, %v5741_v49  ;;  %vm5811_vm8 = vcmp.ge.f32.partialorder %v5803_v59, 0.0 }
 0xc51   : > { %v5819_v25 = vmul.f32 0.01, %v5803_v59  ;;  %v5865_v47 = vadd.f32 %v13194_v11, %v5855_v23  ;;  %v5927_v52 = vadd.f32 %v13203_v34, %v5917_v14  ;;  %v5979_v3 = vmul.f32 %v13209_v22, %v14370_v31 }
 0xc52   : > { %v5597_v46 = vadd.f32 %v5589_v57, %v5535_v60  ;;  %v5713_v38 = vmul.f32 %v13170_v36, %v5703_v21  ;;  %v5765_v19 = vsel %vm5749_vm7, %v5741_v49, %v5757_v20  ;;  %v6041_v28 = vmul.f32 %v13218_v12, %v14370_v31 }
 0xc53   : > { %v6103_v42 = vmul.f32 %v13227_v51, %v14370_v31  ;;  %v5775_v15 = vmul.f32 %v13179_v9, %v5765_v19  ;;  %v5827_v60 = vsel %vm5811_vm8, %v5803_v59, %v5819_v25  ;;  %vm5873_vm9 = vcmp.ge.f32.partialorder %v5865_v47, 0.0  ;;  %v14386_v25 = vld [vmem:[#allocation72_spill] sm:$0xff] }
 0xc54   : > { %v5659_v17 = vadd.f32 %v5651_v43, %v5597_v46  ;;  %v5881_v14 = vmul.f32 0.01, %v5865_v47  ;;  %vm5935_vm10 = vcmp.ge.f32.partialorder %v5927_v52, 0.0  ;;  %v5943_v23 = vmul.f32 0.01, %v5927_v52 }
 0xc55   : > { %v5989_v57 = vadd.f32 %v13212_v61, %v5979_v3  ;;  %v6051_v49 = vadd.f32 %v13221_v7, %v6041_v28  ;;  %v6113_v20 = vadd.f32 %v13230_v1, %v6103_v42  ;;  %v6165_v55 = vmul.f32 %v13236_v13, %v14370_v31 }
 0xc56   : > { %v5721_v21 = vadd.f32 %v5713_v38, %v5659_v17  ;;  %v5889_v43 = vsel %vm5873_vm9, %v5865_v47, %v5881_v14  ;;  %v5951_v46 = vsel %vm5935_vm10, %v5927_v52, %v5943_v23  ;;  %v5837_v3 = vmul.f32 %v14386_v25, %v5827_v60  ;;  %v14387_v38 = vld [vmem:[#allocation73_spill] sm:$0xff] }
 0xc57   : > { %vm5997_vm11 = vcmp.ge.f32.partialorder %v5989_v57, 0.0  ;;  %v6005_v19 = vmul.f32 0.01, %v5989_v57  ;;  %v5899_v28 = vmul.f32 %v14387_v38, %v5889_v43  ;;  %vm6059_vm12 = vcmp.ge.f32.partialorder %v6051_v49, 0.0 }
 0xc58   : > { %v5783_v59 = vadd.f32 %v5775_v15, %v5721_v21  ;;  %v6067_v17 = vmul.f32 0.01, %v6051_v49  ;;  %vm6121_vm13 = vcmp.ge.f32.partialorder %v6113_v20, 0.0  ;;  %v6129_v47 = vmul.f32 0.01, %v6113_v20 }
 0xc59   : > { %v6013_v42 = vsel %vm5997_vm11, %v5989_v57, %v6005_v19  ;;  %v5961_v14 = vmul.f32 %v13206_v35, %v5951_v46  ;;  %v6175_v23 = vadd.f32 %v13239_v6, %v6165_v55  ;;  %v6227_v15 = vmul.f32 %v14388_v45, %v14370_v31  ;;  %v6354_v57 = vld [vmem:[%s13757_s7] sm:$0x77]  ;;  %v6355_v19 = vld [vmem:[%s13757_s7 + $0x8] sm:$0x77] }
 0xc5a   : > { %v5845_v52 = vadd.f32 %v5837_v3, %v5783_v59  ;;  %v6023_v21 = vmul.f32 %v14371_v5, %v6013_v42  ;;  %v6075_v60 = vsel %vm6059_vm12, %v6051_v49, %v6067_v17  ;;  %v6137_v1 = vsel %vm6121_vm13, %v6113_v20, %v6129_v47  ;;  %v14389_v46 = vld [vmem:[#allocation85_spill] sm:$0xff]  ;;  %v14393_v47 = vld [vmem:[#allocation87_spill] sm:$0xff] }
 0xc5b   : > { %v6289_v43 = vmul.f32 %v14372_v16, %v14370_v31  ;;  %v6085_v13 = vmul.f32 %v14373_v44, %v6075_v60  ;;  %vm6183_vm0 = vcmp.ge.f32.partialorder %v6175_v23, 0.0  ;;  %v13773_v59 = vadd.f32 %v14389_v46, %v13686_v40  ;;  %v14392_v40 = vld [vmem:[#allocation63_spill] sm:$0xff] }
 0xc5c   : > { %v5907_v38 = vadd.f32 %v5899_v28, %v5845_v52  ;;  %v6147_v55 = vmul.f32 %v14364_v56, %v6137_v1  ;;  %v6191_v31 = vmul.f32 0.01, %v6175_v23  ;;  %v6237_v49 = vadd.f32 %v13248_v0, %v6227_v15  ;;  %v14391_v28 = vld [vmem:[#allocation54_spill] sm:$0xff] }
 0xc5d   : > { %v6299_v20 = vadd.f32 %v14374_v32, %v6289_v43  ;;  %v6406_v42 = vmul.f32 %v14391_v28, %v6354_v57  ;;  %v6407_v17 = vmul.f32 %v14392_v40, %v6355_v19  ;;  %v5361_v52 = vmul.f32 %v13099_v4, %v14393_v47  ;;  %v14394_v4 = vld [vmem:[#allocation62_spill] sm:$0xff]  ;;  %v14397_v40 = vld [vmem:[#allocation55_spill] sm:$0xff] }
 0xc5e   : > { %v5969_v3 = vadd.f32 %v5961_v14, %v5907_v38  ;;  %v6199_v60 = vsel %vm6183_vm0, %v6175_v23, %v6191_v31  ;;  %vm6245_vm1 = vcmp.ge.f32.partialorder %v6237_v49, 0.0  ;;  %v6253_v44 = vmul.f32 0.01, %v6237_v49  ;;  %v14395_v31 = vld [vmem:[#allocation84_spill] sm:$0xff] }
 0xc5f   : > { %vm6307_vm14 = vcmp.ge.f32.partialorder %v6299_v20, 0.0  ;;  %v6209_v1 = vmul.f32 %v14377_v30, %v6199_v60  ;;  %v6315_v56 = vmul.f32 0.01, %v6299_v20  ;;  %6410 = vst [vmem:[%s13780_s15] sm:$0x77] %v6406_v42  ;;  %6411 = vst [vmem:[%s13780_s15 + $0x8] sm:$0x77] %v6407_v17  ;;  %v5371_v15 = vadd.f32 %v14331_v29, %v5361_v52 }
 0xc60   : > { %v6031_v16 = vadd.f32 %v6023_v21, %v5969_v3  ;;  %v6261_v38 = vsel %vm6245_vm1, %v6237_v49, %v6253_v44  ;;  %v5423_v14 = vmul.f32 %v14361_v58, %v14393_v47  ;;  %v5485_v43 = vmul.f32 %v14362_v50, %v14393_v47  ;;  %v14396_v50 = vld [vmem:[#allocation64_spill] sm:$0xff] }
 0xc61   : > { %v5547_v23 = vmul.f32 %v14394_v4, %v14393_v47  ;;  %v6271_v21 = vmul.f32 %v14379_v63, %v6261_v38  ;;  %v6323_v19 = vsel %vm6307_vm14, %v6299_v20, %v6315_v56  ;;  %vm5379_vm15 = vcmp.ge.f32.partialorder %v5371_v15, 0.0 }
 0xc62   : > { %v6093_v57 = vadd.f32 %v6085_v13, %v6031_v16  ;;  %v6333_v3 = vmul.f32 %v14395_v31, %v6323_v19  ;;  %v5387_v28 = vmul.f32 0.01, %v5371_v15  ;;  %v5433_v29 = vadd.f32 %v14366_v41, %v5423_v14 }
 0xc63   : > { %v5495_v44 = vadd.f32 %v14354_v54, %v5485_v43  ;;  %v5557_v58 = vadd.f32 %v14337_v24, %v5547_v23  ;;  %v5609_v42 = vmul.f32 %v14396_v50, %v14393_v47  ;;  %v5671_v13 = vmul.f32 %v14376_v27, %v14393_v47 }
 0xc64   : > { %v6155_v49 = vadd.f32 %v6147_v55, %v6093_v57  ;;  %v5395_v16 = vsel %vm5379_vm15, %v5371_v15, %v5387_v28  ;;  %vm5441_vm2 = vcmp.ge.f32.partialorder %v5433_v29, 0.0  ;;  %v5449_v56 = vmul.f32 0.01, %v5433_v29  ;;  %v14398_v55 = vld [vmem:[#allocation65_spill] sm:$0xff] }
 0xc65   : > { %vm5503_vm3 = vcmp.ge.f32.partialorder %v5495_v44, 0.0  ;;  %v5405_v17 = vmul.f32 %v14397_v40, %v5395_v16  ;;  %v5511_v52 = vmul.f32 0.01, %v5495_v44  ;;  %vm5565_vm4 = vcmp.ge.f32.partialorder %v5557_v58, 0.0  ;;  %v14399_v15 = vld [vmem:[#allocation15_spill] sm:$0xff] }
 0xc66   : > { %v6217_v20 = vadd.f32 %v6209_v1, %v6155_v49  ;;  %v5457_v41 = vsel %vm5441_vm2, %v5433_v29, %v5449_v56  ;;  %v5573_v54 = vmul.f32 0.01, %v5557_v58  ;;  %v5619_v60 = vadd.f32 %v14398_v55, %v5609_v42  ;;  %v6356_v56 = vld [vmem:[%s13757_s7 + $0x10] sm:$0x77] }
 0xc67   : > { %v5681_v24 = vadd.f32 %v14306_v18, %v5671_v13  ;;  %v5467_v14 = vmul.f32 %v14382_v10, %v5457_v41  ;;  %v5519_v43 = vsel %vm5503_vm3, %v5495_v44, %v5511_v52  ;;  %v5733_v27 = vmul.f32 %v14340_v39, %v14393_v47 }
 0xc68   : > { %v6279_v38 = vadd.f32 %v6271_v21, %v6217_v20  ;;  %v6377_v1 = vrot.slane %v13773_v59, %v14399_v15  ;;  %v5581_v4 = vsel %vm5565_vm4, %v5557_v58, %v5573_v54  ;;  %vm5627_vm5 = vcmp.ge.f32.partialorder %v5619_v60, 0.0  ;;  %v14400_v21 = vld [vmem:[#allocation70_spill] sm:$0xff] }
 0xc69   : > { %v5635_v23 = vmul.f32 0.01, %v5619_v60  ;;  %v5475_v19 = vadd.f32 %v5467_v14, %v5405_v17  ;;  %v5529_v28 = vmul.f32 %v14383_v8, %v5519_v43  ;;  %vm5689_vm6 = vcmp.ge.f32.partialorder %v5681_v24, 0.0 }
 0xc6a   : > { %v6341_v57 = vadd.f32 %v6333_v3, %v6279_v38  ;;  %v5697_v18 = vmul.f32 0.01, %v5681_v24  ;;  %v5743_v10 = vadd.f32 %v14323_v2, %v5733_v27  ;;  %v5795_v44 = vmul.f32 %v14400_v21, %v14393_v47  ;;  %v14404_v21 = vld [vmem:[#allocation82_spill] sm:$0xff] }
 0xc6b   : > { %v5643_v29 = vsel %vm5627_vm5, %v5619_v60, %v5635_v23  ;;  %v5537_v49 = vadd.f32 %v5529_v28, %v5475_v19  ;;  %v5591_v59 = vmul.f32 %v13144_v33, %v5581_v4  ;;  %v5857_v3 = vmul.f32 %v13191_v62, %v14393_v47  ;;  %v14402_v23 = vld [vmem:[#allocation73_spill] sm:$0xff]  ;;  %v14403_v28 = vld [vmem:[#allocation76_spill] sm:$0xff] }
 0xc6c   : > { %v6351_v39 = vadd.f32 %v14389_v46, %v6341_v57  ;;  %v5705_v58 = vsel %vm5689_vm6, %v5681_v24, %v5697_v18  ;;  %vm5751_vm7 = vcmp.ge.f32.partialorder %v5743_v10, 0.0  ;;  %v5759_v8 = vmul.f32 0.01, %v5743_v10 }
 0xc6d   : > { %v5805_v50 = vadd.f32 %v14309_v53, %v5795_v44  ;;  %v5599_v13 = vadd.f32 %v5591_v59, %v5537_v49  ;;  %v5653_v2 = vmul.f32 %v13157_v37, %v5643_v29  ;;  %v5867_v16 = vadd.f32 %v13194_v11, %v5857_v3 }
 0xc6e   : > { %v6381_v42 = vrot.slane %v6351_v39, %v14399_v15  ;;  %v5767_v20 = vsel %vm5751_vm7, %v5743_v10, %v5759_v8  ;;  %v5919_v33 = vmul.f32 %v13200_v48, %v14393_v47  ;;  %vm6308_vm9 = vcmp.ge.f32.partialorder %v13704_v26, 0.0  ;;  %v14405_v8 = vld [vmem:[#allocation60_spill] sm:$0xff] }
 0xc6f   : > { %vm5813_vm8 = vcmp.ge.f32.partialorder %v5805_v50, 0.0  ;;  %v5821_v40 = vmul.f32 0.01, %v5805_v50  ;;  %v5661_v17 = vadd.f32 %v5653_v2, %v5599_v13  ;;  %v5715_v53 = vmul.f32 %v13170_v36, %v5705_v58  ;;  %v14408_v13 = vld [vmem:[#allocation75_spill] sm:$0xff] }
 0xc70   : > { %v6400_v62 = vcombine.low %v6377_v1, %v6381_v42  ;;  %vm5875_vm10 = vcmp.ge.f32.partialorder %v5867_v16, 0.0  ;;  %v5883_v41 = vmul.f32 0.01, %v5867_v16  ;;  %v5929_v37 = vadd.f32 %v13203_v34, %v5919_v33  ;;  %v14401_v1 = vld [vmem:[#allocation78_spill] sm:$0xff] }
 0xc71   : > { %v5829_v52 = vsel %vm5813_vm8, %v5805_v50, %v5821_v40  ;;  %v5981_v11 = vmul.f32 %v13209_v22, %v14393_v47  ;;  %v5723_v55 = vadd.f32 %v5715_v53, %v5661_v17  ;;  %v5777_v60 = vmul.f32 %v13179_v9, %v5767_v20  ;;  %v14407_v50 = vld [vmem:[#allocation67_spill] sm:$0xff] }
 0xc72   : > { %v6408_v54 = vmul.f32 %v6400_v62, %v6356_v56  ;;  %v6043_v48 = vmul.f32 %v13218_v12, %v14393_v47  ;;  %v5891_v24 = vsel %vm5875_vm10, %v5867_v16, %v5883_v41  ;;  %vm5937_vm11 = vcmp.ge.f32.partialorder %v5929_v37, 0.0 }
 0xc73   : > { %v5945_v38 = vmul.f32 0.01, %v5929_v37  ;;  %v5991_v36 = vadd.f32 %v13212_v61, %v5981_v11  ;;  %v5785_v14 = vadd.f32 %v5777_v60, %v5723_v55  ;;  %v5839_v43 = vmul.f32 %v14386_v25, %v5829_v52 }
 0xc74   : > { %6412 = vst [vmem:[%s13780_s15 + $0x10] sm:$0x77] %v6408_v54  ;;  %v6053_v34 = vadd.f32 %v13221_v7, %v6043_v48  ;;  %v6105_v22 = vmul.f32 %v13227_v51, %v14393_v47  ;;  %v6167_v12 = vmul.f32 %v14401_v1, %v14393_v47  ;;  %v5901_v57 = vmul.f32 %v14402_v23, %v5891_v24 }
 0xc75   : > { %v5953_v27 = vsel %vm5937_vm11, %v5929_v37, %v5945_v38  ;;  %vm5999_vm12 = vcmp.ge.f32.partialorder %v5991_v36, 0.0  ;;  %v6007_v9 = vmul.f32 0.01, %v5991_v36  ;;  %v5847_v4 = vadd.f32 %v5839_v43, %v5785_v14 }
 0xc76   : > { %vm6061_vm13 = vcmp.ge.f32.partialorder %v6053_v34, 0.0  ;;  %v6069_v61 = vmul.f32 0.01, %v6053_v34  ;;  %v6115_v29 = vadd.f32 %v14403_v28, %v6105_v22  ;;  %v6177_v25 = vadd.f32 %v13239_v6, %v6167_v12 }
 0xc77   : > { %v6015_v19 = vsel %vm5999_vm12, %v5991_v36, %v6007_v9  ;;  %v6229_v7 = vmul.f32 %v14388_v45, %v14393_v47  ;;  %v5909_v51 = vadd.f32 %v5901_v57, %v5847_v4  ;;  %v5963_v18 = vmul.f32 %v13206_v35, %v5953_v27  ;;  %v6357_v36 = vld [vmem:[%s13757_s7 + $0x18] sm:$0x77] }
 0xc78   : > { %v6025_v10 = vmul.f32 %v14371_v5, %v6015_v19  ;;  %v6291_v44 = vmul.f32 %v14404_v21, %v14393_v47  ;;  %v6077_v39 = vsel %vm6061_vm13, %v6053_v34, %v6069_v61  ;;  %vm6123_vm0 = vcmp.ge.f32.partialorder %v6115_v29, 0.0  ;;  %v14406_v5 = vld [vmem:[#allocation68_spill] sm:$0xff] }
 0xc79   : > { %v6131_v49 = vmul.f32 0.01, %v6115_v29  ;;  %vm6185_vm1 = vcmp.ge.f32.partialorder %v6177_v25, 0.0  ;;  %v5971_v59 = vadd.f32 %v5963_v18, %v5909_v51  ;;  %v6193_v3 = vmul.f32 0.01, %v6177_v25 }
 0xc7a   : > { %v6239_v58 = vadd.f32 %v13248_v0, %v6229_v7  ;;  %v6301_v6 = vadd.f32 %v14374_v32, %v6291_v44  ;;  %v6324_v35 = vsel %vm6308_vm9, %v13704_v26, %v14405_v8  ;;  %v6280_v42 = vadd.f32 %v14407_v50, %v14406_v5  ;;  %v14409_v32 = vld [vmem:[#allocation77_spill] sm:$0xff] }
 0xc7b   : > { %v6139_v45 = vsel %vm6123_vm0, %v6115_v29, %v6131_v49  ;;  %v6033_v47 = vadd.f32 %v6025_v10, %v5971_v59  ;;  %v6087_v2 = vmul.f32 %v14408_v13, %v6077_v39  ;;  %v6201_v16 = vsel %vm6185_vm1, %v6177_v25, %v6193_v3 }
 0xc7c   : > { %vm6247_vm14 = vcmp.ge.f32.partialorder %v6239_v58, 0.0  ;;  %v6255_v56 = vmul.f32 0.01, %v6239_v58  ;;  %v6317_v20 = vmul.f32 0.01, %v6301_v6  ;;  %v6334_v0 = vmul.f32 %v14395_v31, %v6324_v35 }
 0xc7d   : > { %v6095_v40 = vadd.f32 %v6087_v2, %v6033_v47  ;;  %v6149_v33 = vmul.f32 %v14409_v32, %v6139_v45  ;;  %vm6309_vm15 = vcmp.ge.f32.partialorder %v6301_v6, 0.0  ;;  %v6211_v53 = vmul.f32 %v14377_v30, %v6201_v16 }
 0xc7e   : > { %v6263_v62 = vsel %vm6247_vm14, %v6239_v58, %v6255_v56  ;;  %v6342_v26 = vadd.f32 %v6334_v0, %v6280_v42  ;;  %v6325_v52 = vsel %vm6309_vm15, %v6301_v6, %v6317_v20 }
 0xc7f   : > { %v6157_v17 = vadd.f32 %v6149_v33, %v6095_v40  ;;  %v6273_v37 = vmul.f32 %v14379_v63, %v6263_v62  ;;  %v6335_v54 = vmul.f32 %v14395_v31, %v6325_v52 }
 0xc80   : > { %v6352_v55 = vadd.f32 %v14389_v46, %v6342_v26 }
 0xc81   : > { %v6219_v41 = vadd.f32 %v6211_v53, %v6157_v17 }
 0xc82   : > { %v6385_v24 = vrot.slane %v6352_v55, %v14399_v15 }
 0xc83   : > { %v6281_v11 = vadd.f32 %v6273_v37, %v6219_v41 }
 0xc85   : > { %v6343_v60 = vadd.f32 %v6335_v54, %v6281_v11 }
 0xc87   : > { %v6353_v48 = vadd.f32 %v14389_v46, %v6343_v60 }
 0xc89   : > { %v6389_v38 = vrot.slane %v6353_v48, %v14399_v15 }
 0xc8b   : > { %v6401_v14 = vcombine.low %v6385_v24, %v6389_v38 }
 0xc8d   : > { %v6409_v43 = vmul.f32 %v6401_v14, %v6357_v36 }
 0xc8f   : > { %6413 = vst [vmem:[%s13780_s15 + $0x18] sm:$0x77] %v6409_v43 }
 0xc90 PF: > { %s14410_s26 = sld [smem:[#allocation13_spill]] }
 0xc96   : > { %s35_s23 = sadd.s32 1, %s14410_s26  }
 0xc97   : > { %p32_p2 = scmp.ge.s32.totalorder %s35_s23, 4  }
 0xc99   :  { %34 = sbr.rel (!%p32_p2) target bundleno = 25 (0x19), region = 176 }
 0xca0   :  { %6465 = vsyncpa [#allocation4], 1 }
 0xca1   :  { %6467 = vsyncpa [#allocation4 + $0x1], 1 }
 0xca2   :  { %6468 = vsyncpa [#allocation6], 1 }
 0xca3   :  { %6469 = vsyncpa [#allocation9], 1 }

</bundles_post_ra>
